<compile_context>
chip_gen: v6e
topology: v6e:2x2x1
jax: 0.10.0
libtpu: 0.0.40
codegen_flags: <defaults>
</compile_context>

<pallas_src>
import jax
import jax.numpy as jnp
from jax.experimental import pallas as pl
from jax.experimental.pallas import tpu as pltpu

C_PAD = 128            # padded channel width (lane-dense)
K1_PAD = 256           # padded contraction dim for the 7x7 stem conv (7*7*3 = 147)
FC_PAD = 1024          # padded fc output width (1000 -> 1024)
MAX_IMGS_PER_STEP = 8  # images per grid step (MXU fill vs. VMEM)


# ----------------------------------------------------------------------------
# Fused whole-network Pallas kernel
# ----------------------------------------------------------------------------
def _make_fused_kernel(B, m_img, wo1, ho2, wo2, WP, P):
    """B images per grid step; per-image conv frame has P = (ho2+2)*WP rows."""
    BP1 = B * m_img            # rows of stem-conv output block (pitch wo1)
    BP = B * P                 # rows of padded layer-conv frames (pitch WP)
    inv_pool = 1.0 / float(ho2 * wo2)

    def read_at_offset(x, off):
        # result[p] = x[(p + off) % rows] : aligned full-buffer XLU rotate.
        if off == 0:
            return x
        rows = x.shape[0]
        return pltpu.roll(x, (rows - off) % rows, axis=0)

    def kernel(patches_ref, w1_ref, b1_ref, sel_ref, wl_ref, bl_ref,
               wfc_ref, bfc_ref, out_ref):
        f32 = jnp.float32

        # ---- stem conv (+ folded bn1) + relu : one MXU matmul ---------------
        c1 = jnp.dot(patches_ref[...], w1_ref[...], preferred_element_type=f32)
        c1 = jnp.maximum(c1 + b1_ref[...], 0.0)            # (BP1, 128), >= 0

        # ---- max_pool2d(kernel=3, stride=2, pad=1), fully vectorized --------
        # Zero padding == -inf padding because c1 >= 0 after relu.
        idx1 = jax.lax.broadcasted_iota(jnp.int32, (BP1, 1), 0)
        top_row = (idx1 % m_img) < wo1       # y == 0 rows of each image
        left_col = (idx1 % wo1) == 0         # x == 0 positions
        up = jnp.where(top_row, 0.0, read_at_offset(c1, -wo1))
        down = read_at_offset(c1, wo1)       # garbage only at y==ho1-1 (unused)
        vmax = jnp.maximum(jnp.maximum(up, c1), down)
        left = jnp.where(left_col, 0.0, read_at_offset(vmax, -1))
        right = read_at_offset(vmax, 1)      # garbage only at x==wo1-1 (unused)
        hmax = jnp.maximum(jnp.maximum(left, vmax), right)  # 3x3 max everywhere

        # Stride-2 decimation + deposit into the zero-padded conv frame:
        # one MXU matmul with a constant 0/1 selection matrix (aligned, no scatter).
        frame = jnp.dot(sel_ref[...], hmax, preferred_element_type=f32)  # (BP, 128)

        # Valid-output mask for the 3x3 convs.  It kills wrap/garbage rows and
        # doubles as the zero padding of the next frame after redeposit.
        idx2 = jax.lax.broadcasted_iota(jnp.int32, (BP, 1), 0)
        q = idx2 % P
        mask = ((q % WP < wo2) & (q < ho2 * WP)).astype(f32)

        def conv3x3(acts, k, relu):
            # 9 taps fused into one deep-K matmul: lane-concat 9 rolled copies.
            taps = [read_at_offset(acts, dy * WP + dx)
                    for dy in range(3) for dx in range(3)]
            lhs = jnp.concatenate(taps, axis=1)             # (BP, 9*128)
            y = jnp.dot(lhs, wl_ref[k], preferred_element_type=f32) + bl_ref[k]
            if relu:
                y = jnp.maximum(y, 0.0)
            return y * mask

        def redeposit(y):
            # masked conv output (data at y*WP+x) -> next padded input frame
            # (data at (y+1)*WP+x+1); masked zeros provide all of the padding.
            return read_at_offset(y, -(WP + 1))

        y = conv3x3(frame, 0, True)              # layer1: conv-bn-relu
        y = conv3x3(redeposit(y), 1, False)      # layer1: conv-bn
        y = conv3x3(redeposit(y), 2, True)       # layer2: conv-bn-relu
        y = conv3x3(redeposit(y), 3, False)      # layer2: conv-bn   (masked)

        # ---- adaptive avg pool (1,1) + fc -----------------------------------
        pooled = [jnp.sum(y[b * P:(b + 1) * P, :], axis=0, keepdims=True)
                  for b in range(B)]                         # aligned slices
        pooled = jnp.concatenate(pooled, axis=0) * inv_pool  # (B, 128)
        logits = jnp.dot(pooled, wfc_ref[...], preferred_element_type=f32)
        out_ref[0] = logits + bfc_ref[...]                   # (B, 1024) lane-dense

    return kernel


def _build_pool_select(B, m_img, wo1, ho2, wo2, WP, P):
    """Constant 0/1 matrix mapping 3x3-max positions -> padded conv frame."""
    BP, BP1 = B * P, B * m_img
    i = jnp.arange(BP)[:, None]
    j = jnp.arange(BP1)[None, :]
    same_img = (i // P) == (j // m_img)
    pi = i % P
    pj = j % m_img
    r = pi - (WP + 1)
    y2 = r // WP
    x2 = r % WP
    valid = (r >= 0) & (x2 < wo2) & (y2 < ho2)
    src = 2 * wo1 * y2 + 2 * x2                 # stride-2 pool centers
    return (same_img & valid & (pj == src)).astype(jnp.float32)


def _fused_net_pallas(patches, sel, prep, num_blocks, B, m_img, wo1, ho2, wo2, WP, P):
    kernel = _make_fused_kernel(B, m_img, wo1, ho2, wo2, WP, P)

    flops = num_blocks * (
        2 * (B * m_img) * K1_PAD * C_PAD              # stem conv
        + 2 * (B * P) * (B * m_img) * C_PAD           # pool deposit matmul
        + 4 * 2 * (B * P) * (9 * C_PAD) * C_PAD       # four 3x3 convs (fused K)
        + 2 * B * C_PAD * FC_PAD)                     # fc
    bytes_accessed = 4 * (patches.size + sel.size + prep["w1"].size
                          + prep["b1"].size + prep["wl"].size + prep["bl"].size
                          + prep["wfc"].size + prep["bfc"].size
                          + num_blocks * B * FC_PAD)

    out = pl.pallas_call(
        kernel,
        out_shape=jax.ShapeDtypeStruct((num_blocks, B, FC_PAD), jnp.float32),
        grid=(num_blocks,),
        in_specs=[
            pl.BlockSpec((B * m_img, K1_PAD), lambda i: (i, 0)),        # stem patches
            pl.BlockSpec((K1_PAD, C_PAD), lambda i: (0, 0)),            # stem weight
            pl.BlockSpec((1, C_PAD), lambda i: (0, 0)),                 # stem bias
            pl.BlockSpec((B * P, B * m_img), lambda i: (0, 0)),         # pool select
            pl.BlockSpec((4, 9 * C_PAD, C_PAD), lambda i: (0, 0, 0)),   # conv weights
            pl.BlockSpec((4, 1, C_PAD), lambda i: (0, 0, 0)),           # conv biases
            pl.BlockSpec((C_PAD, FC_PAD), lambda i: (0, 0)),            # fc weight
            pl.BlockSpec((1, FC_PAD), lambda i: (0, 0)),                # fc bias
        ],
        out_specs=pl.BlockSpec((1, B, FC_PAD), lambda i: (i, 0, 0)),
        compiler_params=pltpu.CompilerParams(
            dimension_semantics=("parallel",)),
        cost_estimate=pl.CostEstimate(flops=flops, transcendentals=0,
                                      bytes_accessed=bytes_accessed),
    )(patches, prep["w1"], prep["b1"], sel, prep["wl"], prep["bl"],
      prep["wfc"], prep["bfc"])
    return out


# ----------------------------------------------------------------------------
# Wrapper-side glue: stem im2col + parameter preparation (BN folding, padding)
# ----------------------------------------------------------------------------
def _im2col(x, kh, kw, stride, pad):
    """x: (N,H,W,C) -> (N*Ho*Wo, kh*kw*C), feature order (dy, dx, c)."""
    N, H, W, C = x.shape
    xp = jnp.pad(x, ((0, 0), (pad, pad), (pad, pad), (0, 0)))
    Ho = (H + 2 * pad - kh) // stride + 1
    Wo = (W + 2 * pad - kw) // stride + 1
    cols = []
    for dy in range(kh):
        for dx in range(kw):
            patch = jax.lax.slice(
                xp, (0, dy, dx, 0),
                (N, dy + (Ho - 1) * stride + 1, dx + (Wo - 1) * stride + 1, C),
                (1, stride, stride, 1))
            cols.append(patch)
    patches = jnp.concatenate(cols, axis=-1)
    return patches.reshape(N * Ho * Wo, kh * kw * C), Ho, Wo


def _fold_bn(w, bn, eps=1e-5):
    """Fold eval-mode BatchNorm into weights (last dim = out channels) + bias."""
    gamma, beta, mean, var = bn
    scale = gamma / jnp.sqrt(var + eps)
    return w * scale, beta - mean * scale


def prepare_params(params):
    """Fold BN, transpose to matmul layout, zero-pad to lane-dense widths."""
    # stem: (64,3,7,7) -> (147,64), fold bn1, pad K->256, O->128
    w1 = jnp.transpose(params["conv1_w"], (2, 3, 1, 0)).reshape(7 * 7 * 3, 64)
    w1, b1 = _fold_bn(w1, params["bn1"])
    w1 = jnp.pad(w1, ((0, K1_PAD - w1.shape[0]), (0, C_PAD - 64)))
    b1 = jnp.pad(b1, (0, C_PAD - 64)).reshape(1, C_PAD)

    layer_convs = [
        (params["layer1"]["conv_a_w"], params["layer1"]["bn_a"]),
        (params["layer1"]["conv_b_w"], params["layer1"]["bn_b"]),
        (params["layer2"]["conv_a_w"], params["layer2"]["bn_a"]),
        (params["layer2"]["conv_b_w"], params["layer2"]["bn_b"]),
    ]
    stacked, biases = [], []
    for w, bn in layer_convs:
        w_f = jnp.transpose(w, (2, 3, 1, 0))            # OIHW -> (3,3,Cin,Cout)
        w_f, b = _fold_bn(w_f, bn)
        taps = [jnp.pad(w_f[dy, dx], ((0, C_PAD - 64), (0, C_PAD - 64)))
                for dy in range(3) for dx in range(3)]
        stacked.append(jnp.concatenate(taps, axis=0))   # (9*128, 128) K-stacked taps
        biases.append(jnp.pad(b, (0, C_PAD - 64)).reshape(1, C_PAD))
    wl = jnp.stack(stacked, axis=0)                     # (4, 1152, 128)
    bl = jnp.stack(biases, axis=0)                      # (4, 1, 128)

    wfc = jnp.transpose(params["fc_w"])                 # (64, 1000)
    wfc = jnp.pad(wfc, ((0, C_PAD - 64), (0, FC_PAD - 1000)))
    bfc = jnp.pad(params["fc_b"], (0, FC_PAD - 1000)).reshape(1, FC_PAD)
    return dict(w1=w1, b1=b1, wl=wl, bl=bl, wfc=wfc, bfc=bfc)


def net_double_layer_forward(x_nchw, prep):
    x = jnp.transpose(x_nchw, (0, 2, 3, 1)).astype(jnp.float32)   # NCHW -> NHWC
    n = x.shape[0]
    patches, ho1, wo1 = _im2col(x, 7, 7, 2, 3)
    assert ho1 % 2 == 0 and wo1 % 2 == 0, "stem output must have even H, W"
    ho2, wo2 = ho1 // 2, wo1 // 2
    m_img = ho1 * wo1
    assert m_img % 8 == 0, "conv1 output rows per image must be a multiple of 8"

    WP = pl.cdiv(wo2 + 2, 8) * 8           # aligned frame row pitch
    P = (ho2 + 2) * WP                     # per-image padded frame rows
    assert wo2 + 2 <= WP

    B = n if n <= MAX_IMGS_PER_STEP else MAX_IMGS_PER_STEP
    n_pad = pl.cdiv(n, B) * B
    num_blocks = n_pad // B

    patches = jnp.pad(patches, ((0, (n_pad - n) * m_img),
                                (0, K1_PAD - patches.shape[1])))
    sel = _build_pool_select(B, m_img, wo1, ho2, wo2, WP, P)

    out = _fused_net_pallas(patches, sel, prep, num_blocks, B,
                            m_img, wo1, ho2, wo2, WP, P)
    return out.reshape(n_pad, FC_PAD)[:n, :1000]


# ----------------------------------------------------------------------------
# Deterministic synthetic parameters + pure-JAX reference (eval-mode BN)
# ----------------------------------------------------------------------------
def make_params(key):
    ks = jax.random.split(key, 16)

    def conv_w(k, o, c, kh, kw):
        return jax.random.normal(k, (o, c, kh, kw), jnp.float32) * 0.05

    def bn_params(k, c):
        k1, k2, k3, k4 = jax.random.split(k, 4)
        gamma = 1.0 + 0.1 * jax.random.normal(k1, (c,), jnp.float32)
        beta = 0.1 * jax.random.normal(k2, (c,), jnp.float32)
        mean = 0.1 * jax.random.normal(k3, (c,), jnp.float32)
        var = 0.5 + jnp.abs(jax.random.normal(k4, (c,), jnp.float32)) * 0.2
        return (gamma, beta, mean, var)

    return {
        "conv1_w": conv_w(ks[0], 64, 3, 7, 7),
        "bn1": bn_params(ks[1], 64),
        "layer1": {"conv_a_w": conv_w(ks[2], 64, 64, 3, 3), "bn_a": bn_params(ks[3], 64),
                   "conv_b_w": conv_w(ks[4], 64, 64, 3, 3), "bn_b": bn_params(ks[5], 64)},
        "layer2": {"conv_a_w": conv_w(ks[6], 64, 64, 3, 3), "bn_a": bn_params(ks[7], 64),
                   "conv_b_w": conv_w(ks[8], 64, 64, 3, 3), "bn_b": bn_params(ks[9], 64)},
        "fc_w": jax.random.normal(ks[10], (1000, 64), jnp.float32) * 0.05,
        "fc_b": 0.01 * jax.random.normal(ks[11], (1000,), jnp.float32),
    }


def _reference_forward(x_nchw, params):
    x = jnp.transpose(x_nchw, (0, 2, 3, 1)).astype(jnp.float32)

    def conv(x, w, stride, pad):
        w_h = jnp.transpose(w, (2, 3, 1, 0))            # OIHW -> HWIO
        return jax.lax.conv_general_dilated(
            x, w_h, (stride, stride), [(pad, pad), (pad, pad)],
            dimension_numbers=("NHWC", "HWIO", "NHWC"))

    def bn(x, p, eps=1e-5):
        gamma, beta, mean, var = p
        return (x - mean) / jnp.sqrt(var + eps) * gamma + beta

    x = jax.nn.relu(bn(conv(x, params["conv1_w"], 2, 3), params["bn1"]))
    x = jax.lax.reduce_window(x, -jnp.inf, jax.lax.max,
                              (1, 3, 3, 1), (1, 2, 2, 1),
                              [(0, 0), (1, 1), (1, 1), (0, 0)])
    for name in ("layer1", "layer2"):
        lp = params[name]
        x = jax.nn.relu(bn(conv(x, lp["conv_a_w"], 1, 1), lp["bn_a"]))
        x = bn(conv(x, lp["conv_b_w"], 1, 1), lp["bn_b"])
    pooled = jnp.mean(x, axis=(1, 2))
    return pooled @ params["fc_w"].T + params["fc_b"]


if __name__ == "__main__":
    key = jax.random.PRNGKey(0)
    k_param, k_input = jax.random.split(key)

    params = make_params(k_param)
    prep = prepare_params(params)                      # BN folding done once, offline
    x = jax.random.normal(k_input, (2, 3, 16, 16), jnp.float32)   # NCHW like PyTorch

    fwd = jax.jit(net_double_layer_forward)
    out = jax.block_until_ready(fwd(x, prep))

    assert out.shape == (2, 1000), out.shape
    assert bool(jnp.all(jnp.isfinite(out)))

    ref = _reference_forward(x, params)
    err = float(jnp.max(jnp.abs(out - ref)))
    assert err < 1e-2, f"mismatch vs pure-JAX reference: max abs err {err}"
    print("KERNEL_OK")
</pallas_src>

<mosaic_0001>
module attributes {stable_mosaic.version = 11 : i64} {
  func.func @kernel(%arg0: i32, %arg1: memref<128x256xf32, #tpu.memory_space<vmem>>, %arg2: memref<256x128xf32, #tpu.memory_space<vmem>>, %arg3: memref<1x128xf32, #tpu.memory_space<vmem>>, %arg4: memref<96x128xf32, #tpu.memory_space<vmem>>, %arg5: memref<4x1152x128xf32, #tpu.memory_space<vmem>>, %arg6: memref<4x1x128xf32, #tpu.memory_space<vmem>>, %arg7: memref<128x1024xf32, #tpu.memory_space<vmem>>, %arg8: memref<1x1024xf32, #tpu.memory_space<vmem>>, %arg9: memref<1x2x1024xf32, #tpu.memory_space<vmem>>) attributes {dimension_semantics = [#tpu.dimension_semantics<parallel>], iteration_bounds = array<i64: 1>, scalar_prefetch = 0 : i64, scratch_operands = 0 : i64, tpu.core_type = #tpu.core_type<tc>, window_params = [{transform_indices = @transform_0, window_bounds = array<i64: 128, 256>}, {pipeline_mode = #tpu.pipeline_mode<synchronous>, transform_indices = @transform_1, window_bounds = array<i64: 256, 128>}, {pipeline_mode = #tpu.pipeline_mode<synchronous>, transform_indices = @transform_2, window_bounds = array<i64: 1, 128>}, {pipeline_mode = #tpu.pipeline_mode<synchronous>, transform_indices = @transform_3, window_bounds = array<i64: 96, 128>}, {pipeline_mode = #tpu.pipeline_mode<synchronous>, transform_indices = @transform_4, window_bounds = array<i64: 4, 1152, 128>}, {pipeline_mode = #tpu.pipeline_mode<synchronous>, transform_indices = @transform_5, window_bounds = array<i64: 4, 1, 128>}, {pipeline_mode = #tpu.pipeline_mode<synchronous>, transform_indices = @transform_6, window_bounds = array<i64: 128, 1024>}, {pipeline_mode = #tpu.pipeline_mode<synchronous>, transform_indices = @transform_7, window_bounds = array<i64: 1, 1024>}, {transform_indices = @transform_8, window_bounds = array<i64: 1, 2, 1024>}]} {
    %c0 = arith.constant 0 : index
    %c0_0 = arith.constant 0 : index
    %0 = vector.load %arg1[%c0, %c0_0] : memref<128x256xf32, #tpu.memory_space<vmem>>, vector<128x256xf32>
    %c0_1 = arith.constant 0 : index
    %c0_2 = arith.constant 0 : index
    %1 = vector.load %arg2[%c0_1, %c0_2] : memref<256x128xf32, #tpu.memory_space<vmem>>, vector<256x128xf32>
    %cst = arith.constant dense<0.000000e+00> : vector<128x128xf32>
    %2 = tpu.matmul %0, %1, %cst {dimension_numbers = #tpu.dot_dimension_numbers<[1], [0], [0], [1], [0, 0, 1, 1], [], []>} : vector<128x256xf32>, vector<256x128xf32>, vector<128x128xf32> -> vector<128x128xf32>
    %c0_3 = arith.constant 0 : index
    %c0_4 = arith.constant 0 : index
    %3 = vector.load %arg3[%c0_3, %c0_4] : memref<1x128xf32, #tpu.memory_space<vmem>>, vector<1x128xf32>
    %4 = vector.broadcast %3 : vector<1x128xf32> to vector<128x128xf32>
    %5 = arith.addf %2, %4 : vector<128x128xf32>
    %cst_5 = arith.constant 0.000000e+00 : f32
    %6 = vector.broadcast %cst_5 : f32 to vector<128x128xf32>
    %7 = arith.maximumf %5, %6 : vector<128x128xf32>
    %8 = tpu.iota {dimensions = array<i32: 0>} : vector<128x1xi32>
    %c64_i32 = arith.constant 64 : i32
    %c0_i32 = arith.constant 0 : i32
    %9 = arith.cmpi eq, %c64_i32, %c0_i32 : i32
    %c1_i32 = arith.constant 1 : i32
    %10 = arith.select %9, %c1_i32, %c64_i32 : i32
    %11 = vector.broadcast %10 : i32 to vector<128x1xi32>
    %12 = arith.remsi %8, %11 : vector<128x1xi32>
    %c0_i32_6 = arith.constant 0 : i32
    %13 = vector.broadcast %c0_i32_6 : i32 to vector<128x1xi32>
    %14 = arith.cmpi ne, %12, %13 : vector<128x1xi32>
    %c0_i32_7 = arith.constant 0 : i32
    %15 = vector.broadcast %c0_i32_7 : i32 to vector<128x1xi32>
    %16 = arith.cmpi slt, %12, %15 : vector<128x1xi32>
    %c0_i32_8 = arith.constant 0 : i32
    %17 = arith.cmpi slt, %10, %c0_i32_8 : i32
    %18 = vector.broadcast %17 : i1 to vector<128x1xi1>
    %19 = vector.broadcast %18 : vector<128x1xi1> to vector<128x1xi1>
    %20 = arith.xori %16, %19 : vector<128x1xi1>
    %21 = arith.andi %20, %14 : vector<128x1xi1>
    %22 = vector.broadcast %10 : i32 to vector<128x1xi32>
    %23 = arith.addi %12, %22 : vector<128x1xi32>
    %24 = arith.select %21, %23, %12 : vector<128x1xi1>, vector<128x1xi32>
    %c8_i32 = arith.constant 8 : i32
    %25 = vector.broadcast %c8_i32 : i32 to vector<128x1xi32>
    %26 = arith.cmpi slt, %24, %25 : vector<128x1xi32>
    %c8_i32_9 = arith.constant 8 : i32
    %c0_i32_10 = arith.constant 0 : i32
    %27 = arith.cmpi eq, %c8_i32_9, %c0_i32_10 : i32
    %c1_i32_11 = arith.constant 1 : i32
    %28 = arith.select %27, %c1_i32_11, %c8_i32_9 : i32
    %29 = vector.broadcast %28 : i32 to vector<128x1xi32>
    %30 = arith.remsi %8, %29 : vector<128x1xi32>
    %c0_i32_12 = arith.constant 0 : i32
    %31 = vector.broadcast %c0_i32_12 : i32 to vector<128x1xi32>
    %32 = arith.cmpi ne, %30, %31 : vector<128x1xi32>
    %c0_i32_13 = arith.constant 0 : i32
    %33 = vector.broadcast %c0_i32_13 : i32 to vector<128x1xi32>
    %34 = arith.cmpi slt, %30, %33 : vector<128x1xi32>
    %c0_i32_14 = arith.constant 0 : i32
    %35 = arith.cmpi slt, %28, %c0_i32_14 : i32
    %36 = vector.broadcast %35 : i1 to vector<128x1xi1>
    %37 = vector.broadcast %36 : vector<128x1xi1> to vector<128x1xi1>
    %38 = arith.xori %34, %37 : vector<128x1xi1>
    %39 = arith.andi %38, %32 : vector<128x1xi1>
    %40 = vector.broadcast %28 : i32 to vector<128x1xi32>
    %41 = arith.addi %30, %40 : vector<128x1xi32>
    %42 = arith.select %39, %41, %30 : vector<128x1xi1>, vector<128x1xi32>
    %c0_i32_15 = arith.constant 0 : i32
    %43 = vector.broadcast %c0_i32_15 : i32 to vector<128x1xi32>
    %44 = arith.cmpi eq, %42, %43 : vector<128x1xi32>
    %c8_i32_16 = arith.constant 8 : i32
    %45 = tpu.dynamic_rotate %7 by %c8_i32_16 dim 0 : vector<128x128xf32>, i32 -> vector<128x128xf32>
    %cst_17 = arith.constant 0.000000e+00 : f32
    %46 = vector.shape_cast %26 : vector<128x1xi1> to vector<128x1xi1>
    %47 = vector.broadcast %46 : vector<128x1xi1> to vector<128x128xi1>
    %48 = vector.broadcast %cst_17 : f32 to vector<128x128xf32>
    %49 = arith.select %47, %48, %45 : vector<128x128xi1>, vector<128x128xf32>
    %c120_i32 = arith.constant 120 : i32
    %50 = tpu.dynamic_rotate %7 by %c120_i32 dim 0 : vector<128x128xf32>, i32 -> vector<128x128xf32>
    %51 = arith.maximumf %49, %7 : vector<128x128xf32>
    %52 = arith.maximumf %51, %50 : vector<128x128xf32>
    %c1_i32_18 = arith.constant 1 : i32
    %53 = tpu.dynamic_rotate %52 by %c1_i32_18 dim 0 : vector<128x128xf32>, i32 -> vector<128x128xf32>
    %cst_19 = arith.constant 0.000000e+00 : f32
    %54 = vector.shape_cast %44 : vector<128x1xi1> to vector<128x1xi1>
    %55 = vector.broadcast %54 : vector<128x1xi1> to vector<128x128xi1>
    %56 = vector.broadcast %cst_19 : f32 to vector<128x128xf32>
    %57 = arith.select %55, %56, %53 : vector<128x128xi1>, vector<128x128xf32>
    %c127_i32 = arith.constant 127 : i32
    %58 = tpu.dynamic_rotate %52 by %c127_i32 dim 0 : vector<128x128xf32>, i32 -> vector<128x128xf32>
    %59 = arith.maximumf %57, %52 : vector<128x128xf32>
    %60 = arith.maximumf %59, %58 : vector<128x128xf32>
    %c0_20 = arith.constant 0 : index
    %c0_21 = arith.constant 0 : index
    %61 = vector.load %arg4[%c0_20, %c0_21] : memref<96x128xf32, #tpu.memory_space<vmem>>, vector<96x128xf32>
    %cst_22 = arith.constant dense<0.000000e+00> : vector<96x128xf32>
    %62 = tpu.matmul %61, %60, %cst_22 {dimension_numbers = #tpu.dot_dimension_numbers<[1], [0], [0], [1], [0, 0, 1, 1], [], []>} : vector<96x128xf32>, vector<128x128xf32>, vector<96x128xf32> -> vector<96x128xf32>
    %63 = tpu.iota {dimensions = array<i32: 0>} : vector<96x1xi32>
    %c48_i32 = arith.constant 48 : i32
    %c0_i32_23 = arith.constant 0 : i32
    %64 = arith.cmpi eq, %c48_i32, %c0_i32_23 : i32
    %c1_i32_24 = arith.constant 1 : i32
    %65 = arith.select %64, %c1_i32_24, %c48_i32 : i32
    %66 = vector.broadcast %65 : i32 to vector<96x1xi32>
    %67 = arith.remsi %63, %66 : vector<96x1xi32>
    %c0_i32_25 = arith.constant 0 : i32
    %68 = vector.broadcast %c0_i32_25 : i32 to vector<96x1xi32>
    %69 = arith.cmpi ne, %67, %68 : vector<96x1xi32>
    %c0_i32_26 = arith.constant 0 : i32
    %70 = vector.broadcast %c0_i32_26 : i32 to vector<96x1xi32>
    %71 = arith.cmpi slt, %67, %70 : vector<96x1xi32>
    %c0_i32_27 = arith.constant 0 : i32
    %72 = arith.cmpi slt, %65, %c0_i32_27 : i32
    %73 = vector.broadcast %72 : i1 to vector<96x1xi1>
    %74 = vector.broadcast %73 : vector<96x1xi1> to vector<96x1xi1>
    %75 = arith.xori %71, %74 : vector<96x1xi1>
    %76 = arith.andi %75, %69 : vector<96x1xi1>
    %77 = vector.broadcast %65 : i32 to vector<96x1xi32>
    %78 = arith.addi %67, %77 : vector<96x1xi32>
    %79 = arith.select %76, %78, %67 : vector<96x1xi1>, vector<96x1xi32>
    %c8_i32_28 = arith.constant 8 : i32
    %c0_i32_29 = arith.constant 0 : i32
    %80 = arith.cmpi eq, %c8_i32_28, %c0_i32_29 : i32
    %c1_i32_30 = arith.constant 1 : i32
    %81 = arith.select %80, %c1_i32_30, %c8_i32_28 : i32
    %82 = vector.broadcast %81 : i32 to vector<96x1xi32>
    %83 = arith.remsi %79, %82 : vector<96x1xi32>
    %c0_i32_31 = arith.constant 0 : i32
    %84 = vector.broadcast %c0_i32_31 : i32 to vector<96x1xi32>
    %85 = arith.cmpi ne, %83, %84 : vector<96x1xi32>
    %c0_i32_32 = arith.constant 0 : i32
    %86 = vector.broadcast %c0_i32_32 : i32 to vector<96x1xi32>
    %87 = arith.cmpi slt, %83, %86 : vector<96x1xi32>
    %c0_i32_33 = arith.constant 0 : i32
    %88 = arith.cmpi slt, %81, %c0_i32_33 : i32
    %89 = vector.broadcast %88 : i1 to vector<96x1xi1>
    %90 = vector.broadcast %89 : vector<96x1xi1> to vector<96x1xi1>
    %91 = arith.xori %87, %90 : vector<96x1xi1>
    %92 = arith.andi %91, %85 : vector<96x1xi1>
    %93 = vector.broadcast %81 : i32 to vector<96x1xi32>
    %94 = arith.addi %83, %93 : vector<96x1xi32>
    %95 = arith.select %92, %94, %83 : vector<96x1xi1>, vector<96x1xi32>
    %c4_i32 = arith.constant 4 : i32
    %96 = vector.broadcast %c4_i32 : i32 to vector<96x1xi32>
    %97 = arith.cmpi slt, %95, %96 : vector<96x1xi32>
    %c32_i32 = arith.constant 32 : i32
    %98 = vector.broadcast %c32_i32 : i32 to vector<96x1xi32>
    %99 = arith.cmpi slt, %79, %98 : vector<96x1xi32>
    %100 = arith.andi %97, %99 : vector<96x1xi1>
    %101 = arith.extui %100 : vector<96x1xi1> to vector<96x1xi32>
    %102 = arith.sitofp %101 : vector<96x1xi32> to vector<96x1xf32>
    %c95_i32 = arith.constant 95 : i32
    %103 = tpu.dynamic_rotate %62 by %c95_i32 dim 0 : vector<96x128xf32>, i32 -> vector<96x128xf32>
    %c94_i32 = arith.constant 94 : i32
    %104 = tpu.dynamic_rotate %62 by %c94_i32 dim 0 : vector<96x128xf32>, i32 -> vector<96x128xf32>
    %c88_i32 = arith.constant 88 : i32
    %105 = tpu.dynamic_rotate %62 by %c88_i32 dim 0 : vector<96x128xf32>, i32 -> vector<96x128xf32>
    %c87_i32 = arith.constant 87 : i32
    %106 = tpu.dynamic_rotate %62 by %c87_i32 dim 0 : vector<96x128xf32>, i32 -> vector<96x128xf32>
    %c86_i32 = arith.constant 86 : i32
    %107 = tpu.dynamic_rotate %62 by %c86_i32 dim 0 : vector<96x128xf32>, i32 -> vector<96x128xf32>
    %c80_i32 = arith.constant 80 : i32
    %108 = tpu.dynamic_rotate %62 by %c80_i32 dim 0 : vector<96x128xf32>, i32 -> vector<96x128xf32>
    %c79_i32 = arith.constant 79 : i32
    %109 = tpu.dynamic_rotate %62 by %c79_i32 dim 0 : vector<96x128xf32>, i32 -> vector<96x128xf32>
    %c78_i32 = arith.constant 78 : i32
    %110 = tpu.dynamic_rotate %62 by %c78_i32 dim 0 : vector<96x128xf32>, i32 -> vector<96x128xf32>
    %111 = tpu.concatenate %62, %103, %104, %105, %106, %107, %108, %109, %110 in 1 : vector<96x128xf32>, vector<96x128xf32>, vector<96x128xf32>, vector<96x128xf32>, vector<96x128xf32>, vector<96x128xf32>, vector<96x128xf32>, vector<96x128xf32>, vector<96x128xf32> -> vector<96x1152xf32>
    %c0_34 = arith.constant 0 : index
    %c0_35 = arith.constant 0 : index
    %c0_36 = arith.constant 0 : index
    %112 = vector.load %arg5[%c0_34, %c0_35, %c0_36] : memref<4x1152x128xf32, #tpu.memory_space<vmem>>, vector<1x1152x128xf32>
    %113 = vector.shape_cast %112 : vector<1x1152x128xf32> to vector<1152x128xf32>
    %cst_37 = arith.constant dense<0.000000e+00> : vector<96x128xf32>
    %114 = tpu.matmul %111, %113, %cst_37 {dimension_numbers = #tpu.dot_dimension_numbers<[1], [0], [0], [1], [0, 0, 1, 1], [], []>} : vector<96x1152xf32>, vector<1152x128xf32>, vector<96x128xf32> -> vector<96x128xf32>
    %c0_38 = arith.constant 0 : index
    %c0_39 = arith.constant 0 : index
    %c0_40 = arith.constant 0 : index
    %115 = vector.load %arg6[%c0_38, %c0_39, %c0_40] : memref<4x1x128xf32, #tpu.memory_space<vmem>>, vector<1x1x128xf32>
    %116 = vector.shape_cast %115 : vector<1x1x128xf32> to vector<1x128xf32>
    %117 = vector.broadcast %116 : vector<1x128xf32> to vector<96x128xf32>
    %118 = arith.addf %114, %117 : vector<96x128xf32>
    %cst_41 = arith.constant 0.000000e+00 : f32
    %119 = vector.broadcast %cst_41 : f32 to vector<96x128xf32>
    %120 = arith.maximumf %118, %119 : vector<96x128xf32>
    %121 = vector.broadcast %102 : vector<96x1xf32> to vector<96x128xf32>
    %122 = arith.mulf %120, %121 : vector<96x128xf32>
    %c9_i32 = arith.constant 9 : i32
    %123 = tpu.dynamic_rotate %122 by %c9_i32 dim 0 : vector<96x128xf32>, i32 -> vector<96x128xf32>
    %c95_i32_42 = arith.constant 95 : i32
    %124 = tpu.dynamic_rotate %123 by %c95_i32_42 dim 0 : vector<96x128xf32>, i32 -> vector<96x128xf32>
    %c94_i32_43 = arith.constant 94 : i32
    %125 = tpu.dynamic_rotate %123 by %c94_i32_43 dim 0 : vector<96x128xf32>, i32 -> vector<96x128xf32>
    %c88_i32_44 = arith.constant 88 : i32
    %126 = tpu.dynamic_rotate %123 by %c88_i32_44 dim 0 : vector<96x128xf32>, i32 -> vector<96x128xf32>
    %c87_i32_45 = arith.constant 87 : i32
    %127 = tpu.dynamic_rotate %123 by %c87_i32_45 dim 0 : vector<96x128xf32>, i32 -> vector<96x128xf32>
    %c86_i32_46 = arith.constant 86 : i32
    %128 = tpu.dynamic_rotate %123 by %c86_i32_46 dim 0 : vector<96x128xf32>, i32 -> vector<96x128xf32>
    %c80_i32_47 = arith.constant 80 : i32
    %129 = tpu.dynamic_rotate %123 by %c80_i32_47 dim 0 : vector<96x128xf32>, i32 -> vector<96x128xf32>
    %c79_i32_48 = arith.constant 79 : i32
    %130 = tpu.dynamic_rotate %123 by %c79_i32_48 dim 0 : vector<96x128xf32>, i32 -> vector<96x128xf32>
    %c78_i32_49 = arith.constant 78 : i32
    %131 = tpu.dynamic_rotate %123 by %c78_i32_49 dim 0 : vector<96x128xf32>, i32 -> vector<96x128xf32>
    %132 = tpu.concatenate %123, %124, %125, %126, %127, %128, %129, %130, %131 in 1 : vector<96x128xf32>, vector<96x128xf32>, vector<96x128xf32>, vector<96x128xf32>, vector<96x128xf32>, vector<96x128xf32>, vector<96x128xf32>, vector<96x128xf32>, vector<96x128xf32> -> vector<96x1152xf32>
    %c1 = arith.constant 1 : index
    %c0_50 = arith.constant 0 : index
    %c0_51 = arith.constant 0 : index
    %133 = vector.load %arg5[%c1, %c0_50, %c0_51] : memref<4x1152x128xf32, #tpu.memory_space<vmem>>, vector<1x1152x128xf32>
    %134 = vector.shape_cast %133 : vector<1x1152x128xf32> to vector<1152x128xf32>
    %cst_52 = arith.constant dense<0.000000e+00> : vector<96x128xf32>
    %135 = tpu.matmul %132, %134, %cst_52 {dimension_numbers = #tpu.dot_dimension_numbers<[1], [0], [0], [1], [0, 0, 1, 1], [], []>} : vector<96x1152xf32>, vector<1152x128xf32>, vector<96x128xf32> -> vector<96x128xf32>
    %c1_53 = arith.constant 1 : index
    %c0_54 = arith.constant 0 : index
    %c0_55 = arith.constant 0 : index
    %136 = vector.load %arg6[%c1_53, %c0_54, %c0_55] : memref<4x1x128xf32, #tpu.memory_space<vmem>>, vector<1x1x128xf32>
    %137 = vector.shape_cast %136 : vector<1x1x128xf32> to vector<1x128xf32>
    %138 = vector.broadcast %137 : vector<1x128xf32> to vector<96x128xf32>
    %139 = arith.addf %135, %138 : vector<96x128xf32>
    %140 = vector.broadcast %102 : vector<96x1xf32> to vector<96x128xf32>
    %141 = arith.mulf %139, %140 : vector<96x128xf32>
    %c9_i32_56 = arith.constant 9 : i32
    %142 = tpu.dynamic_rotate %141 by %c9_i32_56 dim 0 : vector<96x128xf32>, i32 -> vector<96x128xf32>
    %c95_i32_57 = arith.constant 95 : i32
    %143 = tpu.dynamic_rotate %142 by %c95_i32_57 dim 0 : vector<96x128xf32>, i32 -> vector<96x128xf32>
    %c94_i32_58 = arith.constant 94 : i32
    %144 = tpu.dynamic_rotate %142 by %c94_i32_58 dim 0 : vector<96x128xf32>, i32 -> vector<96x128xf32>
    %c88_i32_59 = arith.constant 88 : i32
    %145 = tpu.dynamic_rotate %142 by %c88_i32_59 dim 0 : vector<96x128xf32>, i32 -> vector<96x128xf32>
    %c87_i32_60 = arith.constant 87 : i32
    %146 = tpu.dynamic_rotate %142 by %c87_i32_60 dim 0 : vector<96x128xf32>, i32 -> vector<96x128xf32>
    %c86_i32_61 = arith.constant 86 : i32
    %147 = tpu.dynamic_rotate %142 by %c86_i32_61 dim 0 : vector<96x128xf32>, i32 -> vector<96x128xf32>
    %c80_i32_62 = arith.constant 80 : i32
    %148 = tpu.dynamic_rotate %142 by %c80_i32_62 dim 0 : vector<96x128xf32>, i32 -> vector<96x128xf32>
    %c79_i32_63 = arith.constant 79 : i32
    %149 = tpu.dynamic_rotate %142 by %c79_i32_63 dim 0 : vector<96x128xf32>, i32 -> vector<96x128xf32>
    %c78_i32_64 = arith.constant 78 : i32
    %150 = tpu.dynamic_rotate %142 by %c78_i32_64 dim 0 : vector<96x128xf32>, i32 -> vector<96x128xf32>
    %151 = tpu.concatenate %142, %143, %144, %145, %146, %147, %148, %149, %150 in 1 : vector<96x128xf32>, vector<96x128xf32>, vector<96x128xf32>, vector<96x128xf32>, vector<96x128xf32>, vector<96x128xf32>, vector<96x128xf32>, vector<96x128xf32>, vector<96x128xf32> -> vector<96x1152xf32>
    %c2 = arith.constant 2 : index
    %c0_65 = arith.constant 0 : index
    %c0_66 = arith.constant 0 : index
    %152 = vector.load %arg5[%c2, %c0_65, %c0_66] : memref<4x1152x128xf32, #tpu.memory_space<vmem>>, vector<1x1152x128xf32>
    %153 = vector.shape_cast %152 : vector<1x1152x128xf32> to vector<1152x128xf32>
    %cst_67 = arith.constant dense<0.000000e+00> : vector<96x128xf32>
    %154 = tpu.matmul %151, %153, %cst_67 {dimension_numbers = #tpu.dot_dimension_numbers<[1], [0], [0], [1], [0, 0, 1, 1], [], []>} : vector<96x1152xf32>, vector<1152x128xf32>, vector<96x128xf32> -> vector<96x128xf32>
    %c2_68 = arith.constant 2 : index
    %c0_69 = arith.constant 0 : index
    %c0_70 = arith.constant 0 : index
    %155 = vector.load %arg6[%c2_68, %c0_69, %c0_70] : memref<4x1x128xf32, #tpu.memory_space<vmem>>, vector<1x1x128xf32>
    %156 = vector.shape_cast %155 : vector<1x1x128xf32> to vector<1x128xf32>
    %157 = vector.broadcast %156 : vector<1x128xf32> to vector<96x128xf32>
    %158 = arith.addf %154, %157 : vector<96x128xf32>
    %cst_71 = arith.constant 0.000000e+00 : f32
    %159 = vector.broadcast %cst_71 : f32 to vector<96x128xf32>
    %160 = arith.maximumf %158, %159 : vector<96x128xf32>
    %161 = vector.broadcast %102 : vector<96x1xf32> to vector<96x128xf32>
    %162 = arith.mulf %160, %161 : vector<96x128xf32>
    %c9_i32_72 = arith.constant 9 : i32
    %163 = tpu.dynamic_rotate %162 by %c9_i32_72 dim 0 : vector<96x128xf32>, i32 -> vector<96x128xf32>
    %c95_i32_73 = arith.constant 95 : i32
    %164 = tpu.dynamic_rotate %163 by %c95_i32_73 dim 0 : vector<96x128xf32>, i32 -> vector<96x128xf32>
    %c94_i32_74 = arith.constant 94 : i32
    %165 = tpu.dynamic_rotate %163 by %c94_i32_74 dim 0 : vector<96x128xf32>, i32 -> vector<96x128xf32>
    %c88_i32_75 = arith.constant 88 : i32
    %166 = tpu.dynamic_rotate %163 by %c88_i32_75 dim 0 : vector<96x128xf32>, i32 -> vector<96x128xf32>
    %c87_i32_76 = arith.constant 87 : i32
    %167 = tpu.dynamic_rotate %163 by %c87_i32_76 dim 0 : vector<96x128xf32>, i32 -> vector<96x128xf32>
    %c86_i32_77 = arith.constant 86 : i32
    %168 = tpu.dynamic_rotate %163 by %c86_i32_77 dim 0 : vector<96x128xf32>, i32 -> vector<96x128xf32>
    %c80_i32_78 = arith.constant 80 : i32
    %169 = tpu.dynamic_rotate %163 by %c80_i32_78 dim 0 : vector<96x128xf32>, i32 -> vector<96x128xf32>
    %c79_i32_79 = arith.constant 79 : i32
    %170 = tpu.dynamic_rotate %163 by %c79_i32_79 dim 0 : vector<96x128xf32>, i32 -> vector<96x128xf32>
    %c78_i32_80 = arith.constant 78 : i32
    %171 = tpu.dynamic_rotate %163 by %c78_i32_80 dim 0 : vector<96x128xf32>, i32 -> vector<96x128xf32>
    %172 = tpu.concatenate %163, %164, %165, %166, %167, %168, %169, %170, %171 in 1 : vector<96x128xf32>, vector<96x128xf32>, vector<96x128xf32>, vector<96x128xf32>, vector<96x128xf32>, vector<96x128xf32>, vector<96x128xf32>, vector<96x128xf32>, vector<96x128xf32> -> vector<96x1152xf32>
    %c3 = arith.constant 3 : index
    %c0_81 = arith.constant 0 : index
    %c0_82 = arith.constant 0 : index
    %173 = vector.load %arg5[%c3, %c0_81, %c0_82] : memref<4x1152x128xf32, #tpu.memory_space<vmem>>, vector<1x1152x128xf32>
    %174 = vector.shape_cast %173 : vector<1x1152x128xf32> to vector<1152x128xf32>
    %cst_83 = arith.constant dense<0.000000e+00> : vector<96x128xf32>
    %175 = tpu.matmul %172, %174, %cst_83 {dimension_numbers = #tpu.dot_dimension_numbers<[1], [0], [0], [1], [0, 0, 1, 1], [], []>} : vector<96x1152xf32>, vector<1152x128xf32>, vector<96x128xf32> -> vector<96x128xf32>
    %c3_84 = arith.constant 3 : index
    %c0_85 = arith.constant 0 : index
    %c0_86 = arith.constant 0 : index
    %176 = vector.load %arg6[%c3_84, %c0_85, %c0_86] : memref<4x1x128xf32, #tpu.memory_space<vmem>>, vector<1x1x128xf32>
    %177 = vector.shape_cast %176 : vector<1x1x128xf32> to vector<1x128xf32>
    %178 = vector.broadcast %177 : vector<1x128xf32> to vector<96x128xf32>
    %179 = arith.addf %175, %178 : vector<96x128xf32>
    %180 = vector.broadcast %102 : vector<96x1xf32> to vector<96x128xf32>
    %181 = arith.mulf %179, %180 : vector<96x128xf32>
    %182 = vector.extract_strided_slice %181 {offsets = [0, 0], sizes = [48, 128], strides = [1, 1]} : vector<96x128xf32> to vector<48x128xf32>
    %cst_87 = arith.constant dense<0.000000e+00> : vector<128xf32>
    %183 = vector.multi_reduction <add>, %182, %cst_87 [0] : vector<48x128xf32> to vector<128xf32>
    %184 = vector.shape_cast %183 : vector<128xf32> to vector<1x128xf32>
    %185 = vector.extract_strided_slice %181 {offsets = [48, 0], sizes = [48, 128], strides = [1, 1]} : vector<96x128xf32> to vector<48x128xf32>
    %cst_88 = arith.constant dense<0.000000e+00> : vector<128xf32>
    %186 = vector.multi_reduction <add>, %185, %cst_88 [0] : vector<48x128xf32> to vector<128xf32>
    %187 = vector.shape_cast %186 : vector<128xf32> to vector<1x128xf32>
    %188 = tpu.concatenate %184, %187 in 0 : vector<1x128xf32>, vector<1x128xf32> -> vector<2x128xf32>
    %cst_89 = arith.constant 6.250000e-02 : f32
    %189 = vector.broadcast %cst_89 : f32 to vector<2x128xf32>
    %190 = arith.mulf %188, %189 : vector<2x128xf32>
    %c0_90 = arith.constant 0 : index
    %c0_91 = arith.constant 0 : index
    %191 = vector.load %arg7[%c0_90, %c0_91] : memref<128x1024xf32, #tpu.memory_space<vmem>>, vector<128x1024xf32>
    %cst_92 = arith.constant dense<0.000000e+00> : vector<2x1024xf32>
    %192 = tpu.matmul %190, %191, %cst_92 {dimension_numbers = #tpu.dot_dimension_numbers<[1], [0], [0], [1], [0, 0, 1, 1], [], []>} : vector<2x128xf32>, vector<128x1024xf32>, vector<2x1024xf32> -> vector<2x1024xf32>
    %c0_93 = arith.constant 0 : index
    %c0_94 = arith.constant 0 : index
    %193 = vector.load %arg8[%c0_93, %c0_94] : memref<1x1024xf32, #tpu.memory_space<vmem>>, vector<1x1024xf32>
    %194 = vector.broadcast %193 : vector<1x1024xf32> to vector<2x1024xf32>
    %195 = arith.addf %192, %194 : vector<2x1024xf32>
    %c0_95 = arith.constant 0 : index
    %c0_96 = arith.constant 0 : index
    %c0_97 = arith.constant 0 : index
    %196 = vector.load %arg9[%c0_95, %c0_96, %c0_97] : memref<1x2x1024xf32, #tpu.memory_space<vmem>>, vector<1x2x1024xf32>
    %197 = vector.shape_cast %196 : vector<1x2x1024xf32> to vector<2x1024xf32>
    %198 = vector.shape_cast %195 : vector<2x1024xf32> to vector<1x2x1024xf32>
    tpu.vector_store %arg9[%c0_95, %c0_96, %c0_97], %198 {strides = array<i32>} : memref<1x2x1024xf32, #tpu.memory_space<vmem>>, vector<1x2x1024xf32>,
    return
  }
  func.func @transform_0(%arg0: i32) -> (i32, i32) {
    %c0_i32 = arith.constant 0 : i32
    %c0_i32_0 = arith.constant 0 : i32
    return %arg0, %c0_i32 : i32, i32
  }
  func.func @transform_1(%arg0: i32) -> (i32, i32) {
    %c0_i32 = arith.constant 0 : i32
    %c0_i32_0 = arith.constant 0 : i32
    %c0_i32_1 = arith.constant 0 : i32
    return %c0_i32, %c0_i32_0 : i32, i32
  }
  func.func @transform_2(%arg0: i32) -> (i32, i32) {
    %c0_i32 = arith.constant 0 : i32
    %c0_i32_0 = arith.constant 0 : i32
    %c0_i32_1 = arith.constant 0 : i32
    return %c0_i32, %c0_i32_0 : i32, i32
  }
  func.func @transform_3(%arg0: i32) -> (i32, i32) {
    %c0_i32 = arith.constant 0 : i32
    %c0_i32_0 = arith.constant 0 : i32
    %c0_i32_1 = arith.constant 0 : i32
    return %c0_i32, %c0_i32_0 : i32, i32
  }
  func.func @transform_4(%arg0: i32) -> (i32, i32, i32) {
    %c0_i32 = arith.constant 0 : i32
    %c0_i32_0 = arith.constant 0 : i32
    %c0_i32_1 = arith.constant 0 : i32
    %c0_i32_2 = arith.constant 0 : i32
    return %c0_i32, %c0_i32_0, %c0_i32_1 : i32, i32, i32
  }
  func.func @transform_5(%arg0: i32) -> (i32, i32, i32) {
    %c0_i32 = arith.constant 0 : i32
    %c0_i32_0 = arith.constant 0 : i32
    %c0_i32_1 = arith.constant 0 : i32
    %c0_i32_2 = arith.constant 0 : i32
    return %c0_i32, %c0_i32_0, %c0_i32_1 : i32, i32, i32
  }
  func.func @transform_6(%arg0: i32) -> (i32, i32) {
    %c0_i32 = arith.constant 0 : i32
    %c0_i32_0 = arith.constant 0 : i32
    %c0_i32_1 = arith.constant 0 : i32
    return %c0_i32, %c0_i32_0 : i32, i32
  }
  func.func @transform_7(%arg0: i32) -> (i32, i32) {
    %c0_i32 = arith.constant 0 : i32
    %c0_i32_0 = arith.constant 0 : i32
    %c0_i32_1 = arith.constant 0 : i32
    return %c0_i32, %c0_i32_0 : i32, i32
  }
  func.func @transform_8(%arg0: i32) -> (i32, i32, i32) {
    %c0_i32 = arith.constant 0 : i32
    %c0_i32_0 = arith.constant 0 : i32
    %c0_i32_1 = arith.constant 0 : i32
    return %arg0, %c0_i32, %c0_i32_0 : i32, i32, i32
  }
}

</mosaic_0001>

<bundles_post_ra>
// kernel: net_double_layer_forward.1
= control target key start
LH: loop header
LB: loop body
LE: loop exit
PB: predicated region body
PF: predicated region fallthrough
CT: control target
= control target key end

     0   :  { %s12682_s0 = inlined_call_operand.vmem [shape: f32[128,256], index: 0, kind: input, shape index: {}]   ;;  %s12683_s1 = inlined_call_operand.vmem [shape: f32[256,128], index: 1, kind: input, shape index: {}]   ;;  %s12684_s2 = inlined_call_operand.vmem [shape: f32[1,128], index: 2, kind: input, shape index: {}]   ;;  %s12685_s3 = inlined_call_operand.vmem [shape: f32[96,128], index: 3, kind: input, shape index: {}]   ;;  %s12686_s4 = inlined_call_operand.vmem [shape: f32[4,1152,128], index: 4, kind: input, shape index: {}]   ;;  %s12687_s5 = inlined_call_operand.vmem [shape: f32[4,1,128], index: 5, kind: input, shape index: {}]   ;;  %s12688_s6 = inlined_call_operand.vmem [shape: f32[128,1024], index: 6, kind: input, shape index: {}]   ;;  %s12689_s7 = inlined_call_operand.vmem [shape: f32[1,1024], index: 7, kind: input, shape index: {}]   ;;  %s12690_s8 = inlined_call_operand.hbm [shape: f32[1,2,1024], index: 8, kind: output, shape index: {}]  }
   0x1   :  { %v93_v0 = vld [vmem:[%s12683_s1 + $0xf8] sm:$0xff]  ;;  %v92_v2 = vld [vmem:[%s12683_s1 + $0xf0] sm:$0xff]  ;;  %v91_v4 = vld [vmem:[%s12683_s1 + $0xe8] sm:$0xff] }
   0x2   :  { %v77_v1 = vld [vmem:[%s12683_s1 + $0x78] sm:$0xff]  ;;  %5904 = vmatprep.subr.mxu0 %v93_v0  ;;  %v76_v3 = vld [vmem:[%s12683_s1 + $0x70] sm:$0xff]  ;;  %v75_v5 = vld [vmem:[%s12683_s1 + $0x68] sm:$0xff] }
   0x3   :  { %5905 = vmatpush3.msra.mxu0 %v77_v1  ;;  %v90_v6 = vld [vmem:[%s12683_s1 + $0xe0] sm:$0xff]  ;;  %v89_v8 = vld [vmem:[%s12683_s1 + $0xd8] sm:$0xff]  ;;  %v88_v10 = vld [vmem:[%s12683_s1 + $0xd0] sm:$0xff] }
   0x4   :  { %5906 = vmatprep.subr.mxu0 %v92_v2  ;;  %v74_v7 = vld [vmem:[%s12683_s1 + $0x60] sm:$0xff]  ;;  %v73_v9 = vld [vmem:[%s12683_s1 + $0x58] sm:$0xff]  ;;  %v72_v11 = vld [vmem:[%s12683_s1 + $0x50] sm:$0xff] }
   0x5   :  { %5907 = vmatpush3.msra.mxu0 %v76_v3  ;;  %v87_v12 = vld [vmem:[%s12683_s1 + $0xc8] sm:$0xff]  ;;  %v86_v15 = vld [vmem:[%s12683_s1 + $0xc0] sm:$0xff]  ;;  %v85_v17 = vld [vmem:[%s12683_s1 + $0xb8] sm:$0xff] }
   0x6   :  { %5908 = vmatprep.subr.mxu0 %v91_v4  ;;  %v31_v13 = vld [vmem:[%s12682_s0 + $0x8] sm:$0xff]  ;;  %v70_v16 = vld [vmem:[%s12683_s1 + $0x40] sm:$0xff]  ;;  %v69_v18 = vld [vmem:[%s12683_s1 + $0x38] sm:$0xff] }
   0x7   :  { %5909 = vmatpush3.msra.mxu0 %v75_v5  ;;  %v71_v14 = vld [vmem:[%s12683_s1 + $0x48] sm:$0xff]  ;;  %165 = vmatprep.mubr.f32.mxu0 %v31_v13  ;;  %v84_v19 = vld [vmem:[%s12683_s1 + $0xb0] sm:$0xff]  ;;  %v82_v23 = vld [vmem:[%s12683_s1 + $0xa0] sm:$0xff] }
   0x8   :  { %5910 = vmatprep.subr.mxu0 %v90_v6  ;;  %v68_v20 = vld [vmem:[%s12683_s1 + $0x30] sm:$0xff]  ;;  %v83_v21 = vld [vmem:[%s12683_s1 + $0xa8] sm:$0xff]  ;;  %v66_v24 = vld [vmem:[%s12683_s1 + $0x20] sm:$0xff] }
   0x9   :  { %5911 = vmatpush3.msra.mxu0 %v74_v7  ;;  %v67_v22 = vld [vmem:[%s12683_s1 + $0x28] sm:$0xff] }
   0xa   :  { %5912 = vmatprep.subr.mxu0 %v89_v8 }
   0xb   :  { %5913 = vmatpush3.msra.mxu0 %v73_v9 }
   0xc   :  { %5914 = vmatprep.subr.mxu0 %v88_v10 }
   0xd   :  { %5915 = vmatpush3.msra.mxu0 %v72_v11 }
   0xe   :  { %5916 = vmatprep.subr.mxu0 %v87_v12 }
   0xf   :  { %5917 = vmatpush3.msra.mxu0 %v71_v14 }
  0x10   :  { %5918 = vmatprep.subr.mxu0 %v86_v15 }
  0x11   :  { %5919 = vmatpush3.msra.mxu0 %v70_v16 }
  0x12   :  { %5920 = vmatprep.subr.mxu0 %v85_v17 }
  0x13   :  { %5921 = vmatpush3.msra.mxu0 %v69_v18 }
  0x14   :  { %5922 = vmatprep.subr.mxu0 %v84_v19 }
  0x15   :  { %5923 = vmatpush3.msra.mxu0 %v68_v20 }
  0x16   :  { %5924 = vmatprep.subr.mxu0 %v83_v21 }
  0x17   :  { %13 = vsyncpa [#allocation3], 0  ;;  %5925 = vmatpush3.msra.mxu0 %v67_v22  ;;  %v81_v25 = vld [vmem:[%s12683_s1 + $0x98] sm:$0xff]  ;;  %v80_v27 = vld [vmem:[%s12683_s1 + $0x90] sm:$0xff]  ;;  %v262_v2 = vlaneseq }
  0x18   :  { %5926 = vmatprep.subr.mxu0 %v82_v23  ;;  %v65_v26 = vld [vmem:[%s12683_s1 + $0x18] sm:$0xff]  ;;  %v64_v28 = vld [vmem:[%s12683_s1 + $0x10] sm:$0xff]  ;;  %v79_v29 = vld [vmem:[%s12683_s1 + $0x88] sm:$0xff] }
  0x19   :  { %5927 = vmatpush3.msra.mxu0 %v66_v24  ;;  %v63_v30 = vld [vmem:[%s12683_s1 + $0x8] sm:$0xff]  ;;  %v78_v31 = vld [vmem:[%s12683_s1 + $0x80] sm:$0xff]  ;;  %v33_v34 = vld [vmem:[%s12682_s0 + $0x18] sm:$0xff]  ;;  %v7760_v8 = vshrl.u32 %v262_v2, 7 }
  0x1a   :  { %5928 = vmatprep.subr.mxu0 %v81_v25  ;;  %v62_v32 = vld [vmem:[%s12683_s1] sm:$0xff]  ;;  %v32_v35 = vld [vmem:[%s12682_s0 + $0x10] sm:$0xff]  ;;  %v35_v36 = vld [vmem:[%s12682_s0 + $0x28] sm:$0xff] }
  0x1b   :  { %5929 = vmatpush3.msra.mxu0 %v65_v26  ;;  %v30_v33 = vld [vmem:[%s12682_s0] sm:$0xff]  ;;  %v37_v38 = vld [vmem:[%s12682_s0 + $0x38] sm:$0xff]  ;;  %v36_v39 = vld [vmem:[%s12682_s0 + $0x30] sm:$0xff]  ;;  %12727 = vst [vmem:[#allocation5_spill] sm:$0xff] %v7760_v8  ;;  %v7784_v20 = vadd.s32 8, %v7760_v8  ;;  %vm12696_vm0 = vcmp.lt.s32.totalorder %v7760_v8, 1 }
  0x1c   :  { %5930 = vmatprep.subr.mxu0 %v80_v27  ;;  %v34_v37 = vld [vmem:[%s12682_s0 + $0x20] sm:$0xff]  ;;  %v39_v40 = vld [vmem:[%s12682_s0 + $0x48] sm:$0xff]  ;;  %v41_v42 = vld [vmem:[%s12682_s0 + $0x58] sm:$0xff]  ;;  %vm12695_vm1 = vcmp.lt.s32.totalorder %v7760_v8, 7 }
  0x1d   :  { %5931 = vmatpush3.msra.mxu0 %v64_v28  ;;  %v38_v41 = vld [vmem:[%s12682_s0 + $0x40] sm:$0xff]  ;;  %v40_v43 = vld [vmem:[%s12682_s0 + $0x50] sm:$0xff]  ;;  %v43_v44 = vld [vmem:[%s12682_s0 + $0x68] sm:$0xff] }
  0x1e   :  { %5932 = vmatprep.subr.mxu0 %v79_v29  ;;  %v42_v45 = vld [vmem:[%s12682_s0 + $0x60] sm:$0xff]  ;;  %v45_v46 = vld [vmem:[%s12682_s0 + $0x78] sm:$0xff]  ;;  %v44_v47 = vld [vmem:[%s12682_s0 + $0x70] sm:$0xff] }
  0x1f   :  { %5933 = vmatpush3.msra.mxu0 %v63_v30  ;;  %v47_v48 = vld [vmem:[%s12682_s0 + $0x88] sm:$0xff]  ;;  %v46_v49 = vld [vmem:[%s12682_s0 + $0x80] sm:$0xff]  ;;  %v49_v50 = vld [vmem:[%s12682_s0 + $0x98] sm:$0xff] }
  0x20   :  { %5934 = vmatprep.subr.mxu0 %v78_v31  ;;  %v48_v51 = vld [vmem:[%s12682_s0 + $0x90] sm:$0xff]  ;;  %v51_v52 = vld [vmem:[%s12682_s0 + $0xa8] sm:$0xff]  ;;  %v50_v53 = vld [vmem:[%s12682_s0 + $0xa0] sm:$0xff]  ;;  %v498_v31 = vand.u32 7, %v7784_v20 }
  0x21   :  { %5935 = vmatpush3.msra.mxu0 %v62_v32  ;;  %v53_v54 = vld [vmem:[%s12682_s0 + $0xb8] sm:$0xff]  ;;  %v52_v55 = vld [vmem:[%s12682_s0 + $0xb0] sm:$0xff]  ;;  %v55_v56 = vld [vmem:[%s12682_s0 + $0xc8] sm:$0xff] }
  0x22   :  { %166 = vmatmul.mubr.f32.vlgmr.msra.gmra.mxu0 %v30_v33  ;;  %v54_v57 = vld [vmem:[%s12682_s0 + $0xc0] sm:$0xff]  ;;  %v57_v58 = vld [vmem:[%s12682_s0 + $0xd8] sm:$0xff]  ;;  %v56_v59 = vld [vmem:[%s12682_s0 + $0xd0] sm:$0xff]  ;;  %vm7822_vm2 = vcmp.eq.s32.totalorder %v498_v31, 0 }
  0x23   :  { %170 = vmatprep.mubr.f32.mxu0 %v33_v34  ;;  %v59_v60 = vld [vmem:[%s12682_s0 + $0xe8] sm:$0xff]  ;;  %v58_v61 = vld [vmem:[%s12682_s0 + $0xe0] sm:$0xff]  ;;  %v61_v62 = vld [vmem:[%s12682_s0 + $0xf8] sm:$0xff] }
  0x24   :  { %v60_v63 = vld [vmem:[%s12682_s0 + $0xf0] sm:$0xff]  ;;  %v921_v0 = vld [vmem:[%s12685_s3] sm:$0xff]  ;;  %v1566_v9 = vld [vmem:[%s12686_s4 + $0x1f8] sm:$0xff] }
  0x25   :  { %7244 = vmatprep.mubr.f32.mxu1 %v921_v0  ;;  %v7757_v3 = vld [vmem:[%s12684_s2] ss:$0 sm:$0xff]  ;;  %v1550_v10 = vld [vmem:[%s12686_s4 + $0x178] sm:$0xff]  ;;  %v1565_v11 = vld [vmem:[%s12686_s4 + $0x1f0] sm:$0xff]  ;;  %6080 = vmatprep.subr.mxu0 %v1566_v9 }
  0x26   :  { %171 = vmatmul.mubr.f32.gmra.mxu0 %v32_v35  ;;  %v1549_v13 = vld [vmem:[%s12686_s4 + $0x170] sm:$0xff]  ;;  %v1564_v15 = vld [vmem:[%s12686_s4 + $0x1e8] sm:$0xff]  ;;  %v1563_v21 = vld [vmem:[%s12686_s4 + $0x1e0] sm:$0xff]  ;;  %v7807_v35 = vadd.s32 16, %v7760_v8 }
  0x27   :  { %175 = vmatprep.mubr.f32.mxu0 %v35_v36  ;;  %6081 = vmatpush3.msra.mxu0 %v1550_v10  ;;  %v1548_v18 = vld [vmem:[%s12686_s4 + $0x168] sm:$0xff]  ;;  %v1547_v23 = vld [vmem:[%s12686_s4 + $0x160] sm:$0xff]  ;;  %v1562_v26 = vld [vmem:[%s12686_s4 + $0x1d8] sm:$0xff] }
  0x28   :  { %6082 = vmatprep.subr.mxu0 %v1565_v11  ;;  %v1546_v29 = vld [vmem:[%s12686_s4 + $0x158] sm:$0xff]  ;;  %v1561_v32 = vld [vmem:[%s12686_s4 + $0x1d0] sm:$0xff] }
  0x29   :  { %6083 = vmatpush3.msra.mxu0 %v1549_v13  ;;  %v1545_v36 = vld [vmem:[%s12686_s4 + $0x150] sm:$0xff] }
  0x2a   :  { %176 = vmatmul.mubr.f32.gmra.mxu0 %v34_v37  ;;  %6084 = vmatprep.subr.mxu0 %v1564_v15  ;;  %v1557_v2 = vld [vmem:[%s12686_s4 + $0x1b0] sm:$0xff]  ;;  %v1556_v15 = vld [vmem:[%s12686_s4 + $0x1a8] sm:$0xff] }
  0x2b   :  { %180 = vmatprep.mubr.f32.mxu0 %v37_v38  ;;  %6085 = vmatpush3.msra.mxu0 %v1548_v18  ;;  %v1541_v10 = vld [vmem:[%s12686_s4 + $0x130] sm:$0xff] }
  0x2c   :  { %6086 = vmatprep.subr.mxu0 %v1563_v21  ;;  %v1540_v21 = vld [vmem:[%s12686_s4 + $0x128] sm:$0xff] }
  0x2d   :  { %6087 = vmatpush3.msra.mxu0 %v1547_v23 }
  0x2e   :  { %181 = vmatmul.mubr.f32.gmra.mxu0 %v36_v39  ;;  %6088 = vmatprep.subr.mxu0 %v1562_v26  ;;  %v1555_v26 = vld [vmem:[%s12686_s4 + $0x1a0] sm:$0xff] }
  0x2f   :  { %185 = vmatprep.mubr.f32.mxu0 %v39_v40  ;;  %6089 = vmatpush3.msra.mxu0 %v1546_v29  ;;  %v1560_v40 = vld [vmem:[%s12686_s4 + $0x1c8] sm:$0xff] }
  0x30   :  { %6090 = vmatprep.subr.mxu0 %v1561_v32  ;;  %v1539_v32 = vld [vmem:[%s12686_s4 + $0x120] sm:$0xff] }
  0x31   :  { %6091 = vmatpush3.msra.mxu0 %v1545_v36 }
  0x32   :  { %186 = vmatmul.mubr.f32.gmra.mxu0 %v38_v41  ;;  %6092 = vmatprep.subr.mxu0 %v1560_v40 }
  0x33   :  { %190 = vmatprep.mubr.f32.mxu0 %v41_v42  ;;  %v1544_v42 = vld [vmem:[%s12686_s4 + $0x148] sm:$0xff] }
  0x34   :  { %6093 = vmatpush3.msra.mxu0 %v1544_v42 }
  0x36   :  { %191 = vmatmul.mubr.f32.gmra.mxu0 %v40_v43 }
  0x37   :  { %195 = vmatprep.mubr.f32.mxu0 %v43_v44 }
  0x3a   :  { %196 = vmatmul.mubr.f32.gmra.mxu0 %v42_v45 }
  0x3b   :  { %200 = vmatprep.mubr.f32.mxu0 %v45_v46  ;;  %v1559_v46 = vld [vmem:[%s12686_s4 + $0x1c0] sm:$0xff] }
  0x3c   :  { %6094 = vmatprep.subr.mxu0 %v1559_v46  ;;  %v7970_v46 = vadd.s32 56, %v7760_v8 }
  0x3e   :  { %201 = vmatmul.mubr.f32.gmra.mxu0 %v44_v47 }
  0x3f   :  { %205 = vmatprep.mubr.f32.mxu0 %v47_v48 }
  0x42   :  { %206 = vmatmul.mubr.f32.gmra.mxu0 %v46_v49  ;;  %v7830_v49 = vadd.s32 24, %v7760_v8 }
  0x43   :  { %210 = vmatprep.mubr.f32.mxu0 %v49_v50  ;;  %v505_v50 = vand.u32 7, %v7807_v35 }
  0x45   :  { %vm7856_vm3 = vcmp.eq.s32.totalorder %v505_v50, 0 }
  0x46   :  { %211 = vmatmul.mubr.f32.gmra.mxu0 %v48_v51 }
  0x47   :  { %215 = vmatprep.mubr.f32.mxu0 %v51_v52  ;;  %v1543_v52 = vld [vmem:[%s12686_s4 + $0x140] sm:$0xff] }
  0x48   :  { %6095 = vmatpush3.msra.mxu0 %v1543_v52 }
  0x4a   :  { %216 = vmatmul.mubr.f32.gmra.mxu0 %v50_v53 }
  0x4b   :  { %220 = vmatprep.mubr.f32.mxu0 %v53_v54 }
  0x4e   :  { %221 = vmatmul.mubr.f32.gmra.mxu0 %v52_v55 }
  0x4f   :  { %225 = vmatprep.mubr.f32.mxu0 %v55_v56 }
  0x52   :  { %226 = vmatmul.mubr.f32.gmra.mxu0 %v54_v57  ;;  %v1558_v57 = vld [vmem:[%s12686_s4 + $0x1b8] sm:$0xff] }
  0x53   :  { %230 = vmatprep.mubr.f32.mxu0 %v57_v58  ;;  %6096 = vmatprep.subr.mxu0 %v1558_v57 }
  0x56   :  { %231 = vmatmul.mubr.f32.gmra.mxu0 %v56_v59 }
  0x57   :  { %235 = vmatprep.mubr.f32.mxu0 %v59_v60  ;;  %v7842_v60 = vadd.s32 32, %v7760_v8 }
  0x59   :  { %v519_v18 = vand.u32 7, %v7842_v60 }
  0x5a   :  { %236 = vmatmul.mubr.f32.gmra.mxu0 %v58_v61  ;;  %v1542_v61 = vld [vmem:[%s12686_s4 + $0x138] sm:$0xff] }
  0x5b   :  { %240 = vmatprep.mubr.f32.mxu0 %v61_v62  ;;  %6097 = vmatpush3.msra.mxu0 %v1542_v61  ;;  %vm7907_vm5 = vcmp.eq.s32.totalorder %v519_v18, 0 }
  0x5c   :  { %6098 = vmatprep.subr.mxu0 %v1557_v2 }
  0x5d   :  { %6099 = vmatpush3.msra.mxu0 %v1541_v10 }
  0x5e   :  { %241 = vmatmul.mubr.f32.gmra.mxu0 %v60_v63  ;;  %6100 = vmatprep.subr.mxu0 %v1556_v15 }
  0x5f   :  { %6101 = vmatpush3.msra.mxu0 %v1540_v21 }
  0x60   :  { %6102 = vmatprep.subr.mxu0 %v1555_v26 }
  0x61   :  { %6103 = vmatpush3.msra.mxu0 %v1539_v32 }
  0xe2   :  { %v5936_v1 = vpop.f32.mrf.mxu0 }
  0xe4   :  { %v5937_v4 = vpop.f32.mrf.mxu0 }
  0xe5   :  { %v5938_v5 = vadd.f32 %v5937_v4, %v5936_v1 }
  0xe6   :  { %v5939_v6 = vpop.f32.mrf.mxu0 }
  0xe7   :  { %v168_v7 = vadd.f32 %v5938_v5, %v7757_v3  ;;  %v512_v5 = vand.u32 7, %v7830_v49 }
  0xe8   :  { %v5940_v12 = vpop.f32.mrf.mxu0 }
  0xe9   :  { %v5941_v14 = vadd.f32 %v5940_v12, %v5939_v6  ;;  %v7777_v16 = vmax.f32 %v168_v7, 0.0  ;;  %vm7887_vm4 = vcmp.eq.s32.totalorder %v512_v5, 0 }
  0xea   :  { %v5942_v17 = vpop.f32.mrf.mxu0 }
  0xeb   :  { %v173_v19 = vadd.f32 %v5941_v14, %v7757_v3  ;;  %v743_v27 = vmax.f32 %v7777_v16, 0.0 }
  0xec   :  { %v5943_v22 = vpop.f32.mrf.mxu0 }
  0xed   :  { %v247_v24 = vmax.f32 %v173_v19, 0.0  ;;  %v5944_v25 = vadd.f32 %v5943_v22, %v5942_v17 }
  0xee   :  { %v5945_v28 = vpop.f32.mrf.mxu0 }
  0xef   :  { %v178_v30 = vadd.f32 %v5944_v25, %v7757_v3  ;;  %v7804_v33 = vmax.f32 %v743_v27, %v247_v24  ;;  %v744_v37 = vmax.f32 %v7777_v16, %v247_v24 }
  0xf0   :  { %v5946_v34 = vpop.f32.mrf.mxu0 }
  0xf1   :  { %v248_v38 = vmax.f32 %v178_v30, 0.0  ;;  %v5947_v39 = vadd.f32 %v5946_v34, %v5945_v28  ;;  %v775_v51 = vrot.slane %v7804_v33, 7  ;;  %v856_v59 = vrot.slane %v7804_v33, 1 }
  0xf2   :  { %v5948_v41 = vpop.f32.mrf.mxu0  ;;  %v7885_v28 = vadd.s32 40, %v7760_v8 }
  0xf3   :  { %v760_v43 = vmax.f32 %v744_v37, %v248_v38  ;;  %v183_v44 = vadd.f32 %v5947_v39, %v7757_v3  ;;  %v745_v47 = vmax.f32 %v247_v24, %v248_v38  ;;  %v1554_v39 = vld [vmem:[%s12686_s4 + $0x198] sm:$0xff] }
  0xf4   :  { %v5949_v48 = vpop.f32.mrf.mxu0  ;;  %v526_v52 = vand.u32 7, %v7885_v28  ;;  %6104 = vmatprep.subr.mxu0 %v1554_v39 }
  0xf5   :  { %v249_v53 = vmax.f32 %v183_v44, 0.0  ;;  %v5950_v54 = vadd.f32 %v5949_v48, %v5948_v41  ;;  %v776_v55 = vrot.slane %v760_v43, 7  ;;  %v857_v56 = vrot.slane %v760_v43, 1 }
  0xf6   :  { %v5951_v58 = vpop.f32.mrf.mxu0  ;;  %vm7930_vm6 = vcmp.eq.s32.totalorder %v526_v52, 0  ;;  %v7974_v52 = vadd.s32 64, %v7760_v8 }
  0xf7   :  { %v746_v62 = vmax.f32 %v248_v38, %v249_v53  ;;  %v761_v63 = vmax.f32 %v745_v47, %v249_v53  ;;  %v188_v0 = vadd.f32 %v5950_v54, %v7757_v3  ;;  %v806_v1 = vsel %vm12696_vm0, %v775_v51, %v776_v55 }
  0xf8   :  { %v5952_v4 = vpop.f32.mrf.mxu0  ;;  %v841_v7 = vsel %vm7822_vm2, 0.0, %v806_v1  ;;  %v7866_v9 = vsel %vm12695_vm1, %v856_v59, %v857_v56 }
  0xf9   :  { %v250_v11 = vmax.f32 %v188_v0, 0.0  ;;  %v5953_v12 = vadd.f32 %v5952_v4, %v5951_v58  ;;  %v777_v13 = vrot.slane %v761_v63, 7  ;;  %v858_v14 = vrot.slane %v761_v63, 1 }
  0xfa   :  { %v5954_v17 = vpop.f32.mrf.mxu0  ;;  %v890_v19 = vmax.f32 %v841_v7, %v760_v43  ;;  %v1538_v43 = vld [vmem:[%s12686_s4 + $0x118] sm:$0xff] }
  0xfb   :  { %v747_v22 = vmax.f32 %v249_v53, %v250_v11  ;;  %v762_v23 = vmax.f32 %v746_v62, %v250_v11  ;;  %v193_v24 = vadd.f32 %v5953_v12, %v7757_v3  ;;  %v805_v25 = vsel %vm12696_vm0, %v776_v55, %v777_v13  ;;  %6105 = vmatpush3.msra.mxu0 %v1538_v43 }
  0xfc   :  { %v5955_v27 = vpop.f32.mrf.mxu0  ;;  %v842_v30 = vsel %vm7856_vm3, 0.0, %v805_v25  ;;  %v886_v31 = vsel %vm12695_vm1, %v857_v56, %v858_v14  ;;  %v7967_v43 = vadd.s32 48, %v7760_v8 }
  0xfd   :  { %v251_v34 = vmax.f32 %v193_v24, 0.0  ;;  %v5956_v36 = vadd.f32 %v5955_v27, %v5954_v17  ;;  %v778_v37 = vrot.slane %v762_v23, 7  ;;  %v859_v38 = vrot.slane %v762_v23, 1 }
  0xfe   :  { %v5957_v40 = vpop.f32.mrf.mxu0  ;;  %v891_v41 = vmax.f32 %v842_v30, %v761_v63  ;;  %v7901_v42 = vmax.f32 %v890_v19, %v886_v31 }
  0xff   :  { %v763_v44 = vmax.f32 %v747_v22, %v251_v34  ;;  %v198_v45 = vadd.f32 %v5956_v36, %v7757_v3  ;;  %v804_v47 = vsel %vm12696_vm0, %v777_v13, %v778_v37  ;;  %v748_v48 = vmax.f32 %v250_v11, %v251_v34 }
 0x100   :  { %v5958_v50 = vpop.f32.mrf.mxu0  ;;  %v843_v53 = vsel %vm7887_vm4, 0.0, %v804_v47  ;;  %v885_v54 = vsel %vm12695_vm1, %v858_v14, %v859_v38  ;;  %vm12692_vm4 = vcmp.lt.s32.totalorder %v7760_v8, 6 }
 0x101   :  { %v7918_v55 = vmax.f32 %v198_v45, 0.0  ;;  %v5959_v56 = vadd.f32 %v5958_v50, %v5957_v40  ;;  %v779_v57 = vrot.slane %v763_v44, 7  ;;  %v860_v58 = vrot.slane %v763_v44, 1 }
 0x102   :  { %v5960_v61 = vpop.f32.mrf.mxu0  ;;  %v892_v62 = vmax.f32 %v843_v53, %v762_v23  ;;  %v7920_v63 = vmax.f32 %v891_v41, %v885_v54 }
 0x103   :  { %v7923_v0 = vmax.f32 %v748_v48, %v7918_v55  ;;  %v7926_v1 = vadd.f32 %v5959_v56, %v7757_v3  ;;  %v803_v2 = vsel %vm12696_vm0, %v778_v37, %v779_v57  ;;  %v884_v7 = vsel %vm12695_vm1, %v859_v38, %v860_v58 }
 0x104   :  { %v5961_v4 = vpop.f32.mrf.mxu0  ;;  %v844_v6 = vsel %vm7907_vm5, 0.0, %v803_v2  ;;  %v749_v11 = vmax.f32 %v251_v34, %v7918_v55  ;;  %v7942_v17 = vmax.f32 %v892_v62, %v884_v7  ;;  %v533_v62 = vand.u32 7, %v7967_v43 }
 0x105   :  { %v253_v10 = vmax.f32 %v7926_v1, 0.0  ;;  %v780_v12 = vrot.slane %v7923_v0, 7  ;;  %v861_v13 = vrot.slane %v7923_v0, 1  ;;  %v893_v15 = vmax.f32 %v844_v6, %v763_v44 }
 0x106   :  { %v5963_v14 = vpop.f32.mrf.mxu0  ;;  %v5962_v56 = vadd.f32 %v5961_v4, %v5960_v61  ;;  %v540_v7 = vand.u32 7, %v7970_v46  ;;  %v547_v61 = vand.u32 7, %v7974_v52  ;;  %vm8143_vm3 = vcmp.eq.s32.totalorder %v533_v62, 0 }
 0x107   :  { %v7946_v18 = vmax.f32 %v749_v11, %v253_v10  ;;  %v802_v19 = vsel %vm12696_vm0, %v779_v57, %v780_v12  ;;  %v883_v23 = vsel %vm12695_vm1, %v860_v58, %v861_v13  ;;  %v7979_v58 = vadd.s32 80, %v7760_v8 }
 0x108   :  { %v5964_v21 = vpop.f32.mrf.mxu0  ;;  %v845_v22 = vsel %vm7930_vm6, 0.0, %v802_v19  ;;  %v7958_v27 = vmax.f32 %v893_v15, %v883_v23  ;;  %v7986_v15 = vadd.s32 88, %v7760_v8  ;;  %v208_v23 = vadd.f32 %v5962_v56, %v7757_v3 }
 0x109   :  { %v12691_v24 = vrot.slane %v7946_v18, 1  ;;  %v894_v26 = vmax.f32 %v845_v22, %v7923_v0  ;;  %v5965_v47 = vadd.f32 %v5964_v21, %v5963_v14  ;;  %v275_v21 = vadd.s32 96, %v7760_v8 }
 0x10a   :  { %v5966_v25 = vpop.f32.mrf.mxu0  ;;  %v7992_v22 = vadd.s32 72, %v7760_v8  ;;  %vm8113_vm15 = vcmp.eq.s32.totalorder %v547_v61, 0  ;;  %vm8129_vm2 = vcmp.eq.s32.totalorder %v540_v7, 0  ;;  %v1523_v7 = vld [vmem:[%s12686_s4 + $0xa0] sm:$0xff] }
 0x10b   :  { %v882_v30 = vsel %vm12695_vm1, %v861_v13, %v12691_v24  ;;  %v213_v11 = vadd.f32 %v5965_v47, %v7757_v3 }
 0x10c   :  { %v5967_v29 = vpop.f32.mrf.mxu0  ;;  %v7964_v32 = vmax.f32 %v894_v26, %v882_v30  ;;  %v277_v26 = vadd.s32 112, %v7760_v8  ;;  %v561_v30 = vand.u32 7, %v7979_v58 }
 0x10d   :  { %v5968_v44 = vadd.f32 %v5967_v29, %v5966_v25  ;;  %v276_v29 = vadd.s32 104, %v7760_v8 }
 0x10e   :  { %v5969_v31 = vpop.f32.mrf.mxu0  ;;  %vm8033_vm11 = vcmp.eq.s32.totalorder %v561_v30, 0 }
 0x10f   :  { %v218_v2 = vadd.f32 %v5968_v44, %v7757_v3  ;;  %v582_v56 = vand.u32 7, %v276_v29 }
 0x110   :  { %v5970_v34 = vpop.f32.mrf.mxu0 }
 0x111   :  { %v5971_v40 = vadd.f32 %v5970_v34, %v5969_v31  ;;  %v256_v31 = vmax.f32 %v218_v2, 0.0  ;;  %vm8020_vm9 = vcmp.eq.s32.totalorder %v582_v56, 0 }
 0x112   :  { %v5972_v36 = vpop.f32.mrf.mxu0 }
 0x113   :  { %v223_v53 = vadd.f32 %v5971_v40, %v7757_v3  ;;  %v278_v40 = vadd.s32 120, %v7760_v8 }
 0x114   :  { %v5973_v37 = vpop.f32.mrf.mxu0 }
 0x115   :  { %v5974_v38 = vadd.f32 %v5973_v37, %v5972_v36  ;;  %v257_v4 = vmax.f32 %v223_v53, 0.0 }
 0x116   :  { %v5975_v39 = vpop.f32.mrf.mxu0 }
 0x117   :  { %v228_v48 = vadd.f32 %v5974_v38, %v7757_v3  ;;  %v255_v38 = vmax.f32 %v213_v11, 0.0  ;;  %v754_v44 = vmax.f32 %v256_v31, %v257_v4 }
 0x118   :  { %v5976_v41 = vpop.f32.mrf.mxu0 }
 0x119   :  { %v5977_v45 = vadd.f32 %v5976_v41, %v5975_v39  ;;  %v258_v13 = vmax.f32 %v228_v48, 0.0  ;;  %v568_v41 = vand.u32 7, %v7986_v15  ;;  %v575_v48 = vand.u32 7, %v275_v21 }
 0x11a   :  { %v5978_v50 = vpop.f32.mrf.mxu0 }
 0x11b   :  { %v233_v54 = vadd.f32 %v5977_v45, %v7757_v3  ;;  %v755_v39 = vmax.f32 %v257_v4, %v258_v13  ;;  %v8005_v2 = vmax.f32 %v754_v44, %v258_v13  ;;  %vm8012_vm7 = vcmp.eq.s32.totalorder %v568_v41, 0 }
 0x11c   :  { %v5979_v57 = vpop.f32.mrf.mxu0  ;;  %vm8025_vm10 = vcmp.eq.s32.totalorder %v575_v48, 0  ;;  %v750_v44 = vmax.f32 %v7918_v55, %v253_v10 }
 0x11d   :  { %v259_v5 = vmax.f32 %v233_v54, 0.0  ;;  %v5980_v6 = vadd.f32 %v5979_v57, %v5978_v50  ;;  %v254_v50 = vmax.f32 %v208_v23, 0.0  ;;  %v589_v54 = vand.u32 7, %v277_v26 }
 0x11e   :  { %v5981_v14 = vpop.f32.mrf.mxu0  ;;  %v753_v57 = vmax.f32 %v255_v38, %v256_v31 }
 0x11f   :  { %v238_v19 = vadd.f32 %v5980_v6, %v7757_v3  ;;  %v756_v34 = vmax.f32 %v258_v13, %v259_v5  ;;  %v8003_v53 = vmax.f32 %v755_v39, %v259_v5  ;;  %vm8016_vm8 = vcmp.eq.s32.totalorder %v589_v54, 0 }
 0x120   :  { %v5982_v25 = vpop.f32.mrf.mxu0  ;;  %v8009_v24 = vmax.f32 %v753_v57, %v257_v4  ;;  %v8057_v10 = vmax.f32 %v750_v44, %v254_v50 }
 0x121   :  { %v260_v36 = vmax.f32 %v238_v19, 0.0  ;;  %v5983_v37 = vadd.f32 %v5982_v25, %v5981_v14  ;;  %v752_v14 = vmax.f32 %v254_v50, %v255_v38  ;;  %v596_v19 = vand.u32 7, %v278_v40 }
 0x122   :  { %v554_v25 = vand.u32 7, %v7992_v22  ;;  %v787_v29 = vrot.slane %v8003_v53, 7  ;;  %v786_v40 = vrot.slane %v8005_v2, 7  ;;  %v785_v1 = vrot.slane %v8009_v24, 7 }
 0x123   :  { %v8000_v45 = vmax.f32 %v756_v34, %v260_v36  ;;  %v243_v47 = vadd.f32 %v5983_v37, %v7757_v3  ;;  %v757_v11 = vmax.f32 %v259_v5, %v260_v36  ;;  %v491_v34 = vand.u32 7, %v7760_v8 }
 0x124   :  { %vm8040_vm12 = vcmp.eq.s32.totalorder %v596_v19, 0  ;;  %vm8053_vm14 = vcmp.eq.s32.totalorder %v554_v25, 0  ;;  %v796_v19 = vsel %vm12696_vm0, %v785_v1, %v786_v40 }
 0x125   :  { %v261_v6 = vmax.f32 %v243_v47, 0.0  ;;  %v788_v23 = vrot.slane %v8000_v45, 7  ;;  %v751_v47 = vmax.f32 %v254_v50, 0.0  ;;  %vm8044_vm13 = vcmp.eq.s32.totalorder %v491_v34, 0 }
 0x126   :  { %v869_v44 = vrot.slane %v8000_v45, 1 }
 0x127   :  { %v758_v3 = vmax.f32 %v260_v36, %v261_v6  ;;  %v773_v21 = vmax.f32 %v757_v11, %v261_v6  ;;  %v8029_v36 = vmax.f32 %v752_v14, %v256_v31  ;;  %v794_v54 = vsel %vm12696_vm0, %v787_v29, %v788_v23 }
 0x128   :  { %v795_v6 = vsel %vm12696_vm0, %v786_v40, %v787_v29  ;;  %v8063_v11 = vmax.f32 %v751_v47, %v255_v38  ;;  %v851_v31 = vsel %vm8012_vm7, 0.0, %v796_v19  ;;  %v866_v19 = vrot.slane %v8009_v24, 1 }
 0x129   :  { %v774_v37 = vmax.f32 %v758_v3, %v7777_v16  ;;  %v789_v39 = vrot.slane %v773_v21, 7  ;;  %v784_v25 = vrot.slane %v8029_v36, 7  ;;  %v870_v34 = vrot.slane %v773_v21, 1 }
 0x12a   :  { %v853_v3 = vsel %vm8020_vm9, 0.0, %v794_v54  ;;  %v852_v29 = vsel %vm8025_vm10, 0.0, %v795_v6  ;;  %v783_v47 = vrot.slane %v8063_v11, 7  ;;  %v782_v54 = vrot.slane %v8057_v10, 7 }
 0x12b   :  { %v790_v16 = vrot.slane %v774_v37, 7  ;;  %v793_v30 = vsel %vm12696_vm0, %v788_v23, %v789_v39  ;;  %v871_v56 = vrot.slane %v774_v37, 1  ;;  %v797_v4 = vsel %vm12696_vm0, %v784_v25, %v785_v1 }
 0x12c   :  { %v854_v57 = vsel %vm8016_vm8, 0.0, %v793_v30  ;;  %v874_v48 = vsel %vm12695_vm1, %v869_v44, %v870_v34  ;;  %v798_v30 = vsel %vm12696_vm0, %v783_v47, %v784_v25  ;;  %v850_v26 = vsel %vm8033_vm11, 0.0, %v797_v4 }
 0x12d   :  { %v792_v14 = vsel %vm12696_vm0, %v789_v39, %v790_v16  ;;  %v807_v38 = vsel %vm12696_vm0, %v790_v16, %v775_v51  ;;  %v903_v13 = vmax.f32 %v854_v57, %v773_v21  ;;  %v888_v40 = vsel %vm12695_vm1, %v871_v56, %v856_v59 }
 0x12e   :  { %v855_v50 = vsel %vm8040_vm12, 0.0, %v792_v14  ;;  %v840_v39 = vsel %vm8044_vm13, 0.0, %v807_v38  ;;  %v873_v5 = vsel %vm12695_vm1, %v870_v34, %v871_v56  ;;  %v902_v21 = vmax.f32 %v853_v3, %v8000_v45 }
 0x12f   :  { %v904_v23 = vmax.f32 %v855_v50, %v774_v37  ;;  %v889_v51 = vmax.f32 %v840_v39, %v7804_v33  ;;  %v868_v59 = vrot.slane %v8003_v53, 1  ;;  %v919_v33 = vmax.f32 %v903_v13, %v873_v5 }
 0x130   :  { %v901_v45 = vmax.f32 %v852_v29, %v8003_v53  ;;  %v867_v56 = vrot.slane %v8005_v2, 1  ;;  %v781_v53 = vrot.slane %v7946_v18, 7  ;;  %v918_v57 = vmax.f32 %v902_v21, %v874_v48 }
 0x131   :  { %v920_v37 = vmax.f32 %v904_v23, %v888_v40  ;;  %v8100_v16 = vmax.f32 %v889_v51, %v7866_v9  ;;  %v875_v1 = vsel %vm12695_vm1, %v868_v59, %v869_v44  ;;  %v900_v6 = vmax.f32 %v851_v31, %v8005_v2  ;;  %v1532_v31 = vld [vmem:[%s12686_s4 + $0xe8] sm:$0xff]  ;;  %v1529_v9 = vld [vmem:[%s12686_s4 + $0xd0] sm:$0xff] }
 0x132   :  { %v799_v14 = vsel %vm12696_vm0, %v782_v54, %v783_v47  ;;  %v876_v41 = vsel %vm12695_vm1, %v867_v56, %v868_v59  ;;  %v849_v61 = vsel %vm8053_vm14, 0.0, %v798_v30  ;;  %v917_v25 = vmax.f32 %v901_v45, %v875_v1  ;;  %v1531_v45 = vld [vmem:[%s12686_s4 + $0xe0] sm:$0xff]  ;;  %v1530_v1 = vld [vmem:[%s12686_s4 + $0xd8] sm:$0xff]  ;;  %v931_v2 = vld [vmem:[%s12685_s3 + $0x50] sm:$0xff] }
 0x133   :  { %7212 = vmatprep.subr.mxu1 %v920_v37  ;;  %v899_v50 = vmax.f32 %v850_v26, %v8009_v24  ;;  %v800_v34 = vsel %vm12696_vm0, %v781_v53, %v782_v54  ;;  %v877_v3 = vsel %vm12695_vm1, %v866_v19, %v867_v56  ;;  %v865_v55 = vrot.slane %v8029_v36, 1  ;;  %v1515_v30 = vld [vmem:[%s12686_s4 + $0x60] sm:$0xff]  ;;  %v926_v54 = vld [vmem:[%s12685_s3 + $0x28] sm:$0xff]  ;;  %v927_v56 = vld [vmem:[%s12685_s3 + $0x30] sm:$0xff] }
 0x134   :  { %7213 = vmatpush3.msra.mxu1 %v920_v37  ;;  %v848_v38 = vsel %vm8113_vm15, 0.0, %v799_v14  ;;  %v916_v24 = vmax.f32 %v900_v6, %v876_v41  ;;  %v898_v23 = vmax.f32 %v849_v61, %v8029_v36  ;;  %v801_v13 = vsel %vm12696_vm0, %v780_v12, %v781_v53  ;;  %v1514_v26 = vld [vmem:[%s12686_s4 + $0x58] sm:$0xff]  ;;  %v1513_v53 = vld [vmem:[%s12686_s4 + $0x50] sm:$0xff]  ;;  %v1528_v6 = vld [vmem:[%s12686_s4 + $0xc8] sm:$0xff] }
 0x135   :  { %7214 = vmatprep.subr.mxu1 %v919_v33  ;;  %v878_v29 = vsel %vm12695_vm1, %v865_v55, %v866_v19  ;;  %v864_v39 = vrot.slane %v8063_v11, 1  ;;  %v847_v36 = vsel %vm8129_vm2, 0.0, %v800_v34  ;;  %v915_v40 = vmax.f32 %v899_v50, %v877_v3  ;;  %v929_v14 = vld [vmem:[%s12685_s3 + $0x40] sm:$0xff]  ;;  %v1512_v41 = vld [vmem:[%s12686_s4 + $0x48] sm:$0xff]  ;;  %v1526_v50 = vld [vmem:[%s12686_s4 + $0xb8] sm:$0xff] }
 0x136   :  { %7215 = vmatpush3.msra.mxu1 %v919_v33  ;;  %v897_v62 = vmax.f32 %v848_v38, %v8063_v11  ;;  %v863_v5 = vrot.slane %v8057_v10, 1  ;;  %v846_v12 = vsel %vm8143_vm3, 0.0, %v801_v13  ;;  %v914_v44 = vmax.f32 %v898_v23, %v878_v29  ;;  %v1516_v33 = vld [vmem:[%s12686_s4 + $0x68] sm:$0xff]  ;;  %v1527_v19 = vld [vmem:[%s12686_s4 + $0xc0] sm:$0xff]  ;;  %v1510_v34 = vld [vmem:[%s12686_s4 + $0x38] sm:$0xff] }
 0x137   :  { %7216 = vmatprep.subr.mxu1 %v918_v57  ;;  %v879_v0 = vsel %vm12695_vm1, %v864_v39, %v865_v55  ;;  %v896_v51 = vmax.f32 %v847_v36, %v8057_v10  ;;  %v895_v11 = vmax.f32 %v846_v12, %v7946_v18  ;;  %v12760_v4 = vrot.slane %v7946_v18, 1  ;;  %v922_v18 = vld [vmem:[%s12685_s3 + $0x8] sm:$0xff]  ;;  %v924_v10 = vld [vmem:[%s12685_s3 + $0x18] sm:$0xff]  ;;  %v1511_v61 = vld [vmem:[%s12686_s4 + $0x40] sm:$0xff] }
 0x138   :  { %7217 = vmatpush3.msra.mxu1 %v918_v57  ;;  %v880_v37 = vsel %vm12695_vm1, %v863_v5, %v864_v39  ;;  %v913_v21 = vmax.f32 %v897_v62, %v879_v0  ;;  %v928_v57 = vld [vmem:[%s12685_s3 + $0x38] sm:$0xff]  ;;  %v1525_v3 = vld [vmem:[%s12686_s4 + $0xb0] sm:$0xff]  ;;  %v1508_v23 = vld [vmem:[%s12686_s4 + $0x28] sm:$0xff] }
 0x139   :  { %7218 = vmatprep.subr.mxu1 %v917_v25  ;;  %v881_v47 = vsel %vm12695_vm1, %v12760_v4, %v863_v5  ;;  %v912_v48 = vmax.f32 %v896_v51, %v880_v37  ;;  %v1509_v55 = vld [vmem:[%s12686_s4 + $0x30] sm:$0xff]  ;;  %v932_v38 = vld [vmem:[%s12685_s3 + $0x58] sm:$0xff]  ;;  %v1507_v13 = vld [vmem:[%s12686_s4 + $0x20] sm:$0xff] }
 0x13a   :  { %7219 = vmatpush3.msra.mxu1 %v917_v25  ;;  %v911_v59 = vmax.f32 %v895_v11, %v881_v47  ;;  %v930_v25 = vld [vmem:[%s12685_s3 + $0x48] sm:$0xff]  ;;  %v1522_v29 = vld [vmem:[%s12686_s4 + $0x98] sm:$0xff]  ;;  %v1521_v36 = vld [vmem:[%s12686_s4 + $0x90] sm:$0xff] }
 0x13b   :  { %7220 = vmatprep.subr.mxu1 %v916_v24  ;;  %v1506_v39 = vld [vmem:[%s12686_s4 + $0x18] sm:$0xff]  ;;  %v1505_v62 = vld [vmem:[%s12686_s4 + $0x10] sm:$0xff]  ;;  %v1520_v5 = vld [vmem:[%s12686_s4 + $0x88] sm:$0xff] }
 0x13c   :  { %7221 = vmatpush3.msra.mxu1 %v916_v24  ;;  %v1524_v24 = vld [vmem:[%s12686_s4 + $0xa8] sm:$0xff]  ;;  %v1537_v0 = vld [vmem:[%s12686_s4 + $0x110] sm:$0xff]  ;;  %v1519_v37 = vld [vmem:[%s12686_s4 + $0x80] sm:$0xff] }
 0x13d   :  { %7222 = vmatprep.subr.mxu1 %v915_v40  ;;  %v1552_v12 = vld [vmem:[%s12686_s4 + $0x188] sm:$0xff]  ;;  %v1503_v11 = vld [vmem:[%s12686_s4] sm:$0xff]  ;;  %v1598_v47 = vld [vmem:[%s12686_s4 + $0x2f8] sm:$0xff] }
 0x13e   :  { %7223 = vmatpush3.msra.mxu1 %v915_v40  ;;  %v1553_v40 = vld [vmem:[%s12686_s4 + $0x190] sm:$0xff]  ;;  %v1536_v51 = vld [vmem:[%s12686_s4 + $0x108] sm:$0xff]  ;;  %v1535_v4 = vld [vmem:[%s12686_s4 + $0x100] sm:$0xff] }
 0x13f   :  { %7224 = vmatprep.subr.mxu1 %v914_v44  ;;  %6106 = vmatprep.subr.mxu0 %v1553_v40 }
 0x140   :  { %7225 = vmatpush3.msra.mxu1 %v914_v44  ;;  %6107 = vmatpush3.msra.mxu0 %v1537_v0  ;;  %v1504_v44 = vld [vmem:[%s12686_s4 + $0x8] sm:$0xff]  ;;  %v1629_v0 = vld [vmem:[%s12686_s4 + $0x3f0] sm:$0xff] }
 0x141   :  { %7226 = vmatprep.subr.mxu1 %v913_v21  ;;  %6108 = vmatprep.subr.mxu0 %v1552_v12 }
 0x142   :  { %7227 = vmatpush3.msra.mxu1 %v913_v21  ;;  %v1551_v21 = vld [vmem:[%s12686_s4 + $0x180] sm:$0xff]  ;;  %6109 = vmatpush3.msra.mxu0 %v1536_v51  ;;  %v1613_v51 = vld [vmem:[%s12686_s4 + $0x370] sm:$0xff] }
 0x143   :  { %7228 = vmatprep.subr.mxu1 %v912_v48  ;;  %6110 = vmatprep.subr.mxu0 %v1551_v21 }
 0x144   :  { %7229 = vmatpush3.msra.mxu1 %v912_v48  ;;  %6111 = vmatpush3.msra.mxu0 %v1535_v4  ;;  %v1630_v48 = vld [vmem:[%s12686_s4 + $0x3f8] sm:$0xff]  ;;  %v1591_v4 = vld [vmem:[%s12686_s4 + $0x2c0] sm:$0xff] }
 0x145   :  { %7230 = vmatprep.subr.mxu1 %v911_v59  ;;  %6216 = vmatprep.subr.mxu0 %v1630_v48  ;;  %v1575_v48 = vld [vmem:[%s12686_s4 + $0x240] sm:$0xff] }
 0x146   :  { %7231 = vmatpush3.msra.mxu1 %v911_v59 }
 0x147   :  { %7232 = vmatprep.subr.mxu1 %v7964_v32 }
 0x148   :  { %7233 = vmatpush3.msra.mxu1 %v7964_v32  ;;  %v1517_v32 = vld [vmem:[%s12686_s4 + $0x70] sm:$0xff] }
 0x149   :  { %7234 = vmatprep.subr.mxu1 %v7958_v27 }
 0x14a   :  { %7235 = vmatpush3.msra.mxu1 %v7958_v27  ;;  %v1534_v27 = vld [vmem:[%s12686_s4 + $0xf8] sm:$0xff] }
 0x14b   :  { %7236 = vmatprep.subr.mxu1 %v7942_v17 }
 0x14c   :  { %7237 = vmatpush3.msra.mxu1 %v7942_v17  ;;  %v923_v17 = vld [vmem:[%s12685_s3 + $0x10] sm:$0xff] }
 0x14d   :  { %7238 = vmatprep.subr.mxu1 %v7920_v63 }
 0x14e   :  { %7239 = vmatpush3.msra.mxu1 %v7920_v63  ;;  %v1518_v63 = vld [vmem:[%s12686_s4 + $0x78] sm:$0xff] }
 0x14f   :  { %7240 = vmatprep.subr.mxu1 %v7901_v42 }
 0x150   :  { %7241 = vmatpush3.msra.mxu1 %v7901_v42  ;;  %v1533_v42 = vld [vmem:[%s12686_s4 + $0xf0] sm:$0xff] }
 0x151   :  { %7242 = vmatprep.subr.mxu1 %v8100_v16 }
 0x152   :  { %7243 = vmatpush3.msra.mxu1 %v8100_v16  ;;  %v925_v16 = vld [vmem:[%s12685_s3 + $0x20] sm:$0xff] }
 0x153   :  { %7245 = vmatmul.mubr.f32.vlgmr.msra.gmra.mxu1 %v922_v18  ;;  %6012 = vmatprep.subr.mxu1 %v1534_v27 }
 0x154   :  { %7247 = vmatprep.mubr.f32.mxu1 %v923_v17  ;;  %6013 = vmatpush3.msra.mxu1 %v1518_v63 }
 0x155   :  { %6014 = vmatprep.subr.mxu1 %v1533_v42 }
 0x156   :  { %6015 = vmatpush3.msra.mxu1 %v1517_v32 }
 0x157   :  { %7248 = vmatmul.mubr.f32.gmra.mxu1 %v924_v10  ;;  %6016 = vmatprep.subr.mxu1 %v1532_v31 }
 0x158   :  { %7250 = vmatprep.mubr.f32.mxu1 %v925_v16  ;;  %6017 = vmatpush3.msra.mxu1 %v1516_v33  ;;  %v1582_v16 = vld [vmem:[%s12686_s4 + $0x278] sm:$0xff] }
 0x159   :  { %6018 = vmatprep.subr.mxu1 %v1531_v45  ;;  %v1614_v33 = vld [vmem:[%s12686_s4 + $0x378] sm:$0xff] }
 0x15a   :  { %6019 = vmatpush3.msra.mxu1 %v1515_v30  ;;  %v1597_v30 = vld [vmem:[%s12686_s4 + $0x2f0] sm:$0xff] }
 0x15b   :  { %7251 = vmatmul.mubr.f32.gmra.mxu1 %v926_v54  ;;  %6020 = vmatprep.subr.mxu1 %v1530_v1 }
 0x15c   :  { %7253 = vmatprep.mubr.f32.mxu1 %v927_v56  ;;  %6021 = vmatpush3.msra.mxu1 %v1514_v26  ;;  %v1581_v26 = vld [vmem:[%s12686_s4 + $0x270] sm:$0xff] }
 0x15d   :  { %6022 = vmatprep.subr.mxu1 %v1529_v9 }
 0x15e   :  { %6023 = vmatpush3.msra.mxu1 %v1513_v53 }
 0x15f   :  { %7254 = vmatmul.mubr.f32.gmra.mxu1 %v928_v57  ;;  %6024 = vmatprep.subr.mxu1 %v1528_v6  ;;  %v1596_v57 = vld [vmem:[%s12686_s4 + $0x2e8] sm:$0xff] }
 0x160   :  { %7256 = vmatprep.mubr.f32.mxu1 %v929_v14  ;;  %6025 = vmatpush3.msra.mxu1 %v1512_v41  ;;  %v1580_v41 = vld [vmem:[%s12686_s4 + $0x268] sm:$0xff] }
 0x161   :  { %6026 = vmatprep.subr.mxu1 %v1527_v19 }
 0x162   :  { %6027 = vmatpush3.msra.mxu1 %v1511_v61  ;;  %v1595_v61 = vld [vmem:[%s12686_s4 + $0x2e0] sm:$0xff] }
 0x163   :  { %7257 = vmatmul.mubr.f32.gmra.mxu1 %v930_v25  ;;  %6028 = vmatprep.subr.mxu1 %v1526_v50 }
 0x164   :  { %7259 = vmatprep.mubr.f32.mxu1 %v931_v2  ;;  %6029 = vmatpush3.msra.mxu1 %v1510_v34  ;;  %v1579_v2 = vld [vmem:[%s12686_s4 + $0x260] sm:$0xff] }
 0x165   :  { %6030 = vmatprep.subr.mxu1 %v1525_v3 }
 0x166   :  { %6031 = vmatpush3.msra.mxu1 %v1509_v55 }
 0x167   :  { %7260 = vmatmul.mubr.f32.gmra.mxu1 %v932_v38  ;;  %6032 = vmatprep.subr.mxu1 %v1524_v24  ;;  %v1594_v38 = vld [vmem:[%s12686_s4 + $0x2d8] sm:$0xff] }
 0x168   :  { %6033 = vmatpush3.msra.mxu1 %v1508_v23  ;;  %v1578_v24 = vld [vmem:[%s12686_s4 + $0x258] sm:$0xff]  ;;  %v1593_v23 = vld [vmem:[%s12686_s4 + $0x2d0] sm:$0xff] }
 0x169   :  { %6034 = vmatprep.subr.mxu1 %v1523_v7 }
 0x16a   :  { %6035 = vmatpush3.msra.mxu1 %v1507_v13 }
 0x16b   :  { %6036 = vmatprep.subr.mxu1 %v1522_v29  ;;  %v1577_v29 = vld [vmem:[%s12686_s4 + $0x250] sm:$0xff] }
 0x16c   :  { %6037 = vmatpush3.msra.mxu1 %v1506_v39 }
 0x16d   :  { %6038 = vmatprep.subr.mxu1 %v1521_v36 }
 0x16e   :  { %6039 = vmatpush3.msra.mxu1 %v1505_v62  ;;  %v1592_v62 = vld [vmem:[%s12686_s4 + $0x2c8] sm:$0xff] }
 0x16f   :  { %6040 = vmatprep.subr.mxu1 %v1520_v5  ;;  %v1576_v5 = vld [vmem:[%s12686_s4 + $0x248] sm:$0xff] }
 0x170   :  { %6041 = vmatpush3.msra.mxu1 %v1504_v44 }
 0x171   :  { %6042 = vmatprep.subr.mxu1 %v1519_v37 }
 0x172   :  { %6043 = vmatpush3.msra.mxu1 %v1503_v11  ;;  %v1628_v11 = vld [vmem:[%s12686_s4 + $0x3e8] sm:$0xff] }
 0x173   :  { %6148 = vmatprep.subr.mxu1 %v1598_v47 }
 0x213   :  { %v8335_v59 = vpop.f32.mrf.mxu1 }
 0x214   :  { %1843 = vmatprep.mubr.f32.mxu0 %v8335_v59  ;;  %v1479_v27 = vrot.slane %v8335_v59, 2  ;;  %v1455_v63 = vrot.slane %v8335_v59, 1 }
 0x215   :  { %v8338_v18 = vpop.f32.mrf.mxu1 }
 0x216   :  { %v1454_v17 = vrot.slane %v8338_v18, 1  ;;  %v1478_v42 = vrot.slane %v8338_v18, 2 }
 0x217   :  { %v8345_v32 = vpop.f32.mrf.mxu1 }
 0x218   :  { %v8351_v10 = vsel %vm12695_vm1, %v1454_v17, %v1455_v63  ;;  %v8357_v31 = vsel %vm12692_vm4, %v1478_v42, %v1479_v27  ;;  %v1457_v14 = vrot.slane %v8345_v32, 1  ;;  %v1481_v19 = vrot.slane %v8345_v32, 2 }
 0x219   :  { %v8365_v45 = vpop.f32.mrf.mxu1  ;;  %1718 = vmatprep.mubr.f32.mxu1 %v8351_v10  ;;  %1844 = vmatmul.mubr.f32.vlgmr.msra.gmra.mxu0 %v8357_v31 }
 0x21a   :  { %1719 = vmatmul.mubr.f32.vlgmr.msra.gmra.mxu1 %v8338_v18  ;;  %1848 = vmatprep.mubr.f32.mxu0 %v8365_v45  ;;  %v1456_v54 = vrot.slane %v8365_v45, 1  ;;  %v1480_v1 = vrot.slane %v8365_v45, 2 }
 0x21b   :  { %6149 = vmatpush3.msra.mxu1 %v1582_v16  ;;  %v8376_v56 = vpop.f32.mrf.mxu1  ;;  %6217 = vmatpush3.msra.mxu0 %v1614_v33 }
 0x21c   :  { %6150 = vmatprep.subr.mxu1 %v1597_v30  ;;  %v8383_v9 = vsel %vm12695_vm1, %v1455_v63, %v1456_v54  ;;  %v8387_v53 = vsel %vm12692_vm4, %v1479_v27, %v1480_v1  ;;  %v8408_v25 = vsel %vm12695_vm1, %v1456_v54, %v1457_v14  ;;  %v8419_v3 = vsel %vm12692_vm4, %v1480_v1, %v1481_v19  ;;  %v1612_v63 = vld [vmem:[%s12686_s4 + $0x368] sm:$0xff]  ;;  %v1627_v30 = vld [vmem:[%s12686_s4 + $0x3e0] sm:$0xff] }
 0x21d   :  { %v8392_v6 = vpop.f32.mrf.mxu1  ;;  %1723 = vmatprep.mubr.f32.mxu1 %v8383_v9  ;;  %1849 = vmatmul.mubr.f32.gmra.mxu0 %v8387_v53  ;;  %v1459_v13 = vrot.slane %v8376_v56, 1  ;;  %v1483_v40 = vrot.slane %v8376_v56, 2  ;;  %v1611_v1 = vld [vmem:[%s12686_s4 + $0x360] sm:$0xff] }
 0x21e   :  { %6151 = vmatpush3.msra.mxu1 %v1581_v26  ;;  %1853 = vmatprep.mubr.f32.mxu0 %v8345_v32  ;;  %v1458_v50 = vrot.slane %v8392_v6, 1  ;;  %v1482_v55 = vrot.slane %v8392_v6, 2 }
 0x21f   :  { %1724 = vmatmul.mubr.f32.gmra.mxu1 %v8335_v59  ;;  %6152 = vmatprep.subr.mxu1 %v1596_v57  ;;  %v8414_v34 = vpop.f32.mrf.mxu1  ;;  %v1590_v57 = vld [vmem:[%s12686_s4 + $0x2b8] sm:$0xff] }
 0x220   :  { %1728 = vmatprep.mubr.f32.mxu1 %v8408_v25  ;;  %6153 = vmatpush3.msra.mxu1 %v1580_v41  ;;  %v8436_v7 = vsel %vm12695_vm1, %v1457_v14, %v1458_v50  ;;  %v8447_v36 = vsel %vm12692_vm4, %v1481_v19, %v1482_v55  ;;  %v8464_v12 = vsel %vm12695_vm1, %v1458_v50, %v1459_v13  ;;  %v1461_v16 = vrot.slane %v8414_v34, 1  ;;  %v1626_v41 = vld [vmem:[%s12686_s4 + $0x3d8] sm:$0xff] }
 0x221   :  { %1854 = vmatmul.mubr.f32.gmra.mxu0 %v8419_v3  ;;  %6154 = vmatprep.subr.mxu1 %v1595_v61  ;;  %v8442_v39 = vpop.f32.mrf.mxu1  ;;  %v8473_v37 = vsel %vm12692_vm4, %v1482_v55, %v1483_v40  ;;  %v1485_v54 = vrot.slane %v8414_v34, 2  ;;  %v1610_v50 = vld [vmem:[%s12686_s4 + $0x358] sm:$0xff]  ;;  %v1625_v55 = vld [vmem:[%s12686_s4 + $0x3d0] sm:$0xff] }
 0x222   :  { %1858 = vmatprep.mubr.f32.mxu0 %v8392_v6  ;;  %6155 = vmatpush3.msra.mxu1 %v1579_v2  ;;  %v1460_v44 = vrot.slane %v8442_v39, 1  ;;  %v1484_v21 = vrot.slane %v8442_v39, 2  ;;  %v1574_v2 = vld [vmem:[%s12686_s4 + $0x238] sm:$0xff] }
 0x223   :  { %1729 = vmatmul.mubr.f32.gmra.mxu1 %v8365_v45  ;;  %6156 = vmatprep.subr.mxu1 %v1594_v38  ;;  %v8483_v47 = vpop.f32.mrf.mxu1  ;;  %v1589_v38 = vld [vmem:[%s12686_s4 + $0x2b0] sm:$0xff] }
 0x224   :  { %1733 = vmatprep.mubr.f32.mxu1 %v8436_v7  ;;  %6157 = vmatpush3.msra.mxu1 %v1578_v24  ;;  %v8492_v27 = vsel %vm12695_vm1, %v1459_v13, %v1460_v44  ;;  %v8501_v33 = vsel %vm12692_vm4, %v1483_v40, %v1484_v21  ;;  %v8520_v14 = vsel %vm12695_vm1, %v1460_v44, %v1461_v16  ;;  %v1609_v13 = vld [vmem:[%s12686_s4 + $0x350] sm:$0xff]  ;;  %v1624_v40 = vld [vmem:[%s12686_s4 + $0x3c8] sm:$0xff] }
 0x225   :  { %1859 = vmatmul.mubr.f32.gmra.mxu0 %v8447_v36  ;;  %6158 = vmatprep.subr.mxu1 %v1593_v23  ;;  %v8511_v26 = vpop.f32.mrf.mxu1  ;;  %v8529_v61 = vsel %vm12692_vm4, %v1484_v21, %v1485_v54  ;;  %v1608_v44 = vld [vmem:[%s12686_s4 + $0x348] sm:$0xff] }
 0x226   :  { %1863 = vmatprep.mubr.f32.mxu0 %v8376_v56  ;;  %6159 = vmatpush3.msra.mxu1 %v1577_v29  ;;  %v1462_v19 = vrot.slane %v8511_v26, 1  ;;  %v1486_v24 = vrot.slane %v8511_v26, 2  ;;  %v1573_v29 = vld [vmem:[%s12686_s4 + $0x230] sm:$0xff]  ;;  %v1588_v21 = vld [vmem:[%s12686_s4 + $0x2a8] sm:$0xff] }
 0x227   :  { %1734 = vmatmul.mubr.f32.gmra.mxu1 %v8345_v32  ;;  %6160 = vmatprep.subr.mxu1 %v1592_v62  ;;  %v1463_v62 = vrot.slane %v8483_v47, 1 }
 0x228   :  { %1738 = vmatprep.mubr.f32.mxu1 %v8464_v12  ;;  %6218 = vmatprep.subr.mxu0 %v1629_v0  ;;  %v8549_v23 = vsel %vm12695_vm1, %v1461_v16, %v1462_v19  ;;  %v8562_v0 = vpop.f32.mrf.mxu1  ;;  %v1607_v16 = vld [vmem:[%s12686_s4 + $0x340] sm:$0xff] }
 0x229   :  { %1864 = vmatmul.mubr.f32.gmra.mxu0 %v8473_v37  ;;  %6161 = vmatpush3.msra.mxu1 %v1576_v5  ;;  %v8566_v5 = vsel %vm12692_vm4, %v1485_v54, %v1486_v24 }
 0x22a   :  { %1868 = vmatprep.mubr.f32.mxu0 %v8442_v39  ;;  %6219 = vmatpush3.msra.mxu0 %v1613_v51  ;;  %v8571_v51 = vpop.f32.mrf.mxu1 }
 0x22b   :  { %1739 = vmatmul.mubr.f32.gmra.mxu1 %v8392_v6  ;;  %6220 = vmatprep.subr.mxu0 %v1628_v11  ;;  %v1623_v11 = vld [vmem:[%s12686_s4 + $0x3c0] sm:$0xff]  ;;  %v1464_v54 = vrot.slane %v8571_v51, 1 }
 0x22c   :  { %1743 = vmatprep.mubr.f32.mxu1 %v8492_v27  ;;  %6162 = vmatprep.subr.mxu1 %v1591_v4  ;;  %v1487_v4 = vrot.slane %v8483_v47, 2 }
 0x22d   :  { %1869 = vmatmul.mubr.f32.gmra.mxu0 %v8501_v33  ;;  %6163 = vmatpush3.msra.mxu1 %v1575_v48  ;;  %v8585_v48 = vsel %vm12695_vm1, %v1462_v19, %v1463_v62  ;;  %v1488_v19 = vrot.slane %v8571_v51, 2 }
 0x22e   :  { %1873 = vmatprep.mubr.f32.mxu0 %v8414_v34  ;;  %6221 = vmatpush3.msra.mxu0 %v1612_v63  ;;  %v1572_v63 = vld [vmem:[%s12686_s4 + $0x228] sm:$0xff] }
 0x22f   :  { %1744 = vmatmul.mubr.f32.gmra.mxu1 %v8376_v56  ;;  %6222 = vmatprep.subr.mxu0 %v1627_v30  ;;  %v1622_v30 = vld [vmem:[%s12686_s4 + $0x3b8] sm:$0xff] }
 0x230   :  { %1748 = vmatprep.mubr.f32.mxu1 %v8520_v14  ;;  %6223 = vmatpush3.msra.mxu0 %v1611_v1  ;;  %v8600_v1 = vsel %vm12692_vm4, %v1486_v24, %v1487_v4  ;;  %v1586_v24 = vld [vmem:[%s12686_s4 + $0x298] sm:$0xff] }
 0x231   :  { %1874 = vmatmul.mubr.f32.gmra.mxu0 %v8529_v61  ;;  %6164 = vmatprep.subr.mxu1 %v1590_v57  ;;  %v1587_v57 = vld [vmem:[%s12686_s4 + $0x2a0] sm:$0xff] }
 0x232   :  { %6224 = vmatprep.subr.mxu0 %v1626_v41  ;;  %1878 = vmatprep.mubr.f32.mxu0 %v8511_v26  ;;  %v1606_v41 = vld [vmem:[%s12686_s4 + $0x338] sm:$0xff] }
 0x233   :  { %1749 = vmatmul.mubr.f32.gmra.mxu1 %v8442_v39  ;;  %6225 = vmatpush3.msra.mxu0 %v1610_v50  ;;  %v1571_v50 = vld [vmem:[%s12686_s4 + $0x220] sm:$0xff] }
 0x234   :  { %6165 = vmatpush3.msra.mxu1 %v1574_v2  ;;  %1753 = vmatprep.mubr.f32.mxu1 %v8549_v23  ;;  %v1621_v2 = vld [vmem:[%s12686_s4 + $0x3b0] sm:$0xff] }
 0x235   :  { %6226 = vmatprep.subr.mxu0 %v1625_v55  ;;  %6166 = vmatprep.subr.mxu1 %v1589_v38  ;;  %v8620_v55 = vsel %vm12695_vm1, %v1463_v62, %v1464_v54  ;;  %v1605_v38 = vld [vmem:[%s12686_s4 + $0x330] sm:$0xff]  ;;  %v1604_v62 = vld [vmem:[%s12686_s4 + $0x328] sm:$0xff] }
 0x236   :  { %6227 = vmatpush3.msra.mxu0 %v1609_v13  ;;  %6167 = vmatpush3.msra.mxu1 %v1573_v29  ;;  %v8631_v13 = vsel %vm12692_vm4, %v1487_v4, %v1488_v19  ;;  %v1620_v29 = vld [vmem:[%s12686_s4 + $0x3a8] sm:$0xff] }
 0x237   :  { %1879 = vmatmul.mubr.f32.gmra.mxu0 %v8566_v5  ;;  %6228 = vmatprep.subr.mxu0 %v1624_v40  ;;  %v1570_v40 = vld [vmem:[%s12686_s4 + $0x218] sm:$0xff] }
 0x238   :  { %1754 = vmatmul.mubr.f32.gmra.mxu1 %v8414_v34  ;;  %1883 = vmatprep.mubr.f32.mxu0 %v8483_v47 }
 0x239   :  { %6229 = vmatpush3.msra.mxu0 %v1608_v44  ;;  %1758 = vmatprep.mubr.f32.mxu1 %v8585_v48  ;;  %v1465_v44 = vrot.slane %v8562_v0, 1 }
 0x23a   :  { %6168 = vmatprep.subr.mxu1 %v1588_v21  ;;  %6230 = vmatprep.subr.mxu0 %v1623_v11  ;;  %v1619_v21 = vld [vmem:[%s12686_s4 + $0x3a0] sm:$0xff]  ;;  %v1585_v11 = vld [vmem:[%s12686_s4 + $0x290] sm:$0xff] }
 0x23b   :  { %6169 = vmatpush3.msra.mxu1 %v1572_v63  ;;  %6231 = vmatpush3.msra.mxu0 %v1607_v16  ;;  %v8654_v4 = vsel %vm12695_vm1, %v1464_v54, %v1465_v44  ;;  %v1603_v63 = vld [vmem:[%s12686_s4 + $0x320] sm:$0xff]  ;;  %v1569_v16 = vld [vmem:[%s12686_s4 + $0x210] sm:$0xff] }
 0x23c   :  { %1884 = vmatmul.mubr.f32.gmra.mxu0 %v8600_v1  ;;  %6232 = vmatprep.subr.mxu0 %v1622_v30  ;;  %v1489_v30 = vrot.slane %v8562_v0, 2 }
 0x23d   :  { %1759 = vmatmul.mubr.f32.gmra.mxu1 %v8511_v26  ;;  %1888 = vmatprep.mubr.f32.mxu0 %v8571_v51 }
 0x23e   :  { %6170 = vmatprep.subr.mxu1 %v1587_v57  ;;  %6233 = vmatpush3.msra.mxu0 %v1606_v41  ;;  %v1618_v57 = vld [vmem:[%s12686_s4 + $0x398] sm:$0xff]  ;;  %v8669_v54 = vsel %vm12692_vm4, %v1488_v19, %v1489_v30  ;;  %v8687_v19 = vsel %vm12695_vm1, %v1465_v44, %v1454_v17  ;;  %v1583_v17 = vld [vmem:[%s12686_s4 + $0x280] sm:$0xff] }
 0x23f   :  { %1763 = vmatprep.mubr.f32.mxu1 %v8620_v55  ;;  %6171 = vmatpush3.msra.mxu1 %v1571_v50  ;;  %v1602_v41 = vld [vmem:[%s12686_s4 + $0x318] sm:$0xff]  ;;  %v1584_v50 = vld [vmem:[%s12686_s4 + $0x288] sm:$0xff]  ;;  %v1567_v44 = vld [vmem:[%s12686_s4 + $0x200] sm:$0xff] }
 0x240   :  { %6234 = vmatprep.subr.mxu0 %v1621_v2  ;;  %1889 = vmatmul.mubr.f32.gmra.mxu0 %v8631_v13  ;;  %v1617_v2 = vld [vmem:[%s12686_s4 + $0x390] sm:$0xff] }
 0x241   :  { %6235 = vmatpush3.msra.mxu0 %v1605_v38  ;;  %6172 = vmatprep.subr.mxu1 %v1586_v24  ;;  %v1568_v38 = vld [vmem:[%s12686_s4 + $0x208] sm:$0xff]  ;;  %v1601_v24 = vld [vmem:[%s12686_s4 + $0x310] sm:$0xff] }
 0x242   :  { %6236 = vmatprep.subr.mxu0 %v1620_v29  ;;  %1764 = vmatmul.mubr.f32.gmra.mxu1 %v8483_v47  ;;  %v1616_v29 = vld [vmem:[%s12686_s4 + $0x388] sm:$0xff] }
 0x243   :  { %1893 = vmatprep.mubr.f32.mxu0 %v8562_v0  ;;  %6173 = vmatpush3.msra.mxu1 %v1570_v40  ;;  %v8706_v40 = vsel %vm12692_vm4, %v1489_v30, %v1478_v42  ;;  %v1646_v42 = vld [vmem:[%s12686_s4 + $0x478] sm:$0xff]  ;;  %v5491_v30 = vld [vmem:[%s12686_s4 + $0x548] sm:$0xff] }
 0x244   :  { %6237 = vmatpush3.msra.mxu0 %v1604_v62  ;;  %1768 = vmatprep.mubr.f32.mxu1 %v8654_v4  ;;  %v1600_v62 = vld [vmem:[%s12686_s4 + $0x308] sm:$0xff] }
 0x245   :  { %6238 = vmatprep.subr.mxu0 %v1619_v21  ;;  %6174 = vmatprep.subr.mxu1 %v1585_v11  ;;  %v1615_v21 = vld [vmem:[%s12686_s4 + $0x380] sm:$0xff] }
 0x246   :  { %6239 = vmatpush3.msra.mxu0 %v1603_v63  ;;  %6175 = vmatpush3.msra.mxu1 %v1569_v16  ;;  %v1599_v11 = vld [vmem:[%s12686_s4 + $0x300] sm:$0xff]  ;;  %v1645_v63 = vld [vmem:[%s12686_s4 + $0x470] sm:$0xff]  ;;  %v1644_v16 = vld [vmem:[%s12686_s4 + $0x468] sm:$0xff] }
 0x247   :  { %1894 = vmatmul.mubr.f32.gmra.mxu0 %v8669_v54  ;;  %6240 = vmatprep.subr.mxu0 %v1618_v57  ;;  %v5525_v57 = vld [vmem:[%s12686_s4 + $0x658] sm:$0xff] }
 0x248   :  { %1769 = vmatmul.mubr.f32.gmra.mxu1 %v8571_v51  ;;  %1898 = vmatprep.mubr.f32.mxu0 %v8338_v18 }
 0x249   :  { %6241 = vmatpush3.msra.mxu0 %v1602_v41  ;;  %1773 = vmatprep.mubr.f32.mxu1 %v8687_v19  ;;  %v5475_v41 = vld [vmem:[%s12686_s4 + $0x4c8] sm:$0xff] }
 0x24a   :  { %6176 = vmatprep.subr.mxu1 %v1584_v50  ;;  %6242 = vmatprep.subr.mxu0 %v1617_v2  ;;  %v5524_v50 = vld [vmem:[%s12686_s4 + $0x650] sm:$0xff] }
 0x24b   :  { %6177 = vmatpush3.msra.mxu1 %v1568_v38  ;;  %6243 = vmatpush3.msra.mxu0 %v1601_v24  ;;  %v5508_v2 = vld [vmem:[%s12686_s4 + $0x5d0] sm:$0xff]  ;;  %v5474_v38 = vld [vmem:[%s12686_s4 + $0x4c0] sm:$0xff]  ;;  %v5523_v24 = vld [vmem:[%s12686_s4 + $0x648] sm:$0xff] }
 0x24c   :  { %1899 = vmatmul.mubr.f32.gmra.mxu0 %v8706_v40  ;;  %6244 = vmatprep.subr.mxu0 %v1616_v29  ;;  %v5507_v29 = vld [vmem:[%s12686_s4 + $0x5c8] sm:$0xff] }
 0x24d   :  { %1774 = vmatmul.mubr.f32.gmra.mxu1 %v8562_v0  ;;  %6178 = vmatprep.subr.mxu1 %v1583_v17  ;;  %v5489_v17 = vld [vmem:[%s12686_s4 + $0x538] sm:$0xff] }
 0x24e   :  { %6245 = vmatpush3.msra.mxu0 %v1600_v62  ;;  %2093 = vmatprep.mubr.f32.mxu0 %v8408_v25  ;;  %v5506_v62 = vld [vmem:[%s12686_s4 + $0x5c0] sm:$0xff] }
 0x24f   :  { %6179 = vmatpush3.msra.mxu1 %v1567_v44  ;;  %1968 = vmatprep.mubr.f32.mxu1 %v8387_v53  ;;  %v5473_v44 = vld [vmem:[%s12686_s4 + $0x4b8] sm:$0xff] }
 0x250   :  { %6246 = vmatprep.subr.mxu0 %v1615_v21  ;;  %7262 = vmatprep.subr.mxu1 %v1646_v42  ;;  %v5521_v21 = vld [vmem:[%s12686_s4 + $0x638] sm:$0xff] }
 0x251   :  { %6247 = vmatpush3.msra.mxu0 %v1599_v11  ;;  %1969 = vmatmul.mubr.f32.vlgmr.msra.gmra.mxu1 %v8383_v9  ;;  %v5488_v11 = vld [vmem:[%s12686_s4 + $0x530] sm:$0xff] }
 0x252   :  { %2094 = vmatmul.mubr.f32.vlgmr.msra.gmra.mxu0 %v8365_v45  ;;  %7263 = vmatpush3.msra.mxu1 %v1646_v42  ;;  %v1643_v45 = vld [vmem:[%s12686_s4 + $0x460] sm:$0xff]  ;;  %v5505_v42 = vld [vmem:[%s12686_s4 + $0x5b8] sm:$0xff] }
 0x253   :  { %2098 = vmatprep.mubr.f32.mxu0 %v8436_v7  ;;  %1973 = vmatprep.mubr.f32.mxu1 %v8419_v3 }
 0x254   :  { %7264 = vmatprep.subr.mxu1 %v1645_v63 }
 0x255   :  { %7265 = vmatpush3.msra.mxu1 %v1645_v63  ;;  %v5472_v63 = vld [vmem:[%s12686_s4 + $0x4b0] sm:$0xff] }
 0x256   :  { %2099 = vmatmul.mubr.f32.gmra.mxu0 %v8345_v32  ;;  %1974 = vmatmul.mubr.f32.gmra.mxu1 %v8408_v25  ;;  %v1642_v32 = vld [vmem:[%s12686_s4 + $0x458] sm:$0xff]  ;;  %v1641_v25 = vld [vmem:[%s12686_s4 + $0x450] sm:$0xff] }
 0x257   :  { %2103 = vmatprep.mubr.f32.mxu0 %v8464_v12  ;;  %1978 = vmatprep.mubr.f32.mxu1 %v8447_v36 }
 0x258   :  { %7266 = vmatprep.subr.mxu1 %v1644_v16 }
 0x259   :  { %7267 = vmatpush3.msra.mxu1 %v1644_v16  ;;  %v5520_v16 = vld [vmem:[%s12686_s4 + $0x630] sm:$0xff] }
 0x25a   :  { %2104 = vmatmul.mubr.f32.gmra.mxu0 %v8392_v6  ;;  %1979 = vmatmul.mubr.f32.gmra.mxu1 %v8436_v7  ;;  %v1640_v6 = vld [vmem:[%s12686_s4 + $0x448] sm:$0xff]  ;;  %v1638_v7 = vld [vmem:[%s12686_s4 + $0x438] sm:$0xff] }
 0x25b   :  { %2108 = vmatprep.mubr.f32.mxu0 %v8492_v27  ;;  %7268 = vmatprep.subr.mxu1 %v1643_v45 }
 0x25c   :  { %1983 = vmatprep.mubr.f32.mxu1 %v8473_v37  ;;  %7269 = vmatpush3.msra.mxu1 %v1643_v45  ;;  %v5504_v45 = vld [vmem:[%s12686_s4 + $0x5b0] sm:$0xff] }
 0x25d   :  { %7270 = vmatprep.subr.mxu1 %v1642_v32 }
 0x25e   :  { %2109 = vmatmul.mubr.f32.gmra.mxu0 %v8376_v56  ;;  %1984 = vmatmul.mubr.f32.gmra.mxu1 %v8464_v12  ;;  %v1639_v56 = vld [vmem:[%s12686_s4 + $0x440] sm:$0xff] }
 0x25f   :  { %2113 = vmatprep.mubr.f32.mxu0 %v8520_v14  ;;  %7271 = vmatpush3.msra.mxu1 %v1642_v32  ;;  %v1635_v12 = vld [vmem:[%s12686_s4 + $0x420] sm:$0xff] }
 0x260   :  { %1988 = vmatprep.mubr.f32.mxu1 %v8501_v33  ;;  %7272 = vmatprep.subr.mxu1 %v1641_v25 }
 0x261   :  { %7273 = vmatpush3.msra.mxu1 %v1641_v25  ;;  %v5487_v25 = vld [vmem:[%s12686_s4 + $0x528] sm:$0xff] }
 0x262   :  { %2114 = vmatmul.mubr.f32.gmra.mxu0 %v8442_v39  ;;  %1989 = vmatmul.mubr.f32.gmra.mxu1 %v8492_v27  ;;  %v1637_v39 = vld [vmem:[%s12686_s4 + $0x430] sm:$0xff] }
 0x263   :  { %2118 = vmatprep.mubr.f32.mxu0 %v8549_v23  ;;  %1993 = vmatprep.mubr.f32.mxu1 %v8529_v61  ;;  %v1633_v27 = vld [vmem:[%s12686_s4 + $0x410] sm:$0xff] }
 0x264   :  { %7274 = vmatprep.subr.mxu1 %v1640_v6 }
 0x265   :  { %7275 = vmatpush3.msra.mxu1 %v1640_v6  ;;  %v5519_v6 = vld [vmem:[%s12686_s4 + $0x628] sm:$0xff] }
 0x266   :  { %2119 = vmatmul.mubr.f32.gmra.mxu0 %v8414_v34  ;;  %1994 = vmatmul.mubr.f32.gmra.mxu1 %v8520_v14  ;;  %v1636_v34 = vld [vmem:[%s12686_s4 + $0x428] sm:$0xff]  ;;  %v1631_v14 = vld [vmem:[%s12686_s4 + $0x400] sm:$0xff] }
 0x267   :  { %2123 = vmatprep.mubr.f32.mxu0 %v8585_v48  ;;  %7276 = vmatprep.subr.mxu1 %v1639_v56 }
 0x268   :  { %1998 = vmatprep.mubr.f32.mxu1 %v8566_v5  ;;  %7277 = vmatpush3.msra.mxu1 %v1639_v56 }
 0x269   :  { %7278 = vmatprep.subr.mxu1 %v1638_v7 }
 0x26a   :  { %2124 = vmatmul.mubr.f32.gmra.mxu0 %v8511_v26  ;;  %1999 = vmatmul.mubr.f32.gmra.mxu1 %v8549_v23  ;;  %v1632_v26 = vld [vmem:[%s12686_s4 + $0x408] sm:$0xff]  ;;  %v5528_v23 = vld [vmem:[%s12686_s4 + $0x670] sm:$0xff] }
 0x26b   :  { %2128 = vmatprep.mubr.f32.mxu0 %v8620_v55  ;;  %7279 = vmatpush3.msra.mxu1 %v1638_v7  ;;  %v5503_v7 = vld [vmem:[%s12686_s4 + $0x5a8] sm:$0xff] }
 0x26c   :  { %2003 = vmatprep.mubr.f32.mxu1 %v8600_v1  ;;  %7280 = vmatprep.subr.mxu1 %v1637_v39 }
 0x26d   :  { %7281 = vmatpush3.msra.mxu1 %v1637_v39 }
 0x26e   :  { %2129 = vmatmul.mubr.f32.gmra.mxu0 %v8483_v47  ;;  %2004 = vmatmul.mubr.f32.gmra.mxu1 %v8585_v48  ;;  %v1634_v47 = vld [vmem:[%s12686_s4 + $0x418] sm:$0xff]  ;;  %v5511_v48 = vld [vmem:[%s12686_s4 + $0x5e8] sm:$0xff] }
 0x26f   :  { %2133 = vmatprep.mubr.f32.mxu0 %v8654_v4  ;;  %2008 = vmatprep.mubr.f32.mxu1 %v8631_v13 }
 0x270   :  { %7282 = vmatprep.subr.mxu1 %v1636_v34 }
 0x271   :  { %7283 = vmatpush3.msra.mxu1 %v1636_v34  ;;  %v5471_v34 = vld [vmem:[%s12686_s4 + $0x4a8] sm:$0xff] }
 0x272   :  { %2134 = vmatmul.mubr.f32.gmra.mxu0 %v8571_v51  ;;  %2009 = vmatmul.mubr.f32.gmra.mxu1 %v8620_v55  ;;  %v5527_v51 = vld [vmem:[%s12686_s4 + $0x668] sm:$0xff]  ;;  %v5476_v55 = vld [vmem:[%s12686_s4 + $0x4d0] sm:$0xff] }
 0x273   :  { %2138 = vmatprep.mubr.f32.mxu0 %v8687_v19  ;;  %7284 = vmatprep.subr.mxu1 %v1635_v12 }
 0x274   :  { %2013 = vmatprep.mubr.f32.mxu1 %v8669_v54  ;;  %7285 = vmatpush3.msra.mxu1 %v1635_v12  ;;  %v5518_v12 = vld [vmem:[%s12686_s4 + $0x620] sm:$0xff] }
 0x275   :  { %7286 = vmatprep.subr.mxu1 %v1634_v47 }
 0x276   :  { %2139 = vmatmul.mubr.f32.gmra.mxu0 %v8562_v0  ;;  %2014 = vmatmul.mubr.f32.gmra.mxu1 %v8654_v4  ;;  %v5512_v0 = vld [vmem:[%s12686_s4 + $0x5f0] sm:$0xff]  ;;  %v5510_v4 = vld [vmem:[%s12686_s4 + $0x5e0] sm:$0xff] }
 0x277   :  { %2143 = vmatprep.mubr.f32.mxu0 %v8351_v10  ;;  %7287 = vmatpush3.msra.mxu1 %v1634_v47  ;;  %v8968_v47 = vld [vmem:[%s12687_s5] ss:$0 sm:$0xff] }
 0x278   :  { %2018 = vmatprep.mubr.f32.mxu1 %v8706_v40  ;;  %7288 = vmatprep.subr.mxu1 %v1633_v27 }
 0x279   :  { %7289 = vmatpush3.msra.mxu1 %v1633_v27 }
 0x27a   :  { %2144 = vmatmul.mubr.f32.gmra.mxu0 %v8338_v18  ;;  %2019 = vmatmul.mubr.f32.gmra.mxu1 %v8687_v19  ;;  %v5481_v18 = vld [vmem:[%s12686_s4 + $0x4f8] sm:$0xff]  ;;  %v5490_v19 = vld [vmem:[%s12686_s4 + $0x540] sm:$0xff] }
 0x27b   :  { %2148 = vmatprep.mubr.f32.mxu0 %v8383_v9  ;;  %2023 = vmatprep.mubr.f32.mxu1 %v8357_v31  ;;  %v5495_v9 = vld [vmem:[%s12686_s4 + $0x568] sm:$0xff] }
 0x27c   :  { %7290 = vmatprep.subr.mxu1 %v1632_v26 }
 0x27d   :  { %7291 = vmatpush3.msra.mxu1 %v1632_v26  ;;  %v5486_v26 = vld [vmem:[%s12686_s4 + $0x520] sm:$0xff] }
 0x27e   :  { %2149 = vmatmul.mubr.f32.gmra.mxu0 %v8335_v59  ;;  %2024 = vmatmul.mubr.f32.gmra.mxu1 %v8351_v10  ;;  %v5497_v59 = vld [vmem:[%s12686_s4 + $0x578] sm:$0xff]  ;;  %v5496_v10 = vld [vmem:[%s12686_s4 + $0x570] sm:$0xff] }
 0x27f   :  { %7292 = vmatprep.subr.mxu1 %v1631_v14  ;;  %7294 = vmatprep.mubr.f32.mxu1 %v8419_v3  ;;  %v5494_v3 = vld [vmem:[%s12686_s4 + $0x560] sm:$0xff] }
 0x280   :  { %7293 = vmatpush3.msra.mxu1 %v1631_v14  ;;  %6312 = vmatprep.subr.mxu0 %v5497_v59  ;;  %v5502_v14 = vld [vmem:[%s12686_s4 + $0x5a0] sm:$0xff] }
 0x281   :  { %6313 = vmatpush3.msra.mxu0 %v5481_v18 }
 0x282   :  { %7295 = vmatmul.mubr.f32.vlgmr.msra.gmra.mxu1 %v8447_v36  ;;  %6314 = vmatprep.subr.mxu0 %v5496_v10  ;;  %v5478_v36 = vld [vmem:[%s12686_s4 + $0x4e0] sm:$0xff] }
 0x283   :  { %7297 = vmatprep.mubr.f32.mxu1 %v8473_v37  ;;  %v5493_v37 = vld [vmem:[%s12686_s4 + $0x558] sm:$0xff]  ;;  %v5470_v10 = vld [vmem:[%s12686_s4 + $0x4a0] sm:$0xff] }
 0x286   :  { %7298 = vmatmul.mubr.f32.gmra.mxu1 %v8501_v33  ;;  %v5529_v33 = vld [vmem:[%s12686_s4 + $0x678] sm:$0xff] }
 0x287   :  { %7300 = vmatprep.mubr.f32.mxu1 %v8529_v61  ;;  %6380 = vmatprep.subr.mxu1 %v5529_v33  ;;  %v5513_v61 = vld [vmem:[%s12686_s4 + $0x5f8] sm:$0xff] }
 0x288   :  { %6381 = vmatpush3.msra.mxu1 %v5513_v61  ;;  %v5469_v61 = vld [vmem:[%s12686_s4 + $0x498] sm:$0xff] }
 0x289   :  { %6382 = vmatprep.subr.mxu1 %v5528_v23  ;;  %v5516_v23 = vld [vmem:[%s12686_s4 + $0x610] sm:$0xff] }
 0x28a   :  { %7301 = vmatmul.mubr.f32.gmra.mxu1 %v8566_v5  ;;  %v5477_v5 = vld [vmem:[%s12686_s4 + $0x4d8] sm:$0xff] }
 0x28b   :  { %7303 = vmatprep.mubr.f32.mxu1 %v8600_v1  ;;  %6383 = vmatpush3.msra.mxu1 %v5512_v0  ;;  %v5492_v1 = vld [vmem:[%s12686_s4 + $0x550] sm:$0xff] }
 0x28c   :  { %6384 = vmatprep.subr.mxu1 %v5527_v51  ;;  %v5484_v0 = vld [vmem:[%s12686_s4 + $0x510] sm:$0xff] }
 0x28d   :  { %6385 = vmatpush3.msra.mxu1 %v5511_v48  ;;  %v9002_v51 = vmul.u32.u64.low 2863311531, %v7784_v20  ;;  %v9003_v48 = vmul.u32.u64.high 2863311531, %v7784_v20, %v9002_v51 }
 0x28e   :  { %7304 = vmatmul.mubr.f32.gmra.mxu1 %v8631_v13  ;;  %v5526_v13 = vld [vmem:[%s12686_s4 + $0x660] sm:$0xff] }
 0x28f   :  { %7306 = vmatprep.mubr.f32.mxu1 %v8669_v54  ;;  %6386 = vmatprep.subr.mxu1 %v5526_v13  ;;  %v5509_v54 = vld [vmem:[%s12686_s4 + $0x5d8] sm:$0xff] }
 0x290   :  { %6387 = vmatpush3.msra.mxu1 %v5510_v4  ;;  %v5468_v4 = vld [vmem:[%s12686_s4 + $0x490] sm:$0xff] }
 0x291   :  { %6388 = vmatprep.subr.mxu1 %v5525_v57 }
 0x292   :  { %7307 = vmatmul.mubr.f32.gmra.mxu1 %v8706_v40  ;;  %v5522_v40 = vld [vmem:[%s12686_s4 + $0x640] sm:$0xff] }
 0x293   :  { %7309 = vmatprep.mubr.f32.mxu1 %v8357_v31  ;;  %v5480_v31 = vld [vmem:[%s12686_s4 + $0x4f0] sm:$0xff]  ;;  %6389 = vmatpush3.msra.mxu1 %v5509_v54  ;;  %v5467_v54 = vld [vmem:[%s12686_s4 + $0x488] sm:$0xff] }
 0x294   :  { %6315 = vmatpush3.msra.mxu0 %v5480_v31  ;;  %6390 = vmatprep.subr.mxu1 %v5524_v50  ;;  %v5517_v31 = vld [vmem:[%s12686_s4 + $0x618] sm:$0xff] }
 0x295   :  { %6316 = vmatprep.subr.mxu0 %v5495_v9  ;;  %6391 = vmatpush3.msra.mxu1 %v5508_v2  ;;  %v5485_v9 = vld [vmem:[%s12686_s4 + $0x518] sm:$0xff] }
 0x296   :  { %7310 = vmatmul.mubr.f32.gmra.mxu1 %v8387_v53  ;;  %v5479_v53 = vld [vmem:[%s12686_s4 + $0x4e8] sm:$0xff]  ;;  %6392 = vmatprep.subr.mxu1 %v5523_v24  ;;  %v5466_v24 = vld [vmem:[%s12686_s4 + $0x480] sm:$0xff] }
 0x297   :  { %6317 = vmatpush3.msra.mxu0 %v5479_v53  ;;  %6393 = vmatpush3.msra.mxu1 %v5507_v29  ;;  %v5501_v53 = vld [vmem:[%s12686_s4 + $0x598] sm:$0xff] }
 0x298   :  { %6318 = vmatprep.subr.mxu0 %v5494_v3  ;;  %6394 = vmatprep.subr.mxu1 %v5522_v40  ;;  %v5514_v40 = vld [vmem:[%s12686_s4 + $0x600] sm:$0xff] }
 0x299   :  { %6319 = vmatpush3.msra.mxu0 %v5478_v36  ;;  %6395 = vmatpush3.msra.mxu1 %v5506_v62  ;;  %v5498_v62 = vld [vmem:[%s12686_s4 + $0x580] sm:$0xff] }
 0x29a   :  { %6320 = vmatprep.subr.mxu0 %v5493_v37  ;;  %6396 = vmatprep.subr.mxu1 %v5521_v21 }
 0x29b   :  { %6321 = vmatpush3.msra.mxu0 %v5477_v5  ;;  %6397 = vmatpush3.msra.mxu1 %v5505_v42  ;;  %v5500_v5 = vld [vmem:[%s12686_s4 + $0x590] sm:$0xff]  ;;  %v5561_v42 = vld [vmem:[%s12686_s4 + $0x778] sm:$0xff] }
 0x29c   :  { %6322 = vmatprep.subr.mxu0 %v5492_v1  ;;  %6398 = vmatprep.subr.mxu1 %v5520_v16 }
 0x29d   :  { %6323 = vmatpush3.msra.mxu0 %v5476_v55  ;;  %6399 = vmatpush3.msra.mxu1 %v5504_v45  ;;  %v9041_v16 = vmul.u32.u64.low 2863311531, %v7760_v8  ;;  %v9042_v45 = vmul.u32.u64.high 2863311531, %v7760_v8, %v9041_v16 }
 0x29e   :  { %6324 = vmatprep.subr.mxu0 %v5491_v30  ;;  %6400 = vmatprep.subr.mxu1 %v5519_v6  ;;  %v5483_v30 = vld [vmem:[%s12686_s4 + $0x508] sm:$0xff] }
 0x29f   :  { %6325 = vmatpush3.msra.mxu0 %v5475_v41  ;;  %6401 = vmatpush3.msra.mxu1 %v5503_v7  ;;  %v5515_v41 = vld [vmem:[%s12686_s4 + $0x608] sm:$0xff] }
 0x2a0   :  { %6326 = vmatprep.subr.mxu0 %v5490_v19  ;;  %6402 = vmatprep.subr.mxu1 %v5518_v12  ;;  %v5482_v19 = vld [vmem:[%s12686_s4 + $0x500] sm:$0xff] }
 0x2a1   :  { %6327 = vmatpush3.msra.mxu0 %v5474_v38  ;;  %6403 = vmatpush3.msra.mxu1 %v5502_v14  ;;  %v5499_v38 = vld [vmem:[%s12686_s4 + $0x588] sm:$0xff] }
 0x2a2   :  { %6328 = vmatprep.subr.mxu0 %v5489_v17  ;;  %6404 = vmatprep.subr.mxu1 %v5517_v31 }
 0x2a3   :  { %6329 = vmatpush3.msra.mxu0 %v5473_v44  ;;  %6405 = vmatpush3.msra.mxu1 %v5501_v53 }
 0x2a4   :  { %6330 = vmatprep.subr.mxu0 %v5488_v11  ;;  %6406 = vmatprep.subr.mxu1 %v5516_v23 }
 0x2a5   :  { %6331 = vmatpush3.msra.mxu0 %v5472_v63  ;;  %6407 = vmatpush3.msra.mxu1 %v5500_v5 }
 0x2a6   :  { %6332 = vmatprep.subr.mxu0 %v5487_v25  ;;  %6408 = vmatprep.subr.mxu1 %v5515_v41 }
 0x2a7   :  { %6333 = vmatpush3.msra.mxu0 %v5471_v34  ;;  %6409 = vmatpush3.msra.mxu1 %v5499_v38  ;;  %v1075_v34 = vshrl.u32 %v9003_v48, 5 }
 0x2a8   :  { %6334 = vmatprep.subr.mxu0 %v5486_v26  ;;  %6410 = vmatprep.subr.mxu1 %v5514_v40 }
 0x2a9   :  { %6335 = vmatpush3.msra.mxu0 %v5470_v10  ;;  %6411 = vmatpush3.msra.mxu1 %v5498_v62 }
 0x2aa   :  { %6336 = vmatprep.subr.mxu0 %v5485_v9  ;;  %v1076_v9 = vmul.u32 48, %v1075_v34 }
 0x2ab   :  { %6337 = vmatpush3.msra.mxu0 %v5469_v61 }
 0x2ac   :  { %6338 = vmatprep.subr.mxu0 %v5484_v0 }
 0x2ad   :  { %6339 = vmatpush3.msra.mxu0 %v5468_v4 }
 0x2ae   :  { %6340 = vmatprep.subr.mxu0 %v5483_v30 }
 0x2af   :  { %6341 = vmatpush3.msra.mxu0 %v5467_v54 }
 0x2b0   :  { %6342 = vmatprep.subr.mxu0 %v5482_v19 }
 0x2b1   :  { %6343 = vmatpush3.msra.mxu0 %v5466_v24 }
 0x2b2   :  { %6448 = vmatprep.subr.mxu0 %v5561_v42 }
 0x2d9   :  { %v6112_v32 = vpop.f32.mrf.mxu0 }
 0x2da   :  { %v6044_v56 = vpop.f32.mrf.mxu1 }
 0x2db   :  { %v6113_v39 = vpop.f32.mrf.mxu0 }
 0x2dc   :  { %v6045_v27 = vpop.f32.mrf.mxu1  ;;  %v6114_v3 = vadd.f32 %v6113_v39, %v6112_v32 }
 0x2dd   :  { %v6046_v59 = vadd.f32 %v6045_v27, %v6044_v56  ;;  %v6115_v18 = vpop.f32.mrf.mxu0 }
 0x2df   :  { %v1721_v36 = vadd.f32 %v6046_v59, %v8968_v47  ;;  %v6047_v37 = vpop.f32.mrf.mxu1  ;;  %v6116_v33 = vpop.f32.mrf.mxu0 }
 0x2e0   :  { %v6117_v29 = vadd.f32 %v6116_v33, %v6115_v18 }
 0x2e1   :  { %v6048_v1 = vpop.f32.mrf.mxu1  ;;  %v6118_v55 = vpop.f32.mrf.mxu0  ;;  %v9005_v13 = vadd.f32 %v6114_v3, %v1721_v36  ;;  %v1064_v36 = vshrl.u32 %v9042_v45, 5  ;;  %v9074_v16 = vmul.u32.u64.low 2863311531, %v7992_v22  ;;  %v9075_v45 = vmul.u32.u64.high 2863311531, %v7992_v22, %v9074_v16 }
 0x2e2   :  { %v6049_v57 = vadd.f32 %v6048_v1, %v6047_v37  ;;  %v9053_v37 = vmul.u32.u64.low 2863311531, %v7830_v49  ;;  %v9054_v33 = vmul.u32.u64.high 2863311531, %v7830_v49, %v9053_v37  ;;  %v1077_v1 = vsub.s32 %v7784_v20, %v1076_v9  ;;  %v5593_v20 = vld [vmem:[%s12686_s4 + $0x878] sm:$0xff] }
 0x2e3   :  { %v6050_v50 = vpop.f32.mrf.mxu1  ;;  %v6119_v2 = vpop.f32.mrf.mxu0  ;;  %v1065_v30 = vmul.u32 48, %v1064_v36  ;;  %6516 = vmatprep.subr.mxu1 %v5593_v20 }
 0x2e4   :  { %v1726_v17 = vadd.f32 %v6049_v57, %v8968_v47  ;;  %v6120_v6 = vadd.f32 %v6119_v2, %v6118_v55  ;;  %vm1191_vm5 = vcmp.ne.s32.totalorder %v1077_v1, 0  ;;  %vm1203_vm6 = vcmp.lt.s32.totalorder %v1077_v1, 0 }
 0x2e5   :  { %v6051_v44 = vpop.f32.mrf.mxu1  ;;  %v6121_v21 = vpop.f32.mrf.mxu0  ;;  %v1227_v62 = vadd.s32 48, %v1077_v1  ;;  %vm1215_vm7 = vmand %vm1203_vm6, %vm1191_vm5 }
 0x2e6   :  { %v6052_v11 = vadd.f32 %v6051_v44, %v6050_v50  ;;  %v9038_v63 = vadd.f32 %v6117_v29, %v1726_v17  ;;  %v9061_v41 = vmul.u32.u64.low 2863311531, %v7807_v35  ;;  %v9062_v50 = vmul.u32.u64.high 2863311531, %v7807_v35, %v9061_v41 }
 0x2e7   :  { %v6053_v32 = vpop.f32.mrf.mxu1  ;;  %v6122_v25 = vpop.f32.mrf.mxu0  ;;  %v1066_v17 = vsub.s32 %v7760_v8, %v1065_v30  ;;  %v1097_v44 = vshrl.u32 %v9054_v33, 5  ;;  %v9083_v34 = vsel %vm1215_vm7, %v1227_v62, %v1077_v1 }
 0x2e8   :  { %v1731_v56 = vadd.f32 %v6052_v11, %v8968_v47  ;;  %v6123_v59 = vadd.f32 %v6122_v25, %v6121_v21  ;;  %vm1257_vm2 = vcmp.lt.s32.totalorder %v9083_v34, 0 }
 0x2e9   :  { %v6054_v7 = vpop.f32.mrf.mxu1  ;;  %v6124_v39 = vpop.f32.mrf.mxu0  ;;  %vm1190_vm8 = vcmp.ne.s32.totalorder %v1066_v17, 0  ;;  %vm1202_vm9 = vcmp.lt.s32.totalorder %v1066_v17, 0 }
 0x2ea   :  { %v6055_v12 = vadd.f32 %v6054_v7, %v6053_v32  ;;  %v9046_v27 = vadd.f32 %v6120_v6, %v1731_v56  ;;  %v9078_v32 = vmul.u32.u64.low 2863311531, %v7885_v28  ;;  %v9079_v25 = vmul.u32.u64.high 2863311531, %v7885_v28, %v9078_v32  ;;  %vm1214_vm10 = vmand %vm1202_vm9, %vm1190_vm8 }
 0x2eb   :  { %v6056_v26 = vpop.f32.mrf.mxu1  ;;  %v6125_v14 = vpop.f32.mrf.mxu0 }
 0x2ec   :  { %v1736_v18 = vadd.f32 %v6055_v12, %v8968_v47  ;;  %v6126_v0 = vadd.f32 %v6125_v14, %v6124_v39  ;;  %v1098_v12 = vmul.u32 48, %v1097_v44 }
 0x2ed   :  { %v6057_v10 = vpop.f32.mrf.mxu1  ;;  %v6127_v31 = vpop.f32.mrf.mxu0 }
 0x2ee   :  { %v6058_v53 = vadd.f32 %v6057_v10, %v6056_v26  ;;  %v9049_v3 = vadd.f32 %v6123_v59, %v1736_v18  ;;  %v9086_v26 = vmul.u32.u64.low 2863311531, %v7842_v60  ;;  %v9087_v14 = vmul.u32.u64.high 2863311531, %v7842_v60, %v9086_v26 }
 0x2ef   :  { %v6059_v61 = vpop.f32.mrf.mxu1  ;;  %v6128_v23 = vpop.f32.mrf.mxu0  ;;  %v1226_v18 = vadd.s32 48, %v1066_v17  ;;  %v1086_v10 = vshrl.u32 %v9062_v50, 5 }
 0x2f0   :  { %v1741_v5 = vadd.f32 %v6058_v53, %v8968_v47  ;;  %v6129_v2 = vadd.f32 %v6128_v23, %v6127_v31  ;;  %v9091_v31 = vmul.u32.u64.low 2863311531, %v7970_v46  ;;  %v9092_v9 = vmul.u32.u64.high 2863311531, %v7970_v46, %v9091_v31 }
 0x2f1   :  { %v6060_v51 = vpop.f32.mrf.mxu1  ;;  %v6130_v48 = vpop.f32.mrf.mxu0  ;;  %v1087_v41 = vmul.u32 48, %v1086_v10  ;;  %v1108_v16 = vshrl.u32 %v9087_v14, 5 }
 0x2f2   :  { %v6061_v55 = vadd.f32 %v6060_v51, %v6059_v61  ;;  %v9058_v4 = vadd.f32 %v6126_v0, %v1741_v5  ;;  %v9096_v33 = vmul.u32.u64.low 2863311531, %v7967_v43  ;;  %v9097_v61 = vmul.u32.u64.high 2863311531, %v7967_v43, %v9096_v33 }
 0x2f3   :  { %v6062_v57 = vpop.f32.mrf.mxu1  ;;  %v6131_v54 = vpop.f32.mrf.mxu0  ;;  %v1258_v0 = vsub.s32 0, %v9083_v34  ;;  %v9101_v5 = vmul.u32.u64.low 2863311531, %v7974_v52  ;;  %v9102_v51 = vmul.u32.u64.high 2863311531, %v7974_v52, %v9101_v5  ;;  %v1109_v31 = vmul.u32 48, %v1108_v16 }
 0x2f4   :  { %12761 = vst [vmem:[#allocation6_spill] sm:$0xff] %v9058_v4  ;;  %v1746_v19 = vadd.f32 %v6061_v55, %v8968_v47  ;;  %v6132_v21 = vadd.f32 %v6131_v54, %v6130_v48  ;;  %v1099_v55 = vsub.s32 %v7830_v49, %v1098_v12  ;;  %v9107_v54 = vsel %vm1214_vm10, %v1226_v18, %v1066_v17 }
 0x2f5   :  { %v6063_v38 = vpop.f32.mrf.mxu1  ;;  %v5442_v62 = vmin.u32 %v1258_v0, %v9083_v34  ;;  %v1119_v49 = vshrl.u32 %v9079_v25, 5  ;;  %v1251_v17 = vsub.s32 0, %v9107_v54  ;;  %v1130_v25 = vshrl.u32 %v9097_v61, 5 }
 0x2f6   :  { %v6064_v24 = vadd.f32 %v6063_v38, %v6062_v57  ;;  %v9068_v29 = vadd.f32 %v6129_v2, %v1746_v19  ;;  %v9110_v50 = vmul.u32.u64.low 2863311531, %v7986_v15  ;;  %v9111_v2 = vmul.u32.u64.high 2863311531, %v7986_v15, %v9110_v50 }
 0x2f7   :  { %v6133_v40 = vpop.f32.mrf.mxu0  ;;  %v9114_v19 = vmul.u32.u64.low 2863311531, %v7979_v58  ;;  %v9115_v38 = vmul.u32.u64.high 2863311531, %v7979_v58, %v9114_v19  ;;  %vm1193_vm11 = vcmp.ne.s32.totalorder %v1099_v55, 0  ;;  %vm1205_vm12 = vcmp.lt.s32.totalorder %v1099_v55, 0 }
 0x2f8   :  { %12762 = vst [vmem:[#allocation7_spill] sm:$0xff] %v9068_v29  ;;  %v1751_v42 = vadd.f32 %v6064_v24, %v8968_v47  ;;  %v6065_v11 = vpop.f32.mrf.mxu1  ;;  %vm1217_vm13 = vmand %vm1205_vm12, %vm1193_vm11  ;;  %v1120_v12 = vmul.u32 48, %v1119_v49  ;;  %v9131_v10 = vmin.u32 %v1251_v17, %v9107_v54  ;;  %v1185_v61 = vshrl.u32 %v9111_v2, 5 }
 0x2f9   :  { %v6134_v6 = vpop.f32.mrf.mxu0  ;;  %v1131_v5 = vmul.u32 48, %v1130_v25 }
 0x2fa   :  { %v6066_v56 = vpop.f32.mrf.mxu1  ;;  %v9081_v7 = vadd.f32 %v6132_v21, %v1751_v42  ;;  %v6135_v53 = vadd.f32 %v6134_v6, %v6133_v40  ;;  %v1229_v6 = vadd.s32 48, %v1099_v55 }
 0x2fb   :  { %v6067_v39 = vadd.f32 %v6066_v56, %v6065_v11  ;;  %v1088_v11 = vsub.s32 %v7807_v35, %v1087_v41  ;;  %v1141_v56 = vshrl.u32 %v9092_v9, 5  ;;  %v1163_v35 = vshrl.u32 %v9075_v45, 5 }
 0x2fc   :  { %12763 = vst [vmem:[#allocation8_spill] sm:$0xff] %v9081_v7  ;;  %v6136_v59 = vpop.f32.mrf.mxu0  ;;  %v1152_v9 = vshrl.u32 %v9102_v51, 5  ;;  %v1121_v51 = vsub.s32 %v7885_v28, %v1120_v12  ;;  %v1110_v41 = vsub.s32 %v7842_v60, %v1109_v31  ;;  %v1132_v28 = vsub.s32 %v7967_v43, %v1131_v5 }
 0x2fd   :  { %v1756_v36 = vadd.f32 %v6067_v39, %v8968_v47  ;;  %v6068_v37 = vpop.f32.mrf.mxu1  ;;  %v1261_v39 = vand.u32 7, %v5442_v62  ;;  %vm1192_vm14 = vcmp.ne.s32.totalorder %v1088_v11, 0  ;;  %vm1204_vm15 = vcmp.lt.s32.totalorder %v1088_v11, 0 }
 0x2fe   :  { %v6137_v23 = vpop.f32.mrf.mxu0  ;;  %v1142_v33 = vmul.u32 48, %v1141_v56  ;;  %v1228_v45 = vadd.s32 48, %v1088_v11  ;;  %vm1216_vm3 = vmand %vm1204_vm15, %vm1192_vm14  ;;  %v1153_v50 = vmul.u32 48, %v1152_v9  ;;  %vm1195_vm5 = vcmp.ne.s32.totalorder %v1121_v51, 0 }
 0x2ff   :  { %v6069_v48 = vpop.f32.mrf.mxu1  ;;  %v9104_v1 = vadd.f32 %v6135_v53, %v1756_v36  ;;  %v6138_v20 = vadd.f32 %v6137_v23, %v6136_v59  ;;  %v1262_v0 = vsub.s32 0, %v1261_v39  ;;  %vm1207_vm6 = vcmp.lt.s32.totalorder %v1121_v51, 0 }
 0x300   :  { %v6070_v30 = vadd.f32 %v6069_v48, %v6068_v37  ;;  %v6139_v57 = vpop.f32.mrf.mxu0  ;;  %v9141_v37 = vsel %vm1217_vm13, %v1229_v6, %v1099_v55  ;;  %v1254_v48 = vand.u32 7, %v9131_v10  ;;  %v1143_v19 = vsub.s32 %v7970_v46, %v1142_v33  ;;  %vm9179_vm11 = vmand %vm1207_vm6, %vm1195_vm5 }
 0x301   :  { %12764 = vst [vmem:[#allocation9_spill] sm:$0xff] %v9104_v1  ;;  %v1272_v55 = vsub.s32 0, %v9141_v37  ;;  %v9161_v62 = vsel %vm1216_vm3, %v1228_v45, %v1088_v11  ;;  %vm1194_vm7 = vcmp.ne.s32.totalorder %v1110_v41, 0  ;;  %vm1206_vm8 = vcmp.lt.s32.totalorder %v1110_v41, 0 }
 0x302   :  { %v1761_v24 = vadd.f32 %v6070_v30, %v8968_v47  ;;  %v6071_v40 = vpop.f32.mrf.mxu1  ;;  %v6140_v44 = vpop.f32.mrf.mxu0  ;;  %v1164_v30 = vmul.u32 48, %v1163_v35  ;;  %v1154_v17 = vsub.s32 %v7974_v52, %v1153_v50  ;;  %v1231_v11 = vadd.s32 48, %v1121_v51  ;;  %vm9186_vm14 = vmand %vm1206_vm8, %vm1194_vm7 }
 0x303   :  { %v6141_v26 = vadd.f32 %v6140_v44, %v6139_v57  ;;  %v1255_v44 = vsub.s32 0, %v1254_v48  ;;  %v9170_v46 = vmin.u32 %v1272_v55, %v9141_v37  ;;  %vm1197_vm9 = vcmp.ne.s32.totalorder %v1143_v19, 0 }
 0x304   :  { %v6072_v21 = vpop.f32.mrf.mxu1  ;;  %v9121_v42 = vadd.f32 %v6138_v20, %v1761_v24  ;;  %v1186_v20 = vmul.u32 48, %v1185_v61  ;;  %v1165_v60 = vsub.s32 %v7992_v22, %v1164_v30  ;;  %vm1209_vm10 = vcmp.lt.s32.totalorder %v1143_v19, 0 }
 0x305   :  { %v6073_v32 = vadd.f32 %v6072_v21, %v6071_v40  ;;  %v9159_v40 = vsel %vm1257_vm2, %v1262_v0, %v1261_v39  ;;  %v1230_v6 = vadd.s32 48, %v1110_v41  ;;  %vm1196_vm12 = vcmp.ne.s32.totalorder %v1132_v28, 0  ;;  %vm9196_vm3 = vmand %vm1209_vm10, %vm1197_vm9 }
 0x306   :  { %v1187_v43 = vsub.s32 %v7986_v15, %v1186_v20  ;;  %vm1208_vm13 = vcmp.lt.s32.totalorder %v1132_v28, 0  ;;  %v1233_v39 = vadd.s32 48, %v1143_v19  ;;  %vm1199_vm15 = vcmp.ne.s32.totalorder %v1165_v60, 0 }
 0x307   :  { %v1766_v59 = vadd.f32 %v6073_v32, %v8968_v47  ;;  %v9128_v18 = vpop.f32.mrf.mxu0  ;;  %v1265_v32 = vsub.s32 0, %v9161_v62  ;;  %vm1211_vm2 = vcmp.lt.s32.totalorder %v1165_v60, 0  ;;  %v1174_v15 = vshrl.u32 %v9115_v38, 5  ;;  %vm9205_vm7 = vmand %vm1208_vm13, %vm1196_vm12 }
 0x308   :  { %v9134_v14 = vpop.f32.mrf.mxu1  ;;  %v1275_v25 = vand.u32 7, %v9170_v46  ;;  %vm1198_vm5 = vcmp.ne.s32.totalorder %v1154_v17, 0  ;;  %vm1210_vm6 = vcmp.lt.s32.totalorder %v1154_v17, 0  ;;  %v9202_v35 = vsel %vm9179_vm11, %v1231_v11, %v1121_v51  ;;  %vm9220_vm10 = vmand %vm1211_vm2, %vm1199_vm15 }
 0x309   :  { %v9137_v53 = vpop.f32.mrf.mxu0  ;;  %v9139_v36 = vadd.f32 %v6141_v26, %v1766_v59  ;;  %v1232_v59 = vadd.s32 48, %v1132_v28  ;;  %v1235_v31 = vadd.s32 48, %v1165_v60  ;;  %vm1201_vm8 = vcmp.ne.s32.totalorder %v1187_v43, 0  ;;  %vm9230_vm12 = vmand %vm1210_vm6, %vm1198_vm5 }
 0x30a   :  { %v9144_v23 = vpop.f32.mrf.mxu1  ;;  %vm1213_vm4 = vcmp.lt.s32.totalorder %v1187_v43, 0  ;;  %vm1250_vm9 = vcmp.lt.s32.totalorder %v9107_v54, 0  ;;  %v9216_v61 = vsel %vm9186_vm14, %v1230_v6, %v1110_v41  ;;  %v1234_v45 = vadd.s32 48, %v1154_v17 }
 0x30b   :  { %vm1335_vm11 = vcmp.ne.s32.totalorder %v9159_v40, 0  ;;  %v9227_v5 = vsel %vm9196_vm3, %v1233_v39, %v1143_v19  ;;  %v1237_v30 = vadd.s32 48, %v1187_v43  ;;  %v1175_v55 = vmul.u32 48, %v1174_v15  ;;  %vm1225_vm14 = vmand %vm1213_vm4, %vm1201_vm8 }
 0x30c   :  { %v9150_v57 = vpop.f32.mrf.mxu0  ;;  %vm1347_vm13 = vcmp.lt.s32.totalorder %v9159_v40, 0  ;;  %v9240_v20 = vmin.u32 %v1265_v32, %v9161_v62  ;;  %v1286_v46 = vsub.s32 0, %v9202_v35  ;;  %v9245_v19 = vsel %vm9205_vm7, %v1232_v59, %v1132_v28 }
 0x30d   :  { %12765 = vst [vmem:[#allocation10_spill] sm:$0xff] %v9150_v57  ;;  %v9154_v2 = vpop.f32.mrf.mxu1  ;;  %v9253_v11 = vsel %vm1250_vm9, %v1255_v44, %v1254_v48  ;;  %v1276_v22 = vsub.s32 0, %v1275_v25  ;;  %v1279_v6 = vsub.s32 0, %v9216_v61  ;;  %v9258_v32 = vsel %vm9220_vm10, %v1235_v31, %v1165_v60  ;;  %vm9275_vm15 = vmand %vm1347_vm13, %vm1335_vm11 }
 0x30e   :  { %v9157_v24 = vpop.f32.mrf.mxu0  ;;  %v1371_v39 = vadd.s32 8, %v9159_v40  ;;  %vm1271_vm4 = vcmp.lt.s32.totalorder %v9141_v37, 0  ;;  %v1300_v10 = vsub.s32 0, %v9227_v5  ;;  %v9269_v48 = vsel %vm9230_vm12, %v1234_v45, %v1154_v17 }
 0x30f   :  { %12766 = vst [vmem:[#allocation11_spill] sm:$0xff] %v9157_v24  ;;  %v9164_v49 = vpop.f32.mrf.mxu1  ;;  %v1293_v60 = vsub.s32 0, %v9245_v19  ;;  %v9280_v15 = vsel %vm1225_vm14, %v1237_v30, %v1187_v43  ;;  %v1176_v26 = vsub.s32 %v7979_v58, %v1175_v55  ;;  %vm1334_vm2 = vcmp.ne.s32.totalorder %v9253_v11, 0 }
 0x310   :  { %v1268_v17 = vand.u32 7, %v9240_v20  ;;  %v5446_v31 = vmin.u32 %v1286_v46, %v9202_v35  ;;  %v1314_v0 = vsub.s32 0, %v9258_v32  ;;  %vm1346_vm3 = vcmp.lt.s32.totalorder %v9253_v11, 0 }
 0x311   :  { %v9173_v21 = vpop.f32.mrf.mxu1  ;;  %v9292_v45 = vsel %vm1271_vm4, %v1276_v22, %v1275_v25  ;;  %v9295_v43 = vmin.u32 %v1279_v6, %v9216_v61  ;;  %v1307_v58 = vsub.s32 0, %v9269_v48  ;;  %v1383_v55 = vsel %vm9275_vm15, %v1371_v39, %v9159_v40  ;;  %vm9322_vm8 = vmand %vm1346_vm3, %vm1334_vm2 }
 0x312   :  { %v9176_v16 = vpop.f32.mrf.mxu0  ;;  %v1370_v20 = vadd.s32 8, %v9253_v11  ;;  %v9307_v46 = vmin.u32 %v1300_v10, %v9227_v5  ;;  %v1328_v25 = vsub.s32 0, %v9280_v15  ;;  %vm1264_vm5 = vcmp.lt.s32.totalorder %v9161_v62, 0 }
 0x313   :  { %v9183_v56 = vpop.f32.mrf.mxu1  ;;  %v9312_v22 = vmin.u32 %v1293_v60, %v9245_v19  ;;  %vm1200_vm6 = vcmp.ne.s32.totalorder %v1176_v26, 0  ;;  %vm1212_vm7 = vcmp.lt.s32.totalorder %v1176_v26, 0  ;;  %vm1337_vm9 = vcmp.ne.s32.totalorder %v9292_v45, 0 }
 0x314   :  { %v9191_v12 = vpop.f32.mrf.mxu0  ;;  %v1269_v39 = vsub.s32 0, %v1268_v17  ;;  %v1289_v10 = vand.u32 7, %v5446_v31  ;;  %v9328_v44 = vmin.u32 %v1314_v0, %v9258_v32  ;;  %vm1349_vm10 = vcmp.lt.s32.totalorder %v9292_v45, 0  ;;  %vm1224_vm11 = vmand %vm1212_vm7, %vm1200_vm6 }
 0x315   :  { %v1282_v60 = vand.u32 7, %v9295_v43  ;;  %v9333_v1 = vmin.u32 %v1307_v58, %v9269_v48  ;;  %v1236_v7 = vadd.s32 48, %v1176_v26  ;;  %v1382_v31 = vsel %vm9322_vm8, %v1370_v20, %v9253_v11  ;;  %vm9365_vm14 = vmand %vm1349_vm10, %vm1337_vm9 }
 0x316   :  { %v9209_v9 = vpop.f32.mrf.mxu0  ;;  %v9211_v33 = vpop.f32.mrf.mxu1  ;;  %v9349_v0 = vadd.s32 8, %v9292_v45  ;;  %v1296_v43 = vand.u32 7, %v9312_v22  ;;  %vm9356_vm12 = vcmp.lt.s32.totalorder %v1383_v55, 4  ;;  %vm1407_vm13 = vcmp.lt.s32.totalorder %v9083_v34, 32 }
 0x317   :  { %v9371_v20 = vsel %vm1264_vm5, %v1269_v39, %v1268_v17  ;;  %v1317_v55 = vand.u32 7, %v9328_v44  ;;  %vm1285_vm4 = vcmp.lt.s32.totalorder %v9202_v35, 0  ;;  %v1283_v22 = vsub.s32 0, %v1282_v60 }
 0x318   :  { %v9234_v41 = vpop.f32.mrf.mxu0  ;;  %v9236_v50 = vpop.f32.mrf.mxu1  ;;  %v1310_v40 = vand.u32 7, %v9333_v1  ;;  %vm9382_vm15 = vcmp.lt.s32.totalorder %v1382_v31, 4  ;;  %vm1278_vm3 = vcmp.lt.s32.totalorder %v9216_v61, 0  ;;  %vm1336_vm5 = vcmp.ne.s32.totalorder %v9371_v20, 0 }
 0x319   :  { %vm1299_vm6 = vcmp.lt.s32.totalorder %v9227_v5, 0  ;;  %v1297_v1 = vsub.s32 0, %v1296_v43  ;;  %vm1292_vm7 = vcmp.lt.s32.totalorder %v9245_v19, 0  ;;  %vm1348_vm8 = vcmp.lt.s32.totalorder %v9371_v20, 0 }
 0x31a   :  { %v9260_v52 = vpop.f32.mrf.mxu0  ;;  %v9262_v28 = vpop.f32.mrf.mxu1  ;;  %vm1313_vm9 = vcmp.lt.s32.totalorder %v9258_v32, 0  ;;  %v1311_v57 = vsub.s32 0, %v1310_v40  ;;  %vm1327_vm1 = vcmp.lt.s32.totalorder %v9280_v15, 0  ;;  %v12697_v11 = vmov 0.0  }
 0x31b   :  { %12779 = vst [vmem:[#allocation12_spill] sm:$0xff] %v9260_v52  ;;  %v9341_v52 = vmin.u32 %v1328_v25, %v9280_v15  ;;  %v1290_v25 = vsub.s32 0, %v1289_v10 }
 0x31c   :  { %v9283_v59 = vpop.f32.mrf.mxu0  ;;  %v9285_v38 = vpop.f32.mrf.mxu1 }
 0x31d   :  { %12782 = vst [vmem:[#allocation13_spill] sm:$0xff] %v9283_v59  ;;  %v1303_v59 = vand.u32 7, %v9307_v46  ;;  %v1331_v39 = vand.u32 7, %v9341_v52  ;;  %v9401_v31 = vsel %vm1285_vm4, %v1290_v25, %v1289_v10  ;;  %v1318_v52 = vsub.s32 0, %v1317_v55 }
 0x31e   :  { %v9298_v51 = vpop.f32.mrf.mxu0  ;;  %v9300_v30 = vpop.f32.mrf.mxu1  ;;  %v1372_v10 = vadd.s32 8, %v9371_v20  ;;  %vm1339_vm4 = vcmp.ne.s32.totalorder %v9401_v31, 0 }
 0x31f   :  { %12783 = vst [vmem:[#allocation14_spill] sm:$0xff] %v9298_v51  ;;  %v1304_v17 = vsub.s32 0, %v1303_v59 }
 0x320   :  { %v9314_v6 = vpop.f32.mrf.mxu0  ;;  %v9316_v8 = vpop.f32.mrf.mxu1 }
 0x321   :  { %12784 = vst [vmem:[#allocation15_spill] sm:$0xff] %v9314_v6  ;;  %v9417_v25 = vsel %vm1299_vm6, %v1304_v17, %v1303_v59  ;;  %vm9435_vm6 = vmand %vm1348_vm8, %vm1336_vm5  ;;  %v6191_v59 = vadd.f32 %v9316_v8, %v9300_v30 }
 0x322   :  { %v9335_v4 = vpop.f32.mrf.mxu0  ;;  %v9337_v29 = vpop.f32.mrf.mxu1  ;;  %vm1353_vm5 = vcmp.lt.s32.totalorder %v9417_v25, 0 }
 0x323   :  { %12787 = vst [vmem:[#allocation16_spill] sm:$0xff] %v9335_v4  ;;  %12788 = vst [vmem:[#allocation17_spill] sm:$0xff] %v9337_v29  ;;  %v1332_v29 = vsub.s32 0, %v1331_v39 }
 0x324   :  { %v9352_v58 = vpop.f32.mrf.mxu0  ;;  %v9354_v4 = vpop.f32.mrf.mxu1 }
 0x325   :  { %12789 = vst [vmem:[#allocation18_spill] sm:$0xff] %v9352_v58  ;;  %12790 = vst [vmem:[#allocation19_spill] sm:$0xff] %v9354_v4  ;;  %v9376_v58 = vsel %vm1224_vm11, %v1236_v7, %v1176_v26  ;;  %v9406_v7 = vsel %vm1278_vm3, %v1283_v22, %v1282_v60  ;;  %vm1306_vm11 = vcmp.lt.s32.totalorder %v9269_v48, 0  ;;  %vm1351_vm3 = vcmp.lt.s32.totalorder %v9401_v31, 0 }
 0x326   :  { %v9378_v6 = vpop.f32.mrf.mxu0  ;;  %v9380_v51 = vpop.f32.mrf.mxu1  ;;  %v9424_v60 = vsel %vm1292_vm7, %v1297_v1, %v1296_v43  ;;  %vm1338_vm0 = vcmp.ne.s32.totalorder %v9406_v7, 0  ;;  %vm1350_vm10 = vcmp.lt.s32.totalorder %v9406_v7, 0  ;;  %v9443_v43 = vsel %vm1313_vm9, %v1318_v52, %v1317_v55  ;;  %vm9463_vm8 = vmand %vm1351_vm3, %vm1339_vm4 }
 0x327   :  { %12795 = vst [vmem:[#allocation20_spill] sm:$0xff] %v9378_v6  ;;  %v1321_v6 = vsub.s32 0, %v9376_v58  ;;  %v1375_v1 = vadd.s32 8, %v9401_v31  ;;  %vm1341_vm7 = vcmp.ne.s32.totalorder %v9417_v25, 0  ;;  %v1374_v55 = vadd.s32 8, %v9406_v7  ;;  %vm9489_vm4 = vmand %vm1350_vm10, %vm1338_vm0 }
 0x328   :  { %v9395_v26 = vpop.f32.mrf.mxu0  ;;  %v9397_v44 = vpop.f32.mrf.mxu1  ;;  %vm1340_vm9 = vcmp.ne.s32.totalorder %v9424_v60, 0  ;;  %vm1352_vm2 = vcmp.lt.s32.totalorder %v9424_v60, 0  ;;  %v1384_v52 = vsel %vm9435_vm6, %v1372_v10, %v9371_v20  ;;  %vm12816_vm3 = vcmp.lt.s32.totalorder %v9107_v54, 32 }
 0x329   :  { %12798 = vst [vmem:[#allocation21_spill] sm:$0xff] %v9395_v26  ;;  %v9446_v17 = vmin.u32 %v1321_v6, %v9376_v58  ;;  %vm9516_vm6 = vmand %vm9382_vm15, %vm12816_vm3  ;;  %v1379_v54 = vadd.s32 8, %v9443_v43  ;;  %v1386_v6 = vsel %vm9489_vm4, %v1374_v55, %v9406_v7  ;;  %vm1411_vm3 = vcmp.lt.s32.totalorder %v9202_v35, 32 }
 0x32a   :  { %v9409_v4 = vpop.f32.mrf.mxu0  ;;  %v9411_v26 = vpop.f32.mrf.mxu1 }
 0x32b   :  { %12799 = vst [vmem:[#allocation22_spill] sm:$0xff] %v9409_v4  ;;  %12800 = vst [vmem:[#allocation23_spill] sm:$0xff] %v9411_v26  ;;  %v1324_v10 = vand.u32 7, %v9446_v17 }
 0x32c   :  { %v9427_v22 = vpop.f32.mrf.mxu0  ;;  %v9429_v4 = vpop.f32.mrf.mxu1 }
 0x32d   :  { %12801 = vst [vmem:[#allocation24_spill] sm:$0xff] %v9427_v22  ;;  %12802 = vst [vmem:[#allocation25_spill] sm:$0xff] %v9429_v4  ;;  %v9453_v22 = vsel %vm1306_vm11, %v1311_v57, %v1310_v40  ;;  %v9472_v57 = vsel %vm1327_vm1, %v1332_v29, %v1331_v39  ;;  %v1377_v29 = vadd.s32 8, %v9417_v25  ;;  %vm1343_vm1 = vcmp.ne.s32.totalorder %v9443_v43, 0 }
 0x32e   :  { %v9455_v4 = vpop.f32.mrf.mxu0  ;;  %v9457_v26 = vpop.f32.mrf.mxu1  ;;  %vm9478_vm11 = vmand %vm9356_vm12, %vm1407_vm13  ;;  %vm1355_vm12 = vcmp.lt.s32.totalorder %v9443_v43, 0  ;;  %v1376_v39 = vadd.s32 8, %v9424_v60  ;;  %vm1342_vm0 = vcmp.ne.s32.totalorder %v9453_v22, 0  ;;  %vm1354_vm10 = vcmp.lt.s32.totalorder %v9453_v22, 0 }
 0x32f   :  { %12805 = vst [vmem:[#allocation26_spill] sm:$0xff] %v9455_v4  ;;  %vm9504_vm13 = vmand %vm1353_vm5, %vm1341_vm7  ;;  %vm1345_vm5 = vcmp.ne.s32.totalorder %v9472_v57, 0  ;;  %vm1357_vm15 = vcmp.lt.s32.totalorder %v9472_v57, 0  ;;  %v1381_v7 = vadd.s32 8, %v9472_v57  ;;  %v1325_v20 = vsub.s32 0, %v1324_v10 }
 0x330   :  { %v9496_v34 = vpop.f32.mrf.mxu0  ;;  %v9498_v46 = vpop.f32.mrf.mxu1  ;;  %vm9527_vm7 = vmand %vm1352_vm2, %vm1340_vm9  ;;  %vm1408_vm2 = vcmp.lt.s32.totalorder %v9161_v62, 32  ;;  %v1389_v4 = vsel %vm9504_vm13, %v1377_v29, %v9417_v25 }
 0x331   :  { %12812 = vst [vmem:[#allocation27_spill] sm:$0xff] %v9496_v34  ;;  %12813 = vst [vmem:[#allocation28_spill] sm:$0xff] %v9498_v46  ;;  %v1387_v34 = vsel %vm9463_vm8, %v1375_v1, %v9401_v31  ;;  %v12822_v31 = vsel %vm9365_vm14, %v9349_v0, %v9292_v45  ;;  %v1378_v45 = vadd.s32 8, %v9453_v22  ;;  %vm9558_vm14 = vcmp.lt.s32.totalorder %v1384_v52, 4  ;;  %v12882_v1 = vld [vmem:[#allocation19_spill] sm:$0xff] }
 0x332   :  { %v9534_v24 = vpop.f32.mrf.mxu0  ;;  %v6204_v17 = vpop.f32.mrf.mxu1  ;;  %vm9541_vm8 = vcmp.lt.s32.totalorder %v12822_v31, 4  ;;  %vm9553_vm9 = vmand %vm1355_vm12, %vm1343_vm1  ;;  %vm9577_vm1 = vcmp.lt.s32.totalorder %v1387_v34, 4  ;;  %v1388_v25 = vsel %vm9527_vm7, %v1376_v39, %v9424_v60  ;;  %vm9601_vm12 = vcmp.lt.s32.totalorder %v1386_v6, 4  ;;  %v12888_v0 = vld [vmem:[#allocation15_spill] sm:$0xff] }
 0x333   :  { %12821 = vst [vmem:[#allocation29_spill] sm:$0xff] %v9534_v24  ;;  %vm9570_vm4 = vmand %vm1354_vm10, %vm1342_vm0  ;;  %vm12836_vm0 = vcmp.lt.s32.totalorder %v9141_v37, 32  ;;  %v1391_v46 = vsel %vm9553_vm9, %v1379_v54, %v9443_v43  ;;  %vm1320_vm7 = vcmp.lt.s32.totalorder %v9376_v58, 0  ;;  %vm9638_vm9 = vcmp.lt.s32.totalorder %v1388_v25, 4 }
 0x334   :  { %v9575_v55 = vpop.f32.mrf.mxu0  ;;  %v6205_v52 = vpop.f32.mrf.mxu1  ;;  %vm9589_vm13 = vmand %vm1357_vm15, %vm1345_vm5  ;;  %vm9617_vm15 = vcmp.lt.s32.totalorder %v1389_v4, 4  ;;  %v1390_v43 = vsel %vm9570_vm4, %v1378_v45, %v9453_v22  ;;  %vm12849_vm4 = vcmp.lt.s32.totalorder %v9216_v61, 32  ;;  %v9661_v45 = vsel %vm1320_vm7, %v1325_v20, %v1324_v10  ;;  %v12884_v35 = vld [vmem:[#allocation25_spill] sm:$0xff] }
 0x335   :  { %12831 = vst [vmem:[#allocation30_spill] sm:$0xff] %v9575_v55  ;;  %v6206_v55 = vadd.f32 %v6205_v52, %v6204_v17  ;;  %vm9597_vm10 = vmand %vm9541_vm8, %vm12836_vm0  ;;  %vm1413_vm8 = vcmp.lt.s32.totalorder %v9227_v5, 32  ;;  %v9757_v25 = vadd.s32 8, %v9661_v45  ;;  %v6253_v20 = vadd.f32 %v9234_v41, %v9209_v9 }
 0x336   :  { %v6207_v39 = vpop.f32.mrf.mxu1  ;;  %vm9613_vm5 = vmand %vm9558_vm14, %vm1408_vm2  ;;  %v9628_v62 = vpop.f32.mrf.mxu0  ;;  %vm1412_vm14 = vcmp.lt.s32.totalorder %v9245_v19, 32  ;;  %v6197_v9 = vadd.f32 %v9397_v44, %v9380_v51  ;;  %v6250_v17 = vadd.f32 %v9191_v12, %v9176_v16  ;;  %v12881_v44 = vld [vmem:[#allocation17_spill] sm:$0xff]  ;;  %v12885_v12 = vld [vmem:[#allocation10_spill] sm:$0xff] }
 0x337   :  { %v9626_v54 = vadd.f32 %v6206_v55, %v9121_v42  ;;  %vm9634_vm2 = vmand %vm9577_vm1, %vm1411_vm3  ;;  %v1393_v42 = vsel %vm9589_vm13, %v1381_v7, %v9472_v57  ;;  %vm9654_vm3 = vcmp.lt.s32.totalorder %v1391_v46, 4  ;;  %vm1415_vm1 = vcmp.lt.s32.totalorder %v9258_v32, 32  ;;  %v12891_v19 = vld [vmem:[#allocation7_spill] sm:$0xff] }
 0x338   :  { %v6208_v22 = vpop.f32.mrf.mxu1  ;;  %vm9650_vm0 = vmand %vm9601_vm12, %vm12849_vm4  ;;  %v6185_v57 = vadd.f32 %v9236_v50, %v9211_v33  ;;  %vm9673_vm13 = vcmp.lt.s32.totalorder %v1390_v43, 4  ;;  %vm1414_vm4 = vcmp.lt.s32.totalorder %v9269_v48, 32  ;;  %v9683_v33 = vsel %vm9478_vm11, 1.0, %v12697_v11  ;;  %v9700_v40 = vpop.f32.mrf.mxu0 }
 0x339   :  { %v6209_v61 = vadd.f32 %v6208_v22, %v6207_v39  ;;  %vm9669_vm12 = vmand %vm9617_vm15, %vm1413_vm8  ;;  %12858 = vst [vmem:[#allocation31_spill] sm:$0xff] %v9683_v33  ;;  %vm9693_vm15 = vcmp.lt.s32.totalorder %v1393_v42, 4  ;;  %vm1417_vm8 = vcmp.lt.s32.totalorder %v9280_v15, 32  ;;  %v6182_v7 = vadd.f32 %v9183_v56, %v9173_v21  ;;  %v12883_v22 = vld [vmem:[#allocation23_spill] sm:$0xff] }
 0x33a   :  { %v9678_v10 = vpop.f32.mrf.mxu1  ;;  %vm9689_vm7 = vmand %vm9638_vm9, %vm1412_vm14  ;;  %vm1344_vm9 = vcmp.ne.s32.totalorder %v9661_v45, 0  ;;  %vm1356_vm14 = vcmp.lt.s32.totalorder %v9661_v45, 0  ;;  %v6076_v21 = vadd.f32 %v9144_v23, %v9134_v14  ;;  %v9725_v32 = vsel %vm9597_vm10, 1.0, %v12697_v11  ;;  %v9787_v34 = vpop.f32.mrf.mxu0 }
 0x33b   :  { %v9703_v55 = vadd.f32 %v6209_v61, %v9139_v36  ;;  %vm9709_vm11 = vmand %vm9654_vm3, %vm1415_vm1  ;;  %v9720_v36 = vsel %vm9516_vm6, 1.0, %v12697_v11  ;;  %12866 = vst [vmem:[#allocation33_spill] sm:$0xff] %v9725_v32  ;;  %v9730_v52 = vsel %vm9613_vm5, 1.0, %v12697_v11  ;;  %v1976_v23 = vadd.f32 %v6185_v57, %v9038_v63  ;;  %v12887_v61 = vld [vmem:[#allocation14_spill] sm:$0xff] }
 0x33c   :  { %v6211_v56 = vpop.f32.mrf.mxu1  ;;  %12865 = vst [vmem:[#allocation32_spill] sm:$0xff] %v9720_v36  ;;  %12867 = vst [vmem:[#allocation34_spill] sm:$0xff] %v9730_v52  ;;  %v9746_v31 = vsel %vm9634_vm2, 1.0, %v12697_v11  ;;  %v6188_v63 = vadd.f32 %v9285_v38, %v9262_v28  ;;  %v9764_v30 = vsel %vm9650_vm0, 1.0, %v12697_v11  ;;  %v9769_v15 = vsel %vm9669_vm12, 1.0, %v12697_v11  ;;  %v6279_v5 = vpop.f32.mrf.mxu0 }
 0x33d   :  { %vm9736_vm3 = vmand %vm9673_vm13, %vm1414_vm4  ;;  %12870 = vst [vmem:[#allocation35_spill] sm:$0xff] %v9746_v31  ;;  %v9774_v29 = vsel %vm9689_vm7, 1.0, %v12697_v11  ;;  %v1971_v38 = vadd.f32 %v6182_v7, %v9005_v13  ;;  %v9792_v60 = vsel %vm9709_vm11, 1.0, %v12697_v11  ;;  %v1771_v39 = vadd.f32 %v6076_v21, %v8968_v47 }
 0x33e   :  { %vm9752_vm6 = vmand %vm9693_vm15, %vm1417_vm8  ;;  %v6213_v8 = vpop.f32.mrf.mxu1  ;;  %12873 = vst [vmem:[#allocation36_spill] sm:$0xff] %v9764_v30  ;;  %v9797_v46 = vsel %vm9736_vm3, 1.0, %v12697_v11  ;;  %v6079_v13 = vadd.f32 %v9164_v49, %v9154_v2  ;;  %v1986_v43 = vadd.f32 %v6191_v59, %v9049_v3  ;;  %v2101_v24 = vadd.f32 %v6253_v20, %v1976_v23  ;;  %v12886_v3 = vld [vmem:[#allocation11_spill] sm:$0xff]  ;;  %v12892_v59 = vld [vmem:[#allocation28_spill] sm:$0xff] }
 0x33f   :  { %12874 = vst [vmem:[#allocation37_spill] sm:$0xff] %v9769_v15  ;;  %12875 = vst [vmem:[#allocation38_spill] sm:$0xff] %v9774_v29  ;;  %v9807_v37 = vsel %vm9752_vm6, 1.0, %v12697_v11  ;;  %v6144_v49 = vadd.f32 %v9137_v53, %v9128_v18  ;;  %v1981_v51 = vadd.f32 %v6188_v63, %v9046_v27  ;;  %v6194_v42 = vadd.f32 %v12882_v1, %v12881_v44  ;;  %v12889_v53 = vld [vmem:[#allocation12_spill] sm:$0xff]  ;;  %v12890_v27 = vld [vmem:[#allocation13_spill] sm:$0xff] }
 0x340   :  { %vm9780_vm10 = vmand %vm1356_vm14, %vm1344_vm9  ;;  %12878 = vst [vmem:[#allocation39_spill] sm:$0xff] %v9792_v60  ;;  %v6214_v41 = vpop.f32.mrf.mxu1  ;;  %v6200_v6 = vadd.f32 %v12884_v35, %v12883_v22  ;;  %v6147_v57 = vadd.f32 %v12886_v3, %v12885_v12  ;;  %v6259_v4 = vadd.f32 %v12888_v0, %v12887_v61  ;;  %v2096_v50 = vadd.f32 %v6250_v17, %v1971_v38  ;;  %v12893_v20 = vld [vmem:[#allocation6_spill] sm:$0xff]  ;;  %v12894_v1 = vld [vmem:[#allocation20_spill] sm:$0xff]  ;;  %v6281_v3 = vpop.f32.mrf.mxu0 }
 0x341   :  { %12879 = vst [vmem:[#allocation40_spill] sm:$0xff] %v9797_v46  ;;  %12880 = vst [vmem:[#allocation41_spill] sm:$0xff] %v9807_v37  ;;  %v1392_v2 = vsel %vm9780_vm10, %v9757_v25, %v9661_v45  ;;  %v1776_v18 = vadd.f32 %v6079_v13, %v8968_v47  ;;  %v6256_v7 = vadd.f32 %v12890_v27, %v12889_v53  ;;  %v12896_v17 = vld [vmem:[#allocation8_spill] sm:$0xff]  ;;  %vm1416_vm2 = vcmp.lt.s32.totalorder %v9376_v58, 32 }
 0x342   :  { %v7296_v16 = vpop.f32.mrf.mxu1  ;;  %v1996_v21 = vadd.f32 %v6197_v9, %v12891_v19  ;;  %v1896_v14 = vadd.f32 %v6144_v49, %v1771_v39  ;;  %v6203_v48 = vadd.f32 %v12892_v59, %v9457_v26  ;;  %v2111_v28 = vadd.f32 %v6259_v4, %v1986_v43  ;;  %v12897_v35 = vld [vmem:[#allocation16_spill] sm:$0xff]  ;;  %v12899_v39 = vld [vmem:[#allocation22_spill] sm:$0xff]  ;;  %v12903_v19 = vld [vmem:[#allocation27_spill] sm:$0xff] }
 0x343   :  { %v2226_v45 = vadd.f32 %v7296_v16, %v2101_v24  ;;  %v1991_v44 = vadd.f32 %v6194_v42, %v12893_v20  ;;  %v12895_v24 = vld [vmem:[#allocation21_spill] sm:$0xff]  ;;  %v2001_v47 = vadd.f32 %v6200_v6, %v12896_v17  ;;  %v2106_v22 = vadd.f32 %v6256_v7, %v1981_v51  ;;  %v12898_v16 = vld [vmem:[#allocation18_spill] sm:$0xff]  ;;  %v12900_v49 = vld [vmem:[#allocation24_spill] sm:$0xff] }
 0x344   :  { %v2220_v23 = vpop.f32.mrf.mxu1  ;;  %v6265_v38 = vadd.f32 %v12895_v24, %v12894_v1  ;;  %v6262_v9 = vadd.f32 %v12898_v16, %v12897_v35  ;;  %v6268_v12 = vadd.f32 %v12900_v49, %v12899_v39  ;;  %v6212_v43 = vadd.f32 %v6211_v56, %v9678_v10  ;;  %v12902_v7 = vld [vmem:[#allocation26_spill] sm:$0xff]  ;;  %v12906_v56 = vld [vmem:[#allocation29_spill] sm:$0xff] }
 0x345   :  { %v2280_v25 = vmax.f32 %v2226_v45, 0.0  ;;  %v2221_v63 = vadd.f32 %v2220_v23, %v2096_v50  ;;  %v6215_v0 = vadd.f32 %v6214_v41, %v6213_v8  ;;  %v12901_v50 = vld [vmem:[#allocation9_spill] sm:$0xff]  ;;  %v6271_v23 = vadd.f32 %v12903_v19, %v12902_v7  ;;  %v12907_v8 = vld [vmem:[#allocation30_spill] sm:$0xff] }
 0x346   :  { %v7299_v13 = vpop.f32.mrf.mxu1  ;;  %v2121_v45 = vadd.f32 %v6265_v38, %v1996_v21  ;;  %v2006_v6 = vadd.f32 %v6203_v48, %v12901_v50  ;;  %v1901_v59 = vadd.f32 %v6147_v57, %v1776_v18  ;;  %v2126_v20 = vadd.f32 %v6268_v12, %v2001_v47  ;;  %v6282_v21 = vpop.f32.mrf.mxu0 }
 0x347   :  { %v2279_v26 = vmax.f32 %v2221_v63, 0.0  ;;  %v2236_v61 = vadd.f32 %v7299_v13, %v2111_v28  ;;  %v2292_v42 = vmul.f32 %v9683_v33, %v2280_v25  ;;  %v2116_v28 = vadd.f32 %v6262_v9, %v1991_v44 }
 0x348   :  { %v2230_v4 = vpop.f32.mrf.mxu1  ;;  %vm9849_vm5 = vcmp.lt.s32.totalorder %v1392_v2, 4  ;;  %v6274_v41 = vadd.f32 %v12907_v8, %v12906_v56  ;;  %v2021_v24 = vadd.f32 %v6212_v43, %v1896_v14  ;;  %v2026_v38 = vadd.f32 %v6215_v0, %v1901_v59  ;;  %v12908_v14 = vld [vmem:[#allocation5_spill] sm:$0xff] }
 0x349   :  { %v9845_v51 = vmul.f32 %v9720_v36, %v2279_v26  ;;  %v2282_v53 = vmax.f32 %v2236_v61, 0.0  ;;  %v2231_v27 = vadd.f32 %v2230_v4, %v2106_v22  ;;  %v2304_v57 = vrot.slane %v2292_v42, 7  ;;  %vm1428_vm13 = vmand %vm9849_vm5, %vm1416_vm2 }
 0x34a   :  { %v7302_v63 = vpop.f32.mrf.mxu1  ;;  %v2131_v13 = vadd.f32 %v6271_v23, %v2006_v6  ;;  %v6277_v22 = vadd.f32 %v9700_v40, %v9628_v62  ;;  %v6280_v35 = vadd.f32 %v6279_v5, %v9787_v34  ;;  %v6283_v16 = vadd.f32 %v6282_v21, %v6281_v3 }
 0x34b   :  { %v2303_v48 = vrot.slane %v9845_v51, 7  ;;  %v2281_v25 = vmax.f32 %v2231_v27, 0.0  ;;  %v2246_v1 = vadd.f32 %v7302_v63, %v2121_v45  ;;  %v2294_v18 = vmul.f32 %v9725_v32, %v2282_v53 }
 0x34c   :  { %v2240_v44 = vpop.f32.mrf.mxu1  ;;  %vm12909_vm0 = vcmp.lt.s32.totalorder %v12908_v14, 1  ;;  %v2136_v61 = vadd.f32 %v6274_v41, %v9626_v54  ;;  %v2141_v42 = vadd.f32 %v6277_v22, %v9703_v55  ;;  %v2151_v62 = vadd.f32 %v6283_v16, %v2026_v38 }
 0x34d   :  { %v2293_v2 = vmul.f32 %v9730_v52, %v2281_v25  ;;  %v2284_v17 = vmax.f32 %v2246_v1, 0.0  ;;  %v2241_v47 = vadd.f32 %v2240_v44, %v2116_v28  ;;  %v9866_v39 = vsel %vm12909_vm0, %v2303_v48, %v2304_v57  ;;  %vm12910_vm1 = vmmov %vm12909_vm0 }
 0x34e   :  { %v7305_v9 = vpop.f32.mrf.mxu1  ;;  %v2306_v43 = vrot.slane %v2294_v18, 7  ;;  %v2146_v40 = vadd.f32 %v6280_v35, %v2021_v24  ;;  %v2329_v50 = vrot.slane %v9866_v39, 1  ;;  %v2353_v6 = vrot.slane %v9866_v39, 2  ;;  %vm12911_vm12 = vmmov %vm12909_vm0 }
 0x34f   :  { %v2305_v49 = vrot.slane %v2293_v2, 7  ;;  %v2283_v12 = vmax.f32 %v2241_v47, 0.0  ;;  %v2256_v26 = vadd.f32 %v7305_v9, %v2131_v13  ;;  %v2296_v34 = vmul.f32 %v9746_v31, %v2284_v17  ;;  %vm12917_vm11 = vmmov %vm12909_vm0 }
 0x350   :  { %v2250_v0 = vpop.f32.mrf.mxu1  ;;  %vm12912_vm4 = vcmp.lt.s32.totalorder %v12908_v14, 7  ;;  %vm12913_vm7 = vcmp.lt.s32.totalorder %v12908_v14, 6  ;;  %v9914_v17 = vsel %vm1428_vm13, 1.0, %v12697_v11  ;;  %vm12918_vm9 = vmmov %vm12909_vm0 }
 0x351   :  { %v2295_v5 = vmul.f32 %v9764_v30, %v2283_v12  ;;  %v2286_v3 = vmax.f32 %v2256_v26, 0.0  ;;  %v2251_v4 = vadd.f32 %v2250_v0, %v2126_v20  ;;  %v9876_v54 = vsel %vm12910_vm1, %v2304_v57, %v2305_v49  ;;  %vm12914_vm15 = vmmov %vm12912_vm4  ;;  %12916 = vst [vmem:[#allocation17_spill] sm:$0xff] %v9914_v17 }
 0x352   :  { %v7308_v45 = vpop.f32.mrf.mxu1  ;;  %v9880_v55 = vsel %vm12911_vm12, %v2305_v49, %v2306_v43  ;;  %v2330_v59 = vrot.slane %v9876_v54, 1  ;;  %v2354_v63 = vrot.slane %v9876_v54, 2  ;;  %v2308_v56 = vrot.slane %v2296_v34, 7  ;;  %vm12915_vm8 = vmmov %vm12913_vm7 }
 0x353   :  { %v2307_v53 = vrot.slane %v2295_v5, 7  ;;  %v2298_v27 = vmul.f32 %v9769_v15, %v2286_v3  ;;  %v2285_v7 = vmax.f32 %v2251_v4, 0.0  ;;  %v2266_v19 = vadd.f32 %v7308_v45, %v2141_v42  ;;  %vm12919_vm14 = vmmov %vm12909_vm0 }
 0x354   :  { %v2260_v23 = vpop.f32.mrf.mxu1  ;;  %v2331_v28 = vrot.slane %v9880_v55, 1  ;;  %v2355_v20 = vrot.slane %v9880_v55, 2  ;;  %v9896_v1 = vsel %vm12912_vm4, %v2329_v50, %v2330_v59  ;;  %v9902_v24 = vsel %vm12913_vm7, %v2353_v6, %v2354_v63  ;;  %vm12920_vm3 = vmmov %vm12912_vm4 }
 0x355   :  { %v2297_v8 = vmul.f32 %v9774_v29, %v2285_v7  ;;  %v2288_v41 = vmax.f32 %v2266_v19, 0.0  ;;  %v2261_v21 = vadd.f32 %v2260_v23, %v2136_v61  ;;  %v2310_v2 = vrot.slane %v2298_v27, 7  ;;  %vm12921_vm6 = vmmov %vm12913_vm7 }
 0x356   :  { %v7311_v25 = vpop.f32.mrf.mxu1  ;;  %v9906_v38 = vsel %vm12914_vm15, %v2330_v59, %v2331_v28  ;;  %v9910_v58 = vsel %vm12915_vm8, %v2354_v63, %v2355_v20  ;;  %v9918_v13 = vsel %vm12917_vm11, %v2306_v43, %v2307_v53  ;;  %v9922_v22 = vsel %vm12918_vm9, %v2307_v53, %v2308_v56  ;;  %vm12922_vm10 = vmmov %vm12920_vm3 }
 0x357   :  { %v2309_v10 = vrot.slane %v2297_v8, 7  ;;  %v2300_v57 = vmul.f32 %v9792_v60, %v2288_v41  ;;  %v2287_v18 = vmax.f32 %v2261_v21, 0.0  ;;  %v2276_v44 = vadd.f32 %v7311_v25, %v2151_v62  ;;  %vm12923_vm5 = vmmov %vm12921_vm6 }
 0x358   :  { %v2270_v47 = vpop.f32.mrf.mxu1  ;;  %v2332_v12 = vrot.slane %v9918_v13, 1  ;;  %v2356_v26 = vrot.slane %v9918_v13, 2  ;;  %v2333_v61 = vrot.slane %v9922_v22, 1  ;;  %v2357_v0 = vrot.slane %v9922_v22, 2  ;;  %vm12924_vm2 = vmmov %vm12909_vm0 }
 0x359   :  { %v2312_v35 = vrot.slane %v2300_v57, 7  ;;  %v2299_v16 = vmul.f32 %v9797_v46, %v2287_v18  ;;  %v2290_v9 = vmax.f32 %v2276_v44, 0.0  ;;  %v2271_v49 = vadd.f32 %v2270_v47, %v2146_v40  ;;  %vm12925_vm1 = vmmov %vm12909_vm0 }
 0x35a   :  { %v9932_v34 = vsel %vm12919_vm14, %v2308_v56, %v2309_v10  ;;  %v9936_v5 = vsel %vm12920_vm3, %v2331_v28, %v2332_v12  ;;  %v9940_v40 = vsel %vm12921_vm6, %v2355_v20, %v2356_v26  ;;  %v9944_v3 = vsel %vm12922_vm10, %v2332_v12, %v2333_v61  ;;  %vm12926_vm12 = vmmov %vm12909_vm0 }
 0x35b   :  { %v2311_v42 = vrot.slane %v2299_v16, 7  ;;  %v2302_v43 = vmul.f32 %v9807_v37, %v2290_v9  ;;  %v2289_v62 = vmax.f32 %v2271_v49, 0.0  ;;  %v9948_v4 = vsel %vm12923_vm5, %v2356_v26, %v2357_v0  ;;  %vm12927_vm13 = vmmov %vm12920_vm3  ;;  %v5545_v26 = vld [vmem:[%s12686_s4 + $0x6f8] sm:$0xff] }
 0x35c   :  { %v2334_v27 = vrot.slane %v9932_v34, 1  ;;  %v2358_v7 = vrot.slane %v9932_v34, 2  ;;  %v9955_v19 = vsel %vm12924_vm2, %v2309_v10, %v2310_v2  ;;  %vm12928_vm4 = vmmov %vm12923_vm5 }
 0x35d   :  { %v2314_v45 = vrot.slane %v2302_v43, 7  ;;  %v2301_v53 = vmul.f32 %v9914_v17, %v2289_v62  ;;  %v9959_v23 = vsel %vm12909_vm0, %v2310_v2, %v2311_v42  ;;  %v9963_v59 = vsel %vm12925_vm1, %v2311_v42, %v2312_v35  ;;  %vm12929_vm7 = vmmov %vm12909_vm0  ;;  %v5560_v42 = vld [vmem:[%s12686_s4 + $0x770] sm:$0xff]  ;;  %v5577_v43 = vld [vmem:[%s12686_s4 + $0x7f8] sm:$0xff] }
 0x35e   :  { %v9973_v20 = vsel %vm12927_vm13, %v2333_v61, %v2334_v27  ;;  %v9977_v56 = vsel %vm12928_vm4, %v2357_v0, %v2358_v7  ;;  %v2335_v8 = vrot.slane %v9955_v19, 1  ;;  %v2359_v41 = vrot.slane %v9955_v19, 2  ;;  %vm12930_vm15 = vmmov %vm12920_vm3 }
 0x35f   :  { %v2313_v63 = vrot.slane %v2301_v53, 7  ;;  %v9969_v28 = vsel %vm12926_vm12, %v2314_v45, %v2303_v48  ;;  %v2336_v48 = vrot.slane %v9959_v23, 1  ;;  %v2360_v21 = vrot.slane %v9959_v23, 2  ;;  %vm12931_vm8 = vmmov %vm12928_vm4  ;;  %v5544_v53 = vld [vmem:[%s12686_s4 + $0x6f0] sm:$0xff] }
 0x360   :  { %2717 = vmatprep.mubr.f32.mxu1 %v9969_v28  ;;  %v2337_v25 = vrot.slane %v9963_v59, 1  ;;  %v2328_v57 = vrot.slane %v9969_v28, 1  ;;  %v2352_v44 = vrot.slane %v9969_v28, 2  ;;  %v9995_v2 = vsel %vm12930_vm15, %v2334_v27, %v2335_v8  ;;  %vm12932_vm11 = vmmov %vm12920_vm3 }
 0x361   :  { %v9984_v51 = vsel %vm12929_vm7, %v2313_v63, %v2314_v45  ;;  %v9999_v47 = vsel %vm12931_vm8, %v2358_v7, %v2359_v41  ;;  %v10003_v16 = vsel %vm12932_vm11, %v2335_v8, %v2336_v48  ;;  %vm12933_vm9 = vmmov %vm12928_vm4  ;;  %v2361_v0 = vrot.slane %v9963_v59, 2 }
 0x362   :  { %v2327_v10 = vrot.slane %v9984_v51, 1  ;;  %v2351_v18 = vrot.slane %v9984_v51, 2  ;;  %v10007_v9 = vsel %vm12933_vm9, %v2359_v41, %v2360_v21  ;;  %vm12934_vm14 = vmmov %vm12920_vm3 }
 0x363   :  { %vm12935_vm3 = vmmov %vm12928_vm4 }
 0x364   :  { %v10013_v49 = vsel %vm12934_vm14, %v2327_v10, %v2328_v57  ;;  %v10019_v12 = vsel %vm12935_vm3, %v2351_v18, %v2352_v44  ;;  %vm12936_vm6 = vmmov %vm12922_vm10 }
 0x365   :  { %v10026_v61 = vsel %vm12936_vm6, %v2336_v48, %v2337_v25  ;;  %2592 = vmatprep.mubr.f32.mxu0 %v10013_v49  ;;  %2718 = vmatmul.mubr.f32.vlgmr.msra.gmra.mxu1 %v10019_v12  ;;  %vm12937_vm10 = vmmov %vm12909_vm0  ;;  %v5592_v48 = vld [vmem:[%s12686_s4 + $0x870] sm:$0xff] }
 0x366   :  { %v10039_v62 = vsel %vm12937_vm10, %v2312_v35, %v2313_v63  ;;  %2593 = vmatmul.mubr.f32.vlgmr.msra.gmra.mxu0 %v9984_v51  ;;  %2722 = vmatprep.mubr.f32.mxu1 %v9866_v39  ;;  %vm12938_vm5 = vmmov %vm12936_vm6  ;;  %v5559_v63 = vld [vmem:[%s12686_s4 + $0x768] sm:$0xff] }
 0x367   :  { %v10047_v45 = vsel %vm12938_vm5, %v2328_v57, %v2329_v50  ;;  %vm12939_vm2 = vmmov %vm12935_vm3  ;;  %v2338_v35 = vrot.slane %v10039_v62, 1  ;;  %v2362_v7 = vrot.slane %v10039_v62, 2  ;;  %6449 = vmatpush3.msra.mxu0 %v5545_v26  ;;  %6517 = vmatpush3.msra.mxu1 %v5577_v43  ;;  %v5557_v57 = vld [vmem:[%s12686_s4 + $0x758] sm:$0xff]  ;;  %v5591_v43 = vld [vmem:[%s12686_s4 + $0x868] sm:$0xff] }
 0x368   :  { %v10054_v27 = vsel %vm12939_vm2, %v2360_v21, %v2361_v0  ;;  %2597 = vmatprep.mubr.f32.mxu0 %v10047_v45  ;;  %6450 = vmatprep.subr.mxu0 %v5560_v42  ;;  %vm12940_vm0 = vmmov %vm12939_vm2  ;;  %v5558_v21 = vld [vmem:[%s12686_s4 + $0x760] sm:$0xff]  ;;  %v5541_v26 = vld [vmem:[%s12686_s4 + $0x6d8] sm:$0xff] }
 0x369   :  { %v10063_v50 = vsel %vm12940_vm0, %v2352_v44, %v2353_v6  ;;  %vm12941_vm1 = vmmov %vm12938_vm5  ;;  %6451 = vmatpush3.msra.mxu0 %v5544_v53  ;;  %v5543_v6 = vld [vmem:[%s12686_s4 + $0x6e8] sm:$0xff]  ;;  %6518 = vmatprep.subr.mxu1 %v5592_v48  ;;  %v5576_v44 = vld [vmem:[%s12686_s4 + $0x7f0] sm:$0xff] }
 0x36a   :  { %v10072_v8 = vsel %vm12941_vm1, %v2337_v25, %v2338_v35  ;;  %vm12942_vm12 = vmmov %vm12940_vm0  ;;  %2723 = vmatmul.mubr.f32.gmra.mxu1 %v10063_v50  ;;  %2598 = vmatmul.mubr.f32.gmra.mxu0 %v9969_v28  ;;  %v5542_v25 = vld [vmem:[%s12686_s4 + $0x6e0] sm:$0xff]  ;;  %v5540_v42 = vld [vmem:[%s12686_s4 + $0x6d0] sm:$0xff] }
 0x36b   :  { %v10078_v41 = vsel %vm12942_vm12, %v2361_v0, %v2362_v7  ;;  %2727 = vmatprep.mubr.f32.mxu1 %v9876_v54  ;;  %2602 = vmatprep.mubr.f32.mxu0 %v9896_v1  ;;  %v5556_v0 = vld [vmem:[%s12686_s4 + $0x750] sm:$0xff]  ;;  %v5555_v53 = vld [vmem:[%s12686_s4 + $0x748] sm:$0xff]  ;;  %vm12943_vm13 = vmmov %vm12941_vm1 }
 0x36c   :  { %6452 = vmatprep.subr.mxu0 %v5559_v63  ;;  %6519 = vmatpush3.msra.mxu1 %v5576_v44  ;;  %v5539_v63 = vld [vmem:[%s12686_s4 + $0x6c8] sm:$0xff]  ;;  %v5553_v44 = vld [vmem:[%s12686_s4 + $0x738] sm:$0xff]  ;;  %vm12944_vm4 = vmmov %vm12940_vm0 }
 0x36d   :  { %6453 = vmatpush3.msra.mxu0 %v5543_v6  ;;  %6520 = vmatprep.subr.mxu1 %v5591_v43  ;;  %v5554_v6 = vld [vmem:[%s12686_s4 + $0x740] sm:$0xff]  ;;  %v5575_v48 = vld [vmem:[%s12686_s4 + $0x7e8] sm:$0xff]  ;;  %v5588_v43 = vld [vmem:[%s12686_s4 + $0x850] sm:$0xff] }
 0x36e   :  { %2728 = vmatmul.mubr.f32.gmra.mxu1 %v9902_v24  ;;  %6454 = vmatprep.subr.mxu0 %v5558_v21  ;;  %v5538_v21 = vld [vmem:[%s12686_s4 + $0x6c0] sm:$0xff]  ;;  %vm12969_vm15 = vmmov %vm12929_vm7 }
 0x36f   :  { %2603 = vmatmul.mubr.f32.gmra.mxu0 %v9866_v39  ;;  %2732 = vmatprep.mubr.f32.mxu1 %v9880_v55  ;;  %vm12970_vm8 = vmmov %vm12929_vm7 }
 0x370   :  { %2607 = vmatprep.mubr.f32.mxu0 %v9906_v38  ;;  %6455 = vmatpush3.msra.mxu0 %v5542_v25  ;;  %v5590_v25 = vld [vmem:[%s12686_s4 + $0x860] sm:$0xff]  ;;  %vm12971_vm11 = vmmov %vm12941_vm1 }
 0x371   :  { %6456 = vmatprep.subr.mxu0 %v5557_v57  ;;  %6521 = vmatpush3.msra.mxu1 %v5575_v48  ;;  %v5574_v57 = vld [vmem:[%s12686_s4 + $0x7e0] sm:$0xff]  ;;  %v5587_v48 = vld [vmem:[%s12686_s4 + $0x848] sm:$0xff]  ;;  %vm12972_vm9 = vmmov %vm12940_vm0 }
 0x372   :  { %2733 = vmatmul.mubr.f32.gmra.mxu1 %v9910_v58  ;;  %6457 = vmatpush3.msra.mxu0 %v5541_v26  ;;  %v5589_v26 = vld [vmem:[%s12686_s4 + $0x858] sm:$0xff]  ;;  %vm12975_vm14 = vmmov %vm12941_vm1 }
 0x373   :  { %2608 = vmatmul.mubr.f32.gmra.mxu0 %v9876_v54  ;;  %2737 = vmatprep.mubr.f32.mxu1 %v9918_v13  ;;  %vm12976_vm3 = vmmov %vm12940_vm0 }
 0x374   :  { %2612 = vmatprep.mubr.f32.mxu0 %v9936_v5  ;;  %6458 = vmatprep.subr.mxu0 %v5556_v0  ;;  %v5537_v0 = vld [vmem:[%s12686_s4 + $0x6b8] sm:$0xff]  ;;  %vm12977_vm6 = vmmov %vm12929_vm7 }
 0x375   :  { %6459 = vmatpush3.msra.mxu0 %v5540_v42  ;;  %6522 = vmatprep.subr.mxu1 %v5590_v25  ;;  %v5573_v42 = vld [vmem:[%s12686_s4 + $0x7d8] sm:$0xff]  ;;  %v5551_v25 = vld [vmem:[%s12686_s4 + $0x728] sm:$0xff]  ;;  %vm12978_vm10 = vmmov %vm12977_vm6 }
 0x376   :  { %2738 = vmatmul.mubr.f32.gmra.mxu1 %v9940_v40  ;;  %6460 = vmatprep.subr.mxu0 %v5555_v53  ;;  %v5552_v53 = vld [vmem:[%s12686_s4 + $0x730] sm:$0xff]  ;;  %vm12981_vm5 = vmmov %vm12941_vm1 }
 0x377   :  { %2613 = vmatmul.mubr.f32.gmra.mxu0 %v9880_v55  ;;  %2742 = vmatprep.mubr.f32.mxu1 %v9922_v22  ;;  %vm12982_vm2 = vmmov %vm12940_vm0 }
 0x378   :  { %2617 = vmatprep.mubr.f32.mxu0 %v9944_v3  ;;  %6461 = vmatpush3.msra.mxu0 %v5539_v63  ;;  %v5572_v63 = vld [vmem:[%s12686_s4 + $0x7d0] sm:$0xff]  ;;  %vm12983_vm0 = vmmov %vm12941_vm1 }
 0x379   :  { %6462 = vmatprep.subr.mxu0 %v5554_v6  ;;  %6523 = vmatpush3.msra.mxu1 %v5574_v57  ;;  %v5536_v6 = vld [vmem:[%s12686_s4 + $0x6b0] sm:$0xff]  ;;  %v5586_v57 = vld [vmem:[%s12686_s4 + $0x840] sm:$0xff]  ;;  %vm12984_vm1 = vmmov %vm12982_vm2 }
 0x37a   :  { %2743 = vmatmul.mubr.f32.gmra.mxu1 %v9948_v4  ;;  %6463 = vmatpush3.msra.mxu0 %v5538_v21  ;;  %v5571_v21 = vld [vmem:[%s12686_s4 + $0x7c8] sm:$0xff]  ;;  %vm12985_vm12 = vmmov %vm12977_vm6 }
 0x37b   :  { %2618 = vmatmul.mubr.f32.gmra.mxu0 %v9918_v13  ;;  %2747 = vmatprep.mubr.f32.mxu1 %v9932_v34 }
 0x37c   :  { %2622 = vmatprep.mubr.f32.mxu0 %v9973_v20  ;;  %6464 = vmatprep.subr.mxu0 %v5553_v44  ;;  %v5535_v44 = vld [vmem:[%s12686_s4 + $0x6a8] sm:$0xff] }
 0x37d   :  { %6524 = vmatprep.subr.mxu1 %v5589_v26  ;;  %6465 = vmatpush3.msra.mxu0 %v5537_v0  ;;  %v5570_v26 = vld [vmem:[%s12686_s4 + $0x7c0] sm:$0xff]  ;;  %v5585_v0 = vld [vmem:[%s12686_s4 + $0x838] sm:$0xff] }
 0x37e   :  { %2748 = vmatmul.mubr.f32.gmra.mxu1 %v9977_v56  ;;  %6466 = vmatprep.subr.mxu0 %v5552_v53  ;;  %v5534_v53 = vld [vmem:[%s12686_s4 + $0x6a0] sm:$0xff] }
 0x37f   :  { %2623 = vmatmul.mubr.f32.gmra.mxu0 %v9922_v22  ;;  %2752 = vmatprep.mubr.f32.mxu1 %v9955_v19 }
 0x380   :  { %6525 = vmatpush3.msra.mxu1 %v5573_v42  ;;  %2627 = vmatprep.mubr.f32.mxu0 %v9995_v2  ;;  %v5550_v42 = vld [vmem:[%s12686_s4 + $0x720] sm:$0xff] }
 0x381   :  { %6526 = vmatprep.subr.mxu1 %v5588_v43  ;;  %6467 = vmatpush3.msra.mxu0 %v5536_v6  ;;  %v5569_v43 = vld [vmem:[%s12686_s4 + $0x7b8] sm:$0xff]  ;;  %v5568_v6 = vld [vmem:[%s12686_s4 + $0x7b0] sm:$0xff] }
 0x382   :  { %6527 = vmatpush3.msra.mxu1 %v5572_v63  ;;  %6468 = vmatprep.subr.mxu0 %v5551_v25  ;;  %v5584_v63 = vld [vmem:[%s12686_s4 + $0x830] sm:$0xff]  ;;  %v5533_v25 = vld [vmem:[%s12686_s4 + $0x698] sm:$0xff] }
 0x383   :  { %2753 = vmatmul.mubr.f32.gmra.mxu1 %v9999_v47  ;;  %6528 = vmatprep.subr.mxu1 %v5587_v48  ;;  %v5549_v48 = vld [vmem:[%s12686_s4 + $0x718] sm:$0xff] }
 0x384   :  { %2628 = vmatmul.mubr.f32.gmra.mxu0 %v9932_v34  ;;  %2757 = vmatprep.mubr.f32.mxu1 %v9959_v23 }
 0x385   :  { %6529 = vmatpush3.msra.mxu1 %v5571_v21  ;;  %2632 = vmatprep.mubr.f32.mxu0 %v10003_v16  ;;  %v5583_v21 = vld [vmem:[%s12686_s4 + $0x828] sm:$0xff] }
 0x386   :  { %6530 = vmatprep.subr.mxu1 %v5586_v57  ;;  %6469 = vmatpush3.msra.mxu0 %v5535_v44  ;;  %v5567_v57 = vld [vmem:[%s12686_s4 + $0x7a8] sm:$0xff]  ;;  %v5582_v44 = vld [vmem:[%s12686_s4 + $0x820] sm:$0xff] }
 0x387   :  { %6531 = vmatpush3.msra.mxu1 %v5570_v26  ;;  %6470 = vmatprep.subr.mxu0 %v5550_v42  ;;  %v5548_v26 = vld [vmem:[%s12686_s4 + $0x710] sm:$0xff] }
 0x388   :  { %2633 = vmatmul.mubr.f32.gmra.mxu0 %v9955_v19  ;;  %2758 = vmatmul.mubr.f32.gmra.mxu1 %v10007_v9  ;;  %v5532_v42 = vld [vmem:[%s12686_s4 + $0x690] sm:$0xff] }
 0x389   :  { %6532 = vmatprep.subr.mxu1 %v5585_v0  ;;  %2762 = vmatprep.mubr.f32.mxu1 %v9963_v59  ;;  %v5566_v0 = vld [vmem:[%s12686_s4 + $0x7a0] sm:$0xff] }
 0x38a   :  { %6533 = vmatpush3.msra.mxu1 %v5569_v43  ;;  %2637 = vmatprep.mubr.f32.mxu0 %v10026_v61  ;;  %v5581_v43 = vld [vmem:[%s12686_s4 + $0x818] sm:$0xff] }
 0x38b   :  { %6471 = vmatpush3.msra.mxu0 %v5534_v53  ;;  %6534 = vmatprep.subr.mxu1 %v5584_v63  ;;  %v5565_v53 = vld [vmem:[%s12686_s4 + $0x798] sm:$0xff]  ;;  %v5547_v63 = vld [vmem:[%s12686_s4 + $0x708] sm:$0xff] }
 0x38c   :  { %6535 = vmatpush3.msra.mxu1 %v5568_v6  ;;  %6472 = vmatprep.subr.mxu0 %v5549_v48  ;;  %v5580_v6 = vld [vmem:[%s12686_s4 + $0x810] sm:$0xff]  ;;  %v5531_v48 = vld [vmem:[%s12686_s4 + $0x688] sm:$0xff] }
 0x38d   :  { %2763 = vmatmul.mubr.f32.gmra.mxu1 %v10054_v27  ;;  %6536 = vmatprep.subr.mxu1 %v5583_v21  ;;  %v10275_v21 = vsel %vm12943_vm13, %v2338_v35, %v2327_v10  ;;  %v5563_v10 = vld [vmem:[%s12686_s4 + $0x788] sm:$0xff]  ;;  %v10296_v35 = vsel %vm12944_vm4, %v2362_v7, %v2351_v18  ;;  %v5562_v18 = vld [vmem:[%s12686_s4 + $0x780] sm:$0xff]  ;;  %v5609_v7 = vld [vmem:[%s12686_s4 + $0x8f8] sm:$0xff] }
 0x38e   :  { %2638 = vmatmul.mubr.f32.gmra.mxu0 %v9959_v23  ;;  %2767 = vmatprep.mubr.f32.mxu1 %v10039_v62  ;;  %vm12987_vm13 = vmmov %vm12977_vm6 }
 0x38f   :  { %6473 = vmatpush3.msra.mxu0 %v5533_v25  ;;  %6537 = vmatpush3.msra.mxu1 %v5567_v57  ;;  %v5564_v25 = vld [vmem:[%s12686_s4 + $0x790] sm:$0xff]  ;;  %v5579_v57 = vld [vmem:[%s12686_s4 + $0x808] sm:$0xff]  ;;  %vm12989_vm4 = vmmov %vm12983_vm0 }
 0x390   :  { %2642 = vmatprep.mubr.f32.mxu0 %v10072_v8  ;;  %6538 = vmatprep.subr.mxu1 %v5582_v44  ;;  %v5546_v44 = vld [vmem:[%s12686_s4 + $0x700] sm:$0xff] }
 0x391   :  { %6474 = vmatprep.subr.mxu0 %v5548_v26  ;;  %6539 = vmatpush3.msra.mxu1 %v5566_v0  ;;  %v5530_v26 = vld [vmem:[%s12686_s4 + $0x680] sm:$0xff] }
 0x392   :  { %2768 = vmatmul.mubr.f32.gmra.mxu1 %v10078_v41  ;;  %6475 = vmatpush3.msra.mxu0 %v5532_v42  ;;  %v5578_v0 = vld [vmem:[%s12686_s4 + $0x800] sm:$0xff]  ;;  %v5608_v42 = vld [vmem:[%s12686_s4 + $0x8f0] sm:$0xff] }
 0x393   :  { %6540 = vmatprep.subr.mxu1 %v5581_v43  ;;  %2643 = vmatmul.mubr.f32.gmra.mxu0 %v9963_v59  ;;  %v5607_v43 = vld [vmem:[%s12686_s4 + $0x8e8] sm:$0xff] }
 0x394   :  { %2772 = vmatprep.mubr.f32.mxu1 %v9984_v51  ;;  %6541 = vmatpush3.msra.mxu1 %v5565_v53  ;;  %v5621_v53 = vld [vmem:[%s12686_s4 + $0x948] sm:$0xff] }
 0x395   :  { %2647 = vmatprep.mubr.f32.mxu0 %v10275_v21  ;;  %6476 = vmatprep.subr.mxu0 %v5547_v63  ;;  %v5671_v63 = vld [vmem:[%s12686_s4 + $0xad8] sm:$0xff] }
 0x396   :  { %6542 = vmatprep.subr.mxu1 %v5580_v6  ;;  %6477 = vmatpush3.msra.mxu0 %v5531_v48  ;;  %v5655_v6 = vld [vmem:[%s12686_s4 + $0xa58] sm:$0xff]  ;;  %v5636_v48 = vld [vmem:[%s12686_s4 + $0x9c0] sm:$0xff] }
 0x397   :  { %6543 = vmatpush3.msra.mxu1 %v5564_v25  ;;  %2648 = vmatmul.mubr.f32.gmra.mxu0 %v10039_v62  ;;  %v5670_v25 = vld [vmem:[%s12686_s4 + $0xad0] sm:$0xff] }
 0x398   :  { %2773 = vmatmul.mubr.f32.gmra.mxu1 %v10296_v35  ;;  %6544 = vmatprep.subr.mxu1 %v5579_v57  ;;  %v5654_v57 = vld [vmem:[%s12686_s4 + $0xa50] sm:$0xff] }
 0x399   :  { %6478 = vmatprep.subr.mxu0 %v5546_v44  ;;  %6545 = vmatpush3.msra.mxu1 %v5563_v10  ;;  %v5635_v44 = vld [vmem:[%s12686_s4 + $0x9b8] sm:$0xff]  ;;  %v5669_v10 = vld [vmem:[%s12686_s4 + $0xac8] sm:$0xff] }
 0x39a   :  { %2967 = vmatprep.mubr.f32.mxu1 %v9896_v1  ;;  %6479 = vmatpush3.msra.mxu0 %v5530_v26  ;;  %v5619_v26 = vld [vmem:[%s12686_s4 + $0x938] sm:$0xff] }
 0x39b   :  { %2842 = vmatprep.mubr.f32.mxu0 %v10063_v50  ;;  %6546 = vmatprep.subr.mxu1 %v5578_v0  ;;  %v5668_v0 = vld [vmem:[%s12686_s4 + $0xac0] sm:$0xff] }
 0x39c   :  { %6547 = vmatpush3.msra.mxu1 %v5562_v18  ;;  %7312 = vmatprep.subr.mxu0 %v5609_v7  ;;  %v5652_v18 = vld [vmem:[%s12686_s4 + $0xa40] sm:$0xff] }
 0x39d   :  { %2968 = vmatmul.mubr.f32.vlgmr.msra.gmra.mxu1 %v9866_v39  ;;  %2843 = vmatmul.mubr.f32.vlgmr.msra.gmra.mxu0 %v10047_v45  ;;  %v5606_v39 = vld [vmem:[%s12686_s4 + $0x8e0] sm:$0xff] }
 0x39e   :  { %2972 = vmatprep.mubr.f32.mxu1 %v9906_v38  ;;  %7313 = vmatpush3.msra.mxu0 %v5609_v7  ;;  %v5634_v7 = vld [vmem:[%s12686_s4 + $0x9b0] sm:$0xff] }
 0x39f   :  { %2847 = vmatprep.mubr.f32.mxu0 %v9902_v24  ;;  %7314 = vmatprep.subr.mxu0 %v5608_v42 }
 0x3a0   :  { %7315 = vmatpush3.msra.mxu0 %v5608_v42  ;;  %v5618_v42 = vld [vmem:[%s12686_s4 + $0x930] sm:$0xff] }
 0x3a1   :  { %2973 = vmatmul.mubr.f32.gmra.mxu1 %v9876_v54  ;;  %2848 = vmatmul.mubr.f32.gmra.mxu0 %v9896_v1  ;;  %v5605_v54 = vld [vmem:[%s12686_s4 + $0x8d8] sm:$0xff]  ;;  %v5604_v1 = vld [vmem:[%s12686_s4 + $0x8d0] sm:$0xff] }
 0x3a2   :  { %2977 = vmatprep.mubr.f32.mxu1 %v9936_v5  ;;  %2852 = vmatprep.mubr.f32.mxu0 %v9910_v58 }
 0x3a3   :  { %7316 = vmatprep.subr.mxu0 %v5607_v43 }
 0x3a4   :  { %7317 = vmatpush3.msra.mxu0 %v5607_v43  ;;  %v5667_v43 = vld [vmem:[%s12686_s4 + $0xab8] sm:$0xff] }
 0x3a5   :  { %2978 = vmatmul.mubr.f32.gmra.mxu1 %v9880_v55  ;;  %2853 = vmatmul.mubr.f32.gmra.mxu0 %v9906_v38  ;;  %v5603_v55 = vld [vmem:[%s12686_s4 + $0x8c8] sm:$0xff]  ;;  %v5602_v38 = vld [vmem:[%s12686_s4 + $0x8c0] sm:$0xff] }
 0x3a6   :  { %2982 = vmatprep.mubr.f32.mxu1 %v9944_v3  ;;  %7318 = vmatprep.subr.mxu0 %v5606_v39 }
 0x3a7   :  { %2857 = vmatprep.mubr.f32.mxu0 %v9940_v40  ;;  %7319 = vmatpush3.msra.mxu0 %v5606_v39  ;;  %v5651_v39 = vld [vmem:[%s12686_s4 + $0xa38] sm:$0xff] }
 0x3a8   :  { %7320 = vmatprep.subr.mxu0 %v5605_v54 }
 0x3a9   :  { %2983 = vmatmul.mubr.f32.gmra.mxu1 %v9918_v13  ;;  %2858 = vmatmul.mubr.f32.gmra.mxu0 %v9936_v5  ;;  %v5601_v13 = vld [vmem:[%s12686_s4 + $0x8b8] sm:$0xff]  ;;  %v5598_v5 = vld [vmem:[%s12686_s4 + $0x8a0] sm:$0xff] }
 0x3aa   :  { %2987 = vmatprep.mubr.f32.mxu1 %v9973_v20  ;;  %7321 = vmatpush3.msra.mxu0 %v5605_v54  ;;  %v5633_v54 = vld [vmem:[%s12686_s4 + $0x9a8] sm:$0xff] }
 0x3ab   :  { %2862 = vmatprep.mubr.f32.mxu0 %v9948_v4  ;;  %7322 = vmatprep.subr.mxu0 %v5604_v1 }
 0x3ac   :  { %7323 = vmatpush3.msra.mxu0 %v5604_v1  ;;  %v5666_v1 = vld [vmem:[%s12686_s4 + $0xab0] sm:$0xff] }
 0x3ad   :  { %2988 = vmatmul.mubr.f32.gmra.mxu1 %v9922_v22  ;;  %2863 = vmatmul.mubr.f32.gmra.mxu0 %v9944_v3  ;;  %v5600_v22 = vld [vmem:[%s12686_s4 + $0x8b0] sm:$0xff]  ;;  %v5597_v3 = vld [vmem:[%s12686_s4 + $0x898] sm:$0xff] }
 0x3ae   :  { %2992 = vmatprep.mubr.f32.mxu1 %v9995_v2  ;;  %2867 = vmatprep.mubr.f32.mxu0 %v9977_v56 }
 0x3af   :  { %7324 = vmatprep.subr.mxu0 %v5603_v55 }
 0x3b0   :  { %7325 = vmatpush3.msra.mxu0 %v5603_v55  ;;  %v5650_v55 = vld [vmem:[%s12686_s4 + $0xa30] sm:$0xff] }
 0x3b1   :  { %2993 = vmatmul.mubr.f32.gmra.mxu1 %v9932_v34  ;;  %2868 = vmatmul.mubr.f32.gmra.mxu0 %v9973_v20  ;;  %v5599_v34 = vld [vmem:[%s12686_s4 + $0x8a8] sm:$0xff] }
 0x3b2   :  { %2997 = vmatprep.mubr.f32.mxu1 %v10003_v16  ;;  %7326 = vmatprep.subr.mxu0 %v5602_v38  ;;  %v5625_v20 = vld [vmem:[%s12686_s4 + $0x968] sm:$0xff] }
 0x3b3   :  { %2872 = vmatprep.mubr.f32.mxu0 %v9999_v47  ;;  %7327 = vmatpush3.msra.mxu0 %v5602_v38  ;;  %v5617_v38 = vld [vmem:[%s12686_s4 + $0x928] sm:$0xff] }
 0x3b4   :  { %7328 = vmatprep.subr.mxu0 %v5601_v13 }
 0x3b5   :  { %2998 = vmatmul.mubr.f32.gmra.mxu1 %v9955_v19  ;;  %2873 = vmatmul.mubr.f32.gmra.mxu0 %v9995_v2  ;;  %v5596_v19 = vld [vmem:[%s12686_s4 + $0x890] sm:$0xff]  ;;  %v5639_v2 = vld [vmem:[%s12686_s4 + $0x9d8] sm:$0xff] }
 0x3b6   :  { %3002 = vmatprep.mubr.f32.mxu1 %v10026_v61  ;;  %7329 = vmatpush3.msra.mxu0 %v5601_v13  ;;  %v5665_v13 = vld [vmem:[%s12686_s4 + $0xaa8] sm:$0xff] }
 0x3b7   :  { %2877 = vmatprep.mubr.f32.mxu0 %v10007_v9  ;;  %7330 = vmatprep.subr.mxu0 %v5600_v22 }
 0x3b8   :  { %7331 = vmatpush3.msra.mxu0 %v5600_v22  ;;  %v5649_v22 = vld [vmem:[%s12686_s4 + $0xa28] sm:$0xff] }
 0x3b9   :  { %3003 = vmatmul.mubr.f32.gmra.mxu1 %v9959_v23  ;;  %2878 = vmatmul.mubr.f32.gmra.mxu0 %v10003_v16  ;;  %v5595_v23 = vld [vmem:[%s12686_s4 + $0x888] sm:$0xff]  ;;  %v5675_v16 = vld [vmem:[%s12686_s4 + $0xaf8] sm:$0xff] }
 0x3ba   :  { %3007 = vmatprep.mubr.f32.mxu1 %v10072_v8  ;;  %2882 = vmatprep.mubr.f32.mxu0 %v10054_v27 }
 0x3bb   :  { %7332 = vmatprep.subr.mxu0 %v5599_v34 }
 0x3bc   :  { %7333 = vmatpush3.msra.mxu0 %v5599_v34  ;;  %v5632_v34 = vld [vmem:[%s12686_s4 + $0x9a0] sm:$0xff] }
 0x3bd   :  { %3008 = vmatmul.mubr.f32.gmra.mxu1 %v9963_v59  ;;  %2883 = vmatmul.mubr.f32.gmra.mxu0 %v10026_v61  ;;  %v5594_v59 = vld [vmem:[%s12686_s4 + $0x880] sm:$0xff]  ;;  %v5638_v61 = vld [vmem:[%s12686_s4 + $0x9d0] sm:$0xff] }
 0x3be   :  { %3012 = vmatprep.mubr.f32.mxu1 %v10275_v21  ;;  %7334 = vmatprep.subr.mxu0 %v5598_v5 }
 0x3bf   :  { %2887 = vmatprep.mubr.f32.mxu0 %v10078_v41  ;;  %7335 = vmatpush3.msra.mxu0 %v5598_v5  ;;  %v5616_v5 = vld [vmem:[%s12686_s4 + $0x920] sm:$0xff] }
 0x3c0   :  { %7336 = vmatprep.subr.mxu0 %v5597_v3 }
 0x3c1   :  { %3013 = vmatmul.mubr.f32.gmra.mxu1 %v10039_v62  ;;  %2888 = vmatmul.mubr.f32.gmra.mxu0 %v10072_v8  ;;  %v5622_v62 = vld [vmem:[%s12686_s4 + $0x950] sm:$0xff]  ;;  %v5672_v8 = vld [vmem:[%s12686_s4 + $0xae0] sm:$0xff] }
 0x3c2   :  { %3017 = vmatprep.mubr.f32.mxu1 %v10013_v49  ;;  %7337 = vmatpush3.msra.mxu0 %v5597_v3  ;;  %v5664_v3 = vld [vmem:[%s12686_s4 + $0xaa0] sm:$0xff] }
 0x3c3   :  { %2892 = vmatprep.mubr.f32.mxu0 %v10296_v35  ;;  %7338 = vmatprep.subr.mxu0 %v5596_v19 }
 0x3c4   :  { %7339 = vmatpush3.msra.mxu0 %v5596_v19 }
 0x3c5   :  { %3018 = vmatmul.mubr.f32.gmra.mxu1 %v9984_v51  ;;  %2893 = vmatmul.mubr.f32.gmra.mxu0 %v10275_v21  ;;  %v5624_v51 = vld [vmem:[%s12686_s4 + $0x960] sm:$0xff] }
 0x3c6   :  { %3022 = vmatprep.mubr.f32.mxu1 %v10047_v45  ;;  %2897 = vmatprep.mubr.f32.mxu0 %v10019_v12  ;;  %v5673_v45 = vld [vmem:[%s12686_s4 + $0xae8] sm:$0xff]  ;;  %v5620_v21 = vld [vmem:[%s12686_s4 + $0x940] sm:$0xff] }
 0x3c7   :  { %7340 = vmatprep.subr.mxu0 %v5595_v23 }
 0x3c8   :  { %7341 = vmatpush3.msra.mxu0 %v5595_v23  ;;  %v5648_v23 = vld [vmem:[%s12686_s4 + $0xa20] sm:$0xff] }
 0x3c9   :  { %3023 = vmatmul.mubr.f32.gmra.mxu1 %v9969_v28  ;;  %2898 = vmatmul.mubr.f32.gmra.mxu0 %v10013_v49  ;;  %v5641_v28 = vld [vmem:[%s12686_s4 + $0x9e8] sm:$0xff]  ;;  %v5674_v49 = vld [vmem:[%s12686_s4 + $0xaf0] sm:$0xff] }
 0x3ca   :  { %7342 = vmatprep.subr.mxu0 %v5594_v59  ;;  %7344 = vmatprep.mubr.f32.mxu0 %v9902_v24  ;;  %v5643_v24 = vld [vmem:[%s12686_s4 + $0x9f8] sm:$0xff] }
 0x3cb   :  { %7343 = vmatpush3.msra.mxu0 %v5594_v59  ;;  %6612 = vmatprep.subr.mxu1 %v5643_v24  ;;  %v5631_v24 = vld [vmem:[%s12686_s4 + $0x998] sm:$0xff] }
 0x3cc   :  { %6680 = vmatprep.subr.mxu0 %v5675_v16  ;;  %v5630_v16 = vld [vmem:[%s12686_s4 + $0x990] sm:$0xff] }
 0x3cd   :  { %7345 = vmatmul.mubr.f32.vlgmr.msra.gmra.mxu0 %v9910_v58  ;;  %v5627_v58 = vld [vmem:[%s12686_s4 + $0x978] sm:$0xff] }
 0x3ce   :  { %7347 = vmatprep.mubr.f32.mxu0 %v9940_v40  ;;  %v5642_v40 = vld [vmem:[%s12686_s4 + $0x9f0] sm:$0xff]  ;;  %6613 = vmatpush3.msra.mxu1 %v5627_v58  ;;  %v5663_v58 = vld [vmem:[%s12686_s4 + $0xa98] sm:$0xff] }
 0x3cf   :  { %6614 = vmatprep.subr.mxu1 %v5642_v40 }
 0x3d1   :  { %7348 = vmatmul.mubr.f32.gmra.mxu0 %v9948_v4  ;;  %v5626_v4 = vld [vmem:[%s12686_s4 + $0x970] sm:$0xff] }
 0x3d2   :  { %7350 = vmatprep.mubr.f32.mxu0 %v9977_v56  ;;  %6615 = vmatpush3.msra.mxu1 %v5626_v4  ;;  %v5640_v56 = vld [vmem:[%s12686_s4 + $0x9e0] sm:$0xff]  ;;  %v5647_v4 = vld [vmem:[%s12686_s4 + $0xa18] sm:$0xff] }
 0x3d3   :  { %6616 = vmatprep.subr.mxu1 %v5641_v28  ;;  %v10573_v28 = vld [vmem:[%s12687_s5 + $0x1] ss:$0 sm:$0xff] }
 0x3d4   :  { %6617 = vmatpush3.msra.mxu1 %v5625_v20 }
 0x3d5   :  { %7351 = vmatmul.mubr.f32.gmra.mxu0 %v9999_v47  ;;  %6618 = vmatprep.subr.mxu1 %v5640_v56  ;;  %v5623_v47 = vld [vmem:[%s12686_s4 + $0x958] sm:$0xff] }
 0x3d6   :  { %7353 = vmatprep.mubr.f32.mxu0 %v10007_v9  ;;  %6619 = vmatpush3.msra.mxu1 %v5624_v51  ;;  %v5659_v9 = vld [vmem:[%s12686_s4 + $0xa78] sm:$0xff]  ;;  %v5662_v51 = vld [vmem:[%s12686_s4 + $0xa90] sm:$0xff] }
 0x3d7   :  { %6620 = vmatprep.subr.mxu1 %v5639_v2  ;;  %6681 = vmatpush3.msra.mxu0 %v5659_v9  ;;  %v5615_v56 = vld [vmem:[%s12686_s4 + $0x918] sm:$0xff]  ;;  %v5646_v9 = vld [vmem:[%s12686_s4 + $0xa10] sm:$0xff] }
 0x3d8   :  { %6621 = vmatpush3.msra.mxu1 %v5623_v47  ;;  %6682 = vmatprep.subr.mxu0 %v5674_v49 }
 0x3d9   :  { %7354 = vmatmul.mubr.f32.gmra.mxu0 %v10054_v27  ;;  %6622 = vmatprep.subr.mxu1 %v5638_v61  ;;  %v5657_v27 = vld [vmem:[%s12686_s4 + $0xa68] sm:$0xff] }
 0x3da   :  { %7356 = vmatprep.mubr.f32.mxu0 %v10078_v41  ;;  %6623 = vmatpush3.msra.mxu1 %v5622_v62  ;;  %v5656_v41 = vld [vmem:[%s12686_s4 + $0xa60] sm:$0xff]  ;;  %v5629_v61 = vld [vmem:[%s12686_s4 + $0x988] sm:$0xff] }
 0x3db   :  { %v5613_v62 = vld [vmem:[%s12686_s4 + $0x908] sm:$0xff] }
 0x3dd   :  { %7357 = vmatmul.mubr.f32.gmra.mxu0 %v10296_v35  ;;  %v5653_v35 = vld [vmem:[%s12686_s4 + $0xa48] sm:$0xff] }
 0x3de   :  { %7359 = vmatprep.mubr.f32.mxu0 %v10019_v12  ;;  %v5658_v12 = vld [vmem:[%s12686_s4 + $0xa70] sm:$0xff] }
 0x3df   :  { %6683 = vmatpush3.msra.mxu0 %v5658_v12  ;;  %v5614_v12 = vld [vmem:[%s12686_s4 + $0x910] sm:$0xff] }
 0x3e0   :  { %6684 = vmatprep.subr.mxu0 %v5673_v45 }
 0x3e1   :  { %7360 = vmatmul.mubr.f32.gmra.mxu0 %v10063_v50  ;;  %v5637_v50 = vld [vmem:[%s12686_s4 + $0x9c8] sm:$0xff] }
 0x3e2   :  { %6685 = vmatpush3.msra.mxu0 %v5657_v27  ;;  %6624 = vmatprep.subr.mxu1 %v5637_v50 }
 0x3e3   :  { %6686 = vmatprep.subr.mxu0 %v5672_v8  ;;  %6625 = vmatpush3.msra.mxu1 %v5621_v53  ;;  %v5661_v8 = vld [vmem:[%s12686_s4 + $0xa88] sm:$0xff] }
 0x3e4   :  { %6687 = vmatpush3.msra.mxu0 %v5656_v41  ;;  %6626 = vmatprep.subr.mxu1 %v5636_v48  ;;  %v5628_v41 = vld [vmem:[%s12686_s4 + $0x980] sm:$0xff]  ;;  %v5645_v53 = vld [vmem:[%s12686_s4 + $0xa08] sm:$0xff] }
 0x3e5   :  { %6688 = vmatprep.subr.mxu0 %v5671_v63  ;;  %6627 = vmatpush3.msra.mxu1 %v5620_v21  ;;  %v5660_v48 = vld [vmem:[%s12686_s4 + $0xa80] sm:$0xff] }
 0x3e6   :  { %6689 = vmatpush3.msra.mxu0 %v5655_v6  ;;  %6628 = vmatprep.subr.mxu1 %v5635_v44  ;;  %v5612_v6 = vld [vmem:[%s12686_s4 + $0x900] sm:$0xff] }
 0x3e7   :  { %6690 = vmatprep.subr.mxu0 %v5670_v25  ;;  %6629 = vmatpush3.msra.mxu1 %v5619_v26  ;;  %v5644_v21 = vld [vmem:[%s12686_s4 + $0xa00] sm:$0xff] }
 0x3e8   :  { %6691 = vmatpush3.msra.mxu0 %v5654_v57  ;;  %6630 = vmatprep.subr.mxu1 %v5634_v7 }
 0x3e9   :  { %6692 = vmatprep.subr.mxu0 %v5669_v10  ;;  %6631 = vmatpush3.msra.mxu1 %v5618_v42 }
 0x3ea   :  { %6693 = vmatpush3.msra.mxu0 %v5653_v35  ;;  %6632 = vmatprep.subr.mxu1 %v5633_v54  ;;  %v5707_v35 = vld [vmem:[%s12686_s4 + $0xbf8] sm:$0xff] }
 0x3eb   :  { %6694 = vmatprep.subr.mxu0 %v5668_v0  ;;  %6633 = vmatpush3.msra.mxu1 %v5617_v38 }
 0x3ec   :  { %6695 = vmatpush3.msra.mxu0 %v5652_v18  ;;  %6634 = vmatprep.subr.mxu1 %v5632_v34 }
 0x3ed   :  { %6696 = vmatprep.subr.mxu0 %v5667_v43  ;;  %6635 = vmatpush3.msra.mxu1 %v5616_v5 }
 0x3ee   :  { %6697 = vmatpush3.msra.mxu0 %v5651_v39  ;;  %6636 = vmatprep.subr.mxu1 %v5631_v24 }
 0x3ef   :  { %6698 = vmatprep.subr.mxu0 %v5666_v1  ;;  %6637 = vmatpush3.msra.mxu1 %v5615_v56 }
 0x3f0   :  { %6699 = vmatpush3.msra.mxu0 %v5650_v55  ;;  %6638 = vmatprep.subr.mxu1 %v5630_v16 }
 0x3f1   :  { %6700 = vmatprep.subr.mxu0 %v5665_v13  ;;  %6639 = vmatpush3.msra.mxu1 %v5614_v12 }
 0x3f2   :  { %6701 = vmatpush3.msra.mxu0 %v5649_v22  ;;  %6640 = vmatprep.subr.mxu1 %v5629_v61  ;;  %v5739_v61 = vld [vmem:[%s12686_s4 + $0xcf8] sm:$0xff] }
 0x3f3   :  { %6702 = vmatprep.subr.mxu0 %v5664_v3  ;;  %6641 = vmatpush3.msra.mxu1 %v5613_v62 }
 0x3f4   :  { %6703 = vmatpush3.msra.mxu0 %v5648_v23  ;;  %6642 = vmatprep.subr.mxu1 %v5628_v41 }
 0x3f5   :  { %6704 = vmatprep.subr.mxu0 %v5663_v58  ;;  %6643 = vmatpush3.msra.mxu1 %v5612_v6 }
 0x3f6   :  { %6705 = vmatpush3.msra.mxu0 %v5647_v4  ;;  %6748 = vmatprep.subr.mxu1 %v5707_v35 }
 0x3f7   :  { %6706 = vmatprep.subr.mxu0 %v5662_v51 }
 0x3f8   :  { %6707 = vmatpush3.msra.mxu0 %v5646_v9 }
 0x3f9   :  { %6708 = vmatprep.subr.mxu0 %v5661_v8 }
 0x3fa   :  { %6709 = vmatpush3.msra.mxu0 %v5645_v53 }
 0x3fb   :  { %6710 = vmatprep.subr.mxu0 %v5660_v48 }
 0x3fc   :  { %6711 = vmatpush3.msra.mxu0 %v5644_v21 }
 0x3fd   :  { %6816 = vmatprep.subr.mxu0 %v5739_v61 }
 0x425   :  { %v6412_v19 = vpop.f32.mrf.mxu1 }
 0x426   :  { %v6344_v59 = vpop.f32.mrf.mxu0 }
 0x427   :  { %v6413_v40 = vpop.f32.mrf.mxu1 }
 0x428   :  { %v6345_v20 = vpop.f32.mrf.mxu0  ;;  %v6414_v45 = vadd.f32 %v6413_v40, %v6412_v19 }
 0x429   :  { %v6346_v2 = vadd.f32 %v6345_v20, %v6344_v59 }
 0x42a   :  { %v6415_v47 = vpop.f32.mrf.mxu1  ;;  %v6347_v49 = vpop.f32.mrf.mxu0 }
 0x42b   :  { %v2595_v27 = vadd.f32 %v6346_v2, %v10573_v28 }
 0x42c   :  { %v6416_v50 = vpop.f32.mrf.mxu1  ;;  %v6348_v63 = vpop.f32.mrf.mxu0 }
 0x42d   :  { %v6349_v25 = vadd.f32 %v6348_v63, %v6347_v49  ;;  %v10615_v44 = vadd.f32 %v6414_v45, %v2595_v27  ;;  %v6417_v26 = vadd.f32 %v6416_v50, %v6415_v47 }
 0x42e   :  { %v6418_v57 = vpop.f32.mrf.mxu1 }
 0x42f   :  { %v6350_v10 = vpop.f32.mrf.mxu0  ;;  %v2600_v0 = vadd.f32 %v6349_v25, %v10573_v28 }
 0x430   :  { %v6419_v18 = vpop.f32.mrf.mxu1 }
 0x431   :  { %v6351_v7 = vpop.f32.mrf.mxu0  ;;  %v10621_v39 = vadd.f32 %v6417_v26, %v2600_v0  ;;  %v6420_v1 = vadd.f32 %v6419_v18, %v6418_v57 }
 0x432   :  { %v6352_v42 = vadd.f32 %v6351_v7, %v6350_v10  ;;  %v6421_v43 = vpop.f32.mrf.mxu1 }
 0x433   :  { %v6353_v54 = vpop.f32.mrf.mxu0 }
 0x434   :  { %v2605_v55 = vadd.f32 %v6352_v42, %v10573_v28  ;;  %v6422_v38 = vpop.f32.mrf.mxu1 }
 0x435   :  { %v6354_v13 = vpop.f32.mrf.mxu0  ;;  %v6423_v19 = vadd.f32 %v6422_v38, %v6421_v43 }
 0x436   :  { %v6355_v22 = vadd.f32 %v6354_v13, %v6353_v54  ;;  %v6424_v34 = vpop.f32.mrf.mxu1  ;;  %v10624_v5 = vadd.f32 %v6420_v1, %v2605_v55 }
 0x437   :  { %v6356_v3 = vpop.f32.mrf.mxu0 }
 0x438   :  { %v2610_v23 = vadd.f32 %v6355_v22, %v10573_v28  ;;  %v6425_v59 = vpop.f32.mrf.mxu1 }
 0x439   :  { %v6357_v24 = vpop.f32.mrf.mxu0  ;;  %v6426_v56 = vadd.f32 %v6425_v59, %v6424_v34 }
 0x43a   :  { %v6358_v58 = vadd.f32 %v6357_v24, %v6356_v3  ;;  %v6427_v40 = vpop.f32.mrf.mxu1  ;;  %v10627_v4 = vadd.f32 %v6423_v19, %v2610_v23 }
 0x43b   :  { %v6359_v20 = vpop.f32.mrf.mxu0 }
 0x43c   :  { %v2615_v51 = vadd.f32 %v6358_v58, %v10573_v28  ;;  %v6428_v2 = vpop.f32.mrf.mxu1 }
 0x43d   :  { %v6360_v47 = vpop.f32.mrf.mxu0  ;;  %v6429_v62 = vadd.f32 %v6428_v2, %v6427_v40 }
 0x43e   :  { %v6361_v16 = vadd.f32 %v6360_v47, %v6359_v20  ;;  %v6430_v9 = vpop.f32.mrf.mxu1  ;;  %v10630_v49 = vadd.f32 %v6426_v56, %v2615_v51 }
 0x43f   :  { %v6362_v12 = vpop.f32.mrf.mxu0 }
 0x440   :  { %v2620_v45 = vadd.f32 %v6361_v16, %v10573_v28  ;;  %v6431_v27 = vpop.f32.mrf.mxu1 }
 0x441   :  { %v6363_v50 = vpop.f32.mrf.mxu0  ;;  %v6432_v63 = vadd.f32 %v6431_v27, %v6430_v9 }
 0x442   :  { %v6364_v8 = vadd.f32 %v6363_v50, %v6362_v12  ;;  %v10636_v41 = vadd.f32 %v6429_v62, %v2620_v45 }
 0x443   :  { %v6433_v53 = vpop.f32.mrf.mxu1 }
 0x444   :  { %v2625_v6 = vadd.f32 %v6364_v8, %v10573_v28  ;;  %v6365_v48 = vpop.f32.mrf.mxu0 }
 0x445   :  { %v6434_v21 = vpop.f32.mrf.mxu1 }
 0x446   :  { %v6366_v25 = vpop.f32.mrf.mxu0  ;;  %v10639_v57 = vadd.f32 %v6432_v63, %v2625_v6  ;;  %v6435_v26 = vadd.f32 %v6434_v21, %v6433_v53 }
 0x447   :  { %v6367_v10 = vadd.f32 %v6366_v25, %v6365_v48 }
 0x448   :  { %12945 = vst [vmem:[#allocation19_spill] sm:$0xff] %v10639_v57  ;;  %v6368_v35 = vpop.f32.mrf.mxu0  ;;  %v6436_v18 = vpop.f32.mrf.mxu1 }
 0x449   :  { %v2630_v0 = vadd.f32 %v6367_v10, %v10573_v28 }
 0x44a   :  { %v6369_v7 = vpop.f32.mrf.mxu0  ;;  %v6437_v42 = vpop.f32.mrf.mxu1 }
 0x44b   :  { %v6370_v43 = vadd.f32 %v6369_v7, %v6368_v35  ;;  %v10642_v54 = vadd.f32 %v6435_v26, %v2630_v0  ;;  %v6438_v1 = vadd.f32 %v6437_v42, %v6436_v18 }
 0x44d   :  { %12946 = vst [vmem:[#allocation23_spill] sm:$0xff] %v10642_v54  ;;  %v2635_v55 = vadd.f32 %v6370_v43, %v10573_v28  ;;  %v6439_v38 = vpop.f32.mrf.mxu1 }
 0x44e   :  { %v6371_v13 = vpop.f32.mrf.mxu0 }
 0x44f   :  { %v2760_v22 = vadd.f32 %v6438_v1, %v2635_v55  ;;  %v6440_v34 = vpop.f32.mrf.mxu1 }
 0x450   :  { %v6372_v3 = vpop.f32.mrf.mxu0  ;;  %v6441_v59 = vadd.f32 %v6440_v34, %v6439_v38 }
 0x451   :  { %v6373_v19 = vadd.f32 %v6372_v3, %v6371_v13 }
 0x452   :  { %v10645_v23 = vpop.f32.mrf.mxu1 }
 0x453   :  { %v2640_v24 = vadd.f32 %v6373_v19, %v10573_v28  ;;  %v6374_v58 = vpop.f32.mrf.mxu0 }
 0x454   :  { %v10648_v40 = vpop.f32.mrf.mxu1 }
 0x455   :  { %v6375_v20 = vpop.f32.mrf.mxu0  ;;  %v2765_v56 = vadd.f32 %v6441_v59, %v2640_v24 }
 0x457   :  { %v6377_v51 = vpop.f32.mrf.mxu0 }
 0x458   :  { %v10650_v2 = vpop.f32.mrf.mxu1 }
 0x459   :  { %v6378_v47 = vpop.f32.mrf.mxu0 }
 0x45a   :  { %v10652_v16 = vpop.f32.mrf.mxu1  ;;  %v6379_v36 = vadd.f32 %v6378_v47, %v6377_v51 }
 0x45d   :  { %v6548_v9 = vpop.f32.mrf.mxu1  ;;  %v6480_v12 = vpop.f32.mrf.mxu0 }
 0x45f   :  { %v6549_v61 = vpop.f32.mrf.mxu1  ;;  %v6481_v62 = vpop.f32.mrf.mxu0 }
 0x460   :  { %v6482_v54 = vadd.f32 %v6481_v62, %v6480_v12 }
 0x461   :  { %v6551_v45 = vpop.f32.mrf.mxu1  ;;  %v6483_v27 = vpop.f32.mrf.mxu0 }
 0x463   :  { %v6552_v50 = vpop.f32.mrf.mxu1  ;;  %v6484_v8 = vpop.f32.mrf.mxu0 }
 0x464   :  { %v6485_v52 = vadd.f32 %v6484_v8, %v6483_v27 }
 0x465   :  { %v10654_v53 = vpop.f32.mrf.mxu1  ;;  %v6486_v63 = vpop.f32.mrf.mxu0 }
 0x467   :  { %v10656_v6 = vpop.f32.mrf.mxu1  ;;  %v6487_v48 = vpop.f32.mrf.mxu0 }
 0x469   :  { %v6557_v21 = vpop.f32.mrf.mxu1  ;;  %v6489_v25 = vpop.f32.mrf.mxu0 }
 0x46b   :  { %v6558_v10 = vpop.f32.mrf.mxu1  ;;  %v6490_v35 = vpop.f32.mrf.mxu0 }
 0x46c   :  { %v6559_v51 = vadd.f32 %v6558_v10, %v6557_v21 }
 0x46d   :  { %v10658_v26 = vpop.f32.mrf.mxu1  ;;  %v6492_v0 = vpop.f32.mrf.mxu0 }
 0x46f   :  { %v10660_v18 = vpop.f32.mrf.mxu1  ;;  %v6493_v7 = vpop.f32.mrf.mxu0 }
 0x470   :  { %v6494_v27 = vadd.f32 %v6493_v7, %v6492_v0 }
 0x471   :  { %v10662_v42 = vpop.f32.mrf.mxu1  ;;  %v6495_v43 = vpop.f32.mrf.mxu0 }
 0x473   :  { %v10664_v1 = vpop.f32.mrf.mxu1  ;;  %v6496_v55 = vpop.f32.mrf.mxu0 }
 0x474   :  { %v6565_v8 = vadd.f32 %v10664_v1, %v10662_v42 }
 0x475   :  { %v10666_v38 = vpop.f32.mrf.mxu1  ;;  %v6498_v13 = vpop.f32.mrf.mxu0 }
 0x476   :  { %12947 = vst [vmem:[#allocation25_spill] sm:$0xff] %v10666_v38  ;;  %v6491_v38 = vadd.f32 %v6490_v35, %v6489_v25  ;;  %v12957_v25 = vld [vmem:[#allocation19_spill] sm:$0xff] }
 0x477   :  { %v10668_v34 = vpop.f32.mrf.mxu1  ;;  %v6499_v3 = vpop.f32.mrf.mxu0  ;;  %v12958_v35 = vld [vmem:[#allocation23_spill] sm:$0xff] }
 0x478   :  { %12948 = vst [vmem:[#allocation10_spill] sm:$0xff] %v10668_v34  ;;  %v2860_v12 = vadd.f32 %v6491_v38, %v10627_v4  ;;  %v2865_v4 = vadd.f32 %v6494_v27, %v10630_v49  ;;  %v12954_v49 = vld [vmem:[#allocation32_spill] sm:$0xff] }
 0x479   :  { %v10670_v19 = vpop.f32.mrf.mxu1  ;;  %v6501_v59 = vpop.f32.mrf.mxu0 }
 0x47a   :  { %12949 = vst [vmem:[#allocation11_spill] sm:$0xff] %v10670_v19 }
 0x47b   :  { %v10672_v24 = vpop.f32.mrf.mxu1  ;;  %v6502_v11 = vpop.f32.mrf.mxu0 }
 0x47c   :  { %12950 = vst [vmem:[#allocation14_spill] sm:$0xff] %v10672_v24 }
 0x47d   :  { %v10674_v17 = vpop.f32.mrf.mxu1  ;;  %v6504_v37 = vpop.f32.mrf.mxu0 }
 0x47e   :  { %12951 = vst [vmem:[#allocation15_spill] sm:$0xff] %v10674_v17  ;;  %v2850_v17 = vadd.f32 %v6485_v52, %v10621_v39  ;;  %v6444_v52 = vadd.f32 %v10648_v40, %v10645_v23  ;;  %v6500_v23 = vadd.f32 %v6499_v3, %v6498_v13  ;;  %v6503_v40 = vadd.f32 %v6502_v11, %v6501_v59 }
 0x47f   :  { %v10676_v46 = vpop.f32.mrf.mxu1  ;;  %v6505_v60 = vpop.f32.mrf.mxu0 }
 0x480   :  { %12952 = vst [vmem:[#allocation12_spill] sm:$0xff] %v10676_v46  ;;  %v6506_v29 = vadd.f32 %v6505_v60, %v6504_v37  ;;  %v6376_v46 = vadd.f32 %v6375_v20, %v6374_v58  ;;  %v6553_v37 = vadd.f32 %v6552_v50, %v6551_v45  ;;  %v6447_v58 = vadd.f32 %v10652_v16, %v10650_v2 }
 0x481   :  { %v6507_v15 = vpop.f32.mrf.mxu0  ;;  %v10680_v31 = vpop.f32.mrf.mxu1  ;;  %v2875_v10 = vadd.f32 %v6500_v23, %v12957_v25  ;;  %v2880_v0 = vadd.f32 %v6503_v40, %v12958_v35  ;;  %v12959_v1 = vld [vmem:[#allocation11_spill] sm:$0xff] }
 0x482   :  { %v10678_v30 = vadd.f32 %v6506_v29, %v2760_v22  ;;  %v2845_v29 = vadd.f32 %v6482_v54, %v10615_v44  ;;  %v6488_v22 = vadd.f32 %v6487_v48, %v6486_v63  ;;  %v2645_v39 = vadd.f32 %v6376_v46, %v10573_v28  ;;  %v12956_v48 = vld [vmem:[#allocation10_spill] sm:$0xff] }
 0x483   :  { %v6508_v14 = vpop.f32.mrf.mxu0  ;;  %v6576_v57 = vpop.f32.mrf.mxu1  ;;  %v2650_v44 = vadd.f32 %v6379_v36, %v10573_v28  ;;  %v2985_v28 = vadd.f32 %v6559_v51, %v2860_v12  ;;  %v12960_v38 = vld [vmem:[#allocation14_spill] sm:$0xff] }
 0x484   :  { %12953 = vst [vmem:[#allocation13_spill] sm:$0xff] %v10678_v30  ;;  %v6509_v32 = vadd.f32 %v6508_v14, %v6507_v15  ;;  %v6550_v14 = vadd.f32 %v6549_v61, %v6548_v9  ;;  %v2855_v20 = vadd.f32 %v6488_v22, %v10624_v5  ;;  %v6562_v5 = vadd.f32 %v10660_v18, %v10658_v26  ;;  %v12963_v22 = vld [vmem:[#allocation33_spill] sm:$0xff] }
 0x485   :  { %v6510_v19 = vpop.f32.mrf.mxu0  ;;  %v6578_v30 = vpop.f32.mrf.mxu1  ;;  %v2770_v16 = vadd.f32 %v6444_v52, %v2645_v39  ;;  %v2775_v45 = vadd.f32 %v6447_v58, %v2650_v44  ;;  %v6571_v13 = vadd.f32 %v12960_v38, %v12959_v1  ;;  %v12961_v3 = vld [vmem:[#allocation15_spill] sm:$0xff]  ;;  %v6577_v12 = vadd.f32 %v6576_v57, %v10680_v31 }
 0x486   :  { %v10682_v24 = vadd.f32 %v6509_v32, %v2765_v56  ;;  %v6497_v32 = vadd.f32 %v6496_v55, %v6495_v43  ;;  %v2975_v56 = vadd.f32 %v6553_v37, %v2850_v17  ;;  %v2970_v61 = vadd.f32 %v6550_v14, %v2845_v29 }
 0x487   :  { %v6511_v34 = vpop.f32.mrf.mxu0  ;;  %v6579_v47 = vpop.f32.mrf.mxu1  ;;  %v6556_v17 = vadd.f32 %v10656_v6, %v10654_v53  ;;  %v2990_v18 = vadd.f32 %v6562_v5, %v2865_v4  ;;  %v12962_v59 = vld [vmem:[#allocation12_spill] sm:$0xff]  ;;  %v3005_v51 = vadd.f32 %v6571_v13, %v2880_v0  ;;  %v12974_v0 = vld [vmem:[#allocation38_spill] sm:$0xff] }
 0x488   :  { %v2870_v62 = vadd.f32 %v6497_v32, %v10636_v41  ;;  %v12955_v41 = vld [vmem:[#allocation25_spill] sm:$0xff]  ;;  %v6574_v29 = vadd.f32 %v12962_v59, %v12961_v3  ;;  %v6512_v37 = vadd.f32 %v6511_v34, %v6510_v19  ;;  %v3015_v57 = vadd.f32 %v6577_v12, %v10682_v24 }
 0x489   :  { %v10685_v60 = vpop.f32.mrf.mxu0  ;;  %v6581_v53 = vpop.f32.mrf.mxu1  ;;  %v2980_v6 = vadd.f32 %v6556_v17, %v2855_v20  ;;  %v6568_v21 = vadd.f32 %v12956_v48, %v12955_v41 }
 0x48a   :  { %v2995_v42 = vadd.f32 %v6565_v8, %v2870_v62  ;;  %v2895_v4 = vadd.f32 %v6512_v37, %v2770_v16 }
 0x48b   :  { %v6514_v15 = vpop.f32.mrf.mxu0  ;;  %v6582_v32 = vpop.f32.mrf.mxu1  ;;  %v12966_v34 = vld [vmem:[#allocation13_spill] sm:$0xff] }
 0x48c   :  { %v3010_v19 = vadd.f32 %v6574_v29, %v12966_v34  ;;  %v6583_v23 = vadd.f32 %v6582_v32, %v6581_v53 }
 0x48d   :  { %v7346_v54 = vpop.f32.mrf.mxu0 }
 0x48e   :  { %v3100_v9 = vadd.f32 %v7346_v54, %v2975_v56  ;;  %v12964_v56 = vld [vmem:[#allocation34_spill] sm:$0xff]  ;;  %v6580_v54 = vadd.f32 %v6579_v47, %v6578_v30 }
 0x48f   :  { %v3094_v46 = vpop.f32.mrf.mxu0 }
 0x490   :  { %v3154_v2 = vmul.f32 %v9683_v33, %v3100_v9  ;;  %v3095_v36 = vadd.f32 %v3094_v46, %v2970_v61  ;;  %v3000_v9 = vadd.f32 %v6568_v21, %v2875_v10  ;;  %v6515_v61 = vadd.f32 %v6514_v15, %v10685_v60  ;;  %v12967_v46 = vld [vmem:[#allocation35_spill] sm:$0xff]  ;;  %v12973_v10 = vld [vmem:[#allocation37_spill] sm:$0xff] }
 0x491   :  { %v7349_v50 = vpop.f32.mrf.mxu0 }
 0x492   :  { %v10706_v63 = vmul.f32 %v12954_v49, %v3095_v36  ;;  %v3110_v11 = vadd.f32 %v7349_v50, %v2985_v28  ;;  %v3166_v7 = vrot.slane %v3154_v2, 7  ;;  %v12968_v36 = vld [vmem:[#allocation36_spill] sm:$0xff]  ;;  %v2900_v8 = vadd.f32 %v6515_v61, %v2775_v45 }
 0x493   :  { %v3104_v26 = vpop.f32.mrf.mxu0 }
 0x494   :  { %v3165_v43 = vrot.slane %v10706_v63, 7  ;;  %v3105_v55 = vadd.f32 %v3104_v26, %v2980_v6  ;;  %v3156_v27 = vmul.f32 %v12963_v22, %v3110_v11  ;;  %v3025_v29 = vadd.f32 %v6583_v23, %v2900_v8  ;;  %v12986_v23 = vld [vmem:[#allocation41_spill] sm:$0xff] }
 0x495   :  { %v7352_v14 = vpop.f32.mrf.mxu0 }
 0x496   :  { %v3155_v52 = vmul.f32 %v12964_v56, %v3105_v55  ;;  %v3120_v39 = vadd.f32 %v7352_v14, %v2995_v42  ;;  %v10724_v44 = vsel %vm12929_vm7, %v3165_v43, %v3166_v7  ;;  %v3168_v40 = vrot.slane %v3156_v27, 7  ;;  %v12979_v27 = vld [vmem:[#allocation39_spill] sm:$0xff]  ;;  %vm12990_vm7 = vmmov %vm12984_vm1 }
 0x497   :  { %v3114_v20 = vpop.f32.mrf.mxu0  ;;  %v3191_v47 = vrot.slane %v10724_v44, 1  ;;  %v3215_v15 = vrot.slane %v10724_v44, 2  ;;  %v3020_v42 = vadd.f32 %v6580_v54, %v2895_v4 }
 0x498   :  { %v3167_v17 = vrot.slane %v3155_v52, 7  ;;  %v3115_v31 = vadd.f32 %v3114_v20, %v2990_v18  ;;  %v3158_v62 = vmul.f32 %v12967_v46, %v3120_v39  ;;  %v12980_v20 = vld [vmem:[#allocation40_spill] sm:$0xff] }
 0x499   :  { %v7355_v2 = vpop.f32.mrf.mxu0 }
 0x49a   :  { %v3157_v28 = vmul.f32 %v12968_v36, %v3115_v31  ;;  %v3130_v30 = vadd.f32 %v7355_v2, %v3005_v51  ;;  %v10734_v5 = vsel %vm12969_vm15, %v3166_v7, %v3167_v17  ;;  %v10741_v50 = vsel %vm12970_vm8, %v3167_v17, %v3168_v40  ;;  %vm12991_vm15 = vmmov %vm12977_vm6 }
 0x49b   :  { %v3124_v60 = vpop.f32.mrf.mxu0  ;;  %v3192_v24 = vrot.slane %v10734_v5, 1  ;;  %v3216_v16 = vrot.slane %v10734_v5, 2  ;;  %v3193_v6 = vrot.slane %v10741_v50, 1  ;;  %v3170_v41 = vrot.slane %v3158_v62, 7  ;;  %vm12992_vm8 = vmmov %vm12977_vm6 }
 0x49c   :  { %v3169_v53 = vrot.slane %v3157_v28, 7  ;;  %v3125_v11 = vadd.f32 %v3124_v60, %v3000_v9  ;;  %v3217_v45 = vrot.slane %v10741_v50, 2  ;;  %v3160_v35 = vmul.f32 %v12973_v10, %v3130_v30 }
 0x49d   :  { %v7358_v48 = vpop.f32.mrf.mxu0  ;;  %v10748_v21 = vsel %vm12971_vm11, %v3191_v47, %v3192_v24  ;;  %v10754_v25 = vsel %vm12972_vm9, %v3215_v15, %v3216_v16  ;;  %v10761_v7 = vsel %vm12975_vm14, %v3192_v24, %v3193_v6  ;;  %vm12993_vm11 = vmmov %vm12977_vm6 }
 0x49e   :  { %v3159_v26 = vmul.f32 %v12974_v0, %v3125_v11  ;;  %v3140_v18 = vadd.f32 %v7358_v48, %v3015_v57  ;;  %v10765_v1 = vsel %vm12976_vm3, %v3216_v16, %v3217_v45  ;;  %v10769_v38 = vsel %vm12977_vm6, %v3168_v40, %v3169_v53  ;;  %v12988_v16 = vld [vmem:[#allocation17_spill] sm:$0xff]  ;;  %vm12994_vm9 = vmmov %vm12983_vm0 }
 0x49f   :  { %v3134_v55 = vpop.f32.mrf.mxu0  ;;  %v10773_v13 = vsel %vm12978_vm10, %v3169_v53, %v3170_v41  ;;  %v3194_v37 = vrot.slane %v10769_v38, 1  ;;  %v3218_v32 = vrot.slane %v10769_v38, 2  ;;  %v3172_v54 = vrot.slane %v3160_v35, 7  ;;  %vm12995_vm14 = vmmov %vm12984_vm1 }
 0x4a0   :  { %v3171_v3 = vrot.slane %v3159_v26, 7  ;;  %v3135_v59 = vadd.f32 %v3134_v55, %v3010_v19  ;;  %v3162_v14 = vmul.f32 %v12979_v27, %v3140_v18  ;;  %v3195_v52 = vrot.slane %v10773_v13, 1  ;;  %vm12996_vm3 = vmmov %vm12977_vm6 }
 0x4a1   :  { %v7361_v12 = vpop.f32.mrf.mxu0  ;;  %v3219_v39 = vrot.slane %v10773_v13, 2  ;;  %v10783_v34 = vsel %vm12981_vm5, %v3193_v6, %v3194_v37  ;;  %v10787_v61 = vsel %vm12982_vm2, %v3217_v45, %v3218_v32  ;;  %vm12997_vm6 = vmmov %vm12983_vm0 }
 0x4a2   :  { %v3161_v51 = vmul.f32 %v12980_v20, %v3135_v59  ;;  %v3150_v9 = vadd.f32 %v7361_v12, %v3025_v29  ;;  %v10791_v17 = vsel %vm12983_vm0, %v3194_v37, %v3195_v52  ;;  %v10799_v57 = vsel %vm12985_vm12, %v3170_v41, %v3171_v3  ;;  %vm12998_vm10 = vmmov %vm12984_vm1 }
 0x4a3   :  { %v3144_v19 = vpop.f32.mrf.mxu0  ;;  %v10795_v31 = vsel %vm12984_vm1, %v3218_v32, %v3219_v39  ;;  %v3196_v2 = vrot.slane %v10799_v57, 1  ;;  %v3174_v28 = vrot.slane %v3162_v14, 7  ;;  %v3220_v30 = vrot.slane %v10799_v57, 2  ;;  %vm12999_vm5 = vmmov %vm12983_vm0 }
 0x4a4   :  { %v3173_v4 = vrot.slane %v3161_v51, 7  ;;  %v3164_v40 = vmul.f32 %v12986_v23, %v3150_v9  ;;  %v3145_v62 = vadd.f32 %v3144_v19, %v3020_v42  ;;  %v10806_v60 = vsel %vm12987_vm13, %v3171_v3, %v3172_v54  ;;  %vm13000_vm2 = vmmov %vm12984_vm1 }
 0x4a5   :  { %v10811_v53 = vsel %vm12989_vm4, %v3195_v52, %v3196_v2  ;;  %v3197_v11 = vrot.slane %v10806_v60, 1  ;;  %v10816_v6 = vsel %vm12990_vm7, %v3219_v39, %v3220_v30  ;;  %v3221_v41 = vrot.slane %v10806_v60, 2  ;;  %vm13001_vm0 = vmmov %vm12996_vm3 }
 0x4a6   :  { %v3176_v24 = vrot.slane %v3164_v40, 7  ;;  %v3163_v8 = vmul.f32 %v12988_v16, %v3145_v62  ;;  %v10821_v48 = vsel %vm12991_vm15, %v3172_v54, %v3173_v4  ;;  %v10825_v45 = vsel %vm12992_vm8, %v3173_v4, %v3174_v28  ;;  %vm13002_vm1 = vmmov %vm12989_vm4  ;;  %v5691_v4 = vld [vmem:[%s12686_s4 + $0xb78] sm:$0xff] }
 0x4a7   :  { %v10835_v18 = vsel %vm12994_vm9, %v3196_v2, %v3197_v11  ;;  %v3198_v55 = vrot.slane %v10821_v48, 1  ;;  %v10841_v42 = vsel %vm12995_vm14, %v3220_v30, %v3221_v41  ;;  %v3222_v3 = vrot.slane %v10821_v48, 2  ;;  %vm13003_vm12 = vmmov %vm13000_vm2  ;;  %v5706_v2 = vld [vmem:[%s12686_s4 + $0xbf0] sm:$0xff] }
 0x4a8   :  { %v3175_v35 = vrot.slane %v3163_v8, 7  ;;  %v10831_v26 = vsel %vm12993_vm11, %v3176_v24, %v3165_v43  ;;  %v3199_v59 = vrot.slane %v10825_v45, 1  ;;  %v3223_v29 = vrot.slane %v10825_v45, 2  ;;  %vm13004_vm13 = vmmov %vm13002_vm1 }
 0x4a9   :  { %3579 = vmatprep.mubr.f32.mxu0 %v10831_v26  ;;  %v10850_v43 = vsel %vm12997_vm6, %v3197_v11, %v3198_v55  ;;  %v3214_v37 = vrot.slane %v10831_v26, 2  ;;  %v3190_v12 = vrot.slane %v10831_v26, 1  ;;  %v10860_v52 = vsel %vm12998_vm10, %v3221_v41, %v3222_v3  ;;  %vm13005_vm4 = vmmov %vm13002_vm1  ;;  %v5705_v41 = vld [vmem:[%s12686_s4 + $0xbe8] sm:$0xff] }
 0x4aa   :  { %v10846_v63 = vsel %vm12996_vm3, %v3175_v35, %v3176_v24  ;;  %v10864_v39 = vsel %vm12999_vm5, %v3198_v55, %v3199_v59  ;;  %v10868_v54 = vsel %vm13000_vm2, %v3222_v3, %v3223_v29  ;;  %v10872_v51 = vsel %vm13001_vm0, %v3174_v28, %v3175_v35  ;;  %v5723_v28 = vld [vmem:[%s12686_s4 + $0xc78] sm:$0xff]  ;;  %v5690_v24 = vld [vmem:[%s12686_s4 + $0xb70] sm:$0xff]  ;;  %vm13006_vm7 = vmmov %vm13000_vm2 }
 0x4ab   :  { %v3189_v14 = vrot.slane %v10846_v63, 1  ;;  %v3213_v32 = vrot.slane %v10846_v63, 2  ;;  %v3200_v40 = vrot.slane %v10872_v51, 1  ;;  %v3224_v62 = vrot.slane %v10872_v51, 2  ;;  %vm13007_vm15 = vmmov %vm13000_vm2  ;;  %v5689_v35 = vld [vmem:[%s12686_s4 + $0xb68] sm:$0xff]  ;;  %v5738_v55 = vld [vmem:[%s12686_s4 + $0xcf0] sm:$0xff] }
 0x4ac   :  { %v10905_v30 = vsel %vm13004_vm13, %v3190_v12, %v3191_v47  ;;  %v10927_v47 = vsel %vm13007_vm15, %v3214_v37, %v3215_v15  ;;  %v5704_v15 = vld [vmem:[%s12686_s4 + $0xbe0] sm:$0xff]  ;;  %vm13008_vm8 = vmmov %vm13002_vm1 }
 0x4ad   :  { %v10878_v9 = vsel %vm13002_vm1, %v3189_v14, %v3190_v12  ;;  %v10884_v19 = vsel %vm13003_vm12, %v3213_v32, %v3214_v37  ;;  %v10914_v8 = vsel %vm13005_vm4, %v3199_v59, %v3200_v40  ;;  %v10920_v11 = vsel %vm13006_vm7, %v3223_v29, %v3224_v62  ;;  %v5688_v3 = vld [vmem:[%s12686_s4 + $0xb60] sm:$0xff]  ;;  %v5703_v59 = vld [vmem:[%s12686_s4 + $0xbd8] sm:$0xff]  ;;  %v5722_v29 = vld [vmem:[%s12686_s4 + $0xc70] sm:$0xff] }
 0x4ae   :  { %3454 = vmatprep.mubr.f32.mxu1 %v10878_v9  ;;  %3580 = vmatmul.mubr.f32.vlgmr.msra.gmra.mxu0 %v10884_v19  ;;  %v5687_v37 = vld [vmem:[%s12686_s4 + $0xb58] sm:$0xff]  ;;  %v5702_v12 = vld [vmem:[%s12686_s4 + $0xbd0] sm:$0xff]  ;;  %vm13009_vm11 = vmmov %vm13000_vm2 }
 0x4af   :  { %3455 = vmatmul.mubr.f32.vlgmr.msra.gmra.mxu1 %v10846_v63  ;;  %3584 = vmatprep.mubr.f32.mxu0 %v10724_v44  ;;  %vm13026_vm9 = vmmov %vm13001_vm0 }
 0x4b0   :  { %6749 = vmatpush3.msra.mxu1 %v5691_v4  ;;  %3459 = vmatprep.mubr.f32.mxu1 %v10905_v30  ;;  %v5686_v4 = vld [vmem:[%s12686_s4 + $0xb50] sm:$0xff]  ;;  %vm13030_vm14 = vmmov %vm13001_vm0 }
 0x4b1   :  { %6750 = vmatprep.subr.mxu1 %v5706_v2  ;;  %6817 = vmatpush3.msra.mxu0 %v5723_v28  ;;  %v5737_v2 = vld [vmem:[%s12686_s4 + $0xce8] sm:$0xff]  ;;  %vm13031_vm3 = vmmov %vm13001_vm0 }
 0x4b2   :  { %3585 = vmatmul.mubr.f32.gmra.mxu0 %v10927_v47  ;;  %6751 = vmatpush3.msra.mxu1 %v5690_v24  ;;  %v5701_v28 = vld [vmem:[%s12686_s4 + $0xbc8] sm:$0xff]  ;;  %vm13034_vm6 = vmmov %vm13002_vm1 }
 0x4b3   :  { %3460 = vmatmul.mubr.f32.gmra.mxu1 %v10831_v26  ;;  %3589 = vmatprep.mubr.f32.mxu0 %v10734_v5  ;;  %v5685_v24 = vld [vmem:[%s12686_s4 + $0xb48] sm:$0xff]  ;;  %vm13035_vm10 = vmmov %vm13000_vm2 }
 0x4b4   :  { %3464 = vmatprep.mubr.f32.mxu1 %v10748_v21  ;;  %6752 = vmatprep.subr.mxu1 %v5705_v41  ;;  %v5700_v41 = vld [vmem:[%s12686_s4 + $0xbc0] sm:$0xff]  ;;  %vm13036_vm5 = vmmov %vm13002_vm1 }
 0x4b5   :  { %6753 = vmatpush3.msra.mxu1 %v5689_v35  ;;  %6818 = vmatprep.subr.mxu0 %v5738_v55  ;;  %v5721_v35 = vld [vmem:[%s12686_s4 + $0xc68] sm:$0xff]  ;;  %v5684_v55 = vld [vmem:[%s12686_s4 + $0xb40] sm:$0xff]  ;;  %vm13038_vm1 = vmmov %vm13001_vm0 }
 0x4b6   :  { %3590 = vmatmul.mubr.f32.gmra.mxu0 %v10754_v25  ;;  %6754 = vmatprep.subr.mxu1 %v5704_v15  ;;  %v5736_v15 = vld [vmem:[%s12686_s4 + $0xce0] sm:$0xff]  ;;  %vm13041_vm12 = vmmov %vm13001_vm0 }
 0x4b7   :  { %3465 = vmatmul.mubr.f32.gmra.mxu1 %v10724_v44  ;;  %3594 = vmatprep.mubr.f32.mxu0 %v10741_v50  ;;  %vm13042_vm13 = vmmov %vm13005_vm4 }
 0x4b8   :  { %3469 = vmatprep.mubr.f32.mxu1 %v10761_v7  ;;  %6755 = vmatpush3.msra.mxu1 %v5688_v3  ;;  %v5720_v3 = vld [vmem:[%s12686_s4 + $0xc60] sm:$0xff]  ;;  %vm13043_vm4 = vmmov %vm13000_vm2 }
 0x4b9   :  { %6756 = vmatprep.subr.mxu1 %v5703_v59  ;;  %6819 = vmatpush3.msra.mxu0 %v5722_v29  ;;  %v5699_v59 = vld [vmem:[%s12686_s4 + $0xbb8] sm:$0xff]  ;;  %vm13044_vm7 = vmmov %vm13036_vm5 }
 0x4ba   :  { %3595 = vmatmul.mubr.f32.gmra.mxu0 %v10765_v1  ;;  %6757 = vmatpush3.msra.mxu1 %v5687_v37  ;;  %v5735_v29 = vld [vmem:[%s12686_s4 + $0xcd8] sm:$0xff]  ;;  %vm13045_vm15 = vmmov %vm13000_vm2 }
 0x4bb   :  { %3470 = vmatmul.mubr.f32.gmra.mxu1 %v10734_v5  ;;  %3599 = vmatprep.mubr.f32.mxu0 %v10769_v38  ;;  %v5683_v37 = vld [vmem:[%s12686_s4 + $0xb38] sm:$0xff] }
 0x4bc   :  { %3474 = vmatprep.mubr.f32.mxu1 %v10783_v34  ;;  %6758 = vmatprep.subr.mxu1 %v5702_v12  ;;  %v5719_v12 = vld [vmem:[%s12686_s4 + $0xc58] sm:$0xff] }
 0x4bd   :  { %6759 = vmatpush3.msra.mxu1 %v5686_v4  ;;  %6820 = vmatprep.subr.mxu0 %v5737_v2  ;;  %v5734_v4 = vld [vmem:[%s12686_s4 + $0xcd0] sm:$0xff] }
 0x4be   :  { %3600 = vmatmul.mubr.f32.gmra.mxu0 %v10787_v61  ;;  %6760 = vmatprep.subr.mxu1 %v5701_v28  ;;  %v5698_v2 = vld [vmem:[%s12686_s4 + $0xbb0] sm:$0xff] }
 0x4bf   :  { %3475 = vmatmul.mubr.f32.gmra.mxu1 %v10741_v50  ;;  %3604 = vmatprep.mubr.f32.mxu0 %v10773_v13  ;;  %v5718_v28 = vld [vmem:[%s12686_s4 + $0xc50] sm:$0xff] }
 0x4c0   :  { %3479 = vmatprep.mubr.f32.mxu1 %v10791_v17  ;;  %6761 = vmatpush3.msra.mxu1 %v5685_v24  ;;  %v5682_v24 = vld [vmem:[%s12686_s4 + $0xb30] sm:$0xff] }
 0x4c1   :  { %6762 = vmatprep.subr.mxu1 %v5700_v41  ;;  %6821 = vmatpush3.msra.mxu0 %v5721_v35  ;;  %v5733_v41 = vld [vmem:[%s12686_s4 + $0xcc8] sm:$0xff] }
 0x4c2   :  { %3605 = vmatmul.mubr.f32.gmra.mxu0 %v10795_v31  ;;  %6763 = vmatpush3.msra.mxu1 %v5684_v55  ;;  %v5717_v35 = vld [vmem:[%s12686_s4 + $0xc48] sm:$0xff] }
 0x4c3   :  { %3480 = vmatmul.mubr.f32.gmra.mxu1 %v10769_v38  ;;  %3609 = vmatprep.mubr.f32.mxu0 %v10799_v57  ;;  %v5697_v55 = vld [vmem:[%s12686_s4 + $0xba8] sm:$0xff] }
 0x4c4   :  { %3484 = vmatprep.mubr.f32.mxu1 %v10811_v53  ;;  %6822 = vmatprep.subr.mxu0 %v5736_v15  ;;  %v5732_v15 = vld [vmem:[%s12686_s4 + $0xcc0] sm:$0xff] }
 0x4c5   :  { %6823 = vmatpush3.msra.mxu0 %v5720_v3  ;;  %6764 = vmatprep.subr.mxu1 %v5699_v59  ;;  %v5681_v3 = vld [vmem:[%s12686_s4 + $0xb28] sm:$0xff]  ;;  %v5716_v59 = vld [vmem:[%s12686_s4 + $0xc40] sm:$0xff] }
 0x4c6   :  { %3610 = vmatmul.mubr.f32.gmra.mxu0 %v10816_v6  ;;  %6824 = vmatprep.subr.mxu0 %v5735_v29  ;;  %v5731_v29 = vld [vmem:[%s12686_s4 + $0xcb8] sm:$0xff] }
 0x4c7   :  { %3485 = vmatmul.mubr.f32.gmra.mxu1 %v10773_v13  ;;  %3614 = vmatprep.mubr.f32.mxu0 %v10806_v60 }
 0x4c8   :  { %6765 = vmatpush3.msra.mxu1 %v5683_v37  ;;  %6825 = vmatpush3.msra.mxu0 %v5719_v12  ;;  %v5696_v37 = vld [vmem:[%s12686_s4 + $0xba0] sm:$0xff]  ;;  %v5715_v12 = vld [vmem:[%s12686_s4 + $0xc38] sm:$0xff] }
 0x4c9   :  { %3489 = vmatprep.mubr.f32.mxu1 %v10835_v18  ;;  %6826 = vmatprep.subr.mxu0 %v5734_v4  ;;  %v5680_v4 = vld [vmem:[%s12686_s4 + $0xb20] sm:$0xff] }
 0x4ca   :  { %6766 = vmatprep.subr.mxu1 %v5698_v2  ;;  %6827 = vmatpush3.msra.mxu0 %v5718_v28  ;;  %v5730_v2 = vld [vmem:[%s12686_s4 + $0xcb0] sm:$0xff] }
 0x4cb   :  { %3615 = vmatmul.mubr.f32.gmra.mxu0 %v10841_v42  ;;  %6767 = vmatpush3.msra.mxu1 %v5682_v24  ;;  %v5714_v28 = vld [vmem:[%s12686_s4 + $0xc30] sm:$0xff]  ;;  %v5695_v24 = vld [vmem:[%s12686_s4 + $0xb98] sm:$0xff] }
 0x4cc   :  { %6828 = vmatprep.subr.mxu0 %v5733_v41  ;;  %3490 = vmatmul.mubr.f32.gmra.mxu1 %v10799_v57  ;;  %v5729_v41 = vld [vmem:[%s12686_s4 + $0xca8] sm:$0xff] }
 0x4cd   :  { %3619 = vmatprep.mubr.f32.mxu0 %v10821_v48  ;;  %6829 = vmatpush3.msra.mxu0 %v5717_v35  ;;  %v5679_v35 = vld [vmem:[%s12686_s4 + $0xb18] sm:$0xff] }
 0x4ce   :  { %3494 = vmatprep.mubr.f32.mxu1 %v10850_v43  ;;  %6768 = vmatprep.subr.mxu1 %v5697_v55  ;;  %v5713_v55 = vld [vmem:[%s12686_s4 + $0xc28] sm:$0xff] }
 0x4cf   :  { %6830 = vmatprep.subr.mxu0 %v5732_v15  ;;  %6769 = vmatpush3.msra.mxu1 %v5681_v3  ;;  %v5728_v15 = vld [vmem:[%s12686_s4 + $0xca0] sm:$0xff]  ;;  %v5694_v3 = vld [vmem:[%s12686_s4 + $0xb90] sm:$0xff] }
 0x4d0   :  { %6831 = vmatpush3.msra.mxu0 %v5716_v59  ;;  %3495 = vmatmul.mubr.f32.gmra.mxu1 %v10806_v60  ;;  %v5712_v59 = vld [vmem:[%s12686_s4 + $0xc20] sm:$0xff] }
 0x4d1   :  { %3620 = vmatmul.mubr.f32.gmra.mxu0 %v10860_v52  ;;  %6832 = vmatprep.subr.mxu0 %v5731_v29  ;;  %v5678_v29 = vld [vmem:[%s12686_s4 + $0xb10] sm:$0xff] }
 0x4d2   :  { %3624 = vmatprep.mubr.f32.mxu0 %v10825_v45  ;;  %6770 = vmatprep.subr.mxu1 %v5696_v37  ;;  %v5727_v37 = vld [vmem:[%s12686_s4 + $0xc98] sm:$0xff] }
 0x4d3   :  { %6833 = vmatpush3.msra.mxu0 %v5715_v12  ;;  %3499 = vmatprep.mubr.f32.mxu1 %v10864_v39  ;;  %v5711_v12 = vld [vmem:[%s12686_s4 + $0xc18] sm:$0xff] }
 0x4d4   :  { %6771 = vmatpush3.msra.mxu1 %v5680_v4  ;;  %6834 = vmatprep.subr.mxu0 %v5730_v2  ;;  %v5693_v4 = vld [vmem:[%s12686_s4 + $0xb88] sm:$0xff]  ;;  %v5726_v2 = vld [vmem:[%s12686_s4 + $0xc90] sm:$0xff] }
 0x4d5   :  { %6835 = vmatpush3.msra.mxu0 %v5714_v28  ;;  %6772 = vmatprep.subr.mxu1 %v5695_v24  ;;  %v5677_v28 = vld [vmem:[%s12686_s4 + $0xb08] sm:$0xff]  ;;  %v11127_v24 = vsel %vm13008_vm8, %v3200_v40, %v3189_v14  ;;  %v11148_v40 = vsel %vm13009_vm11, %v3224_v62, %v3213_v32  ;;  %v5708_v32 = vld [vmem:[%s12686_s4 + $0xc00] sm:$0xff]  ;;  %v5755_v62 = vld [vmem:[%s12686_s4 + $0xd78] sm:$0xff] }
 0x4d6   :  { %3625 = vmatmul.mubr.f32.gmra.mxu0 %v10868_v54  ;;  %6836 = vmatprep.subr.mxu0 %v5729_v41  ;;  %v5710_v41 = vld [vmem:[%s12686_s4 + $0xc10] sm:$0xff]  ;;  %v5709_v14 = vld [vmem:[%s12686_s4 + $0xc08] sm:$0xff]  ;;  %vm13047_vm8 = vmmov %vm13001_vm0 }
 0x4d7   :  { %3500 = vmatmul.mubr.f32.gmra.mxu1 %v10821_v48  ;;  %3629 = vmatprep.mubr.f32.mxu0 %v10872_v51  ;;  %vm13048_vm11 = vmmov %vm13001_vm0 }
 0x4d8   :  { %6773 = vmatpush3.msra.mxu1 %v5679_v35  ;;  %6837 = vmatpush3.msra.mxu0 %v5713_v55  ;;  %v5725_v35 = vld [vmem:[%s12686_s4 + $0xc88] sm:$0xff]  ;;  %v5692_v55 = vld [vmem:[%s12686_s4 + $0xb80] sm:$0xff] }
 0x4d9   :  { %3504 = vmatprep.mubr.f32.mxu1 %v10914_v8  ;;  %6838 = vmatprep.subr.mxu0 %v5728_v15  ;;  %v5676_v15 = vld [vmem:[%s12686_s4 + $0xb00] sm:$0xff] }
 0x4da   :  { %6774 = vmatprep.subr.mxu1 %v5694_v3  ;;  %6839 = vmatpush3.msra.mxu0 %v5712_v59  ;;  %v5724_v3 = vld [vmem:[%s12686_s4 + $0xc80] sm:$0xff]  ;;  %v5754_v59 = vld [vmem:[%s12686_s4 + $0xd70] sm:$0xff] }
 0x4db   :  { %3630 = vmatmul.mubr.f32.gmra.mxu0 %v10920_v11  ;;  %6775 = vmatpush3.msra.mxu1 %v5678_v29  ;;  %v5753_v29 = vld [vmem:[%s12686_s4 + $0xd68] sm:$0xff] }
 0x4dc   :  { %6840 = vmatprep.subr.mxu0 %v5727_v37  ;;  %3505 = vmatmul.mubr.f32.gmra.mxu1 %v10825_v45  ;;  %v5817_v37 = vld [vmem:[%s12686_s4 + $0xf58] sm:$0xff] }
 0x4dd   :  { %3634 = vmatprep.mubr.f32.mxu0 %v10846_v63  ;;  %6841 = vmatpush3.msra.mxu0 %v5711_v12  ;;  %v5801_v12 = vld [vmem:[%s12686_s4 + $0xed8] sm:$0xff] }
 0x4de   :  { %3509 = vmatprep.mubr.f32.mxu1 %v11127_v24  ;;  %6776 = vmatprep.subr.mxu1 %v5693_v4  ;;  %v5767_v4 = vld [vmem:[%s12686_s4 + $0xdc8] sm:$0xff] }
 0x4df   :  { %6842 = vmatprep.subr.mxu0 %v5726_v2  ;;  %6777 = vmatpush3.msra.mxu1 %v5677_v28  ;;  %v5816_v2 = vld [vmem:[%s12686_s4 + $0xf50] sm:$0xff] }
 0x4e0   :  { %6843 = vmatpush3.msra.mxu0 %v5710_v41  ;;  %3510 = vmatmul.mubr.f32.gmra.mxu1 %v10872_v51  ;;  %v5800_v28 = vld [vmem:[%s12686_s4 + $0xed0] sm:$0xff]  ;;  %v5766_v41 = vld [vmem:[%s12686_s4 + $0xdc0] sm:$0xff] }
 0x4e1   :  { %3635 = vmatmul.mubr.f32.gmra.mxu0 %v11148_v40  ;;  %6844 = vmatprep.subr.mxu0 %v5725_v35  ;;  %v5815_v35 = vld [vmem:[%s12686_s4 + $0xf48] sm:$0xff] }
 0x4e2   :  { %6778 = vmatprep.subr.mxu1 %v5692_v55  ;;  %6845 = vmatpush3.msra.mxu0 %v5709_v14  ;;  %v5799_v55 = vld [vmem:[%s12686_s4 + $0xec8] sm:$0xff]  ;;  %v5781_v14 = vld [vmem:[%s12686_s4 + $0xe38] sm:$0xff] }
 0x4e3   :  { %3829 = vmatprep.mubr.f32.mxu0 %v10748_v21  ;;  %6779 = vmatpush3.msra.mxu1 %v5676_v15  ;;  %v5798_v15 = vld [vmem:[%s12686_s4 + $0xec0] sm:$0xff] }
 0x4e4   :  { %3704 = vmatprep.mubr.f32.mxu1 %v10927_v47  ;;  %6846 = vmatprep.subr.mxu0 %v5724_v3  ;;  %v5765_v3 = vld [vmem:[%s12686_s4 + $0xdb8] sm:$0xff] }
 0x4e5   :  { %6847 = vmatpush3.msra.mxu0 %v5708_v32  ;;  %7362 = vmatprep.subr.mxu1 %v5755_v62  ;;  %v5813_v32 = vld [vmem:[%s12686_s4 + $0xf38] sm:$0xff] }
 0x4e6   :  { %3830 = vmatmul.mubr.f32.vlgmr.msra.gmra.mxu0 %v10724_v44  ;;  %3705 = vmatmul.mubr.f32.vlgmr.msra.gmra.mxu1 %v10905_v30  ;;  %v5752_v44 = vld [vmem:[%s12686_s4 + $0xd60] sm:$0xff] }
 0x4e7   :  { %3834 = vmatprep.mubr.f32.mxu0 %v10761_v7  ;;  %7363 = vmatpush3.msra.mxu1 %v5755_v62  ;;  %v5797_v62 = vld [vmem:[%s12686_s4 + $0xeb8] sm:$0xff] }
 0x4e8   :  { %3709 = vmatprep.mubr.f32.mxu1 %v10754_v25  ;;  %7364 = vmatprep.subr.mxu1 %v5754_v59 }
 0x4e9   :  { %7365 = vmatpush3.msra.mxu1 %v5754_v59  ;;  %v5780_v59 = vld [vmem:[%s12686_s4 + $0xe30] sm:$0xff] }
 0x4ea   :  { %3835 = vmatmul.mubr.f32.gmra.mxu0 %v10734_v5  ;;  %3710 = vmatmul.mubr.f32.gmra.mxu1 %v10748_v21  ;;  %v5751_v5 = vld [vmem:[%s12686_s4 + $0xd58] sm:$0xff]  ;;  %v5750_v21 = vld [vmem:[%s12686_s4 + $0xd50] sm:$0xff] }
 0x4eb   :  { %3839 = vmatprep.mubr.f32.mxu0 %v10783_v34  ;;  %3714 = vmatprep.mubr.f32.mxu1 %v10765_v1 }
 0x4ec   :  { %7366 = vmatprep.subr.mxu1 %v5753_v29 }
 0x4ed   :  { %7367 = vmatpush3.msra.mxu1 %v5753_v29  ;;  %v5764_v29 = vld [vmem:[%s12686_s4 + $0xdb0] sm:$0xff] }
 0x4ee   :  { %3840 = vmatmul.mubr.f32.gmra.mxu0 %v10741_v50  ;;  %3715 = vmatmul.mubr.f32.gmra.mxu1 %v10761_v7  ;;  %v5749_v50 = vld [vmem:[%s12686_s4 + $0xd48] sm:$0xff]  ;;  %v5748_v7 = vld [vmem:[%s12686_s4 + $0xd40] sm:$0xff] }
 0x4ef   :  { %3844 = vmatprep.mubr.f32.mxu0 %v10791_v17  ;;  %7368 = vmatprep.subr.mxu1 %v5752_v44 }
 0x4f0   :  { %3719 = vmatprep.mubr.f32.mxu1 %v10787_v61  ;;  %7369 = vmatpush3.msra.mxu1 %v5752_v44  ;;  %v5812_v44 = vld [vmem:[%s12686_s4 + $0xf30] sm:$0xff] }
 0x4f1   :  { %7370 = vmatprep.subr.mxu1 %v5751_v5 }
 0x4f2   :  { %3845 = vmatmul.mubr.f32.gmra.mxu0 %v10769_v38  ;;  %3720 = vmatmul.mubr.f32.gmra.mxu1 %v10783_v34  ;;  %v5747_v38 = vld [vmem:[%s12686_s4 + $0xd38] sm:$0xff]  ;;  %v5745_v34 = vld [vmem:[%s12686_s4 + $0xd28] sm:$0xff] }
 0x4f3   :  { %3849 = vmatprep.mubr.f32.mxu0 %v10811_v53  ;;  %7371 = vmatpush3.msra.mxu1 %v5751_v5  ;;  %v5796_v5 = vld [vmem:[%s12686_s4 + $0xeb0] sm:$0xff] }
 0x4f4   :  { %3724 = vmatprep.mubr.f32.mxu1 %v10795_v31  ;;  %7372 = vmatprep.subr.mxu1 %v5750_v21 }
 0x4f5   :  { %7373 = vmatpush3.msra.mxu1 %v5750_v21  ;;  %v5779_v21 = vld [vmem:[%s12686_s4 + $0xe28] sm:$0xff] }
 0x4f6   :  { %3850 = vmatmul.mubr.f32.gmra.mxu0 %v10773_v13  ;;  %3725 = vmatmul.mubr.f32.gmra.mxu1 %v10791_v17  ;;  %v5746_v13 = vld [vmem:[%s12686_s4 + $0xd30] sm:$0xff]  ;;  %v5744_v17 = vld [vmem:[%s12686_s4 + $0xd20] sm:$0xff] }
 0x4f7   :  { %3854 = vmatprep.mubr.f32.mxu0 %v10835_v18  ;;  %3729 = vmatprep.mubr.f32.mxu1 %v10816_v6 }
 0x4f8   :  { %7374 = vmatprep.subr.mxu1 %v5749_v50 }
 0x4f9   :  { %7375 = vmatpush3.msra.mxu1 %v5749_v50  ;;  %v5811_v50 = vld [vmem:[%s12686_s4 + $0xf28] sm:$0xff] }
 0x4fa   :  { %3855 = vmatmul.mubr.f32.gmra.mxu0 %v10799_v57  ;;  %3730 = vmatmul.mubr.f32.gmra.mxu1 %v10811_v53  ;;  %v5743_v57 = vld [vmem:[%s12686_s4 + $0xd18] sm:$0xff]  ;;  %v5741_v53 = vld [vmem:[%s12686_s4 + $0xd08] sm:$0xff] }
 0x4fb   :  { %3859 = vmatprep.mubr.f32.mxu0 %v10850_v43  ;;  %7376 = vmatprep.subr.mxu1 %v5748_v7 }
 0x4fc   :  { %3734 = vmatprep.mubr.f32.mxu1 %v10841_v42  ;;  %7377 = vmatpush3.msra.mxu1 %v5748_v7 }
 0x4fd   :  { %7378 = vmatprep.subr.mxu1 %v5747_v38 }
 0x4fe   :  { %3860 = vmatmul.mubr.f32.gmra.mxu0 %v10806_v60  ;;  %3735 = vmatmul.mubr.f32.gmra.mxu1 %v10835_v18  ;;  %v5742_v60 = vld [vmem:[%s12686_s4 + $0xd10] sm:$0xff]  ;;  %v5770_v18 = vld [vmem:[%s12686_s4 + $0xde0] sm:$0xff] }
 0x4ff   :  { %3864 = vmatprep.mubr.f32.mxu0 %v10864_v39  ;;  %7379 = vmatpush3.msra.mxu1 %v5747_v38  ;;  %v5795_v38 = vld [vmem:[%s12686_s4 + $0xea8] sm:$0xff] }
 0x500   :  { %3739 = vmatprep.mubr.f32.mxu1 %v10860_v52  ;;  %7380 = vmatprep.subr.mxu1 %v5746_v13 }
 0x501   :  { %7381 = vmatpush3.msra.mxu1 %v5746_v13 }
 0x502   :  { %3865 = vmatmul.mubr.f32.gmra.mxu0 %v10821_v48  ;;  %3740 = vmatmul.mubr.f32.gmra.mxu1 %v10850_v43  ;;  %v5740_v48 = vld [vmem:[%s12686_s4 + $0xd00] sm:$0xff]  ;;  %v5805_v43 = vld [vmem:[%s12686_s4 + $0xef8] sm:$0xff] }
 0x503   :  { %3869 = vmatprep.mubr.f32.mxu0 %v10914_v8  ;;  %3744 = vmatprep.mubr.f32.mxu1 %v10868_v54 }
 0x504   :  { %7382 = vmatprep.subr.mxu1 %v5745_v34 }
 0x505   :  { %7383 = vmatpush3.msra.mxu1 %v5745_v34  ;;  %v5763_v34 = vld [vmem:[%s12686_s4 + $0xda8] sm:$0xff] }
 0x506   :  { %3870 = vmatmul.mubr.f32.gmra.mxu0 %v10825_v45  ;;  %3745 = vmatmul.mubr.f32.gmra.mxu1 %v10864_v39  ;;  %v5771_v45 = vld [vmem:[%s12686_s4 + $0xde8] sm:$0xff]  ;;  %v5804_v39 = vld [vmem:[%s12686_s4 + $0xef0] sm:$0xff] }
 0x507   :  { %3874 = vmatprep.mubr.f32.mxu0 %v11127_v24  ;;  %7384 = vmatprep.subr.mxu1 %v5744_v17 }
 0x508   :  { %3749 = vmatprep.mubr.f32.mxu1 %v10920_v11  ;;  %7385 = vmatpush3.msra.mxu1 %v5744_v17  ;;  %v5810_v17 = vld [vmem:[%s12686_s4 + $0xf20] sm:$0xff] }
 0x509   :  { %7386 = vmatprep.subr.mxu1 %v5743_v57 }
 0x50a   :  { %3875 = vmatmul.mubr.f32.gmra.mxu0 %v10872_v51  ;;  %3750 = vmatmul.mubr.f32.gmra.mxu1 %v10914_v8  ;;  %v5819_v51 = vld [vmem:[%s12686_s4 + $0xf68] sm:$0xff]  ;;  %v5818_v8 = vld [vmem:[%s12686_s4 + $0xf60] sm:$0xff] }
 0x50b   :  { %3879 = vmatprep.mubr.f32.mxu0 %v10878_v9  ;;  %7387 = vmatpush3.msra.mxu1 %v5743_v57 }
 0x50c   :  { %3754 = vmatprep.mubr.f32.mxu1 %v11148_v40  ;;  %7388 = vmatprep.subr.mxu1 %v5742_v60 }
 0x50d   :  { %7389 = vmatpush3.msra.mxu1 %v5742_v60  ;;  %v5778_v60 = vld [vmem:[%s12686_s4 + $0xe20] sm:$0xff] }
 0x50e   :  { %3880 = vmatmul.mubr.f32.gmra.mxu0 %v10846_v63  ;;  %3755 = vmatmul.mubr.f32.gmra.mxu1 %v11127_v24  ;;  %v5821_v63 = vld [vmem:[%s12686_s4 + $0xf78] sm:$0xff]  ;;  %v5782_v24 = vld [vmem:[%s12686_s4 + $0xe40] sm:$0xff] }
 0x50f   :  { %3884 = vmatprep.mubr.f32.mxu0 %v10905_v30  ;;  %3759 = vmatprep.mubr.f32.mxu1 %v10884_v19  ;;  %v5768_v30 = vld [vmem:[%s12686_s4 + $0xdd0] sm:$0xff] }
 0x510   :  { %7390 = vmatprep.subr.mxu1 %v5741_v53 }
 0x511   :  { %7391 = vmatpush3.msra.mxu1 %v5741_v53  ;;  %v5794_v53 = vld [vmem:[%s12686_s4 + $0xea0] sm:$0xff] }
 0x512   :  { %3885 = vmatmul.mubr.f32.gmra.mxu0 %v10831_v26  ;;  %3760 = vmatmul.mubr.f32.gmra.mxu1 %v10878_v9  ;;  %v5786_v26 = vld [vmem:[%s12686_s4 + $0xe60] sm:$0xff]  ;;  %v5803_v9 = vld [vmem:[%s12686_s4 + $0xee8] sm:$0xff] }
 0x513   :  { %7392 = vmatprep.subr.mxu1 %v5740_v48  ;;  %7394 = vmatprep.mubr.f32.mxu1 %v10754_v25  ;;  %v5789_v25 = vld [vmem:[%s12686_s4 + $0xe78] sm:$0xff] }
 0x514   :  { %7393 = vmatpush3.msra.mxu1 %v5740_v48  ;;  %6912 = vmatprep.subr.mxu0 %v5789_v25  ;;  %v11413_v25 = vld [vmem:[%s12687_s5 + $0x2] ss:$0 sm:$0xff] }
 0x515   :  { %6980 = vmatprep.subr.mxu1 %v5821_v63  ;;  %v5761_v63 = vld [vmem:[%s12686_s4 + $0xd98] sm:$0xff] }
 0x516   :  { %7395 = vmatmul.mubr.f32.vlgmr.msra.gmra.mxu1 %v10765_v1  ;;  %v5773_v1 = vld [vmem:[%s12686_s4 + $0xdf8] sm:$0xff] }
 0x517   :  { %7397 = vmatprep.mubr.f32.mxu1 %v10787_v61  ;;  %6913 = vmatpush3.msra.mxu0 %v5773_v1  ;;  %v5788_v61 = vld [vmem:[%s12686_s4 + $0xe70] sm:$0xff] }
 0x518   :  { %6914 = vmatprep.subr.mxu0 %v5788_v61  ;;  %6981 = vmatpush3.msra.mxu1 %v5805_v43  ;;  %v5762_v61 = vld [vmem:[%s12686_s4 + $0xda0] sm:$0xff]  ;;  %v5808_v43 = vld [vmem:[%s12686_s4 + $0xf10] sm:$0xff] }
 0x51a   :  { %7398 = vmatmul.mubr.f32.gmra.mxu1 %v10795_v31  ;;  %v5772_v31 = vld [vmem:[%s12686_s4 + $0xdf0] sm:$0xff] }
 0x51b   :  { %7400 = vmatprep.mubr.f32.mxu1 %v10816_v6  ;;  %6915 = vmatpush3.msra.mxu0 %v5772_v31  ;;  %v5787_v6 = vld [vmem:[%s12686_s4 + $0xe68] sm:$0xff]  ;;  %v5809_v31 = vld [vmem:[%s12686_s4 + $0xf18] sm:$0xff] }
 0x51c   :  { %6916 = vmatprep.subr.mxu0 %v5787_v6 }
 0x51d   :  { %6917 = vmatpush3.msra.mxu0 %v5771_v45 }
 0x51e   :  { %7401 = vmatmul.mubr.f32.gmra.mxu1 %v10841_v42  ;;  %6918 = vmatprep.subr.mxu0 %v5786_v26  ;;  %v5785_v42 = vld [vmem:[%s12686_s4 + $0xe58] sm:$0xff] }
 0x51f   :  { %7403 = vmatprep.mubr.f32.mxu1 %v10860_v52  ;;  %6919 = vmatpush3.msra.mxu0 %v5770_v18  ;;  %v5820_v52 = vld [vmem:[%s12686_s4 + $0xf70] sm:$0xff]  ;;  %v5777_v26 = vld [vmem:[%s12686_s4 + $0xe18] sm:$0xff] }
 0x520   :  { %6920 = vmatprep.subr.mxu0 %v5785_v42  ;;  %6982 = vmatprep.subr.mxu1 %v5820_v52  ;;  %v5793_v18 = vld [vmem:[%s12686_s4 + $0xe98] sm:$0xff] }
 0x521   :  { %6983 = vmatpush3.msra.mxu1 %v5804_v39 }
 0x522   :  { %7404 = vmatmul.mubr.f32.gmra.mxu1 %v10868_v54  ;;  %v5769_v54 = vld [vmem:[%s12686_s4 + $0xdd8] sm:$0xff]  ;;  %6984 = vmatprep.subr.mxu1 %v5819_v51  ;;  %v5792_v51 = vld [vmem:[%s12686_s4 + $0xe90] sm:$0xff] }
 0x523   :  { %7406 = vmatprep.mubr.f32.mxu1 %v10920_v11  ;;  %6921 = vmatpush3.msra.mxu0 %v5769_v54  ;;  %v5802_v11 = vld [vmem:[%s12686_s4 + $0xee0] sm:$0xff]  ;;  %v5776_v54 = vld [vmem:[%s12686_s4 + $0xe10] sm:$0xff] }
 0x524   :  { %6985 = vmatpush3.msra.mxu1 %v5803_v9 }
 0x525   :  { %6986 = vmatprep.subr.mxu1 %v5818_v8  ;;  %v5775_v8 = vld [vmem:[%s12686_s4 + $0xe08] sm:$0xff] }
 0x526   :  { %7407 = vmatmul.mubr.f32.gmra.mxu1 %v11148_v40  ;;  %v5814_v40 = vld [vmem:[%s12686_s4 + $0xf40] sm:$0xff] }
 0x527   :  { %7409 = vmatprep.mubr.f32.mxu1 %v10884_v19  ;;  %v5784_v19 = vld [vmem:[%s12686_s4 + $0xe50] sm:$0xff]  ;;  %6987 = vmatpush3.msra.mxu1 %v5802_v11  ;;  %v5759_v11 = vld [vmem:[%s12686_s4 + $0xd88] sm:$0xff] }
 0x528   :  { %6922 = vmatprep.subr.mxu0 %v5784_v19  ;;  %6988 = vmatprep.subr.mxu1 %v5817_v37 }
 0x529   :  { %6923 = vmatpush3.msra.mxu0 %v5768_v30  ;;  %6989 = vmatpush3.msra.mxu1 %v5801_v12  ;;  %v5760_v30 = vld [vmem:[%s12686_s4 + $0xd90] sm:$0xff] }
 0x52a   :  { %7410 = vmatmul.mubr.f32.gmra.mxu1 %v10927_v47  ;;  %v5783_v47 = vld [vmem:[%s12686_s4 + $0xe48] sm:$0xff]  ;;  %6990 = vmatprep.subr.mxu1 %v5816_v2  ;;  %v5774_v2 = vld [vmem:[%s12686_s4 + $0xe00] sm:$0xff] }
 0x52b   :  { %6924 = vmatprep.subr.mxu0 %v5783_v47  ;;  %6991 = vmatpush3.msra.mxu1 %v5800_v28  ;;  %v5791_v28 = vld [vmem:[%s12686_s4 + $0xe88] sm:$0xff] }
 0x52c   :  { %6925 = vmatpush3.msra.mxu0 %v5767_v4  ;;  %6992 = vmatprep.subr.mxu1 %v5815_v35  ;;  %v5807_v4 = vld [vmem:[%s12686_s4 + $0xf08] sm:$0xff]  ;;  %v5806_v35 = vld [vmem:[%s12686_s4 + $0xf00] sm:$0xff] }
 0x52d   :  { %6926 = vmatprep.subr.mxu0 %v5782_v24  ;;  %6993 = vmatpush3.msra.mxu1 %v5799_v55  ;;  %v5790_v55 = vld [vmem:[%s12686_s4 + $0xe80] sm:$0xff] }
 0x52e   :  { %6927 = vmatpush3.msra.mxu0 %v5766_v41  ;;  %6994 = vmatprep.subr.mxu1 %v5814_v40  ;;  %v5758_v41 = vld [vmem:[%s12686_s4 + $0xd80] sm:$0xff] }
 0x52f   :  { %6928 = vmatprep.subr.mxu0 %v5781_v14  ;;  %6995 = vmatpush3.msra.mxu1 %v5798_v15 }
 0x530   :  { %6929 = vmatpush3.msra.mxu0 %v5765_v3  ;;  %6996 = vmatprep.subr.mxu1 %v5813_v32  ;;  %v5853_v32 = vld [vmem:[%s12686_s4 + $0x1078] sm:$0xff] }
 0x531   :  { %6997 = vmatpush3.msra.mxu1 %v5797_v62  ;;  %6930 = vmatprep.subr.mxu0 %v5780_v59 }
 0x532   :  { %6998 = vmatprep.subr.mxu1 %v5812_v44  ;;  %6931 = vmatpush3.msra.mxu0 %v5764_v29 }
 0x533   :  { %6999 = vmatpush3.msra.mxu1 %v5796_v5  ;;  %6932 = vmatprep.subr.mxu0 %v5779_v21 }
 0x534   :  { %7000 = vmatprep.subr.mxu1 %v5811_v50  ;;  %6933 = vmatpush3.msra.mxu0 %v5763_v34 }
 0x535   :  { %7001 = vmatpush3.msra.mxu1 %v5795_v38  ;;  %6934 = vmatprep.subr.mxu0 %v5778_v60 }
 0x536   :  { %7002 = vmatprep.subr.mxu1 %v5810_v17  ;;  %6935 = vmatpush3.msra.mxu0 %v5762_v61 }
 0x537   :  { %7003 = vmatpush3.msra.mxu1 %v5794_v53  ;;  %6936 = vmatprep.subr.mxu0 %v5777_v26 }
 0x538   :  { %7004 = vmatprep.subr.mxu1 %v5809_v31  ;;  %6937 = vmatpush3.msra.mxu0 %v5761_v63 }
 0x539   :  { %7005 = vmatpush3.msra.mxu1 %v5793_v18  ;;  %6938 = vmatprep.subr.mxu0 %v5776_v54 }
 0x53a   :  { %7006 = vmatprep.subr.mxu1 %v5808_v43  ;;  %6939 = vmatpush3.msra.mxu0 %v5760_v30  ;;  %v5885_v30 = vld [vmem:[%s12686_s4 + $0x1178] sm:$0xff] }
 0x53b   :  { %7007 = vmatpush3.msra.mxu1 %v5792_v51  ;;  %6940 = vmatprep.subr.mxu0 %v5775_v8 }
 0x53c   :  { %7008 = vmatprep.subr.mxu1 %v5807_v4  ;;  %6941 = vmatpush3.msra.mxu0 %v5759_v11 }
 0x53d   :  { %7009 = vmatpush3.msra.mxu1 %v5791_v28  ;;  %6942 = vmatprep.subr.mxu0 %v5774_v2 }
 0x53e   :  { %7010 = vmatprep.subr.mxu1 %v5806_v35  ;;  %6943 = vmatpush3.msra.mxu0 %v5758_v41 }
 0x53f   :  { %7011 = vmatpush3.msra.mxu1 %v5790_v55  ;;  %7048 = vmatprep.subr.mxu0 %v5853_v32 }
 0x540   :  { %7116 = vmatprep.subr.mxu1 %v5885_v30 }
 0x56e   :  { %v6712_v7 = vpop.f32.mrf.mxu0 }
 0x56f   :  { %v6644_v13 = vpop.f32.mrf.mxu1 }
 0x570   :  { %v6713_v57 = vpop.f32.mrf.mxu0 }
 0x571   :  { %v6714_v48 = vadd.f32 %v6713_v57, %v6712_v7  ;;  %v6645_v1 = vpop.f32.mrf.mxu1 }
 0x572   :  { %v6646_v6 = vadd.f32 %v6645_v1, %v6644_v13  ;;  %v6715_v45 = vpop.f32.mrf.mxu0 }
 0x573   :  { %v6647_v42 = vpop.f32.mrf.mxu1 }
 0x574   :  { %v3457_v52 = vadd.f32 %v6646_v6, %v11413_v25  ;;  %v6716_v39 = vpop.f32.mrf.mxu0 }
 0x575   :  { %v6717_v9 = vadd.f32 %v6716_v39, %v6715_v45  ;;  %v6648_v19 = vpop.f32.mrf.mxu1 }
 0x576   :  { %v6649_v47 = vadd.f32 %v6648_v19, %v6647_v42  ;;  %v6718_v37 = vpop.f32.mrf.mxu0  ;;  %v11449_v12 = vadd.f32 %v6714_v48, %v3457_v52 }
 0x577   :  { %v6650_v24 = vpop.f32.mrf.mxu1 }
 0x578   :  { %v3462_v14 = vadd.f32 %v6649_v47, %v11413_v25  ;;  %v6719_v40 = vpop.f32.mrf.mxu0 }
 0x579   :  { %v6720_v15 = vadd.f32 %v6719_v40, %v6718_v37  ;;  %v6651_v3 = vpop.f32.mrf.mxu1 }
 0x57a   :  { %v6652_v62 = vadd.f32 %v6651_v3, %v6650_v24  ;;  %v6721_v59 = vpop.f32.mrf.mxu0  ;;  %v11473_v29 = vadd.f32 %v6717_v9, %v3462_v14 }
 0x57b   :  { %v6653_v44 = vpop.f32.mrf.mxu1 }
 0x57c   :  { %v3467_v5 = vadd.f32 %v6652_v62, %v11413_v25  ;;  %v6722_v21 = vpop.f32.mrf.mxu0 }
 0x57d   :  { %v6723_v50 = vadd.f32 %v6722_v21, %v6721_v59  ;;  %v6654_v7 = vpop.f32.mrf.mxu1 }
 0x57e   :  { %v6655_v38 = vadd.f32 %v6654_v7, %v6653_v44  ;;  %v6724_v13 = vpop.f32.mrf.mxu0  ;;  %v11476_v34 = vadd.f32 %v6720_v15, %v3467_v5 }
 0x57f   :  { %v6656_v17 = vpop.f32.mrf.mxu1 }
 0x580   :  { %v3472_v57 = vadd.f32 %v6655_v38, %v11413_v25  ;;  %v6725_v60 = vpop.f32.mrf.mxu0 }
 0x581   :  { %v6726_v53 = vadd.f32 %v6725_v60, %v6724_v13  ;;  %v6657_v48 = vpop.f32.mrf.mxu1 }
 0x582   :  { %v6658_v1 = vadd.f32 %v6657_v48, %v6656_v17  ;;  %v6727_v61 = vpop.f32.mrf.mxu0  ;;  %v11479_v31 = vadd.f32 %v6723_v50, %v3472_v57 }
 0x583   :  { %v6659_v6 = vpop.f32.mrf.mxu1 }
 0x584   :  { %v3477_v45 = vadd.f32 %v6658_v1, %v11413_v25  ;;  %v6728_v26 = vpop.f32.mrf.mxu0 }
 0x585   :  { %v6729_v18 = vadd.f32 %v6728_v26, %v6727_v61  ;;  %v6660_v42 = vpop.f32.mrf.mxu1 }
 0x586   :  { %v6661_v63 = vadd.f32 %v6660_v42, %v6659_v6  ;;  %v6730_v43 = vpop.f32.mrf.mxu0  ;;  %v11482_v52 = vadd.f32 %v6726_v53, %v3477_v45 }
 0x587   :  { %v6662_v39 = vpop.f32.mrf.mxu1 }
 0x588   :  { %v3482_v54 = vadd.f32 %v6661_v63, %v11413_v25  ;;  %v6731_v51 = vpop.f32.mrf.mxu0 }
 0x589   :  { %v6732_v9 = vadd.f32 %v6731_v51, %v6730_v43  ;;  %v6663_v19 = vpop.f32.mrf.mxu1 }
 0x58a   :  { %v6664_v8 = vadd.f32 %v6663_v19, %v6662_v39  ;;  %v11488_v11 = vadd.f32 %v6729_v18, %v3482_v54 }
 0x58b   :  { %v6733_v47 = vpop.f32.mrf.mxu0 }
 0x58c   :  { %v3487_v37 = vadd.f32 %v6664_v8, %v11413_v25  ;;  %v6665_v4 = vpop.f32.mrf.mxu1 }
 0x58d   :  { %v6734_v2 = vpop.f32.mrf.mxu0 }
 0x58e   :  { %v6735_v28 = vadd.f32 %v6734_v2, %v6733_v47  ;;  %v6666_v24 = vpop.f32.mrf.mxu1  ;;  %v11491_v41 = vadd.f32 %v6732_v9, %v3487_v37 }
 0x58f   :  { %v6667_v35 = vadd.f32 %v6666_v24, %v6665_v4 }
 0x590   :  { %v6668_v55 = vpop.f32.mrf.mxu1 }
 0x591   :  { %v3492_v14 = vadd.f32 %v6667_v35, %v11413_v25  ;;  %v6736_v40 = vpop.f32.mrf.mxu0 }
 0x592   :  { %v6669_v15 = vpop.f32.mrf.mxu1 }
 0x593   :  { %v6737_v3 = vpop.f32.mrf.mxu0  ;;  %v6670_v32 = vadd.f32 %v6669_v15, %v6668_v55  ;;  %v11494_v62 = vadd.f32 %v6735_v28, %v3492_v14 }
 0x594   :  { %v6738_v59 = vadd.f32 %v6737_v3, %v6736_v40 }
 0x595   :  { %13010 = vst [vmem:[#allocation7_spill] sm:$0xff] %v11494_v62  ;;  %v3497_v44 = vadd.f32 %v6670_v32, %v11413_v25 }
 0x596   :  { %v6739_v5 = vpop.f32.mrf.mxu0 }
 0x597   :  { %v6671_v21 = vpop.f32.mrf.mxu1  ;;  %v3622_v50 = vadd.f32 %v6738_v59, %v3497_v44 }
 0x598   :  { %v6740_v7 = vpop.f32.mrf.mxu0 }
 0x599   :  { %v6741_v38 = vadd.f32 %v6740_v7, %v6739_v5  ;;  %v6672_v13 = vpop.f32.mrf.mxu1 }
 0x59a   :  { %v6673_v17 = vadd.f32 %v6672_v13, %v6671_v21 }
 0x59b   :  { %v11497_v57 = vpop.f32.mrf.mxu0 }
 0x59c   :  { %v3502_v60 = vadd.f32 %v6673_v17, %v11413_v25  ;;  %v6674_v53 = vpop.f32.mrf.mxu1 }
 0x59d   :  { %v11500_v48 = vpop.f32.mrf.mxu0 }
 0x59e   :  { %v6675_v1 = vpop.f32.mrf.mxu1  ;;  %v3627_v61 = vadd.f32 %v6741_v38, %v3502_v60 }
 0x59f   :  { %v6676_v6 = vadd.f32 %v6675_v1, %v6674_v53 }
 0x5a0   :  { %v6677_v45 = vpop.f32.mrf.mxu1 }
 0x5a1   :  { %v11502_v26 = vpop.f32.mrf.mxu0 }
 0x5a2   :  { %v6678_v18 = vpop.f32.mrf.mxu1 }
 0x5a3   :  { %v11504_v42 = vpop.f32.mrf.mxu0 }
 0x5a6   :  { %v6848_v63 = vpop.f32.mrf.mxu0  ;;  %v6780_v43 = vpop.f32.mrf.mxu1 }
 0x5a8   :  { %v6849_v39 = vpop.f32.mrf.mxu0  ;;  %v6781_v54 = vpop.f32.mrf.mxu1 }
 0x5aa   :  { %v6851_v51 = vpop.f32.mrf.mxu0  ;;  %v6783_v9 = vpop.f32.mrf.mxu1 }
 0x5ac   :  { %v6852_v19 = vpop.f32.mrf.mxu0  ;;  %v6784_v30 = vpop.f32.mrf.mxu1 }
 0x5ad   :  { %v6785_v58 = vadd.f32 %v6784_v30, %v6783_v9 }
 0x5ae   :  { %v11506_v8 = vpop.f32.mrf.mxu0  ;;  %v6786_v47 = vpop.f32.mrf.mxu1 }
 0x5af   :  { %v3712_v62 = vadd.f32 %v6785_v58, %v11473_v29 }
 0x5b0   :  { %v11508_v37 = vpop.f32.mrf.mxu0  ;;  %v6787_v4 = vpop.f32.mrf.mxu1 }
 0x5b1   :  { %v6788_v33 = vadd.f32 %v6787_v4, %v6786_v47 }
 0x5b2   :  { %v6857_v2 = vpop.f32.mrf.mxu0  ;;  %v6789_v28 = vpop.f32.mrf.mxu1 }
 0x5b3   :  { %v3717_v29 = vadd.f32 %v6788_v33, %v11476_v34 }
 0x5b4   :  { %v6858_v24 = vpop.f32.mrf.mxu0  ;;  %v6790_v35 = vpop.f32.mrf.mxu1 }
 0x5b5   :  { %v6859_v47 = vadd.f32 %v6858_v24, %v6857_v2 }
 0x5b6   :  { %v11510_v55 = vpop.f32.mrf.mxu0  ;;  %v6792_v14 = vpop.f32.mrf.mxu1 }
 0x5b8   :  { %v11512_v40 = vpop.f32.mrf.mxu0  ;;  %v6793_v15 = vpop.f32.mrf.mxu1 }
 0x5b9   :  { %v6794_v9 = vadd.f32 %v6793_v15, %v6792_v14  ;;  %v13016_v14 = vld [vmem:[#allocation31_spill] sm:$0xff] }
 0x5ba   :  { %v6863_v3 = vpop.f32.mrf.mxu0  ;;  %v6795_v32 = vpop.f32.mrf.mxu1 }
 0x5bc   :  { %v6864_v59 = vpop.f32.mrf.mxu0  ;;  %v6796_v44 = vpop.f32.mrf.mxu1 }
 0x5be   :  { %v11514_v5 = vpop.f32.mrf.mxu0  ;;  %v6798_v21 = vpop.f32.mrf.mxu1 }
 0x5c0   :  { %v6867_v7 = vpop.f32.mrf.mxu0  ;;  %v6799_v38 = vpop.f32.mrf.mxu1 }
 0x5c1   :  { %v6800_v30 = vadd.f32 %v6799_v38, %v6798_v21 }
 0x5c2   :  { %v11516_v13 = vpop.f32.mrf.mxu0  ;;  %v6801_v17 = vpop.f32.mrf.mxu1 }
 0x5c3   :  { %13011 = vst [vmem:[#allocation28_spill] sm:$0xff] %v11516_v13  ;;  %v6782_v13 = vadd.f32 %v6781_v54, %v6780_v43  ;;  %v3737_v2 = vadd.f32 %v6800_v30, %v11491_v41 }
 0x5c4   :  { %v11518_v60 = vpop.f32.mrf.mxu0  ;;  %v6802_v53 = vpop.f32.mrf.mxu1 }
 0x5c5   :  { %13012 = vst [vmem:[#allocation6_spill] sm:$0xff] %v11518_v60  ;;  %v6803_v33 = vadd.f32 %v6802_v53, %v6801_v17 }
 0x5c6   :  { %v11520_v1 = vpop.f32.mrf.mxu0  ;;  %v6804_v16 = vpop.f32.mrf.mxu1 }
 0x5c7   :  { %13013 = vst [vmem:[#allocation20_spill] sm:$0xff] %v11520_v1 }
 0x5c8   :  { %v11522_v23 = vpop.f32.mrf.mxu0  ;;  %v6805_v20 = vpop.f32.mrf.mxu1 }
 0x5c9   :  { %13014 = vst [vmem:[#allocation21_spill] sm:$0xff] %v11522_v23  ;;  %v6806_v27 = vadd.f32 %v6805_v20, %v6804_v16  ;;  %v6791_v23 = vadd.f32 %v6790_v35, %v6789_v28  ;;  %v3707_v16 = vadd.f32 %v6782_v13, %v11449_v12 }
 0x5ca   :  { %v6807_v0 = vpop.f32.mrf.mxu1  ;;  %v11526_v36 = vpop.f32.mrf.mxu0  ;;  %v13019_v13 = vld [vmem:[#allocation28_spill] sm:$0xff] }
 0x5cb   :  { %v11524_v10 = vadd.f32 %v6806_v27, %v3622_v50  ;;  %v3507_v27 = vadd.f32 %v6676_v6, %v11413_v25  ;;  %v6853_v50 = vadd.f32 %v6852_v19, %v6851_v51  ;;  %v3722_v54 = vadd.f32 %v6791_v23, %v11479_v31 }
 0x5cc   :  { %v6808_v46 = vpop.f32.mrf.mxu1  ;;  %v11528_v49 = vpop.f32.mrf.mxu0 }
 0x5cd   :  { %13015 = vst [vmem:[#allocation8_spill] sm:$0xff] %v11524_v10  ;;  %v6809_v56 = vadd.f32 %v6808_v46, %v6807_v0  ;;  %v6679_v46 = vadd.f32 %v6678_v18, %v6677_v45  ;;  %v6797_v0 = vadd.f32 %v6796_v44, %v6795_v32  ;;  %v3837_v58 = vadd.f32 %v6853_v50, %v3712_v62 }
 0x5ce   :  { %v6810_v22 = vpop.f32.mrf.mxu1  ;;  %v11535_v10 = vpop.f32.mrf.mxu0  ;;  %v6747_v45 = vadd.f32 %v11504_v42, %v11502_v26  ;;  %v6868_v26 = vadd.f32 %v6867_v7, %v11514_v5 }
 0x5cf   :  { %v11530_v60 = vadd.f32 %v6809_v56, %v3627_v61  ;;  %v6744_v56 = vadd.f32 %v11500_v48, %v11497_v57  ;;  %v6850_v61 = vadd.f32 %v6849_v39, %v6848_v63  ;;  %v3512_v18 = vadd.f32 %v6679_v46, %v11413_v25 }
 0x5d0   :  { %v6811_v1 = vpop.f32.mrf.mxu1  ;;  %v6879_v12 = vpop.f32.mrf.mxu0  ;;  %v6856_v57 = vadd.f32 %v11508_v37, %v11506_v8  ;;  %v3732_v23 = vadd.f32 %v6797_v0, %v11488_v11  ;;  %v3847_v48 = vadd.f32 %v6859_v47, %v3722_v54  ;;  %v3727_v63 = vadd.f32 %v6794_v9, %v11482_v52  ;;  %v13017_v52 = vld [vmem:[#allocation7_spill] sm:$0xff] }
 0x5d1   :  { %v3632_v51 = vadd.f32 %v6744_v56, %v3507_v27  ;;  %v3832_v4 = vadd.f32 %v6850_v61, %v3707_v16  ;;  %v6865_v39 = vadd.f32 %v6864_v59, %v6863_v3  ;;  %v6862_v25 = vadd.f32 %v11512_v40, %v11510_v55  ;;  %v13018_v59 = vld [vmem:[#allocation32_spill] sm:$0xff]  ;;  %v13020_v55 = vld [vmem:[#allocation6_spill] sm:$0xff]  ;;  %v13023_v61 = vld [vmem:[#allocation33_spill] sm:$0xff] }
 0x5d2   :  { %v6813_v20 = vpop.f32.mrf.mxu1  ;;  %v3842_v24 = vadd.f32 %v6856_v57, %v3717_v29  ;;  %v6881_v42 = vpop.f32.mrf.mxu0  ;;  %v6812_v37 = vadd.f32 %v6811_v1, %v6810_v22  ;;  %v3742_v3 = vadd.f32 %v6803_v33, %v13017_v52  ;;  %v6871_v40 = vadd.f32 %v13020_v55, %v13019_v13  ;;  %v13021_v22 = vld [vmem:[#allocation20_spill] sm:$0xff]  ;;  %v13022_v1 = vld [vmem:[#allocation21_spill] sm:$0xff]  ;;  %v13024_v29 = vld [vmem:[#allocation34_spill] sm:$0xff] }
 0x5d3   :  { %v3857_v44 = vadd.f32 %v6865_v39, %v3732_v23  ;;  %v3637_v5 = vadd.f32 %v6747_v45, %v3512_v18  ;;  %v3852_v17 = vadd.f32 %v6862_v25, %v3727_v63  ;;  %v3862_v53 = vadd.f32 %v6868_v26, %v3737_v2  ;;  %v13029_v2 = vld [vmem:[#allocation36_spill] sm:$0xff] }
 0x5d4   :  { %v6814_v43 = vpop.f32.mrf.mxu1  ;;  %v6882_v27 = vpop.f32.mrf.mxu0  ;;  %v3757_v0 = vadd.f32 %v6812_v37, %v3632_v51  ;;  %v3867_v47 = vadd.f32 %v6871_v40, %v3742_v3  ;;  %v13033_v40 = vld [vmem:[#allocation38_spill] sm:$0xff] }
 0x5d5   :  { %v6815_v35 = vadd.f32 %v6814_v43, %v6813_v20  ;;  %v6874_v20 = vadd.f32 %v13022_v1, %v13021_v22  ;;  %v6883_v45 = vadd.f32 %v6882_v27, %v6881_v42 }
 0x5d6   :  { %v7396_v6 = vpop.f32.mrf.mxu1 }
 0x5d7   :  { %v3962_v19 = vadd.f32 %v7396_v6, %v3837_v58  ;;  %v3762_v43 = vadd.f32 %v6815_v35, %v3637_v5  ;;  %v13032_v35 = vld [vmem:[#allocation37_spill] sm:$0xff] }
 0x5d8   :  { %v3956_v31 = vpop.f32.mrf.mxu1 }
 0x5d9   :  { %v4016_v34 = vmax.f32 %v3962_v19, 0.0  ;;  %v3957_v62 = vadd.f32 %v3956_v31, %v3832_v4  ;;  %v6877_v19 = vadd.f32 %v11528_v49, %v11526_v36  ;;  %v6880_v4 = vadd.f32 %v6879_v12, %v11535_v10  ;;  %v13028_v10 = vld [vmem:[#allocation35_spill] sm:$0xff] }
 0x5da   :  { %v7399_v28 = vpop.f32.mrf.mxu1  ;;  %v3887_v49 = vadd.f32 %v6883_v45, %v3762_v43 }
 0x5db   :  { %v4015_v8 = vmax.f32 %v3957_v62, 0.0  ;;  %v3972_v11 = vadd.f32 %v7399_v28, %v3847_v48  ;;  %v4028_v15 = vmul.f32 %v13016_v14, %v4016_v34  ;;  %v13027_v34 = vld [vmem:[#allocation8_spill] sm:$0xff]  ;;  %v3877_v39 = vadd.f32 %v6877_v19, %v11530_v60 }
 0x5dc   :  { %v3966_v32 = vpop.f32.mrf.mxu1  ;;  %v3872_v62 = vadd.f32 %v6874_v20, %v13027_v34  ;;  %v3882_v36 = vadd.f32 %v6880_v4, %v3757_v0 }
 0x5dd   :  { %v11555_v41 = vmul.f32 %v13018_v59, %v4015_v8  ;;  %v4018_v21 = vmax.f32 %v3972_v11, 0.0  ;;  %v3967_v38 = vadd.f32 %v3966_v32, %v3842_v24  ;;  %v4040_v56 = vrot.slane %v4028_v15, 7 }
 0x5de   :  { %v7402_v7 = vpop.f32.mrf.mxu1 }
 0x5df   :  { %v4039_v16 = vrot.slane %v11555_v41, 7  ;;  %v4017_v50 = vmax.f32 %v3967_v38, 0.0  ;;  %v3982_v46 = vadd.f32 %v7402_v7, %v3857_v44  ;;  %v4030_v54 = vmul.f32 %v13023_v61, %v4018_v21 }
 0x5e0   :  { %v3976_v58 = vpop.f32.mrf.mxu1 }
 0x5e1   :  { %v4029_v9 = vmul.f32 %v13024_v29, %v4017_v50  ;;  %v4020_v30 = vmax.f32 %v3982_v46, 0.0  ;;  %v3977_v6 = vadd.f32 %v3976_v58, %v3852_v17  ;;  %v11571_v57 = vsel %vm13026_vm9, %v4039_v16, %v4040_v56  ;;  %v13037_v46 = vld [vmem:[#allocation39_spill] sm:$0xff]  ;;  %vm13049_vm9 = vmmov %vm13001_vm0 }
 0x5e2   :  { %v7405_v18 = vpop.f32.mrf.mxu1  ;;  %v4042_v48 = vrot.slane %v4030_v54, 7  ;;  %v4065_v42 = vrot.slane %v11571_v57, 1  ;;  %v4089_v8 = vrot.slane %v11571_v57, 2 }
 0x5e3   :  { %v4041_v23 = vrot.slane %v4029_v9, 7  ;;  %v4019_v31 = vmax.f32 %v3977_v6, 0.0  ;;  %v3992_v33 = vadd.f32 %v7405_v18, %v3867_v47  ;;  %v4032_v12 = vmul.f32 %v13028_v10, %v4020_v30  ;;  %v13039_v47 = vld [vmem:[#allocation40_spill] sm:$0xff] }
 0x5e4   :  { %v3986_v63 = vpop.f32.mrf.mxu1 }
 0x5e5   :  { %v4031_v28 = vmul.f32 %v13029_v2, %v4019_v31  ;;  %v4022_v24 = vmax.f32 %v3992_v33, 0.0  ;;  %v3987_v25 = vadd.f32 %v3986_v63, %v3862_v53  ;;  %v11581_v11 = vsel %vm13030_vm14, %v4040_v56, %v4041_v23  ;;  %vm13050_vm14 = vmmov %vm13001_vm0 }
 0x5e6   :  { %v7408_v26 = vpop.f32.mrf.mxu1  ;;  %v11585_v60 = vsel %vm13031_vm3, %v4041_v23, %v4042_v48  ;;  %v4066_v3 = vrot.slane %v11581_v11, 1  ;;  %v4090_v21 = vrot.slane %v11581_v11, 2  ;;  %v4044_v55 = vrot.slane %v4032_v12, 7  ;;  %vm13051_vm3 = vmmov %vm13036_vm5 }
 0x5e7   :  { %v4043_v37 = vrot.slane %v4031_v28, 7  ;;  %v4034_v15 = vmul.f32 %v13032_v35, %v4022_v24  ;;  %v4021_v32 = vmax.f32 %v3987_v25, 0.0  ;;  %v4002_v44 = vadd.f32 %v7408_v26, %v3877_v39  ;;  %v13046_v25 = vld [vmem:[#allocation17_spill] sm:$0xff] }
 0x5e8   :  { %v3996_v52 = vpop.f32.mrf.mxu1  ;;  %v4067_v38 = vrot.slane %v11585_v60, 1  ;;  %v4091_v13 = vrot.slane %v11585_v60, 2  ;;  %v11597_v22 = vsel %vm13034_vm6, %v4065_v42, %v4066_v3  ;;  %v11603_v1 = vsel %vm13035_vm10, %v4089_v8, %v4090_v21  ;;  %vm13052_vm6 = vmmov %vm13000_vm2 }
 0x5e9   :  { %v4033_v5 = vmul.f32 %v13033_v40, %v4021_v32  ;;  %v4024_v7 = vmax.f32 %v4002_v44, 0.0  ;;  %v3997_v17 = vadd.f32 %v3996_v52, %v3872_v62  ;;  %v4046_v54 = vrot.slane %v4034_v15, 7  ;;  %v13040_v62 = vld [vmem:[#allocation41_spill] sm:$0xff]  ;;  %vm13053_vm10 = vmmov %vm13001_vm0 }
 0x5ea   :  { %v7411_v53 = vpop.f32.mrf.mxu1  ;;  %v11607_v20 = vsel %vm13036_vm5, %v4066_v3, %v4067_v38  ;;  %v11611_v27 = vsel %vm13000_vm2, %v4090_v21, %v4091_v13  ;;  %v11616_v9 = vsel %vm13001_vm0, %v4042_v48, %v4043_v37  ;;  %v11620_v30 = vsel %vm13038_vm1, %v4043_v37, %v4044_v55  ;;  %vm13054_vm5 = vmmov %vm13051_vm3 }
 0x5eb   :  { %v4045_v50 = vrot.slane %v4033_v5, 7  ;;  %v4036_v0 = vmul.f32 %v13037_v46, %v4024_v7  ;;  %v4023_v43 = vmax.f32 %v3997_v17, 0.0  ;;  %v4012_v56 = vadd.f32 %v7411_v53, %v3887_v49  ;;  %vm13055_vm0 = vmmov %vm13051_vm3 }
 0x5ec   :  { %v4006_v58 = vpop.f32.mrf.mxu1  ;;  %v4068_v18 = vrot.slane %v11616_v9, 1  ;;  %v4092_v23 = vrot.slane %v11616_v9, 2  ;;  %v4069_v31 = vrot.slane %v11620_v30, 1  ;;  %v4093_v33 = vrot.slane %v11620_v30, 2  ;;  %vm13056_vm1 = vmmov %vm13000_vm2 }
 0x5ed   :  { %v4048_v6 = vrot.slane %v4036_v0, 7  ;;  %v4035_v19 = vmul.f32 %v13039_v47, %v4023_v43  ;;  %v4026_v4 = vmax.f32 %v4012_v56, 0.0  ;;  %v4007_v45 = vadd.f32 %v4006_v58, %v3882_v36 }
 0x5ee   :  { %v11630_v39 = vsel %vm13041_vm12, %v4044_v55, %v4045_v50  ;;  %v11634_v49 = vsel %vm13042_vm13, %v4067_v38, %v4068_v18  ;;  %v11638_v36 = vsel %vm13043_vm4, %v4091_v13, %v4092_v23  ;;  %v11642_v12 = vsel %vm13044_vm7, %v4068_v18, %v4069_v31  ;;  %vm13057_vm12 = vmmov %vm13055_vm0  ;;  %v5837_v18 = vld [vmem:[%s12686_s4 + $0xff8] sm:$0xff] }
 0x5ef   :  { %v4047_v34 = vrot.slane %v4035_v19, 7  ;;  %v4038_v48 = vmul.f32 %v13040_v62, %v4026_v4  ;;  %v4025_v63 = vmax.f32 %v4007_v45, 0.0  ;;  %v11646_v28 = vsel %vm13045_vm15, %v4092_v23, %v4093_v33  ;;  %vm13058_vm13 = vmmov %vm13056_vm1 }
 0x5f0   :  { %v4070_v37 = vrot.slane %v11630_v39, 1  ;;  %v4094_v15 = vrot.slane %v11630_v39, 2  ;;  %v11653_v32 = vsel %vm13047_vm8, %v4045_v50, %v4046_v54  ;;  %vm13059_vm4 = vmmov %vm13055_vm0 }
 0x5f1   :  { %v4050_v24 = vrot.slane %v4038_v48, 7  ;;  %v4037_v26 = vmul.f32 %v13046_v25, %v4025_v63  ;;  %v11657_v44 = vsel %vm13048_vm11, %v4046_v54, %v4047_v34  ;;  %v11661_v52 = vsel %vm13049_vm9, %v4047_v34, %v4048_v6  ;;  %v5869_v34 = vld [vmem:[%s12686_s4 + $0x10f8] sm:$0xff]  ;;  %vm13060_vm7 = vmmov %vm13047_vm8 }
 0x5f2   :  { %v11671_v38 = vsel %vm13051_vm3, %v4069_v31, %v4070_v37  ;;  %v11675_v13 = vsel %vm13052_vm6, %v4093_v33, %v4094_v15  ;;  %v4071_v55 = vrot.slane %v11653_v32, 1  ;;  %v4095_v5 = vrot.slane %v11653_v32, 2  ;;  %v5852_v33 = vld [vmem:[%s12686_s4 + $0x1070] sm:$0xff]  ;;  %vm13061_vm15 = vmmov %vm13055_vm0 }
 0x5f3   :  { %v4049_v3 = vrot.slane %v4037_v26, 7  ;;  %v11667_v21 = vsel %vm13050_vm14, %v4050_v24, %v4039_v16  ;;  %v4072_v16 = vrot.slane %v11657_v44, 1  ;;  %v4096_v7 = vrot.slane %v11657_v44, 2  ;;  %vm13062_vm8 = vmmov %vm13056_vm1 }
 0x5f4   :  { %4453 = vmatprep.mubr.f32.mxu1 %v11667_v21  ;;  %v4073_v17 = vrot.slane %v11661_v52, 1  ;;  %v4088_v53 = vrot.slane %v11667_v21, 2  ;;  %v4064_v0 = vrot.slane %v11667_v21, 1  ;;  %v11693_v56 = vsel %vm13054_vm5, %v4070_v37, %v4071_v55  ;;  %vm13063_vm11 = vmmov %vm13056_vm1 }
 0x5f5   :  { %v11682_v41 = vsel %vm13053_vm10, %v4049_v3, %v4050_v24  ;;  %v11697_v54 = vsel %vm13000_vm2, %v4094_v15, %v4095_v5  ;;  %v11701_v58 = vsel %vm13055_vm0, %v4071_v55, %v4072_v16  ;;  %v11705_v19 = vsel %vm13056_vm1, %v4095_v5, %v4096_v7  ;;  %v5836_v24 = vld [vmem:[%s12686_s4 + $0xff0] sm:$0xff]  ;;  %v5851_v15 = vld [vmem:[%s12686_s4 + $0x1068] sm:$0xff]  ;;  %vm13064_vm9 = vmmov %vm13055_vm0 }
 0x5f6   :  { %v4063_v50 = vrot.slane %v11682_v41, 1  ;;  %v4087_v43 = vrot.slane %v11682_v41, 2  ;;  %v11724_v23 = vsel %vm13059_vm4, %v4072_v16, %v4073_v17  ;;  %v4097_v31 = vrot.slane %v11661_v52, 2  ;;  %vm13065_vm14 = vmmov %vm13056_vm1  ;;  %v5884_v5 = vld [vmem:[%s12686_s4 + $0x1170] sm:$0xff]  ;;  %v5850_v16 = vld [vmem:[%s12686_s4 + $0x1060] sm:$0xff] }
 0x5f7   :  { %v11737_v48 = vsel %vm13060_vm7, %v4048_v6, %v4049_v3  ;;  %v11745_v63 = vsel %vm13061_vm15, %v4064_v0, %v4065_v42  ;;  %v11761_v42 = vsel %vm13063_vm11, %v4088_v53, %v4089_v8  ;;  %v5835_v8 = vld [vmem:[%s12686_s4 + $0xfe8] sm:$0xff]  ;;  %vm13066_vm3 = vmmov %vm13055_vm0  ;;  %vm4923_vm10 = vcmask 1040384  }
 0x5f8   :  { %v11711_v4 = vsel %vm13057_vm12, %v4063_v50, %v4064_v0  ;;  %v11717_v45 = vsel %vm13058_vm13, %v4087_v43, %v4088_v53  ;;  %v11752_v26 = vsel %vm13062_vm8, %v4096_v7, %v4097_v31  ;;  %v4074_v6 = vrot.slane %v11737_v48, 1  ;;  %v5834_v7 = vld [vmem:[%s12686_s4 + $0xfe0] sm:$0xff]  ;;  %v5868_v53 = vld [vmem:[%s12686_s4 + $0x10f0] sm:$0xff]  ;;  %v5833_v0 = vld [vmem:[%s12686_s4 + $0xfd8] sm:$0xff] }
 0x5f9   :  { %4328 = vmatprep.mubr.f32.mxu0 %v11711_v4  ;;  %4454 = vmatmul.mubr.f32.vlgmr.msra.gmra.mxu1 %v11717_v45  ;;  %v4098_v37 = vrot.slane %v11737_v48, 2  ;;  %vm13067_vm6 = vmmov %vm13056_vm1 }
 0x5fa   :  { %4329 = vmatmul.mubr.f32.vlgmr.msra.gmra.mxu0 %v11682_v41  ;;  %4458 = vmatprep.mubr.f32.mxu1 %v11571_v57  ;;  %v11770_v3 = vsel %vm13064_vm9, %v4073_v17, %v4074_v6  ;;  %v5849_v17 = vld [vmem:[%s12686_s4 + $0x1058] sm:$0xff] }
 0x5fb   :  { %7049 = vmatpush3.msra.mxu0 %v5837_v18  ;;  %4333 = vmatprep.mubr.f32.mxu0 %v11745_v63  ;;  %v11776_v55 = vsel %vm13065_vm14, %v4097_v31, %v4098_v37  ;;  %v5848_v18 = vld [vmem:[%s12686_s4 + $0x1050] sm:$0xff] }
 0x5fc   :  { %7050 = vmatprep.subr.mxu0 %v5852_v33  ;;  %7117 = vmatpush3.msra.mxu1 %v5869_v34  ;;  %v5832_v31 = vld [vmem:[%s12686_s4 + $0xfd0] sm:$0xff]  ;;  %v5883_v33 = vld [vmem:[%s12686_s4 + $0x1168] sm:$0xff] }
 0x5fd   :  { %4459 = vmatmul.mubr.f32.gmra.mxu1 %v11761_v42  ;;  %7051 = vmatpush3.msra.mxu0 %v5836_v24  ;;  %v5847_v34 = vld [vmem:[%s12686_s4 + $0x1048] sm:$0xff] }
 0x5fe   :  { %4334 = vmatmul.mubr.f32.gmra.mxu0 %v11667_v21  ;;  %4463 = vmatprep.mubr.f32.mxu1 %v11581_v11  ;;  %v5831_v24 = vld [vmem:[%s12686_s4 + $0xfc8] sm:$0xff] }
 0x5ff   :  { %4338 = vmatprep.mubr.f32.mxu0 %v11597_v22  ;;  %7052 = vmatprep.subr.mxu0 %v5851_v15  ;;  %v5846_v15 = vld [vmem:[%s12686_s4 + $0x1040] sm:$0xff] }
 0x600   :  { %7053 = vmatpush3.msra.mxu0 %v5835_v8  ;;  %7118 = vmatprep.subr.mxu1 %v5884_v5  ;;  %v5867_v8 = vld [vmem:[%s12686_s4 + $0x10e8] sm:$0xff]  ;;  %v5830_v5 = vld [vmem:[%s12686_s4 + $0xfc0] sm:$0xff] }
 0x601   :  { %4464 = vmatmul.mubr.f32.gmra.mxu1 %v11603_v1  ;;  %7054 = vmatprep.subr.mxu0 %v5850_v16  ;;  %v5882_v16 = vld [vmem:[%s12686_s4 + $0x1160] sm:$0xff] }
 0x602   :  { %4339 = vmatmul.mubr.f32.gmra.mxu0 %v11571_v57  ;;  %4468 = vmatprep.mubr.f32.mxu1 %v11585_v60 }
 0x603   :  { %4343 = vmatprep.mubr.f32.mxu0 %v11607_v20  ;;  %7055 = vmatpush3.msra.mxu0 %v5834_v7  ;;  %v5866_v7 = vld [vmem:[%s12686_s4 + $0x10e0] sm:$0xff] }
 0x604   :  { %7056 = vmatprep.subr.mxu0 %v5849_v17  ;;  %7119 = vmatpush3.msra.mxu1 %v5868_v53  ;;  %v5845_v17 = vld [vmem:[%s12686_s4 + $0x1038] sm:$0xff] }
 0x605   :  { %4469 = vmatmul.mubr.f32.gmra.mxu1 %v11611_v27  ;;  %7057 = vmatpush3.msra.mxu0 %v5833_v0  ;;  %v5881_v53 = vld [vmem:[%s12686_s4 + $0x1158] sm:$0xff] }
 0x606   :  { %4344 = vmatmul.mubr.f32.gmra.mxu0 %v11581_v11  ;;  %4473 = vmatprep.mubr.f32.mxu1 %v11616_v9  ;;  %v5829_v0 = vld [vmem:[%s12686_s4 + $0xfb8] sm:$0xff] }
 0x607   :  { %4348 = vmatprep.mubr.f32.mxu0 %v11634_v49  ;;  %7058 = vmatprep.subr.mxu0 %v5848_v18  ;;  %v5865_v18 = vld [vmem:[%s12686_s4 + $0x10d8] sm:$0xff] }
 0x608   :  { %7059 = vmatpush3.msra.mxu0 %v5832_v31  ;;  %7120 = vmatprep.subr.mxu1 %v5883_v33  ;;  %v5880_v31 = vld [vmem:[%s12686_s4 + $0x1150] sm:$0xff] }
 0x609   :  { %4474 = vmatmul.mubr.f32.gmra.mxu1 %v11638_v36  ;;  %7060 = vmatprep.subr.mxu0 %v5847_v34  ;;  %v5844_v33 = vld [vmem:[%s12686_s4 + $0x1030] sm:$0xff] }
 0x60a   :  { %4349 = vmatmul.mubr.f32.gmra.mxu0 %v11585_v60  ;;  %4478 = vmatprep.mubr.f32.mxu1 %v11620_v30  ;;  %v5864_v34 = vld [vmem:[%s12686_s4 + $0x10d0] sm:$0xff] }
 0x60b   :  { %4353 = vmatprep.mubr.f32.mxu0 %v11642_v12  ;;  %7061 = vmatpush3.msra.mxu0 %v5831_v24  ;;  %v5828_v24 = vld [vmem:[%s12686_s4 + $0xfb0] sm:$0xff] }
 0x60c   :  { %7062 = vmatprep.subr.mxu0 %v5846_v15  ;;  %7121 = vmatpush3.msra.mxu1 %v5867_v8  ;;  %v5879_v15 = vld [vmem:[%s12686_s4 + $0x1148] sm:$0xff] }
 0x60d   :  { %4479 = vmatmul.mubr.f32.gmra.mxu1 %v11646_v28  ;;  %7063 = vmatpush3.msra.mxu0 %v5830_v5  ;;  %v5863_v8 = vld [vmem:[%s12686_s4 + $0x10c8] sm:$0xff] }
 0x60e   :  { %4354 = vmatmul.mubr.f32.gmra.mxu0 %v11616_v9  ;;  %4483 = vmatprep.mubr.f32.mxu1 %v11630_v39  ;;  %v5843_v5 = vld [vmem:[%s12686_s4 + $0x1028] sm:$0xff] }
 0x60f   :  { %4358 = vmatprep.mubr.f32.mxu0 %v11671_v38  ;;  %7122 = vmatprep.subr.mxu1 %v5882_v16  ;;  %v5878_v16 = vld [vmem:[%s12686_s4 + $0x1140] sm:$0xff] }
 0x610   :  { %7123 = vmatpush3.msra.mxu1 %v5866_v7  ;;  %7064 = vmatprep.subr.mxu0 %v5845_v17  ;;  %v5827_v7 = vld [vmem:[%s12686_s4 + $0xfa8] sm:$0xff]  ;;  %v5862_v17 = vld [vmem:[%s12686_s4 + $0x10c0] sm:$0xff] }
 0x611   :  { %4484 = vmatmul.mubr.f32.gmra.mxu1 %v11675_v13  ;;  %7124 = vmatprep.subr.mxu1 %v5881_v53  ;;  %v5877_v53 = vld [vmem:[%s12686_s4 + $0x1138] sm:$0xff] }
 0x612   :  { %4359 = vmatmul.mubr.f32.gmra.mxu0 %v11620_v30  ;;  %4488 = vmatprep.mubr.f32.mxu1 %v11653_v32 }
 0x613   :  { %7065 = vmatpush3.msra.mxu0 %v5829_v0  ;;  %7125 = vmatpush3.msra.mxu1 %v5865_v18  ;;  %v5842_v0 = vld [vmem:[%s12686_s4 + $0x1020] sm:$0xff]  ;;  %v5861_v18 = vld [vmem:[%s12686_s4 + $0x10b8] sm:$0xff] }
 0x614   :  { %4363 = vmatprep.mubr.f32.mxu0 %v11693_v56  ;;  %7126 = vmatprep.subr.mxu1 %v5880_v31  ;;  %v5826_v31 = vld [vmem:[%s12686_s4 + $0xfa0] sm:$0xff] }
 0x615   :  { %7066 = vmatprep.subr.mxu0 %v5844_v33  ;;  %7127 = vmatpush3.msra.mxu1 %v5864_v34  ;;  %v5876_v33 = vld [vmem:[%s12686_s4 + $0x1130] sm:$0xff] }
 0x616   :  { %4489 = vmatmul.mubr.f32.gmra.mxu1 %v11697_v54  ;;  %7067 = vmatpush3.msra.mxu0 %v5828_v24  ;;  %v5860_v34 = vld [vmem:[%s12686_s4 + $0x10b0] sm:$0xff]  ;;  %v5841_v24 = vld [vmem:[%s12686_s4 + $0x1018] sm:$0xff] }
 0x617   :  { %7128 = vmatprep.subr.mxu1 %v5879_v15  ;;  %4364 = vmatmul.mubr.f32.gmra.mxu0 %v11630_v39  ;;  %v5875_v15 = vld [vmem:[%s12686_s4 + $0x1128] sm:$0xff] }
 0x618   :  { %4493 = vmatprep.mubr.f32.mxu1 %v11657_v44  ;;  %7129 = vmatpush3.msra.mxu1 %v5863_v8  ;;  %v5825_v8 = vld [vmem:[%s12686_s4 + $0xf98] sm:$0xff] }
 0x619   :  { %4368 = vmatprep.mubr.f32.mxu0 %v11701_v58  ;;  %7068 = vmatprep.subr.mxu0 %v5843_v5  ;;  %v5859_v5 = vld [vmem:[%s12686_s4 + $0x10a8] sm:$0xff] }
 0x61a   :  { %7130 = vmatprep.subr.mxu1 %v5878_v16  ;;  %7069 = vmatpush3.msra.mxu0 %v5827_v7  ;;  %v5874_v16 = vld [vmem:[%s12686_s4 + $0x1120] sm:$0xff]  ;;  %v5840_v7 = vld [vmem:[%s12686_s4 + $0x1010] sm:$0xff] }
 0x61b   :  { %7131 = vmatpush3.msra.mxu1 %v5862_v17  ;;  %4369 = vmatmul.mubr.f32.gmra.mxu0 %v11653_v32  ;;  %v5858_v17 = vld [vmem:[%s12686_s4 + $0x10a0] sm:$0xff] }
 0x61c   :  { %4494 = vmatmul.mubr.f32.gmra.mxu1 %v11705_v19  ;;  %7132 = vmatprep.subr.mxu1 %v5877_v53  ;;  %v5824_v53 = vld [vmem:[%s12686_s4 + $0xf90] sm:$0xff] }
 0x61d   :  { %4498 = vmatprep.mubr.f32.mxu1 %v11661_v52  ;;  %7070 = vmatprep.subr.mxu0 %v5842_v0  ;;  %v5873_v0 = vld [vmem:[%s12686_s4 + $0x1118] sm:$0xff] }
 0x61e   :  { %7133 = vmatpush3.msra.mxu1 %v5861_v18  ;;  %4373 = vmatprep.mubr.f32.mxu0 %v11724_v23  ;;  %v5857_v18 = vld [vmem:[%s12686_s4 + $0x1098] sm:$0xff] }
 0x61f   :  { %7071 = vmatpush3.msra.mxu0 %v5826_v31  ;;  %7134 = vmatprep.subr.mxu1 %v5876_v33  ;;  %v5839_v31 = vld [vmem:[%s12686_s4 + $0x1008] sm:$0xff]  ;;  %v5872_v33 = vld [vmem:[%s12686_s4 + $0x1110] sm:$0xff] }
 0x620   :  { %7135 = vmatpush3.msra.mxu1 %v5860_v34  ;;  %7072 = vmatprep.subr.mxu0 %v5841_v24  ;;  %v5823_v34 = vld [vmem:[%s12686_s4 + $0xf88] sm:$0xff]  ;;  %v11973_v24 = vsel %vm13066_vm3, %v4074_v6, %v4063_v50  ;;  %v11994_v6 = vsel %vm13067_vm6, %v4098_v37, %v4087_v43  ;;  %v5854_v43 = vld [vmem:[%s12686_s4 + $0x1080] sm:$0xff]  ;;  %v5901_v37 = vld [vmem:[%s12686_s4 + $0x11f8] sm:$0xff] }
 0x621   :  { %4499 = vmatmul.mubr.f32.gmra.mxu1 %v11752_v26  ;;  %7136 = vmatprep.subr.mxu1 %v5875_v15  ;;  %v5856_v15 = vld [vmem:[%s12686_s4 + $0x1090] sm:$0xff]  ;;  %v5855_v50 = vld [vmem:[%s12686_s4 + $0x1088] sm:$0xff] }
 0x622   :  { %4374 = vmatmul.mubr.f32.gmra.mxu0 %v11657_v44  ;;  %4503 = vmatprep.mubr.f32.mxu1 %v11737_v48 }
 0x623   :  { %7073 = vmatpush3.msra.mxu0 %v5825_v8  ;;  %7137 = vmatpush3.msra.mxu1 %v5859_v5  ;;  %v5871_v8 = vld [vmem:[%s12686_s4 + $0x1108] sm:$0xff]  ;;  %v5838_v5 = vld [vmem:[%s12686_s4 + $0x1000] sm:$0xff] }
 0x624   :  { %4378 = vmatprep.mubr.f32.mxu0 %v11770_v3  ;;  %7138 = vmatprep.subr.mxu1 %v5874_v16  ;;  %v5822_v16 = vld [vmem:[%s12686_s4 + $0xf80] sm:$0xff] }
 0x625   :  { %7074 = vmatprep.subr.mxu0 %v5840_v7  ;;  %7139 = vmatpush3.msra.mxu1 %v5858_v17  ;;  %v5870_v7 = vld [vmem:[%s12686_s4 + $0x1100] sm:$0xff]  ;;  %v5900_v17 = vld [vmem:[%s12686_s4 + $0x11f0] sm:$0xff] }
 0x626   :  { %4504 = vmatmul.mubr.f32.gmra.mxu1 %v11776_v55  ;;  %7075 = vmatpush3.msra.mxu0 %v5824_v53  ;;  %v5899_v53 = vld [vmem:[%s12686_s4 + $0x11e8] sm:$0xff] }
 0x627   :  { %7140 = vmatprep.subr.mxu1 %v5873_v0  ;;  %4379 = vmatmul.mubr.f32.gmra.mxu0 %v11661_v52  ;;  %v5007_v0 = vld [vmem:[%s12688_s6 + $0x288] sm:$0xff] }
 0x628   :  { %4508 = vmatprep.mubr.f32.mxu1 %v11682_v41  ;;  %7141 = vmatpush3.msra.mxu1 %v5857_v18  ;;  %v5009_v18 = vld [vmem:[%s12688_s6 + $0x298] sm:$0xff] }
 0x629   :  { %4383 = vmatprep.mubr.f32.mxu0 %v11973_v24  ;;  %7076 = vmatprep.subr.mxu0 %v5839_v31 }
 0x62a   :  { %7142 = vmatprep.subr.mxu1 %v5872_v33  ;;  %7077 = vmatpush3.msra.mxu0 %v5823_v34  ;;  %v5006_v33 = vld [vmem:[%s12688_s6 + $0x280] sm:$0xff]  ;;  %v5008_v34 = vld [vmem:[%s12688_s6 + $0x290] sm:$0xff] }
 0x62b   :  { %7143 = vmatpush3.msra.mxu1 %v5856_v15  ;;  %4384 = vmatmul.mubr.f32.gmra.mxu0 %v11737_v48  ;;  %v4999_v15 = vld [vmem:[%s12688_s6 + $0x248] sm:$0xff] }
 0x62c   :  { %4509 = vmatmul.mubr.f32.gmra.mxu1 %v11994_v6  ;;  %7144 = vmatprep.subr.mxu1 %v5871_v8  ;;  %v5001_v8 = vld [vmem:[%s12688_s6 + $0x258] sm:$0xff] }
 0x62d   :  { %7078 = vmatprep.subr.mxu0 %v5838_v5  ;;  %7145 = vmatpush3.msra.mxu1 %v5855_v50  ;;  %v4998_v50 = vld [vmem:[%s12688_s6 + $0x240] sm:$0xff] }
 0x62e   :  { %4703 = vmatprep.mubr.f32.mxu1 %v11597_v22  ;;  %7079 = vmatpush3.msra.mxu0 %v5822_v16 }
 0x62f   :  { %4578 = vmatprep.mubr.f32.mxu0 %v11761_v42  ;;  %7146 = vmatprep.subr.mxu1 %v5870_v7  ;;  %v12204_v7 = vld [vmem:[%s12687_s5 + $0x3] ss:$0 sm:$0xff] }
 0x630   :  { %7147 = vmatpush3.msra.mxu1 %v5854_v43  ;;  %7412 = vmatprep.subr.mxu0 %v5901_v37 }
 0x631   :  { %4704 = vmatmul.mubr.f32.vlgmr.msra.gmra.mxu1 %v11571_v57  ;;  %4579 = vmatmul.mubr.f32.vlgmr.msra.gmra.mxu0 %v11745_v63  ;;  %v5898_v57 = vld [vmem:[%s12686_s4 + $0x11e0] sm:$0xff] }
 0x632   :  { %4708 = vmatprep.mubr.f32.mxu1 %v11607_v20  ;;  %7413 = vmatpush3.msra.mxu0 %v5901_v37  ;;  %v4991_v37 = vld [vmem:[%s12688_s6 + $0x208] sm:$0xff] }
 0x633   :  { %4583 = vmatprep.mubr.f32.mxu0 %v11603_v1  ;;  %7414 = vmatprep.subr.mxu0 %v5900_v17 }
 0x634   :  { %7415 = vmatpush3.msra.mxu0 %v5900_v17  ;;  %v4993_v17 = vld [vmem:[%s12688_s6 + $0x218] sm:$0xff] }
 0x635   :  { %4709 = vmatmul.mubr.f32.gmra.mxu1 %v11581_v11  ;;  %4584 = vmatmul.mubr.f32.gmra.mxu0 %v11597_v22  ;;  %v5897_v11 = vld [vmem:[%s12686_s4 + $0x11d8] sm:$0xff]  ;;  %v5896_v22 = vld [vmem:[%s12686_s4 + $0x11d0] sm:$0xff] }
 0x636   :  { %4713 = vmatprep.mubr.f32.mxu1 %v11634_v49  ;;  %4588 = vmatprep.mubr.f32.mxu0 %v11611_v27 }
 0x637   :  { %7416 = vmatprep.subr.mxu0 %v5899_v53 }
 0x638   :  { %7417 = vmatpush3.msra.mxu0 %v5899_v53 }
 0x639   :  { %4714 = vmatmul.mubr.f32.gmra.mxu1 %v11585_v60  ;;  %4589 = vmatmul.mubr.f32.gmra.mxu0 %v11607_v20  ;;  %v5895_v60 = vld [vmem:[%s12686_s4 + $0x11c8] sm:$0xff]  ;;  %v5894_v20 = vld [vmem:[%s12686_s4 + $0x11c0] sm:$0xff] }
 0x63a   :  { %4718 = vmatprep.mubr.f32.mxu1 %v11642_v12  ;;  %7418 = vmatprep.subr.mxu0 %v5898_v57 }
 0x63b   :  { %4593 = vmatprep.mubr.f32.mxu0 %v11638_v36  ;;  %7419 = vmatpush3.msra.mxu0 %v5898_v57 }
 0x63c   :  { %7420 = vmatprep.subr.mxu0 %v5897_v11 }
 0x63d   :  { %4719 = vmatmul.mubr.f32.gmra.mxu1 %v11616_v9  ;;  %4594 = vmatmul.mubr.f32.gmra.mxu0 %v11634_v49  ;;  %v5893_v9 = vld [vmem:[%s12686_s4 + $0x11b8] sm:$0xff]  ;;  %v5890_v49 = vld [vmem:[%s12686_s4 + $0x11a0] sm:$0xff] }
 0x63e   :  { %4723 = vmatprep.mubr.f32.mxu1 %v11671_v38  ;;  %7421 = vmatpush3.msra.mxu0 %v5897_v11  ;;  %v4990_v11 = vld [vmem:[%s12688_s6 + $0x200] sm:$0xff] }
 0x63f   :  { %4598 = vmatprep.mubr.f32.mxu0 %v11646_v28  ;;  %7422 = vmatprep.subr.mxu0 %v5896_v22 }
 0x640   :  { %7423 = vmatpush3.msra.mxu0 %v5896_v22  ;;  %v4992_v22 = vld [vmem:[%s12688_s6 + $0x210] sm:$0xff] }
 0x641   :  { %4724 = vmatmul.mubr.f32.gmra.mxu1 %v11620_v30  ;;  %4599 = vmatmul.mubr.f32.gmra.mxu0 %v11642_v12  ;;  %v5892_v30 = vld [vmem:[%s12686_s4 + $0x11b0] sm:$0xff]  ;;  %v5889_v12 = vld [vmem:[%s12686_s4 + $0x1198] sm:$0xff] }
 0x642   :  { %4728 = vmatprep.mubr.f32.mxu1 %v11693_v56  ;;  %4603 = vmatprep.mubr.f32.mxu0 %v11675_v13 }
 0x643   :  { %7424 = vmatprep.subr.mxu0 %v5895_v60 }
 0x644   :  { %7425 = vmatpush3.msra.mxu0 %v5895_v60 }
 0x645   :  { %4729 = vmatmul.mubr.f32.gmra.mxu1 %v11630_v39  ;;  %4604 = vmatmul.mubr.f32.gmra.mxu0 %v11671_v38  ;;  %v5891_v39 = vld [vmem:[%s12686_s4 + $0x11a8] sm:$0xff]  ;;  %v13068_v38 = vmov 0.0  }
 0x646   :  { %4733 = vmatprep.mubr.f32.mxu1 %v11701_v58  ;;  %7426 = vmatprep.subr.mxu0 %v5894_v20 }
 0x647   :  { %4608 = vmatprep.mubr.f32.mxu0 %v11697_v54  ;;  %7427 = vmatpush3.msra.mxu0 %v5894_v20  ;;  %v4983_v20 = vld [vmem:[%s12688_s6 + $0x1c8] sm:$0xff] }
 0x648   :  { %7428 = vmatprep.subr.mxu0 %v5893_v9 }
 0x649   :  { %4734 = vmatmul.mubr.f32.gmra.mxu1 %v11653_v32  ;;  %4609 = vmatmul.mubr.f32.gmra.mxu0 %v11693_v56  ;;  %v5888_v32 = vld [vmem:[%s12686_s4 + $0x1190] sm:$0xff]  ;;  %v5022_v56 = vld [vmem:[%s12688_s6 + $0x300] sm:$0xff] }
 0x64a   :  { %4738 = vmatprep.mubr.f32.mxu1 %v11724_v23  ;;  %7429 = vmatpush3.msra.mxu0 %v5893_v9  ;;  %v4985_v9 = vld [vmem:[%s12688_s6 + $0x1d8] sm:$0xff] }
 0x64b   :  { %4613 = vmatprep.mubr.f32.mxu0 %v11705_v19  ;;  %7430 = vmatprep.subr.mxu0 %v5892_v30 }
 0x64c   :  { %7431 = vmatpush3.msra.mxu0 %v5892_v30 }
 0x64d   :  { %4739 = vmatmul.mubr.f32.gmra.mxu1 %v11657_v44  ;;  %4614 = vmatmul.mubr.f32.gmra.mxu0 %v11701_v58  ;;  %v5887_v44 = vld [vmem:[%s12686_s4 + $0x1188] sm:$0xff]  ;;  %v5049_v58 = vld [vmem:[%s12688_s6 + $0x3d8] sm:$0xff] }
 0x64e   :  { %4743 = vmatprep.mubr.f32.mxu1 %v11770_v3  ;;  %4618 = vmatprep.mubr.f32.mxu0 %v11752_v26 }
 0x64f   :  { %7432 = vmatprep.subr.mxu0 %v5891_v39 }
 0x650   :  { %7433 = vmatpush3.msra.mxu0 %v5891_v39 }
 0x651   :  { %4744 = vmatmul.mubr.f32.gmra.mxu1 %v11661_v52  ;;  %4619 = vmatmul.mubr.f32.gmra.mxu0 %v11724_v23  ;;  %v5886_v52 = vld [vmem:[%s12686_s4 + $0x1180] sm:$0xff]  ;;  %v5033_v23 = vld [vmem:[%s12688_s6 + $0x358] sm:$0xff] }
 0x652   :  { %4748 = vmatprep.mubr.f32.mxu1 %v11973_v24  ;;  %7434 = vmatprep.subr.mxu0 %v5890_v49 }
 0x653   :  { %4623 = vmatprep.mubr.f32.mxu0 %v11776_v55  ;;  %7435 = vmatpush3.msra.mxu0 %v5890_v49  ;;  %v4982_v49 = vld [vmem:[%s12688_s6 + $0x1c0] sm:$0xff] }
 0x654   :  { %7436 = vmatprep.subr.mxu0 %v5889_v12 }
 0x655   :  { %4749 = vmatmul.mubr.f32.gmra.mxu1 %v11737_v48  ;;  %4624 = vmatmul.mubr.f32.gmra.mxu0 %v11770_v3  ;;  %v5032_v48 = vld [vmem:[%s12688_s6 + $0x350] sm:$0xff]  ;;  %v5014_v3 = vld [vmem:[%s12688_s6 + $0x2c0] sm:$0xff] }
 0x656   :  { %4753 = vmatprep.mubr.f32.mxu1 %v11711_v4  ;;  %7437 = vmatpush3.msra.mxu0 %v5889_v12  ;;  %v4984_v12 = vld [vmem:[%s12688_s6 + $0x1d0] sm:$0xff] }
 0x657   :  { %4628 = vmatprep.mubr.f32.mxu0 %v11994_v6  ;;  %7438 = vmatprep.subr.mxu0 %v5888_v32 }
 0x658   :  { %7439 = vmatpush3.msra.mxu0 %v5888_v32 }
 0x659   :  { %4754 = vmatmul.mubr.f32.gmra.mxu1 %v11682_v41  ;;  %4629 = vmatmul.mubr.f32.gmra.mxu0 %v11973_v24  ;;  %v5023_v41 = vld [vmem:[%s12688_s6 + $0x308] sm:$0xff] }
 0x65a   :  { %4758 = vmatprep.mubr.f32.mxu1 %v11745_v63  ;;  %4633 = vmatprep.mubr.f32.mxu0 %v11717_v45  ;;  %v5025_v63 = vld [vmem:[%s12688_s6 + $0x318] sm:$0xff] }
 0x65b   :  { %7440 = vmatprep.subr.mxu0 %v5887_v44 }
 0x65c   :  { %7441 = vmatpush3.msra.mxu0 %v5887_v44 }
 0x65d   :  { %4759 = vmatmul.mubr.f32.gmra.mxu1 %v11667_v21  ;;  %4634 = vmatmul.mubr.f32.gmra.mxu0 %v11711_v4  ;;  %v5031_v21 = vld [vmem:[%s12688_s6 + $0x348] sm:$0xff]  ;;  %v5041_v4 = vld [vmem:[%s12688_s6 + $0x398] sm:$0xff] }
 0x65e   :  { %7442 = vmatprep.subr.mxu0 %v5886_v52  ;;  %7444 = vmatprep.mubr.f32.mxu0 %v11603_v1  ;;  %v5047_v1 = vld [vmem:[%s12688_s6 + $0x3c8] sm:$0xff] }
 0x65f   :  { %7443 = vmatpush3.msra.mxu0 %v5886_v52  ;;  %5160 = vmatprep.mubr.f32.mxu1 %v13068_v38  ;;  %v4975_v52 = vld [vmem:[%s12688_s6 + $0x188] sm:$0xff] }
 0x660   :  { %5096 = vmatprep.subr.mxu1 %v5047_v1  ;;  %5167 = vmatprep.subr.mxu0 %v5049_v58  ;;  %v4977_v1 = vld [vmem:[%s12688_s6 + $0x198] sm:$0xff] }
 0x661   :  { %7445 = vmatmul.mubr.f32.vlgmr.msra.gmra.mxu0 %v11611_v27  ;;  %v5046_v27 = vld [vmem:[%s12688_s6 + $0x3c0] sm:$0xff] }
 0x662   :  { %7447 = vmatprep.mubr.f32.mxu0 %v11638_v36  ;;  %5097 = vmatpush1.msra.mxu1 %v5046_v27  ;;  %v5039_v36 = vld [vmem:[%s12688_s6 + $0x388] sm:$0xff] }
 0x663   :  { %5098 = vmatprep.subr.mxu1 %v5039_v36 }
 0x665   :  { %7448 = vmatmul.mubr.f32.gmra.mxu0 %v11646_v28  ;;  %v5038_v28 = vld [vmem:[%s12688_s6 + $0x380] sm:$0xff] }
 0x666   :  { %7450 = vmatprep.mubr.f32.mxu0 %v11675_v13  ;;  %5099 = vmatpush1.msra.mxu1 %v5038_v28  ;;  %v5030_v13 = vld [vmem:[%s12688_s6 + $0x340] sm:$0xff] }
 0x667   :  { %5100 = vmatprep.subr.mxu1 %v5031_v21  ;;  %v4974_v21 = vld [vmem:[%s12688_s6 + $0x180] sm:$0xff] }
 0x668   :  { %5101 = vmatpush1.msra.mxu1 %v5030_v13  ;;  %v4976_v13 = vld [vmem:[%s12688_s6 + $0x190] sm:$0xff] }
 0x669   :  { %7451 = vmatmul.mubr.f32.gmra.mxu0 %v11697_v54  ;;  %v5015_v54 = vld [vmem:[%s12688_s6 + $0x2c8] sm:$0xff]  ;;  %5102 = vmatprep.subr.mxu1 %v5023_v41 }
 0x66a   :  { %7453 = vmatprep.mubr.f32.mxu0 %v11705_v19  ;;  %5103 = vmatpush1.msra.mxu1 %v5022_v56  ;;  %v5048_v19 = vld [vmem:[%s12688_s6 + $0x3d0] sm:$0xff]  ;;  %v4967_v56 = vld [vmem:[%s12688_s6 + $0x148] sm:$0xff] }
 0x66b   :  { %5104 = vmatprep.subr.mxu1 %v5015_v54  ;;  %5168 = vmatpush1.msra.mxu0 %v5048_v19  ;;  %v4969_v54 = vld [vmem:[%s12688_s6 + $0x158] sm:$0xff] }
 0x66c   :  { %5169 = vmatprep.subr.mxu0 %v5041_v4  ;;  %5105 = vmatpush1.msra.mxu1 %v5014_v3  ;;  %v4966_v4 = vld [vmem:[%s12688_s6 + $0x140] sm:$0xff] }
 0x66d   :  { %7454 = vmatmul.mubr.f32.gmra.mxu0 %v11752_v26  ;;  %v5024_v26 = vld [vmem:[%s12688_s6 + $0x310] sm:$0xff]  ;;  %5106 = vmatprep.subr.mxu1 %v5007_v0  ;;  %v4958_v0 = vld [vmem:[%s12688_s6 + $0x100] sm:$0xff] }
 0x66e   :  { %7456 = vmatprep.mubr.f32.mxu0 %v11776_v55  ;;  %v5016_v55 = vld [vmem:[%s12688_s6 + $0x2d0] sm:$0xff]  ;;  %5107 = vmatpush1.msra.mxu1 %v5006_v33  ;;  %v4951_v33 = vld [vmem:[%s12688_s6 + $0xc8] sm:$0xff] }
 0x66f   :  { %5108 = vmatprep.subr.mxu1 %v4999_v15 }
 0x670   :  { %5109 = vmatpush1.msra.mxu1 %v4998_v50 }
 0x671   :  { %7457 = vmatmul.mubr.f32.gmra.mxu0 %v11994_v6  ;;  %v5000_v6 = vld [vmem:[%s12688_s6 + $0x250] sm:$0xff]  ;;  %5110 = vmatprep.subr.mxu1 %v4991_v37 }
 0x672   :  { %7459 = vmatprep.mubr.f32.mxu0 %v11717_v45  ;;  %v5040_v45 = vld [vmem:[%s12688_s6 + $0x390] sm:$0xff]  ;;  %5111 = vmatpush1.msra.mxu1 %v4990_v11 }
 0x673   :  { %5170 = vmatpush1.msra.mxu0 %v5040_v45  ;;  %5112 = vmatprep.subr.mxu1 %v4983_v20  ;;  %v4968_v45 = vld [vmem:[%s12688_s6 + $0x150] sm:$0xff]  ;;  %v4937_v20 = vld [vmem:[%s12688_s6 + $0x58] sm:$0xff] }
 0x674   :  { %5171 = vmatprep.subr.mxu0 %v5033_v23  ;;  %5113 = vmatpush1.msra.mxu1 %v4982_v49  ;;  %v4944_v11 = vld [vmem:[%s12688_s6 + $0x90] sm:$0xff] }
 0x675   :  { %7460 = vmatmul.mubr.f32.gmra.mxu0 %v11761_v42  ;;  %v5017_v42 = vld [vmem:[%s12688_s6 + $0x2d8] sm:$0xff]  ;;  %5114 = vmatprep.subr.mxu1 %v4975_v52  ;;  %v4936_v49 = vld [vmem:[%s12688_s6 + $0x50] sm:$0xff] }
 0x676   :  { %5231 = vmatprep.mubr.f32.mxu0 %v13068_v38  ;;  %5172 = vmatpush1.msra.mxu0 %v5032_v48  ;;  %v4929_v52 = vld [vmem:[%s12688_s6 + $0x18] sm:$0xff] }
 0x677   :  { %5173 = vmatprep.subr.mxu0 %v5025_v63  ;;  %5115 = vmatpush1.msra.mxu1 %v4974_v21  ;;  %v4959_v63 = vld [vmem:[%s12688_s6 + $0x108] sm:$0xff]  ;;  %v4926_v21 = vld [vmem:[%s12688_s6] sm:$0xff] }
 0x678   :  { %5174 = vmatpush1.msra.mxu0 %v5024_v26  ;;  %5116 = vmatprep.subr.mxu1 %v4967_v56  ;;  %v4961_v26 = vld [vmem:[%s12688_s6 + $0x118] sm:$0xff] }
 0x679   :  { %5175 = vmatprep.subr.mxu0 %v5017_v42  ;;  %5117 = vmatpush1.msra.mxu1 %v4966_v4 }
 0x67a   :  { %5176 = vmatpush1.msra.mxu0 %v5016_v55  ;;  %5118 = vmatprep.subr.mxu1 %v4959_v63 }
 0x67b   :  { %5177 = vmatprep.subr.mxu0 %v5009_v18  ;;  %v4960_v18 = vld [vmem:[%s12688_s6 + $0x110] sm:$0xff]  ;;  %5119 = vmatpush1.msra.mxu1 %v4958_v0 }
 0x67c   :  { %5178 = vmatpush1.msra.mxu0 %v5008_v34  ;;  %v4953_v34 = vld [vmem:[%s12688_s6 + $0xd8] sm:$0xff]  ;;  %5120 = vmatprep.subr.mxu1 %v4951_v33 }
 0x67d   :  { %5179 = vmatprep.subr.mxu0 %v5001_v8  ;;  %v4950_v8 = vld [vmem:[%s12688_s6 + $0xc0] sm:$0xff] }
 0x67e   :  { %5180 = vmatpush1.msra.mxu0 %v5000_v6  ;;  %5121 = vmatpush1.msra.mxu1 %v4950_v8 }
 0x67f   :  { %5181 = vmatprep.subr.mxu0 %v4993_v17 }
 0x680   :  { %5182 = vmatpush1.msra.mxu0 %v4992_v22 }
 0x681   :  { %5183 = vmatprep.subr.mxu0 %v4985_v9 }
 0x682   :  { %5184 = vmatpush1.msra.mxu0 %v4984_v12 }
 0x683   :  { %5185 = vmatprep.subr.mxu0 %v4977_v1 }
 0x684   :  { %5186 = vmatpush1.msra.mxu0 %v4976_v13  ;;  %v4928_v13 = vld [vmem:[%s12688_s6 + $0x10] sm:$0xff] }
 0x685   :  { %5187 = vmatprep.subr.mxu0 %v4969_v54  ;;  %v5053_v54 = vld [vmem:[%s12688_s6 + $0x3f8] sm:$0xff] }
 0x686   :  { %5188 = vmatpush1.msra.mxu0 %v4968_v45 }
 0x687   :  { %5189 = vmatprep.subr.mxu0 %v4961_v26 }
 0x688   :  { %5190 = vmatpush1.msra.mxu0 %v4960_v18 }
 0x689   :  { %5191 = vmatprep.subr.mxu0 %v4953_v34 }
 0x6b9   :  { %v7012_v31 = vpop.f32.mrf.mxu1 }
 0x6ba   :  { %v6944_v24 = vpop.f32.mrf.mxu0 }
 0x6bb   :  { %v7013_v5 = vpop.f32.mrf.mxu1 }
 0x6bc   :  { %v7014_v16 = vadd.f32 %v7013_v5, %v7012_v31  ;;  %v6945_v43 = vpop.f32.mrf.mxu0  ;;  %v4952_v5 = vld [vmem:[%s12688_s6 + $0xd0] sm:$0xff] }
 0x6bd   :  { %v6946_v53 = vadd.f32 %v6945_v43, %v6944_v24  ;;  %v7015_v57 = vpop.f32.mrf.mxu1  ;;  %5192 = vmatpush1.msra.mxu0 %v4952_v5  ;;  %v4945_v43 = vld [vmem:[%s12688_s6 + $0x98] sm:$0xff] }
 0x6be   :  { %v6947_v60 = vpop.f32.mrf.mxu0  ;;  %5193 = vmatprep.subr.mxu0 %v4945_v43 }
 0x6bf   :  { %v4331_v30 = vadd.f32 %v6946_v53, %v12204_v7  ;;  %v7016_v39 = vpop.f32.mrf.mxu1  ;;  %5194 = vmatpush1.msra.mxu0 %v4944_v11 }
 0x6c0   :  { %v7017_v32 = vadd.f32 %v7016_v39, %v7015_v57  ;;  %v6948_v44 = vpop.f32.mrf.mxu0  ;;  %v4942_v57 = vld [vmem:[%s12688_s6 + $0x80] sm:$0xff]  ;;  %5195 = vmatprep.subr.mxu0 %v4937_v20 }
 0x6c1   :  { %v6949_v27 = vadd.f32 %v6948_v44, %v6947_v60  ;;  %v7018_v36 = vpop.f32.mrf.mxu1  ;;  %v12237_v28 = vadd.f32 %v7014_v16, %v4331_v30  ;;  %v4943_v16 = vld [vmem:[%s12688_s6 + $0x88] sm:$0xff]  ;;  %v4934_v39 = vld [vmem:[%s12688_s6 + $0x40] sm:$0xff]  ;;  %5196 = vmatpush1.msra.mxu0 %v4936_v49 }
 0x6c2   :  { %v6950_v41 = vpop.f32.mrf.mxu0  ;;  %5122 = vmatprep.subr.mxu1 %v4943_v16  ;;  %v4935_v60 = vld [vmem:[%s12688_s6 + $0x48] sm:$0xff]  ;;  %5197 = vmatprep.subr.mxu0 %v4929_v52 }
 0x6c3   :  { %v4336_v58 = vadd.f32 %v6949_v27, %v12204_v7  ;;  %v7019_v19 = vpop.f32.mrf.mxu1  ;;  %5123 = vmatpush1.msra.mxu1 %v4942_v57  ;;  %v4927_v44 = vld [vmem:[%s12688_s6 + $0x8] sm:$0xff]  ;;  %5198 = vmatpush1.msra.mxu0 %v4928_v13 }
 0x6c4   :  { %v7020_v23 = vadd.f32 %v7019_v19, %v7018_v36  ;;  %v6951_v48 = vpop.f32.mrf.mxu0  ;;  %5124 = vmatprep.subr.mxu1 %v4935_v60  ;;  %5309 = vmatprep.subr.mxu0 %v5053_v54 }
 0x6c5   :  { %v6952_v42 = vadd.f32 %v6951_v48, %v6950_v41  ;;  %v7021_v3 = vpop.f32.mrf.mxu1  ;;  %v12264_v55 = vadd.f32 %v7017_v32, %v4336_v58  ;;  %5125 = vmatpush1.msra.mxu1 %v4934_v39  ;;  %v5051_v41 = vld [vmem:[%s12688_s6 + $0x3e8] sm:$0xff] }
 0x6c6   :  { %v6953_v31 = vpop.f32.mrf.mxu0  ;;  %5126 = vmatprep.subr.mxu1 %v4927_v44 }
 0x6c7   :  { %v4341_v24 = vadd.f32 %v6952_v42, %v12204_v7  ;;  %v7022_v15 = vpop.f32.mrf.mxu1  ;;  %5127 = vmatpush1.msra.mxu1 %v4926_v21 }
 0x6c8   :  { %v7023_v50 = vadd.f32 %v7022_v15, %v7021_v3  ;;  %v6954_v6 = vpop.f32.mrf.mxu0  ;;  %5238 = vmatprep.subr.mxu1 %v5051_v41 }
 0x6c9   :  { %v6955_v37 = vadd.f32 %v6954_v6, %v6953_v31  ;;  %v7024_v17 = vpop.f32.mrf.mxu1  ;;  %v12291_v53 = vadd.f32 %v7020_v23, %v4341_v24 }
 0x6ca   :  { %v6956_v22 = vpop.f32.mrf.mxu0 }
 0x6cb   :  { %v4346_v9 = vadd.f32 %v6955_v37, %v12204_v7  ;;  %v7025_v30 = vpop.f32.mrf.mxu1 }
 0x6cc   :  { %v7026_v12 = vadd.f32 %v7025_v30, %v7024_v17  ;;  %v6957_v32 = vpop.f32.mrf.mxu0 }
 0x6cd   :  { %v6958_v1 = vadd.f32 %v6957_v32, %v6956_v22  ;;  %v7027_v27 = vpop.f32.mrf.mxu1  ;;  %v12318_v36 = vadd.f32 %v7023_v50, %v4346_v9 }
 0x6ce   :  { %v6959_v56 = vpop.f32.mrf.mxu0 }
 0x6cf   :  { %v4351_v58 = vadd.f32 %v6958_v1, %v12204_v7  ;;  %v7028_v19 = vpop.f32.mrf.mxu1 }
 0x6d0   :  { %v7029_v4 = vadd.f32 %v7028_v19, %v7027_v27  ;;  %v6960_v45 = vpop.f32.mrf.mxu0 }
 0x6d1   :  { %v6961_v23 = vadd.f32 %v6960_v45, %v6959_v56  ;;  %v12333_v48 = vpop.f32.mrf.mxu1  ;;  %v12335_v63 = vadd.f32 %v7026_v12, %v4351_v58 }
 0x6d2   :  { %v6962_v26 = vpop.f32.mrf.mxu0 }
 0x6d3   :  { %v4356_v42 = vadd.f32 %v6961_v23, %v12204_v7  ;;  %v12338_v3 = vpop.f32.mrf.mxu1 }
 0x6d4   :  { %v6963_v0 = vpop.f32.mrf.mxu0 }
 0x6d5   :  { %v12340_v18 = vadd.f32 %v6963_v0, %v6962_v26  ;;  %v12342_v31 = vadd.f32 %v7029_v4, %v4356_v42 }
 0x6d6   :  { %v12344_v33 = vpop.f32.mrf.mxu1 }
 0x6d7   :  { %v6965_v34 = vpop.f32.mrf.mxu0 }
 0x6d8   :  { %v12346_v24 = vpop.f32.mrf.mxu1 }
 0x6d9   :  { %v6966_v15 = vpop.f32.mrf.mxu0 }
 0x6da   :  { %v12348_v8 = vadd.f32 %v6966_v15, %v6965_v34 }
 0x6db   :  { %v6968_v5 = vpop.f32.mrf.mxu0 }
 0x6dc   :  { %v12350_v50 = vpop.f32.mrf.mxu1 }
 0x6dd   :  { %v6969_v6 = vpop.f32.mrf.mxu0 }
 0x6de   :  { %v12352_v16 = vpop.f32.mrf.mxu1  ;;  %v12354_v43 = vadd.f32 %v6969_v6, %v6968_v5 }
 0x6e1   :  { %v12356_v37 = vpop.f32.mrf.mxu1 }
 0x6e2   :  { %v6971_v17 = vpop.f32.mrf.mxu0 }
 0x6e3   :  { %v12358_v57 = vpop.f32.mrf.mxu1 }
 0x6e4   :  { %v6972_v11 = vpop.f32.mrf.mxu0 }
 0x6e5   :  { %v12360_v22 = vadd.f32 %v6972_v11, %v6971_v17 }
 0x6e6   :  { %v12362_v60 = vpop.f32.mrf.mxu1 }
 0x6e7   :  { %v6974_v20 = vpop.f32.mrf.mxu0 }
 0x6e8   :  { %v12364_v9 = vpop.f32.mrf.mxu1 }
 0x6e9   :  { %v6975_v30 = vpop.f32.mrf.mxu0 }
 0x6ea   :  { %v12366_v39 = vadd.f32 %v6975_v30, %v6974_v20 }
 0x6eb   :  { %v6977_v49 = vpop.f32.mrf.mxu0 }
 0x6ec   :  { %13069 = vst [vmem:[#allocation16_spill] sm:$0xff] %v12366_v39  ;;  %v12368_v12 = vpop.f32.mrf.mxu1 }
 0x6ed   :  { %13070 = vst [vmem:[#allocation18_spill] sm:$0xff] %v12368_v12  ;;  %v6978_v32 = vpop.f32.mrf.mxu0 }
 0x6ee   :  { %v12370_v44 = vpop.f32.mrf.mxu1  ;;  %v12372_v52 = vadd.f32 %v6978_v32, %v6977_v49 }
 0x6ef   :  { %13071 = vst [vmem:[#allocation22_spill] sm:$0xff] %v12370_v44 }
 0x6f0   :  { %13072 = vst [vmem:[#allocation24_spill] sm:$0xff] %v12372_v52 }
 0x6f1   :  { %v7148_v1 = vpop.f32.mrf.mxu1  ;;  %v7080_v27 = vpop.f32.mrf.mxu0 }
 0x6f3   :  { %v7149_v21 = vpop.f32.mrf.mxu1  ;;  %v7081_v13 = vpop.f32.mrf.mxu0 }
 0x6f5   :  { %v7151_v41 = vpop.f32.mrf.mxu1  ;;  %v7083_v56 = vpop.f32.mrf.mxu0 }
 0x6f7   :  { %v7152_v54 = vpop.f32.mrf.mxu1  ;;  %v7084_v58 = vpop.f32.mrf.mxu0 }
 0x6f8   :  { %v7085_v44 = vadd.f32 %v7084_v58, %v7083_v56  ;;  %v7032_v56 = vadd.f32 %v12338_v3, %v12333_v48  ;;  %v4361_v58 = vadd.f32 %v12340_v18, %v12204_v7 }
 0x6f9   :  { %v7154_v19 = vpop.f32.mrf.mxu1  ;;  %v7086_v4 = vpop.f32.mrf.mxu0 }
 0x6fa   :  { %v4586_v39 = vadd.f32 %v7085_v44, %v12264_v55  ;;  %v4366_v55 = vadd.f32 %v12348_v8, %v12204_v7  ;;  %v4371_v44 = vadd.f32 %v12354_v43, %v12204_v7 }
 0x6fb   :  { %v7155_v45 = vpop.f32.mrf.mxu1  ;;  %v7087_v23 = vpop.f32.mrf.mxu0 }
 0x6fc   :  { %v7156_v43 = vadd.f32 %v7155_v45, %v7154_v19  ;;  %v7044_v19 = vadd.f32 %v12364_v9, %v12362_v60 }
 0x6fd   :  { %v7157_v26 = vpop.f32.mrf.mxu1  ;;  %v7089_v42 = vpop.f32.mrf.mxu0 }
 0x6ff   :  { %v7158_v0 = vpop.f32.mrf.mxu1  ;;  %v7090_v34 = vpop.f32.mrf.mxu0 }
 0x701   :  { %v12374_v15 = vpop.f32.mrf.mxu1  ;;  %v7092_v5 = vpop.f32.mrf.mxu0 }
 0x703   :  { %v12376_v6 = vpop.f32.mrf.mxu1  ;;  %v7093_v17 = vpop.f32.mrf.mxu0 }
 0x705   :  { %v12378_v11 = vpop.f32.mrf.mxu1  ;;  %v7095_v20 = vpop.f32.mrf.mxu0 }
 0x707   :  { %v12380_v30 = vpop.f32.mrf.mxu1  ;;  %v7096_v49 = vpop.f32.mrf.mxu0 }
 0x708   :  { %13073 = vst [vmem:[#allocation9_spill] sm:$0xff] %v12380_v30  ;;  %v7097_v8 = vadd.f32 %v7096_v49, %v7095_v20 }
 0x709   :  { %v12382_v32 = vpop.f32.mrf.mxu1  ;;  %v7098_v51 = vpop.f32.mrf.mxu0 }
 0x70a   :  { %13074 = vst [vmem:[#allocation26_spill] sm:$0xff] %v12382_v32 }
 0x70b   :  { %v12384_v38 = vpop.f32.mrf.mxu1  ;;  %v7099_v62 = vpop.f32.mrf.mxu0 }
 0x70c   :  { %13075 = vst [vmem:[#allocation27_spill] sm:$0xff] %v12384_v38  ;;  %v7082_v38 = vadd.f32 %v7081_v13, %v7080_v27  ;;  %v7150_v13 = vadd.f32 %v7149_v21, %v7148_v1  ;;  %v4486_v1 = vadd.f32 %v7032_v56, %v4361_v58 }
 0x70d   :  { %v12386_v25 = vpop.f32.mrf.mxu1  ;;  %v7101_v46 = vpop.f32.mrf.mxu0 }
 0x70e   :  { %13076 = vst [vmem:[#allocation29_spill] sm:$0xff] %v12386_v25  ;;  %v7088_v25 = vadd.f32 %v7087_v23, %v7086_v4 }
 0x70f   :  { %v7102_v47 = vpop.f32.mrf.mxu0  ;;  %v12388_v40 = vpop.f32.mrf.mxu1  ;;  %v13081_v45 = vld [vmem:[#allocation9_spill] sm:$0xff] }
 0x710   :  { %13077 = vst [vmem:[#allocation30_spill] sm:$0xff] %v12388_v40  ;;  %v7091_v40 = vadd.f32 %v7090_v34, %v7089_v42  ;;  %v4591_v48 = vadd.f32 %v7088_v25, %v12291_v53  ;;  %v7100_v53 = vadd.f32 %v7099_v62, %v7098_v51 }
 0x711   :  { %v12390_v35 = vpop.f32.mrf.mxu0  ;;  %v12394_v2 = vpop.f32.mrf.mxu1 }
 0x712   :  { %13078 = vst [vmem:[#allocation25_spill] sm:$0xff] %v12390_v35  ;;  %13080 = vst [vmem:[#allocation19_spill] sm:$0xff] %v12394_v2  ;;  %v4581_v2 = vadd.f32 %v7082_v38, %v12237_v28  ;;  %v7035_v38 = vadd.f32 %v12346_v24, %v12344_v33  ;;  %v7038_v28 = vadd.f32 %v12352_v16, %v12350_v50 }
 0x713   :  { %v12392_v10 = vpop.f32.mrf.mxu0  ;;  %v12396_v32 = vpop.f32.mrf.mxu1  ;;  %v4596_v3 = vadd.f32 %v7091_v40, %v12318_v36  ;;  %v7103_v33 = vadd.f32 %v7102_v47, %v7101_v46  ;;  %v7041_v40 = vadd.f32 %v12358_v57, %v12356_v37  ;;  %v7162_v37 = vadd.f32 %v12376_v6, %v12374_v15  ;;  %v13086_v15 = vld [vmem:[#allocation16_spill] sm:$0xff] }
 0x714   :  { %13079 = vst [vmem:[#allocation10_spill] sm:$0xff] %v12392_v10  ;;  %v7153_v10 = vadd.f32 %v7152_v54, %v7151_v41  ;;  %v7094_v54 = vadd.f32 %v7093_v17, %v7092_v5  ;;  %v4706_v42 = vadd.f32 %v7150_v13, %v4581_v2  ;;  %v4491_v50 = vadd.f32 %v7035_v38, %v4366_v55  ;;  %v13088_v38 = vld [vmem:[#allocation18_spill] sm:$0xff] }
 0x715   :  { %v7107_v61 = vpop.f32.mrf.mxu0  ;;  %v12403_v30 = vpop.f32.mrf.mxu1  ;;  %v4496_v16 = vadd.f32 %v7038_v28, %v4371_v44  ;;  %v4716_v2 = vadd.f32 %v7156_v43, %v4591_v48  ;;  %v13082_v20 = vld [vmem:[#allocation29_spill] sm:$0xff]  ;;  %v4381_v6 = vadd.f32 %v13086_v15, %v12204_v7  ;;  %v13087_v44 = vld [vmem:[#allocation34_spill] sm:$0xff] }
 0x716   :  { %v4711_v4 = vadd.f32 %v7153_v10, %v4586_v39  ;;  %v4376_v10 = vadd.f32 %v12360_v22, %v12204_v7  ;;  %v7159_v39 = vadd.f32 %v7158_v0, %v7157_v26  ;;  %v4601_v5 = vadd.f32 %v7094_v54, %v12335_v63  ;;  %v13089_v28 = vld [vmem:[#allocation22_spill] sm:$0xff] }
 0x717   :  { %v7108_v52 = vpop.f32.mrf.mxu0  ;;  %v12424_v18 = vpop.f32.mrf.mxu1  ;;  %v4606_v22 = vadd.f32 %v7097_v8, %v12342_v31  ;;  %v4616_v51 = vadd.f32 %v7103_v33, %v4491_v50  ;;  %v7165_v26 = vadd.f32 %v13081_v45, %v12378_v11  ;;  %v4611_v31 = vadd.f32 %v7100_v53, %v4486_v1  ;;  %v13091_v54 = vld [vmem:[#allocation26_spill] sm:$0xff]  ;;  %v13092_v8 = vld [vmem:[#allocation27_spill] sm:$0xff] }
 0x718   :  { %v4721_v21 = vadd.f32 %v7159_v39, %v4596_v3  ;;  %v4501_v62 = vadd.f32 %v7041_v40, %v4376_v10  ;;  %v7109_v60 = vadd.f32 %v7108_v52, %v7107_v61  ;;  %v4726_v11 = vadd.f32 %v7162_v37, %v4601_v5  ;;  %v13090_v3 = vld [vmem:[#allocation24_spill] sm:$0xff]  ;;  %v13093_v52 = vld [vmem:[#allocation33_spill] sm:$0xff] }
 0x719   :  { %v12398_v12 = vpop.f32.mrf.mxu0  ;;  %v12430_v36 = vpop.f32.mrf.mxu1  ;;  %v7047_v48 = vadd.f32 %v13089_v28, %v13088_v38 }
 0x71a   :  { %v4626_v1 = vadd.f32 %v7109_v60, %v4501_v62 }
 0x71b   :  { %v12400_v29 = vpop.f32.mrf.mxu0  ;;  %v13085_v56 = vld [vmem:[#allocation10_spill] sm:$0xff]  ;;  %v7179_v9 = vpop.f32.mrf.mxu1 }
 0x71c   :  { %v7112_v50 = vadd.f32 %v12400_v29, %v12398_v12  ;;  %v13096_v29 = vld [vmem:[#allocation35_spill] sm:$0xff] }
 0x71d   :  { %v12405_v35 = vpop.f32.mrf.mxu0 }
 0x71f   :  { %v12412_v27 = vpop.f32.mrf.mxu0 }
 0x721   :  { %v7446_v41 = vpop.f32.mrf.mxu0 }
 0x722   :  { %v4836_v23 = vadd.f32 %v7446_v41, %v4711_v4  ;;  %v4731_v4 = vadd.f32 %v7165_v26, %v4606_v22  ;;  %v4386_v41 = vadd.f32 %v13090_v3, %v12204_v7  ;;  %v7115_v7 = vadd.f32 %v12412_v27, %v12405_v35  ;;  %v13095_v22 = vld [vmem:[#allocation19_spill] sm:$0xff] }
 0x723   :  { %v4830_v24 = vpop.f32.mrf.mxu0 }
 0x724   :  { %v4831_v25 = vadd.f32 %v4830_v24, %v4706_v42  ;;  %v4890_v46 = vmul.f32 %v13016_v14, %v4836_v23  ;;  %v13083_v14 = vld [vmem:[#allocation30_spill] sm:$0xff]  ;;  %v7168_v23 = vadd.f32 %v13092_v8, %v13091_v54  ;;  %v13102_v54 = vld [vmem:[#allocation41_spill] sm:$0xff] }
 0x725   :  { %v7449_v34 = vpop.f32.mrf.mxu0  ;;  %v7171_v49 = vadd.f32 %v13083_v14, %v13082_v20 }
 0x726   :  { %v4889_v47 = vmul.f32 %v13018_v59, %v4831_v25  ;;  %v4846_v63 = vadd.f32 %v7449_v34, %v4721_v21  ;;  %v13084_v59 = vld [vmem:[#allocation25_spill] sm:$0xff]  ;;  %v7181_v25 = vpop.f32.mrf.mxu1  ;;  %v4736_v53 = vadd.f32 %v7168_v23, %v4611_v31  ;;  %v13094_v21 = vld [vmem:[#allocation36_spill] sm:$0xff] }
 0x727   :  { %v4840_v57 = vpop.f32.mrf.mxu0  ;;  %v7106_v58 = vadd.f32 %v13085_v56, %v13084_v59  ;;  %v4741_v61 = vadd.f32 %v7171_v49, %v4616_v51  ;;  %v4511_v51 = vadd.f32 %v7047_v48, %v4386_v41  ;;  %v13097_v31 = vld [vmem:[#allocation37_spill] sm:$0xff] }
 0x728   :  { %v4901_v0 = vadd.f32 %v4890_v46, %v4889_v47  ;;  %v4841_v17 = vadd.f32 %v4840_v57, %v4716_v2  ;;  %v4892_v10 = vmul.f32 %v13093_v52, %v4846_v63  ;;  %v7174_v46 = vadd.f32 %v12396_v32, %v13095_v22  ;;  %v7182_v26 = vpop.f32.mrf.mxu1  ;;  %v13098_v32 = vld [vmem:[#allocation38_spill] sm:$0xff]  ;;  %v13101_v41 = vld [vmem:[#allocation17_spill] sm:$0xff] }
 0x729   :  { %v7452_v55 = vpop.f32.mrf.mxu0  ;;  %v4621_v24 = vadd.f32 %v7106_v58, %v4496_v16  ;;  %v7177_v16 = vadd.f32 %v12424_v18, %v12403_v30  ;;  %v4506_v47 = vadd.f32 %v7044_v19, %v4381_v6  ;;  %v4636_v63 = vadd.f32 %v7115_v7, %v4511_v51  ;;  %v5050_v7 = vld [vmem:[%s12688_s6 + $0x3e0] sm:$0xff]  ;;  %v5044_v22 = vld [vmem:[%s12688_s6 + $0x3b0] sm:$0xff]  ;;  %v5027_v51 = vld [vmem:[%s12688_s6 + $0x328] sm:$0xff] }
 0x72a   :  { %v4891_v13 = vmul.f32 %v13087_v44, %v4841_v17  ;;  %v4856_v39 = vadd.f32 %v7452_v55, %v4731_v4  ;;  %v7180_v30 = vadd.f32 %v7179_v9, %v12430_v36  ;;  %v7183_v19 = vadd.f32 %v7182_v26, %v7181_v25  ;;  %v13099_v55 = vld [vmem:[#allocation40_spill] sm:$0xff]  ;;  %v13100_v4 = vld [vmem:[#allocation39_spill] sm:$0xff] }
 0x72b   :  { %v4850_v42 = vpop.f32.mrf.mxu0  ;;  %v4631_v45 = vadd.f32 %v7112_v50, %v4506_v47  ;;  %v4751_v35 = vadd.f32 %v7177_v16, %v4626_v1  ;;  %v5037_v16 = vld [vmem:[%s12688_s6 + $0x378] sm:$0xff]  ;;  %v5034_v47 = vld [vmem:[%s12688_s6 + $0x360] sm:$0xff] }
 0x72c   :  { %v4902_v43 = vadd.f32 %v4901_v0, %v4891_v13  ;;  %v4851_v33 = vadd.f32 %v4850_v42, %v4726_v11  ;;  %v4894_v12 = vmul.f32 %v13096_v29, %v4856_v39  ;;  %v4746_v0 = vadd.f32 %v7174_v46, %v4621_v24  ;;  %v5035_v46 = vld [vmem:[%s12688_s6 + $0x368] sm:$0xff]  ;;  %v5029_v29 = vld [vmem:[%s12688_s6 + $0x338] sm:$0xff]  ;;  %v5018_v26 = vld [vmem:[%s12688_s6 + $0x2e0] sm:$0xff] }
 0x72d   :  { %v7455_v40 = vpop.f32.mrf.mxu0  ;;  %v4761_v6 = vadd.f32 %v7183_v19, %v4636_v63  ;;  %v4756_v44 = vadd.f32 %v7180_v30, %v4631_v45  ;;  %v5021_v45 = vld [vmem:[%s12688_s6 + $0x2f8] sm:$0xff]  ;;  %v5010_v63 = vld [vmem:[%s12688_s6 + $0x2a0] sm:$0xff]  ;;  %v4995_v30 = vld [vmem:[%s12688_s6 + $0x228] sm:$0xff] }
 0x72e   :  { %v4893_v34 = vmul.f32 %v13094_v21, %v4851_v33  ;;  %v4903_v2 = vadd.f32 %v4902_v43, %v4892_v10  ;;  %v4866_v5 = vadd.f32 %v7455_v40, %v4741_v61  ;;  %v5052_v21 = vld [vmem:[%s12688_s6 + $0x3f0] sm:$0xff]  ;;  %v4994_v19 = vld [vmem:[%s12688_s6 + $0x220] sm:$0xff] }
 0x72f   :  { %v4860_v37 = vpop.f32.mrf.mxu0 }
 0x730   :  { %v4904_v62 = vadd.f32 %v4903_v2, %v4893_v34  ;;  %v4861_v57 = vadd.f32 %v4860_v37, %v4736_v53  ;;  %v4896_v20 = vmul.f32 %v13097_v31, %v4866_v5  ;;  %v5043_v34 = vld [vmem:[%s12688_s6 + $0x3a8] sm:$0xff]  ;;  %v5045_v2 = vld [vmem:[%s12688_s6 + $0x3b8] sm:$0xff]  ;;  %v5042_v5 = vld [vmem:[%s12688_s6 + $0x3a0] sm:$0xff] }
 0x731   :  { %v7458_v27 = vpop.f32.mrf.mxu0  ;;  %v5036_v37 = vld [vmem:[%s12688_s6 + $0x370] sm:$0xff]  ;;  %v5003_v31 = vld [vmem:[%s12688_s6 + $0x268] sm:$0xff] }
 0x732   :  { %v4905_v17 = vadd.f32 %v4904_v62, %v4894_v12  ;;  %v4895_v14 = vmul.f32 %v13098_v32, %v4861_v57  ;;  %v4876_v59 = vadd.f32 %v7458_v27, %v4751_v35  ;;  %v5026_v12 = vld [vmem:[%s12688_s6 + $0x320] sm:$0xff]  ;;  %v5028_v62 = vld [vmem:[%s12688_s6 + $0x330] sm:$0xff]  ;;  %v5019_v57 = vld [vmem:[%s12688_s6 + $0x2e8] sm:$0xff] }
 0x733   :  { %v4870_v18 = vpop.f32.mrf.mxu0  ;;  %v5020_v35 = vld [vmem:[%s12688_s6 + $0x2f0] sm:$0xff]  ;;  %v5011_v27 = vld [vmem:[%s12688_s6 + $0x2a8] sm:$0xff]  ;;  %v5002_v32 = vld [vmem:[%s12688_s6 + $0x260] sm:$0xff] }
 0x734   :  { %v4912_v49 = vadd.f32 %v4896_v20, %v4895_v14  ;;  %v4871_v56 = vadd.f32 %v4870_v18, %v4746_v0  ;;  %v4906_v60 = vrot.slane %v4905_v17, 4  ;;  %v4898_v11 = vmul.f32 %v13100_v4, %v4876_v59  ;;  %v5013_v0 = vld [vmem:[%s12688_s6 + $0x2b8] sm:$0xff]  ;;  %v5004_v14 = vld [vmem:[%s12688_s6 + $0x270] sm:$0xff]  ;;  %v4987_v59 = vld [vmem:[%s12688_s6 + $0x1e8] sm:$0xff] }
 0x735   :  { %v7461_v58 = vpop.f32.mrf.mxu0  ;;  %v5005_v20 = vld [vmem:[%s12688_s6 + $0x278] sm:$0xff] }
 0x736   :  { %v4897_v15 = vmul.f32 %v13099_v55, %v4871_v56  ;;  %v4886_v28 = vadd.f32 %v7461_v58, %v4761_v6  ;;  %v4907_v3 = vadd.f32 %v4906_v60, %v4905_v17  ;;  %v5012_v17 = vld [vmem:[%s12688_s6 + $0x2b0] sm:$0xff]  ;;  %v4997_v18 = vld [vmem:[%s12688_s6 + $0x238] sm:$0xff]  ;;  %v4986_v58 = vld [vmem:[%s12688_s6 + $0x1e0] sm:$0xff] }
 0x737   :  { %v4880_v13 = vpop.f32.mrf.mxu0  ;;  %v4989_v56 = vld [vmem:[%s12688_s6 + $0x1f8] sm:$0xff]  ;;  %v4988_v60 = vld [vmem:[%s12688_s6 + $0x1f0] sm:$0xff]  ;;  %v4979_v55 = vld [vmem:[%s12688_s6 + $0x1a8] sm:$0xff] }
 0x738   :  { %v4913_v38 = vadd.f32 %v4912_v49, %v4897_v15  ;;  %v4881_v48 = vadd.f32 %v4880_v13, %v4756_v44  ;;  %v4900_v8 = vmul.f32 %v13102_v54, %v4886_v28  ;;  %v4908_v42 = vrot.slane %v4907_v3, 2  ;;  %v4996_v49 = vld [vmem:[%s12688_s6 + $0x230] sm:$0xff]  ;;  %v4981_v15 = vld [vmem:[%s12688_s6 + $0x1b8] sm:$0xff]  ;;  %v4978_v6 = vld [vmem:[%s12688_s6 + $0x1a0] sm:$0xff] }
 0x739   :  { %v4980_v44 = vld [vmem:[%s12688_s6 + $0x1b0] sm:$0xff]  ;;  %v4971_v13 = vld [vmem:[%s12688_s6 + $0x168] sm:$0xff]  ;;  %v4973_v4 = vld [vmem:[%s12688_s6 + $0x178] sm:$0xff] }
 0x73a   :  { %v4899_v36 = vmul.f32 %v13101_v41, %v4881_v48  ;;  %v4914_v9 = vadd.f32 %v4913_v38, %v4898_v11  ;;  %v4909_v10 = vadd.f32 %v4908_v42, %v4907_v3  ;;  %v4970_v11 = vld [vmem:[%s12688_s6 + $0x160] sm:$0xff]  ;;  %v4972_v38 = vld [vmem:[%s12688_s6 + $0x170] sm:$0xff]  ;;  %v4963_v28 = vld [vmem:[%s12688_s6 + $0x128] sm:$0xff] }
 0x73b   :  { %v4965_v48 = vld [vmem:[%s12688_s6 + $0x138] sm:$0xff]  ;;  %v4962_v3 = vld [vmem:[%s12688_s6 + $0x120] sm:$0xff]  ;;  %v4964_v41 = vld [vmem:[%s12688_s6 + $0x130] sm:$0xff] }
 0x73c   :  { %v4915_v23 = vadd.f32 %v4914_v9, %v4899_v36  ;;  %v4910_v33 = vrot.slane %v4909_v10, 1  ;;  %v4955_v36 = vld [vmem:[%s12688_s6 + $0xe8] sm:$0xff]  ;;  %v4957_v9 = vld [vmem:[%s12688_s6 + $0xf8] sm:$0xff]  ;;  %v4954_v54 = vld [vmem:[%s12688_s6 + $0xe0] sm:$0xff] }
 0x73d   :  { %v4949_v42 = vld [vmem:[%s12688_s6 + $0xb8] sm:$0xff] }
 0x73e   :  { %v4916_v61 = vadd.f32 %v4915_v23, %v4900_v8  ;;  %v4911_v50 = vadd.f32 %v4910_v33, %v4909_v10  ;;  %v4956_v8 = vld [vmem:[%s12688_s6 + $0xf0] sm:$0xff]  ;;  %v4947_v23 = vld [vmem:[%s12688_s6 + $0xa8] sm:$0xff] }
 0x73f   :  { %v4939_v10 = vld [vmem:[%s12688_s6 + $0x68] sm:$0xff]  ;;  %v4940_v33 = vld [vmem:[%s12688_s6 + $0x70] sm:$0xff] }
 0x740   :  { %v4917_v52 = vrot.slane %v4916_v61, 4 }
 0x742   :  { %v4918_v43 = vadd.f32 %v4917_v52, %v4916_v61  ;;  %v4946_v61 = vld [vmem:[%s12688_s6 + $0xa0] sm:$0xff]  ;;  %v4948_v52 = vld [vmem:[%s12688_s6 + $0xb0] sm:$0xff] }
 0x744   :  { %v4919_v39 = vrot.slane %v4918_v43, 2 }
 0x746   :  { %v4920_v24 = vadd.f32 %v4919_v39, %v4918_v43  ;;  %v4941_v43 = vld [vmem:[%s12688_s6 + $0x78] sm:$0xff]  ;;  %v4938_v39 = vld [vmem:[%s12688_s6 + $0x60] sm:$0xff] }
 0x748   :  { %v4921_v1 = vrot.slane %v4920_v24, 1 }
 0x74a   :  { %v4922_v25 = vadd.f32 %v4921_v1, %v4920_v24  ;;  %v4931_v24 = vld [vmem:[%s12688_s6 + $0x28] sm:$0xff]  ;;  %v4933_v1 = vld [vmem:[%s12688_s6 + $0x38] sm:$0xff] }
 0x74c   :  { %v4924_v40 = vsel %vm4923_vm10, %v4911_v50, %v4922_v25  ;;  %v4930_v50 = vld [vmem:[%s12688_s6 + $0x20] sm:$0xff]  ;;  %v4932_v25 = vld [vmem:[%s12688_s6 + $0x30] sm:$0xff] }
 0x74d   :  { %v12473_v53 = vmul.f32 0.0625, %v4924_v40  ;;  %v13103_v40 = vmov 0.0  }
 0x74f   :  { %5161 = vmatmul.mubr.f32.vlgmr.msra.gmra.mxu1 %v12473_v53  ;;  %5232 = vmatmul.mubr.f32.vlgmr.msra.gmra.mxu0 %v12473_v53 }
 0x750   :  { %5239 = vmatpush1.msra.mxu1 %v5050_v7  ;;  %5310 = vmatpush1.msra.mxu0 %v5052_v21  ;;  %v7512_v7 = vmov 1983009808  }
 0x751   :  { %5240 = vmatprep.subr.mxu1 %v5043_v34  ;;  %5311 = vmatprep.subr.mxu0 %v5045_v2  ;;  %v5391_v21 = vunpack.c.l.s4 %v7512_v7  ;;  %v13104_v34 = vld [vmem:[#allocation5_spill] sm:$0xff] }
 0x752   :  { %5241 = vmatpush1.msra.mxu1 %v5042_v5  ;;  %5312 = vmatpush1.msra.mxu0 %v5044_v22  ;;  %v5058_v2 = vsub.s32 0, %v13104_v34  ;;  %v5066_v5 = vsub.s32 2, %v13104_v34  ;;  %v5062_v22 = vsub.s32 1, %v13104_v34 }
 0x753   :  { %5242 = vmatprep.subr.mxu1 %v5035_v46  ;;  %5313 = vmatprep.subr.mxu0 %v5037_v16  ;;  %v5070_v46 = vsub.s32 3, %v13104_v34  ;;  %v5054_v16 = vld [vmem:[%s12689_s7] sm:$0xff]  ;;  %s7513_s7 = smov [#allocation2]  }
 0x754   :  { %5243 = vmatpush1.msra.mxu1 %v5034_v47  ;;  %5314 = vmatpush1.msra.mxu0 %v5036_v37  ;;  %v5392_v47 = vunpack.c.0.s8 %v5391_v21  ;;  %v5059_v37 = vrot.slane %v5054_v16, %v5058_v2  ;;  %s5432_s3 = sshll.u32 %s7513_s7, 4  ;;  %s5433_s3 = int_to_ptr.vmem [resolvable:$true] %s5432_s3 }
 0x755   :  { %5244 = vmatprep.subr.mxu1 %v5027_v51  ;;  %5315 = vmatprep.subr.mxu0 %v5029_v29  ;;  %v5067_v51 = vrot.slane %v5054_v16, %v5066_v5  ;;  %v5063_v29 = vrot.slane %v5054_v16, %v5062_v22  ;;  %s7489_s5 = scalar_lea.vmem %s5433_s3, 256  ;;  %p7494_p1 = scmp.lt.s32.totalorder %s5433_s3, %s5433_s3 }
 0x756   :  { %5245 = vmatpush1.msra.mxu1 %v5026_v12  ;;  %5316 = vmatpush1.msra.mxu0 %v5028_v62  ;;  %v5071_v12 = vrot.slane %v5054_v16, %v5070_v46  ;;  %p7490_p0 = scmp.ne.s32.totalorder %s5433_s3, %s7489_s5  ;;  %p7495_p2 = scmp.lt.s32.totalorder %s7489_s5, %s7489_s5 }
 0x757   :  { %5246 = vmatprep.subr.mxu1 %v5019_v57  ;;  %5317 = vmatprep.subr.mxu0 %v5021_v45  ;;  %v5395_v45 = vsub.s32 %v5392_v47, %v13104_v34 }
 0x758   :  { %5247 = vmatpush1.msra.mxu1 %v5018_v26  ;;  %5318 = vmatpush1.msra.mxu0 %v5020_v35  ;;  %p7496_p3 = por %p7495_p2, %p7494_p1 }
 0x759   :  { %5248 = vmatprep.subr.mxu1 %v5011_v27  ;;  %5319 = vmatprep.subr.mxu0 %v5013_v0 }
 0x75a   :  { %5249 = vmatpush1.msra.mxu1 %v5010_v63  ;;  %5320 = vmatpush1.msra.mxu0 %v5012_v17  ;;  %p7497_p4 = pnand %p7496_p3, %p7490_p0 }
 0x75b   :  { %5250 = vmatprep.subr.mxu1 %v5003_v31  ;;  %5321 = vmatprep.subr.mxu0 %v5005_v20 }
 0x75c   :  { %5251 = vmatpush1.msra.mxu1 %v5002_v32  ;;  %5322 = vmatpush1.msra.mxu0 %v5004_v14 }
 0x75d   :  { %5252 = vmatprep.subr.mxu1 %v4995_v30  ;;  %5323 = vmatprep.subr.mxu0 %v4997_v18  ;;  %v5074_v30 = vsub.s32 4, %v13104_v34  ;;  %v5082_v18 = vsub.s32 6, %v13104_v34 }
 0x75e   :  { %5253 = vmatpush1.msra.mxu1 %v4994_v19  ;;  %5324 = vmatpush1.msra.mxu0 %v4996_v49  ;;  %v5078_v19 = vsub.s32 5, %v13104_v34  ;;  %v5086_v49 = vsub.s32 7, %v13104_v34 }
 0x75f   :  { %5254 = vmatprep.subr.mxu1 %v4987_v59  ;;  %5325 = vmatprep.subr.mxu0 %v4989_v56  ;;  %v5075_v59 = vrot.slane %v5054_v16, %v5074_v30  ;;  %v5083_v56 = vrot.slane %v5054_v16, %v5082_v18 }
 0x760   :  { %5255 = vmatpush1.msra.mxu1 %v4986_v58  ;;  %5326 = vmatpush1.msra.mxu0 %v4988_v60  ;;  %v5079_v58 = vrot.slane %v5054_v16, %v5078_v19  ;;  %v5087_v60 = vrot.slane %v5054_v16, %v5086_v49 }
 0x761   :  { %5256 = vmatprep.subr.mxu1 %v4979_v55  ;;  %5327 = vmatprep.subr.mxu0 %v4981_v15 }
 0x762   :  { %5257 = vmatpush1.msra.mxu1 %v4978_v6  ;;  %5328 = vmatpush1.msra.mxu0 %v4980_v44 }
 0x763   :  { %5258 = vmatprep.subr.mxu1 %v4971_v13  ;;  %5329 = vmatprep.subr.mxu0 %v4973_v4 }
 0x764   :  { %5259 = vmatpush1.msra.mxu1 %v4970_v11  ;;  %5330 = vmatpush1.msra.mxu0 %v4972_v38 }
 0x765   :  { %5260 = vmatprep.subr.mxu1 %v4963_v28  ;;  %5331 = vmatprep.subr.mxu0 %v4965_v48 }
 0x766   :  { %5261 = vmatpush1.msra.mxu1 %v4962_v3  ;;  %5332 = vmatpush1.msra.mxu0 %v4964_v41 }
 0x767   :  { %5262 = vmatprep.subr.mxu1 %v4955_v36  ;;  %5333 = vmatprep.subr.mxu0 %v4957_v9 }
 0x768   :  { %5263 = vmatpush1.msra.mxu1 %v4954_v54  ;;  %5334 = vmatpush1.msra.mxu0 %v4956_v8 }
 0x769   :  { %5264 = vmatprep.subr.mxu1 %v4947_v23  ;;  %5335 = vmatprep.subr.mxu0 %v4949_v42 }
 0x76a   :  { %5265 = vmatpush1.msra.mxu1 %v4946_v61  ;;  %5336 = vmatpush1.msra.mxu0 %v4948_v52 }
 0x76b   :  { %5266 = vmatprep.subr.mxu1 %v4939_v10  ;;  %5337 = vmatprep.subr.mxu0 %v4941_v43 }
 0x76c   :  { %5267 = vmatpush1.msra.mxu1 %v4938_v39  ;;  %5338 = vmatpush1.msra.mxu0 %v4940_v33 }
 0x76d   :  { %5268 = vmatprep.subr.mxu1 %v4931_v24  ;;  %5339 = vmatprep.subr.mxu0 %v4933_v1 }
 0x76e   :  { %5269 = vmatpush1.msra.mxu1 %v4930_v50  ;;  %5302 = vmatprep.mubr.f32.mxu1 %v13103_v40 }
 0x76f   :  { %5340 = vmatpush1.msra.mxu0 %v4932_v25  ;;  %5373 = vmatprep.mubr.f32.mxu0 %v13103_v40 }
 0x770   :  { %5303 = vmatmul.mubr.f32.vlgmr.msra.gmra.mxu1 %v12473_v53  ;;  %5374 = vmatmul.mubr.f32.vlgmr.msra.gmra.mxu0 %v12473_v53 }
 0x80f   :  { %v5162_v53 = vpop.f32.mrf.mxu1  ;;  %v5233_v62 = vpop.f32.mrf.mxu0 }
 0x810   :  { %v5163_v35 = vadd.f32 %v5162_v53, %v5059_v37  ;;  %v5234_v27 = vadd.f32 %v5233_v62, %v5067_v51 }
 0x811   :  { %v5164_v57 = vpop.f32.mrf.mxu1  ;;  %v5235_v26 = vpop.f32.mrf.mxu0 }
 0x812   :  { %v5165_v0 = vadd.f32 %v5164_v57, %v5063_v29  ;;  %v5236_v63 = vadd.f32 %v5235_v26, %v5071_v12 }
 0x814   :  { %v5388_v17 = vcombine.low %v5163_v35, %v5165_v0  ;;  %v5389_v31 = vcombine.low %v5234_v27, %v5236_v63 }
 0x816   :  { %v5396_v20 = vrot.slane %v5388_v17, %v5395_v45  ;;  %v5403_v32 = vrot.slane %v5389_v31, %v5395_v45 }
 0x818   :  { %v5404_v14 = vcombine.low %v5396_v20, %v5403_v32 }
 0x81a   :  { %5424 = vst [vmem:[#allocation2] sm:$0xff] %v5404_v14 }
 0x830   :  { %v5304_v55 = vpop.f32.mrf.mxu1  ;;  %v5375_v15 = vpop.f32.mrf.mxu0 }
 0x831   :  { %v5305_v13 = vadd.f32 %v5304_v55, %v5075_v59  ;;  %v5376_v4 = vadd.f32 %v5375_v15, %v5083_v56 }
 0x832   :  { %v5306_v6 = vpop.f32.mrf.mxu1  ;;  %v5377_v44 = vpop.f32.mrf.mxu0 }
 0x833   :  { %v5307_v11 = vadd.f32 %v5306_v6, %v5079_v58  ;;  %v5378_v38 = vadd.f32 %v5377_v44, %v5087_v60 }
 0x835   :  { %v5405_v28 = vcombine.low %v5305_v13, %v5307_v11  ;;  %v5406_v48 = vcombine.low %v5376_v4, %v5378_v38 }
 0x837   :  { %v5413_v3 = vrot.slane %v5405_v28, %v5395_v45  ;;  %v5420_v41 = vrot.slane %v5406_v48, %v5395_v45 }
 0x839   :  { %v5421_v36 = vcombine.low %v5413_v3, %v5420_v41 }
 0x83b   :  { %5425 = vst [vmem:[#allocation2 + $0x8] sm:$0xff] %v5421_v36 }
 0x83c   :  { %7500 = shalt.err (!%p7497_p4)
}
 0x83d   :  { %5435 = dma.vmem_to_hbm [thread:$0]  %s5433_s3, 256, %s12690_s8, [#allocation3]  }
 0x83e   :  { %7509 = dma.done.wait [#allocation3], 256  }
 0x83f   :  { %7510 = vsyncadd [#allocation3], 4294967040 }
 0x840   :  { %5439 = vsyncpa [#allocation3], 1 }

</bundles_post_ra>
